<compile_context>
chip_gen: v5e
topology: v5e:2x2
jax: 0.10.0
libtpu: 0.0.40
codegen_flags: <defaults>
</compile_context>

<pallas_src>
import numpy as np
import jax
import jax.numpy as jnp
from jax import lax
from jax.experimental import pallas as pl
from jax.experimental.pallas import tpu as pltpu

K = 5          # ConvTranspose2d kernel size used by DeConvLayer
PAD = K - 1    # zero padding that turns ConvTranspose2d into a valid correlation


def _round_up(n, m):
    return (n + m - 1) // m * m


# ----------------------------------------------------------------------------- kernel helpers
def _emit_unpool(x2d, qc2d, upe_ref, upq_ref):
    """MaxUnpool2d(2) of an H-major pooled map into the conv-ready q-expanded buffer.

    x2d  : (h*Cp, w) f32  pooled values, row r = i*Cp + ci (pad channels are zero)
    qc2d : (h*Cp, w) i32  quadrant code di*2+dj of each pooled max (-1 on pad rows)
    upe_ref: (2, h, Cp, Wp) VMEM  full-width unpooled rows; [di, i] holds row y=PAD+2i+di
    upq_ref: (Hp*K, Cp, Wout) VMEM  upq[y*K+q, ci, b] == upad[y, ci, b+q]
    """
    _, h, Cp, Wp = upe_ref.shape
    w = x2d.shape[1]
    Wout = upq_ref.shape[2]
    HpK = upq_ref.shape[0]
    Hp = HpK // K

    # Lane expansion: pooled column j scatters to full-res column PAD + 2j + dj via an
    # exact 0/1 expansion matrix (one small MXU pass per (di, dj) quadrant).
    row = lax.broadcasted_iota(jnp.int32, (w, Wp), 0)
    col = lax.broadcasted_iota(jnp.int32, (w, Wp), 1)
    e_mats = [(col == 2 * row + PAD + dj).astype(jnp.float32) for dj in range(2)]

    for di in range(2):
        acc = None
        for dj in range(2):
            m = jnp.where(qc2d == di * 2 + dj, x2d, 0.0)
            t = jnp.dot(m, e_mats[dj], preferred_element_type=jnp.float32)
            acc = t if acc is None else acc + t
        upe_ref[di] = acc.reshape(h, Cp, Wp)

    # Zero only the K-1 top/bottom padding rows; everything else is overwritten below.
    zeros = jnp.zeros((PAD * K, Cp, Wout), jnp.float32)
    upq_ref[0:PAD * K] = zeros
    upq_ref[(Hp - PAD) * K:HpK] = zeros

    # Row interleave (y = PAD + 2i + di) and static lane-shift expansion over q.
    def body(i, carry):
        for di in range(2):
            y = PAD + 2 * i + di
            blk = upe_ref[di, i]                      # (Cp, Wp)
            for q in range(K):
                upq_ref[y * K + q] = blk[:, q:q + Wout]
        return carry

    lax.fori_loop(0, h, body, 0)


def _emit_deconv(upq_ref, w_ref, b_ref, store_row, *, hout, final_layer):
    """ConvTranspose2d(k=5, s=1) + bias + ReLU/Sigmoid over the prepared upq buffer.

    One MXU contraction of depth K*K*Cp per output row (not 25 tiny dots per row).
    """
    _, Cp, Wout = upq_ref.shape
    wmat = w_ref[...]                                  # (Coutp, K*K*Cp), loop-invariant
    bias = b_ref[...]                                  # (Coutp, 1)

    def body(a, carry):
        win = upq_ref[pl.ds(a * K, K * K)]             # (K*K, Cp, Wout), contiguous slice
        rhs = win.reshape(K * K * Cp, Wout)            # tile-compatible collapse (Cp % 8 == 0)
        r = jnp.dot(wmat, rhs, preferred_element_type=jnp.float32) + bias
        if final_layer:
            r = jax.nn.sigmoid(r)                      # Sigmoid on the final layer
        else:
            r = jnp.maximum(r, 0.0)                    # ReLU otherwise
        store_row(a, r)                                # lane-dense (Coutp, Wout) row store
        return carry

    lax.fori_loop(0, hout, body, 0)


def _decoder_kernel(xh1_ref, qc1_ref, qc0_ref, w1_ref, b1_ref, w2_ref, b2_ref,
                    o_ref,
                    upe1_ref, upq1_ref, mid_ref, upe2_ref, upq2_ref):
    hout1, cp2, wout1 = mid_ref.shape
    hout2 = o_ref.shape[1]

    # ---- DeConvLayer 1: MaxUnpool2d(2) -> ConvTranspose2d(20->10, k5) -> ReLU
    _emit_unpool(xh1_ref[0], qc1_ref[0], upe1_ref, upq1_ref)

    def store_mid(a, r):
        mid_ref[a] = r            # (cp2, wout1); padded output channels are exactly zero

    _emit_deconv(upq1_ref, w1_ref, b1_ref, store_mid, hout=hout1, final_layer=False)

    # ---- DeConvLayer 2: (Dropout2d: eval-mode identity) -> MaxUnpool2d(2)
    #      -> ConvTranspose2d(10->3, k5) -> Sigmoid.  Intermediate stays in VMEM.
    mid2d = mid_ref[...].reshape(hout1 * cp2, wout1)
    _emit_unpool(mid2d, qc0_ref[0], upe2_ref, upq2_ref)

    def store_out(a, r):
        o_ref[0, a] = r           # (Cout2, Wout2) row, Wout2 on lanes

    _emit_deconv(upq2_ref, w2_ref, b2_ref, store_out, hout=hout2, final_layer=True)


# ----------------------------------------------------------------------------- wrapper glue
def _hmajor_pad(a, cp, fill):
    """(B, C, h, w) -> (B, h*cp, w): H-major rows r = i*cp + c, channels padded to cp."""
    B, C, h, w = a.shape
    a = jnp.transpose(a, (0, 2, 1, 3))
    a = jnp.pad(a, ((0, 0), (0, 0), (0, cp - C), (0, 0)), constant_values=fill)
    return a.reshape(B, h * cp, w)


def _quadrant_code(idx, out_w):
    """MaxPool2d(2) flat indices -> 2-bit within-window code di*2 + dj (int32)."""
    _, _, h, w = idx.shape
    ii = jnp.arange(h, dtype=jnp.int32).reshape(1, 1, h, 1)
    jj = jnp.arange(w, dtype=jnp.int32).reshape(1, 1, 1, w)
    rel = idx.astype(jnp.int32) - 2 * ii * out_w - 2 * jj
    di = rel // out_w
    dj = rel - di * out_w
    return (di * 2 + dj).astype(jnp.int32)


def _pack_weight(w, cin_p, cout_p):
    """torch ConvTranspose2d weight (Cin, Cout, K, K) -> (cout_p, K*K*cin_p) matmul LHS.

    wbig[co, (p*K + q)*cin_p + ci] == w[ci, co, K-1-p, K-1-q] (spatial flip), zero-padded.
    """
    cin, cout = w.shape[0], w.shape[1]
    wf = w[:, :, ::-1, ::-1]
    wf = jnp.transpose(wf, (1, 2, 3, 0))                      # (Cout, K, K, Cin)
    wf = jnp.pad(wf, ((0, cout_p - cout), (0, 0), (0, 0), (0, cin_p - cin)))
    return wf.reshape(cout_p, K * K * cin_p).astype(jnp.float32)


def decoder_forward(x, index_list, dimension_list, params):
    """Decoder.forward: STN (exact identity) -> DeConvLayer1 -> STN -> DeConvLayer2."""
    B, C1, h1, w1 = x.shape
    H1, W1 = int(dimension_list[1][-2]), int(dimension_list[1][-1])
    H0, W0 = int(dimension_list[0][-2]), int(dimension_list[0][-1])
    assert (H1, W1) == (2 * h1, 2 * w1)

    cout1 = params["w1"].shape[1]
    cout2 = params["w2"].shape[1]
    hout1, wout1 = H1 + PAD, W1 + PAD
    hout2, wout2 = H0 + PAD, W0 + PAD
    h2, w2 = H0 // 2, W0 // 2
    assert (h2, w2) == (hout1, wout1)

    cp1 = _round_up(C1, 8)          # sublane padding of layer-1 input channels
    cp2 = _round_up(cout1, 8)       # layer-1 output == layer-2 input channel padding

    # Wrapper-side layout plumbing, all at pooled resolution (tiny XLA ops).
    xh1 = _hmajor_pad(x.astype(jnp.float32), cp1, 0.0)
    qc1 = _hmajor_pad(_quadrant_code(index_list[1], W1), cp1, -1)
    qc0 = _hmajor_pad(_quadrant_code(index_list[0], W0), cp2, -1)
    w1b = _pack_weight(params["w1"], cp1, cp2)
    b1b = jnp.pad(params["b1"].astype(jnp.float32), (0, cp2 - cout1)).reshape(cp2, 1)
    w2b = _pack_weight(params["w2"], cp2, cout2)
    b2b = params["b2"].astype(jnp.float32).reshape(cout2, 1)

    hp1, wp1 = H1 + 2 * PAD, W1 + 2 * PAD
    hp2, wp2 = H0 + 2 * PAD, W0 + 2 * PAD

    out_hm = pl.pallas_call(
        _decoder_kernel,
        out_shape=jax.ShapeDtypeStruct((B, hout2, cout2, wout2), jnp.float32),
        grid_spec=pltpu.PrefetchScalarGridSpec(
            num_scalar_prefetch=0,
            grid=(B,),
            in_specs=[
                pl.BlockSpec((1, h1 * cp1, w1), lambda b: (b, 0, 0)),       # pooled values L1
                pl.BlockSpec((1, h1 * cp1, w1), lambda b: (b, 0, 0)),       # quadrant code L1
                pl.BlockSpec((1, h2 * cp2, w2), lambda b: (b, 0, 0)),       # quadrant code L2
                pl.BlockSpec((cp2, K * K * cp1), lambda b: (0, 0)),         # packed convT1 weight
                pl.BlockSpec((cp2, 1), lambda b: (0, 0)),                   # bias1 (padded)
                pl.BlockSpec((cout2, K * K * cp2), lambda b: (0, 0)),       # packed convT2 weight
                pl.BlockSpec((cout2, 1), lambda b: (0, 0)),                 # bias2
            ],
            out_specs=pl.BlockSpec((1, hout2, cout2, wout2), lambda b: (b, 0, 0, 0)),
            scratch_shapes=[
                pltpu.VMEM((2, h1, cp1, wp1), jnp.float32),                 # upe1
                pltpu.VMEM((hp1 * K, cp1, wout1), jnp.float32),             # upq1
                pltpu.VMEM((hout1, cp2, wout1), jnp.float32),               # mid (layer-1 output)
                pltpu.VMEM((2, h2, cp2, wp2), jnp.float32),                 # upe2
                pltpu.VMEM((hp2 * K, cp2, wout2), jnp.float32),             # upq2
            ],
        ),
        compiler_params=pltpu.CompilerParams(
            dimension_semantics=("parallel",),
            vmem_limit_bytes=32 * 1024 * 1024,
        ),
    )(xh1, qc1, qc0, w1b, b1b, w2b, b2b)

    # Trivial permute of the lane-dense (B, Hout, Cout, Wout) slab back to NCHW.
    return jnp.transpose(out_hm, (0, 2, 1, 3))


# ----------------------------------------------------------------------------- pure-JAX reference
def _unpool_ref(x, idx, H, W):
    B, C, h, w = x.shape

    def one(v, i):
        return jnp.zeros((H * W,), v.dtype).at[i].set(v)

    out = jax.vmap(jax.vmap(one))(x.reshape(B, C, -1), idx.reshape(B, C, -1))
    return out.reshape(B, C, H, W)


def _convT_ref(x, w, b):
    wf = jnp.transpose(w[:, :, ::-1, ::-1], (1, 0, 2, 3))
    y = lax.conv_general_dilated(x, wf, (1, 1), [(K - 1, K - 1)] * 2,
                                 dimension_numbers=("NCHW", "OIHW", "NCHW"),
                                 precision=lax.Precision.HIGHEST)
    return y + b.reshape(1, -1, 1, 1)


def decoder_reference(x, index_list, dimension_list, params):
    u = _unpool_ref(x, index_list[1], *dimension_list[1][-2:])
    y = jnp.maximum(_convT_ref(u, params["w1"], params["b1"]), 0.0)
    u = _unpool_ref(y, index_list[0], *dimension_list[0][-2:])
    return jax.nn.sigmoid(_convT_ref(u, params["w2"], params["b2"]))


# ----------------------------------------------------------------------------- main
if __name__ == "__main__":
    B = 2
    key = jax.random.PRNGKey(0)
    ks = jax.random.split(key, 8)

    # Decoder input: output of the encoder's second pool (20 channels, 18x18).
    x = jax.random.normal(ks[0], (B, 20, 18, 18), jnp.float32)

    def make_idx(k, B, C, h, w):
        """Valid MaxPool2d(2) indices: one flat (row*W+col) position per 2x2 window."""
        kr, kc = jax.random.split(k)
        dr = jax.random.randint(kr, (B, C, h, w), 0, 2)
        dc = jax.random.randint(kc, (B, C, h, w), 0, 2)
        ii = jnp.arange(h).reshape(1, 1, h, 1)
        jj = jnp.arange(w).reshape(1, 1, 1, w)
        return ((2 * ii + dr) * (2 * w) + (2 * jj + dc)).astype(jnp.int32)

    # index_list / dimension_list as returned by the encoder:
    #   [0] -> first pool (10ch, 80x80 -> 40x40), consumed by convT2
    #   [1] -> second pool (20ch, 36x36 -> 18x18), consumed by convT1
    idx1 = make_idx(ks[1], B, 20, 18, 18)
    idx0 = make_idx(ks[2], B, 10, 40, 40)
    dims1 = (B, 20, 36, 36)
    dims0 = (B, 10, 80, 80)
    index_list = [idx0, idx1]
    dimension_list = [dims0, dims1]

    # Deterministic ConvTranspose2d parameters (shapes from the module __init__).
    params = {
        "w1": (jax.random.uniform(ks[3], (20, 10, K, K), jnp.float32) - 0.5) * 0.2,
        "b1": (jax.random.uniform(ks[4], (10,), jnp.float32) - 0.5) * 0.2,
        "w2": (jax.random.uniform(ks[5], (10, 3, K, K), jnp.float32) - 0.5) * 0.2,
        "b2": (jax.random.uniform(ks[6], (3,), jnp.float32) - 0.5) * 0.2,
    }

    out = decoder_forward(x, index_list, dimension_list, params)
    out = jax.block_until_ready(out)
    assert out.shape == (B, 3, 84, 84), out.shape

    ref = decoder_reference(x, index_list, dimension_list, params)
    np.testing.assert_allclose(np.asarray(out), np.asarray(ref), rtol=2e-3, atol=2e-3)

    print("KERNEL_OK")
</pallas_src>

<mosaic_0001>
module attributes {stable_mosaic.version = 11 : i64} {
  func.func @_decoder_kernel(%arg0: i32, %arg1: memref<1x432x18xf32, #tpu.memory_space<vmem>>, %arg2: memref<1x432x18xi32, #tpu.memory_space<vmem>>, %arg3: memref<1x640x40xi32, #tpu.memory_space<vmem>>, %arg4: memref<16x600xf32, #tpu.memory_space<vmem>>, %arg5: memref<16x1xf32, #tpu.memory_space<vmem>>, %arg6: memref<3x400xf32, #tpu.memory_space<vmem>>, %arg7: memref<3x1xf32, #tpu.memory_space<vmem>>, %arg8: memref<1x84x3x84xf32, #tpu.memory_space<vmem>>, %arg9: memref<2x18x24x44xf32, #tpu.memory_space<vmem>>, %arg10: memref<220x24x40xf32, #tpu.memory_space<vmem>>, %arg11: memref<40x16x40xf32, #tpu.memory_space<vmem>>, %arg12: memref<2x40x16x88xf32, #tpu.memory_space<vmem>>, %arg13: memref<440x16x84xf32, #tpu.memory_space<vmem>>) attributes {dimension_semantics = [#tpu.dimension_semantics<parallel>], iteration_bounds = array<i64: 2>, scalar_prefetch = 0 : i64, scratch_operands = 5 : i64, tpu.core_type = #tpu.core_type<tc>, window_params = [{transform_indices = @transform_0, window_bounds = array<i64: 1, 432, 18>}, {transform_indices = @transform_1, window_bounds = array<i64: 1, 432, 18>}, {transform_indices = @transform_2, window_bounds = array<i64: 1, 640, 40>}, {pipeline_mode = #tpu.pipeline_mode<synchronous>, transform_indices = @transform_3, window_bounds = array<i64: 16, 600>}, {pipeline_mode = #tpu.pipeline_mode<synchronous>, transform_indices = @transform_4, window_bounds = array<i64: 16, 1>}, {pipeline_mode = #tpu.pipeline_mode<synchronous>, transform_indices = @transform_5, window_bounds = array<i64: 3, 400>}, {pipeline_mode = #tpu.pipeline_mode<synchronous>, transform_indices = @transform_6, window_bounds = array<i64: 3, 1>}, {transform_indices = @transform_7, window_bounds = array<i64: 1, 84, 3, 84>}]} {
    %c0 = arith.constant 0 : index
    %c0_0 = arith.constant 0 : index
    %c0_1 = arith.constant 0 : index
    %0 = vector.load %arg1[%c0, %c0_0, %c0_1] : memref<1x432x18xf32, #tpu.memory_space<vmem>>, vector<1x432x18xf32>
    %1 = vector.shape_cast %0 : vector<1x432x18xf32> to vector<432x18xf32>
    %c0_2 = arith.constant 0 : index
    %c0_3 = arith.constant 0 : index
    %c0_4 = arith.constant 0 : index
    %2 = vector.load %arg2[%c0_2, %c0_3, %c0_4] : memref<1x432x18xi32, #tpu.memory_space<vmem>>, vector<1x432x18xi32>
    %3 = vector.shape_cast %2 : vector<1x432x18xi32> to vector<432x18xi32>
    %4 = tpu.iota {dimensions = array<i32: 0>} : vector<18x44xi32>
    %5 = tpu.iota {dimensions = array<i32: 1>} : vector<18x44xi32>
    %c2_i32 = arith.constant 2 : i32
    %6 = vector.broadcast %c2_i32 : i32 to vector<18x44xi32>
    %7 = arith.muli %6, %4 : vector<18x44xi32>
    %c4_i32 = arith.constant 4 : i32
    %8 = vector.broadcast %c4_i32 : i32 to vector<18x44xi32>
    %9 = arith.addi %7, %8 : vector<18x44xi32>
    %c0_i32 = arith.constant 0 : i32
    %10 = vector.broadcast %c0_i32 : i32 to vector<18x44xi32>
    %11 = arith.addi %9, %10 : vector<18x44xi32>
    %12 = arith.cmpi eq, %5, %11 : vector<18x44xi32>
    %13 = arith.extui %12 : vector<18x44xi1> to vector<18x44xi32>
    %14 = arith.sitofp %13 : vector<18x44xi32> to vector<18x44xf32>
    %c2_i32_5 = arith.constant 2 : i32
    %15 = vector.broadcast %c2_i32_5 : i32 to vector<18x44xi32>
    %16 = arith.muli %15, %4 : vector<18x44xi32>
    %c4_i32_6 = arith.constant 4 : i32
    %17 = vector.broadcast %c4_i32_6 : i32 to vector<18x44xi32>
    %18 = arith.addi %16, %17 : vector<18x44xi32>
    %c1_i32 = arith.constant 1 : i32
    %19 = vector.broadcast %c1_i32 : i32 to vector<18x44xi32>
    %20 = arith.addi %18, %19 : vector<18x44xi32>
    %21 = arith.cmpi eq, %5, %20 : vector<18x44xi32>
    %22 = arith.extui %21 : vector<18x44xi1> to vector<18x44xi32>
    %23 = arith.sitofp %22 : vector<18x44xi32> to vector<18x44xf32>
    %c0_i32_7 = arith.constant 0 : i32
    %24 = vector.broadcast %c0_i32_7 : i32 to vector<432x18xi32>
    %25 = arith.cmpi eq, %3, %24 : vector<432x18xi32>
    %cst = arith.constant 0.000000e+00 : f32
    %26 = vector.broadcast %cst : f32 to vector<432x18xf32>
    %27 = arith.select %25, %1, %26 : vector<432x18xi1>, vector<432x18xf32>
    %cst_8 = arith.constant dense<0.000000e+00> : vector<432x44xf32>
    %28 = tpu.matmul %27, %14, %cst_8 {dimension_numbers = #tpu.dot_dimension_numbers<[1], [0], [0], [1], [0, 0, 1, 1], [], []>} : vector<432x18xf32>, vector<18x44xf32>, vector<432x44xf32> -> vector<432x44xf32>
    %c1_i32_9 = arith.constant 1 : i32
    %29 = vector.broadcast %c1_i32_9 : i32 to vector<432x18xi32>
    %30 = arith.cmpi eq, %3, %29 : vector<432x18xi32>
    %cst_10 = arith.constant 0.000000e+00 : f32
    %31 = vector.broadcast %cst_10 : f32 to vector<432x18xf32>
    %32 = arith.select %30, %1, %31 : vector<432x18xi1>, vector<432x18xf32>
    %cst_11 = arith.constant dense<0.000000e+00> : vector<432x44xf32>
    %33 = tpu.matmul %32, %23, %cst_11 {dimension_numbers = #tpu.dot_dimension_numbers<[1], [0], [0], [1], [0, 0, 1, 1], [], []>} : vector<432x18xf32>, vector<18x44xf32>, vector<432x44xf32> -> vector<432x44xf32>
    %34 = arith.addf %28, %33 : vector<432x44xf32>
    %35 = vector.shape_cast %34 : vector<432x44xf32> to vector<18x24x44xf32>
    %c0_12 = arith.constant 0 : index
    %c0_13 = arith.constant 0 : index
    %c0_14 = arith.constant 0 : index
    %c0_15 = arith.constant 0 : index
    %36 = vector.load %arg9[%c0_12, %c0_13, %c0_14, %c0_15] : memref<2x18x24x44xf32, #tpu.memory_space<vmem>>, vector<1x18x24x44xf32>
    %37 = vector.shape_cast %36 : vector<1x18x24x44xf32> to vector<18x24x44xf32>
    %38 = vector.shape_cast %35 : vector<18x24x44xf32> to vector<1x18x24x44xf32>
    tpu.vector_store %arg9[%c0_12, %c0_13, %c0_14, %c0_15], %38 {strides = array<i32>} : memref<2x18x24x44xf32, #tpu.memory_space<vmem>>, vector<1x18x24x44xf32>,
    %c2_i32_16 = arith.constant 2 : i32
    %39 = vector.broadcast %c2_i32_16 : i32 to vector<432x18xi32>
    %40 = arith.cmpi eq, %3, %39 : vector<432x18xi32>
    %cst_17 = arith.constant 0.000000e+00 : f32
    %41 = vector.broadcast %cst_17 : f32 to vector<432x18xf32>
    %42 = arith.select %40, %1, %41 : vector<432x18xi1>, vector<432x18xf32>
    %cst_18 = arith.constant dense<0.000000e+00> : vector<432x44xf32>
    %43 = tpu.matmul %42, %14, %cst_18 {dimension_numbers = #tpu.dot_dimension_numbers<[1], [0], [0], [1], [0, 0, 1, 1], [], []>} : vector<432x18xf32>, vector<18x44xf32>, vector<432x44xf32> -> vector<432x44xf32>
    %c3_i32 = arith.constant 3 : i32
    %44 = vector.broadcast %c3_i32 : i32 to vector<432x18xi32>
    %45 = arith.cmpi eq, %3, %44 : vector<432x18xi32>
    %cst_19 = arith.constant 0.000000e+00 : f32
    %46 = vector.broadcast %cst_19 : f32 to vector<432x18xf32>
    %47 = arith.select %45, %1, %46 : vector<432x18xi1>, vector<432x18xf32>
    %cst_20 = arith.constant dense<0.000000e+00> : vector<432x44xf32>
    %48 = tpu.matmul %47, %23, %cst_20 {dimension_numbers = #tpu.dot_dimension_numbers<[1], [0], [0], [1], [0, 0, 1, 1], [], []>} : vector<432x18xf32>, vector<18x44xf32>, vector<432x44xf32> -> vector<432x44xf32>
    %49 = arith.addf %43, %48 : vector<432x44xf32>
    %50 = vector.shape_cast %49 : vector<432x44xf32> to vector<18x24x44xf32>
    %c1 = arith.constant 1 : index
    %c0_21 = arith.constant 0 : index
    %c0_22 = arith.constant 0 : index
    %c0_23 = arith.constant 0 : index
    %51 = vector.load %arg9[%c1, %c0_21, %c0_22, %c0_23] : memref<2x18x24x44xf32, #tpu.memory_space<vmem>>, vector<1x18x24x44xf32>
    %52 = vector.shape_cast %51 : vector<1x18x24x44xf32> to vector<18x24x44xf32>
    %53 = vector.shape_cast %50 : vector<18x24x44xf32> to vector<1x18x24x44xf32>
    tpu.vector_store %arg9[%c1, %c0_21, %c0_22, %c0_23], %53 {strides = array<i32>} : memref<2x18x24x44xf32, #tpu.memory_space<vmem>>, vector<1x18x24x44xf32>,
    %cst_24 = arith.constant 0.000000e+00 : f32
    %54 = vector.broadcast %cst_24 : f32 to vector<20x24x40xf32>
    %c0_25 = arith.constant 0 : index
    %c0_26 = arith.constant 0 : index
    %c0_27 = arith.constant 0 : index
    %55 = vector.load %arg10[%c0_25, %c0_26, %c0_27] : memref<220x24x40xf32, #tpu.memory_space<vmem>>, vector<20x24x40xf32>
    tpu.vector_store %arg10[%c0_25, %c0_26, %c0_27], %54 {strides = array<i32>} : memref<220x24x40xf32, #tpu.memory_space<vmem>>, vector<20x24x40xf32>,
    %c200 = arith.constant 200 : index
    %c0_28 = arith.constant 0 : index
    %c0_29 = arith.constant 0 : index
    %56 = vector.load %arg10[%c200, %c0_28, %c0_29] : memref<220x24x40xf32, #tpu.memory_space<vmem>>, vector<20x24x40xf32>
    tpu.vector_store %arg10[%c200, %c0_28, %c0_29], %54 {strides = array<i32>} : memref<220x24x40xf32, #tpu.memory_space<vmem>>, vector<20x24x40xf32>,
    %c0_i32_30 = arith.constant 0 : i32
    %c18_i32 = arith.constant 18 : i32
    %57 = arith.addi %c0_i32_30, %c18_i32 : i32
    %c1_i32_31 = arith.constant 1 : i32
    scf.for %arg14 = %c0_i32_30 to %57 step %c1_i32_31  : i32 {
      %c2_i32_89 = arith.constant 2 : i32
      %122 = arith.muli %c2_i32_89, %arg14 : i32
      %c4_i32_90 = arith.constant 4 : i32
      %123 = arith.addi %c4_i32_90, %122 : i32
      %c0_i32_91 = arith.constant 0 : i32
      %124 = arith.addi %123, %c0_i32_91 : i32
      %c0_92 = arith.constant 0 : index
      %125 = arith.index_cast %arg14 : i32 to index
      %c0_93 = arith.constant 0 : index
      %c0_94 = arith.constant 0 : index
      %126 = vector.load %arg9[%c0_92, %125, %c0_93, %c0_94] : memref<2x18x24x44xf32, #tpu.memory_space<vmem>>, vector<1x1x24x44xf32>
      %127 = vector.shape_cast %126 : vector<1x1x24x44xf32> to vector<24x44xf32>
      %128 = vector.extract_strided_slice %127 {offsets = [0, 0], sizes = [24, 40], strides = [1, 1]} : vector<24x44xf32> to vector<24x40xf32>
      %c5_i32 = arith.constant 5 : i32
      %129 = arith.muli %124, %c5_i32 : i32
      %c0_i32_95 = arith.constant 0 : i32
      %130 = arith.addi %129, %c0_i32_95 : i32
      %131 = arith.index_cast %130 : i32 to index
      %c0_96 = arith.constant 0 : index
      %c0_97 = arith.constant 0 : index
      %132 = vector.load %arg10[%131, %c0_96, %c0_97] : memref<220x24x40xf32, #tpu.memory_space<vmem>>, vector<1x24x40xf32>
      %133 = vector.shape_cast %132 : vector<1x24x40xf32> to vector<24x40xf32>
      %134 = vector.shape_cast %128 : vector<24x40xf32> to vector<1x24x40xf32>
      tpu.vector_store %arg10[%131, %c0_96, %c0_97], %134 {strides = array<i32>} : memref<220x24x40xf32, #tpu.memory_space<vmem>>, vector<1x24x40xf32>,
      %135 = vector.extract_strided_slice %127 {offsets = [0, 1], sizes = [24, 40], strides = [1, 1]} : vector<24x44xf32> to vector<24x40xf32>
      %c5_i32_98 = arith.constant 5 : i32
      %136 = arith.muli %124, %c5_i32_98 : i32
      %c1_i32_99 = arith.constant 1 : i32
      %137 = arith.addi %136, %c1_i32_99 : i32
      %138 = arith.index_cast %137 : i32 to index
      %c0_100 = arith.constant 0 : index
      %c0_101 = arith.constant 0 : index
      %139 = vector.load %arg10[%138, %c0_100, %c0_101] : memref<220x24x40xf32, #tpu.memory_space<vmem>>, vector<1x24x40xf32>
      %140 = vector.shape_cast %139 : vector<1x24x40xf32> to vector<24x40xf32>
      %141 = vector.shape_cast %135 : vector<24x40xf32> to vector<1x24x40xf32>
      tpu.vector_store %arg10[%138, %c0_100, %c0_101], %141 {strides = array<i32>} : memref<220x24x40xf32, #tpu.memory_space<vmem>>, vector<1x24x40xf32>,
      %142 = vector.extract_strided_slice %127 {offsets = [0, 2], sizes = [24, 40], strides = [1, 1]} : vector<24x44xf32> to vector<24x40xf32>
      %c5_i32_102 = arith.constant 5 : i32
      %143 = arith.muli %124, %c5_i32_102 : i32
      %c2_i32_103 = arith.constant 2 : i32
      %144 = arith.addi %143, %c2_i32_103 : i32
      %145 = arith.index_cast %144 : i32 to index
      %c0_104 = arith.constant 0 : index
      %c0_105 = arith.constant 0 : index
      %146 = vector.load %arg10[%145, %c0_104, %c0_105] : memref<220x24x40xf32, #tpu.memory_space<vmem>>, vector<1x24x40xf32>
      %147 = vector.shape_cast %146 : vector<1x24x40xf32> to vector<24x40xf32>
      %148 = vector.shape_cast %142 : vector<24x40xf32> to vector<1x24x40xf32>
      tpu.vector_store %arg10[%145, %c0_104, %c0_105], %148 {strides = array<i32>} : memref<220x24x40xf32, #tpu.memory_space<vmem>>, vector<1x24x40xf32>,
      %149 = vector.extract_strided_slice %127 {offsets = [0, 3], sizes = [24, 40], strides = [1, 1]} : vector<24x44xf32> to vector<24x40xf32>
      %c5_i32_106 = arith.constant 5 : i32
      %150 = arith.muli %124, %c5_i32_106 : i32
      %c3_i32_107 = arith.constant 3 : i32
      %151 = arith.addi %150, %c3_i32_107 : i32
      %152 = arith.index_cast %151 : i32 to index
      %c0_108 = arith.constant 0 : index
      %c0_109 = arith.constant 0 : index
      %153 = vector.load %arg10[%152, %c0_108, %c0_109] : memref<220x24x40xf32, #tpu.memory_space<vmem>>, vector<1x24x40xf32>
      %154 = vector.shape_cast %153 : vector<1x24x40xf32> to vector<24x40xf32>
      %155 = vector.shape_cast %149 : vector<24x40xf32> to vector<1x24x40xf32>
      tpu.vector_store %arg10[%152, %c0_108, %c0_109], %155 {strides = array<i32>} : memref<220x24x40xf32, #tpu.memory_space<vmem>>, vector<1x24x40xf32>,
      %156 = vector.extract_strided_slice %127 {offsets = [0, 4], sizes = [24, 40], strides = [1, 1]} : vector<24x44xf32> to vector<24x40xf32>
      %c5_i32_110 = arith.constant 5 : i32
      %157 = arith.muli %124, %c5_i32_110 : i32
      %c4_i32_111 = arith.constant 4 : i32
      %158 = arith.addi %157, %c4_i32_111 : i32
      %159 = arith.index_cast %158 : i32 to index
      %c0_112 = arith.constant 0 : index
      %c0_113 = arith.constant 0 : index
      %160 = vector.load %arg10[%159, %c0_112, %c0_113] : memref<220x24x40xf32, #tpu.memory_space<vmem>>, vector<1x24x40xf32>
      %161 = vector.shape_cast %160 : vector<1x24x40xf32> to vector<24x40xf32>
      %162 = vector.shape_cast %156 : vector<24x40xf32> to vector<1x24x40xf32>
      tpu.vector_store %arg10[%159, %c0_112, %c0_113], %162 {strides = array<i32>} : memref<220x24x40xf32, #tpu.memory_space<vmem>>, vector<1x24x40xf32>,
      %c2_i32_114 = arith.constant 2 : i32
      %163 = arith.muli %c2_i32_114, %arg14 : i32
      %c4_i32_115 = arith.constant 4 : i32
      %164 = arith.addi %c4_i32_115, %163 : i32
      %c1_i32_116 = arith.constant 1 : i32
      %165 = arith.addi %164, %c1_i32_116 : i32
      %c1_117 = arith.constant 1 : index
      %166 = arith.index_cast %arg14 : i32 to index
      %c0_118 = arith.constant 0 : index
      %c0_119 = arith.constant 0 : index
      %167 = vector.load %arg9[%c1_117, %166, %c0_118, %c0_119] : memref<2x18x24x44xf32, #tpu.memory_space<vmem>>, vector<1x1x24x44xf32>
      %168 = vector.shape_cast %167 : vector<1x1x24x44xf32> to vector<24x44xf32>
      %169 = vector.extract_strided_slice %168 {offsets = [0, 0], sizes = [24, 40], strides = [1, 1]} : vector<24x44xf32> to vector<24x40xf32>
      %c5_i32_120 = arith.constant 5 : i32
      %170 = arith.muli %165, %c5_i32_120 : i32
      %c0_i32_121 = arith.constant 0 : i32
      %171 = arith.addi %170, %c0_i32_121 : i32
      %172 = arith.index_cast %171 : i32 to index
      %c0_122 = arith.constant 0 : index
      %c0_123 = arith.constant 0 : index
      %173 = vector.load %arg10[%172, %c0_122, %c0_123] : memref<220x24x40xf32, #tpu.memory_space<vmem>>, vector<1x24x40xf32>
      %174 = vector.shape_cast %173 : vector<1x24x40xf32> to vector<24x40xf32>
      %175 = vector.shape_cast %169 : vector<24x40xf32> to vector<1x24x40xf32>
      tpu.vector_store %arg10[%172, %c0_122, %c0_123], %175 {strides = array<i32>} : memref<220x24x40xf32, #tpu.memory_space<vmem>>, vector<1x24x40xf32>,
      %176 = vector.extract_strided_slice %168 {offsets = [0, 1], sizes = [24, 40], strides = [1, 1]} : vector<24x44xf32> to vector<24x40xf32>
      %c5_i32_124 = arith.constant 5 : i32
      %177 = arith.muli %165, %c5_i32_124 : i32
      %c1_i32_125 = arith.constant 1 : i32
      %178 = arith.addi %177, %c1_i32_125 : i32
      %179 = arith.index_cast %178 : i32 to index
      %c0_126 = arith.constant 0 : index
      %c0_127 = arith.constant 0 : index
      %180 = vector.load %arg10[%179, %c0_126, %c0_127] : memref<220x24x40xf32, #tpu.memory_space<vmem>>, vector<1x24x40xf32>
      %181 = vector.shape_cast %180 : vector<1x24x40xf32> to vector<24x40xf32>
      %182 = vector.shape_cast %176 : vector<24x40xf32> to vector<1x24x40xf32>
      tpu.vector_store %arg10[%179, %c0_126, %c0_127], %182 {strides = array<i32>} : memref<220x24x40xf32, #tpu.memory_space<vmem>>, vector<1x24x40xf32>,
      %183 = vector.extract_strided_slice %168 {offsets = [0, 2], sizes = [24, 40], strides = [1, 1]} : vector<24x44xf32> to vector<24x40xf32>
      %c5_i32_128 = arith.constant 5 : i32
      %184 = arith.muli %165, %c5_i32_128 : i32
      %c2_i32_129 = arith.constant 2 : i32
      %185 = arith.addi %184, %c2_i32_129 : i32
      %186 = arith.index_cast %185 : i32 to index
      %c0_130 = arith.constant 0 : index
      %c0_131 = arith.constant 0 : index
      %187 = vector.load %arg10[%186, %c0_130, %c0_131] : memref<220x24x40xf32, #tpu.memory_space<vmem>>, vector<1x24x40xf32>
      %188 = vector.shape_cast %187 : vector<1x24x40xf32> to vector<24x40xf32>
      %189 = vector.shape_cast %183 : vector<24x40xf32> to vector<1x24x40xf32>
      tpu.vector_store %arg10[%186, %c0_130, %c0_131], %189 {strides = array<i32>} : memref<220x24x40xf32, #tpu.memory_space<vmem>>, vector<1x24x40xf32>,
      %190 = vector.extract_strided_slice %168 {offsets = [0, 3], sizes = [24, 40], strides = [1, 1]} : vector<24x44xf32> to vector<24x40xf32>
      %c5_i32_132 = arith.constant 5 : i32
      %191 = arith.muli %165, %c5_i32_132 : i32
      %c3_i32_133 = arith.constant 3 : i32
      %192 = arith.addi %191, %c3_i32_133 : i32
      %193 = arith.index_cast %192 : i32 to index
      %c0_134 = arith.constant 0 : index
      %c0_135 = arith.constant 0 : index
      %194 = vector.load %arg10[%193, %c0_134, %c0_135] : memref<220x24x40xf32, #tpu.memory_space<vmem>>, vector<1x24x40xf32>
      %195 = vector.shape_cast %194 : vector<1x24x40xf32> to vector<24x40xf32>
      %196 = vector.shape_cast %190 : vector<24x40xf32> to vector<1x24x40xf32>
      tpu.vector_store %arg10[%193, %c0_134, %c0_135], %196 {strides = array<i32>} : memref<220x24x40xf32, #tpu.memory_space<vmem>>, vector<1x24x40xf32>,
      %197 = vector.extract_strided_slice %168 {offsets = [0, 4], sizes = [24, 40], strides = [1, 1]} : vector<24x44xf32> to vector<24x40xf32>
      %c5_i32_136 = arith.constant 5 : i32
      %198 = arith.muli %165, %c5_i32_136 : i32
      %c4_i32_137 = arith.constant 4 : i32
      %199 = arith.addi %198, %c4_i32_137 : i32
      %200 = arith.index_cast %199 : i32 to index
      %c0_138 = arith.constant 0 : index
      %c0_139 = arith.constant 0 : index
      %201 = vector.load %arg10[%200, %c0_138, %c0_139] : memref<220x24x40xf32, #tpu.memory_space<vmem>>, vector<1x24x40xf32>
      %202 = vector.shape_cast %201 : vector<1x24x40xf32> to vector<24x40xf32>
      %203 = vector.shape_cast %197 : vector<24x40xf32> to vector<1x24x40xf32>
      tpu.vector_store %arg10[%200, %c0_138, %c0_139], %203 {strides = array<i32>} : memref<220x24x40xf32, #tpu.memory_space<vmem>>, vector<1x24x40xf32>,
    }
    %c18_i32_32 = arith.constant 18 : i32
    %c0_33 = arith.constant 0 : index
    %c0_34 = arith.constant 0 : index
    %58 = vector.load %arg4[%c0_33, %c0_34] : memref<16x600xf32, #tpu.memory_space<vmem>>, vector<16x600xf32>
    %c0_35 = arith.constant 0 : index
    %c0_36 = arith.constant 0 : index
    %59 = vector.load %arg5[%c0_35, %c0_36] : memref<16x1xf32, #tpu.memory_space<vmem>>, vector<16x1xf32>
    %c0_i32_37 = arith.constant 0 : i32
    %c40_i32 = arith.constant 40 : i32
    %60 = arith.addi %c0_i32_37, %c40_i32 : i32
    %c1_i32_38 = arith.constant 1 : i32
    scf.for %arg14 = %c0_i32_37 to %60 step %c1_i32_38  : i32 {
      %c5_i32 = arith.constant 5 : i32
      %122 = arith.muli %arg14, %c5_i32 : i32
      %123 = arith.index_cast %122 : i32 to index
      %c0_89 = arith.constant 0 : index
      %c0_90 = arith.constant 0 : index
      %124 = vector.load %arg10[%123, %c0_89, %c0_90] : memref<220x24x40xf32, #tpu.memory_space<vmem>>, vector<25x24x40xf32>
      %125 = vector.shape_cast %124 : vector<25x24x40xf32> to vector<600x40xf32>
      %cst_91 = arith.constant dense<0.000000e+00> : vector<16x40xf32>
      %126 = tpu.matmul %58, %125, %cst_91 {dimension_numbers = #tpu.dot_dimension_numbers<[1], [0], [0], [1], [0, 0, 1, 1], [], []>} : vector<16x600xf32>, vector<600x40xf32>, vector<16x40xf32> -> vector<16x40xf32>
      %127 = vector.broadcast %59 : vector<16x1xf32> to vector<16x40xf32>
      %128 = arith.addf %126, %127 : vector<16x40xf32>
      %cst_92 = arith.constant 0.000000e+00 : f32
      %129 = vector.broadcast %cst_92 : f32 to vector<16x40xf32>
      %130 = arith.maximumf %128, %129 : vector<16x40xf32>
      %131 = arith.index_cast %arg14 : i32 to index
      %c0_93 = arith.constant 0 : index
      %c0_94 = arith.constant 0 : index
      %132 = vector.load %arg11[%131, %c0_93, %c0_94] : memref<40x16x40xf32, #tpu.memory_space<vmem>>, vector<1x16x40xf32>
      %133 = vector.shape_cast %132 : vector<1x16x40xf32> to vector<16x40xf32>
      %134 = vector.shape_cast %130 : vector<16x40xf32> to vector<1x16x40xf32>
      tpu.vector_store %arg11[%131, %c0_93, %c0_94], %134 {strides = array<i32>} : memref<40x16x40xf32, #tpu.memory_space<vmem>>, vector<1x16x40xf32>,
    }
    %c40_i32_39 = arith.constant 40 : i32
    %c0_40 = arith.constant 0 : index
    %c0_41 = arith.constant 0 : index
    %c0_42 = arith.constant 0 : index
    %61 = vector.load %arg11[%c0_40, %c0_41, %c0_42] : memref<40x16x40xf32, #tpu.memory_space<vmem>>, vector<40x16x40xf32>
    %62 = vector.shape_cast %61 : vector<40x16x40xf32> to vector<640x40xf32>
    %c0_43 = arith.constant 0 : index
    %c0_44 = arith.constant 0 : index
    %c0_45 = arith.constant 0 : index
    %63 = vector.load %arg3[%c0_43, %c0_44, %c0_45] : memref<1x640x40xi32, #tpu.memory_space<vmem>>, vector<1x640x40xi32>
    %64 = vector.shape_cast %63 : vector<1x640x40xi32> to vector<640x40xi32>
    %65 = tpu.iota {dimensions = array<i32: 0>} : vector<40x88xi32>
    %66 = tpu.iota {dimensions = array<i32: 1>} : vector<40x88xi32>
    %c2_i32_46 = arith.constant 2 : i32
    %67 = vector.broadcast %c2_i32_46 : i32 to vector<40x88xi32>
    %68 = arith.muli %67, %65 : vector<40x88xi32>
    %c4_i32_47 = arith.constant 4 : i32
    %69 = vector.broadcast %c4_i32_47 : i32 to vector<40x88xi32>
    %70 = arith.addi %68, %69 : vector<40x88xi32>
    %c0_i32_48 = arith.constant 0 : i32
    %71 = vector.broadcast %c0_i32_48 : i32 to vector<40x88xi32>
    %72 = arith.addi %70, %71 : vector<40x88xi32>
    %73 = arith.cmpi eq, %66, %72 : vector<40x88xi32>
    %74 = arith.extui %73 : vector<40x88xi1> to vector<40x88xi32>
    %75 = arith.sitofp %74 : vector<40x88xi32> to vector<40x88xf32>
    %c2_i32_49 = arith.constant 2 : i32
    %76 = vector.broadcast %c2_i32_49 : i32 to vector<40x88xi32>
    %77 = arith.muli %76, %65 : vector<40x88xi32>
    %c4_i32_50 = arith.constant 4 : i32
    %78 = vector.broadcast %c4_i32_50 : i32 to vector<40x88xi32>
    %79 = arith.addi %77, %78 : vector<40x88xi32>
    %c1_i32_51 = arith.constant 1 : i32
    %80 = vector.broadcast %c1_i32_51 : i32 to vector<40x88xi32>
    %81 = arith.addi %79, %80 : vector<40x88xi32>
    %82 = arith.cmpi eq, %66, %81 : vector<40x88xi32>
    %83 = arith.extui %82 : vector<40x88xi1> to vector<40x88xi32>
    %84 = arith.sitofp %83 : vector<40x88xi32> to vector<40x88xf32>
    %c0_i32_52 = arith.constant 0 : i32
    %85 = vector.broadcast %c0_i32_52 : i32 to vector<640x40xi32>
    %86 = arith.cmpi eq, %64, %85 : vector<640x40xi32>
    %cst_53 = arith.constant 0.000000e+00 : f32
    %87 = vector.broadcast %cst_53 : f32 to vector<640x40xf32>
    %88 = arith.select %86, %62, %87 : vector<640x40xi1>, vector<640x40xf32>
    %cst_54 = arith.constant dense<0.000000e+00> : vector<640x88xf32>
    %89 = tpu.matmul %88, %75, %cst_54 {dimension_numbers = #tpu.dot_dimension_numbers<[1], [0], [0], [1], [0, 0, 1, 1], [], []>} : vector<640x40xf32>, vector<40x88xf32>, vector<640x88xf32> -> vector<640x88xf32>
    %c1_i32_55 = arith.constant 1 : i32
    %90 = vector.broadcast %c1_i32_55 : i32 to vector<640x40xi32>
    %91 = arith.cmpi eq, %64, %90 : vector<640x40xi32>
    %cst_56 = arith.constant 0.000000e+00 : f32
    %92 = vector.broadcast %cst_56 : f32 to vector<640x40xf32>
    %93 = arith.select %91, %62, %92 : vector<640x40xi1>, vector<640x40xf32>
    %cst_57 = arith.constant dense<0.000000e+00> : vector<640x88xf32>
    %94 = tpu.matmul %93, %84, %cst_57 {dimension_numbers = #tpu.dot_dimension_numbers<[1], [0], [0], [1], [0, 0, 1, 1], [], []>} : vector<640x40xf32>, vector<40x88xf32>, vector<640x88xf32> -> vector<640x88xf32>
    %95 = arith.addf %89, %94 : vector<640x88xf32>
    %96 = vector.shape_cast %95 : vector<640x88xf32> to vector<40x16x88xf32>
    %c0_58 = arith.constant 0 : index
    %c0_59 = arith.constant 0 : index
    %c0_60 = arith.constant 0 : index
    %c0_61 = arith.constant 0 : index
    %97 = vector.load %arg12[%c0_58, %c0_59, %c0_60, %c0_61] : memref<2x40x16x88xf32, #tpu.memory_space<vmem>>, vector<1x40x16x88xf32>
    %98 = vector.shape_cast %97 : vector<1x40x16x88xf32> to vector<40x16x88xf32>
    %99 = vector.shape_cast %96 : vector<40x16x88xf32> to vector<1x40x16x88xf32>
    tpu.vector_store %arg12[%c0_58, %c0_59, %c0_60, %c0_61], %99 {strides = array<i32>} : memref<2x40x16x88xf32, #tpu.memory_space<vmem>>, vector<1x40x16x88xf32>,
    %c2_i32_62 = arith.constant 2 : i32
    %100 = vector.broadcast %c2_i32_62 : i32 to vector<640x40xi32>
    %101 = arith.cmpi eq, %64, %100 : vector<640x40xi32>
    %cst_63 = arith.constant 0.000000e+00 : f32
    %102 = vector.broadcast %cst_63 : f32 to vector<640x40xf32>
    %103 = arith.select %101, %62, %102 : vector<640x40xi1>, vector<640x40xf32>
    %cst_64 = arith.constant dense<0.000000e+00> : vector<640x88xf32>
    %104 = tpu.matmul %103, %75, %cst_64 {dimension_numbers = #tpu.dot_dimension_numbers<[1], [0], [0], [1], [0, 0, 1, 1], [], []>} : vector<640x40xf32>, vector<40x88xf32>, vector<640x88xf32> -> vector<640x88xf32>
    %c3_i32_65 = arith.constant 3 : i32
    %105 = vector.broadcast %c3_i32_65 : i32 to vector<640x40xi32>
    %106 = arith.cmpi eq, %64, %105 : vector<640x40xi32>
    %cst_66 = arith.constant 0.000000e+00 : f32
    %107 = vector.broadcast %cst_66 : f32 to vector<640x40xf32>
    %108 = arith.select %106, %62, %107 : vector<640x40xi1>, vector<640x40xf32>
    %cst_67 = arith.constant dense<0.000000e+00> : vector<640x88xf32>
    %109 = tpu.matmul %108, %84, %cst_67 {dimension_numbers = #tpu.dot_dimension_numbers<[1], [0], [0], [1], [0, 0, 1, 1], [], []>} : vector<640x40xf32>, vector<40x88xf32>, vector<640x88xf32> -> vector<640x88xf32>
    %110 = arith.addf %104, %109 : vector<640x88xf32>
    %111 = vector.shape_cast %110 : vector<640x88xf32> to vector<40x16x88xf32>
    %c1_68 = arith.constant 1 : index
    %c0_69 = arith.constant 0 : index
    %c0_70 = arith.constant 0 : index
    %c0_71 = arith.constant 0 : index
    %112 = vector.load %arg12[%c1_68, %c0_69, %c0_70, %c0_71] : memref<2x40x16x88xf32, #tpu.memory_space<vmem>>, vector<1x40x16x88xf32>
    %113 = vector.shape_cast %112 : vector<1x40x16x88xf32> to vector<40x16x88xf32>
    %114 = vector.shape_cast %111 : vector<40x16x88xf32> to vector<1x40x16x88xf32>
    tpu.vector_store %arg12[%c1_68, %c0_69, %c0_70, %c0_71], %114 {strides = array<i32>} : memref<2x40x16x88xf32, #tpu.memory_space<vmem>>, vector<1x40x16x88xf32>,
    %cst_72 = arith.constant 0.000000e+00 : f32
    %115 = vector.broadcast %cst_72 : f32 to vector<20x16x84xf32>
    %c0_73 = arith.constant 0 : index
    %c0_74 = arith.constant 0 : index
    %c0_75 = arith.constant 0 : index
    %116 = vector.load %arg13[%c0_73, %c0_74, %c0_75] : memref<440x16x84xf32, #tpu.memory_space<vmem>>, vector<20x16x84xf32>
    tpu.vector_store %arg13[%c0_73, %c0_74, %c0_75], %115 {strides = array<i32>} : memref<440x16x84xf32, #tpu.memory_space<vmem>>, vector<20x16x84xf32>,
    %c420 = arith.constant 420 : index
    %c0_76 = arith.constant 0 : index
    %c0_77 = arith.constant 0 : index
    %117 = vector.load %arg13[%c420, %c0_76, %c0_77] : memref<440x16x84xf32, #tpu.memory_space<vmem>>, vector<20x16x84xf32>
    tpu.vector_store %arg13[%c420, %c0_76, %c0_77], %115 {strides = array<i32>} : memref<440x16x84xf32, #tpu.memory_space<vmem>>, vector<20x16x84xf32>,
    %c0_i32_78 = arith.constant 0 : i32
    %c40_i32_79 = arith.constant 40 : i32
    %118 = arith.addi %c0_i32_78, %c40_i32_79 : i32
    %c1_i32_80 = arith.constant 1 : i32
    scf.for %arg14 = %c0_i32_78 to %118 step %c1_i32_80  : i32 {
      %c2_i32_89 = arith.constant 2 : i32
      %122 = arith.muli %c2_i32_89, %arg14 : i32
      %c4_i32_90 = arith.constant 4 : i32
      %123 = arith.addi %c4_i32_90, %122 : i32
      %c0_i32_91 = arith.constant 0 : i32
      %124 = arith.addi %123, %c0_i32_91 : i32
      %c0_92 = arith.constant 0 : index
      %125 = arith.index_cast %arg14 : i32 to index
      %c0_93 = arith.constant 0 : index
      %c0_94 = arith.constant 0 : index
      %126 = vector.load %arg12[%c0_92, %125, %c0_93, %c0_94] : memref<2x40x16x88xf32, #tpu.memory_space<vmem>>, vector<1x1x16x88xf32>
      %127 = vector.shape_cast %126 : vector<1x1x16x88xf32> to vector<16x88xf32>
      %128 = vector.extract_strided_slice %127 {offsets = [0, 0], sizes = [16, 84], strides = [1, 1]} : vector<16x88xf32> to vector<16x84xf32>
      %c5_i32 = arith.constant 5 : i32
      %129 = arith.muli %124, %c5_i32 : i32
      %c0_i32_95 = arith.constant 0 : i32
      %130 = arith.addi %129, %c0_i32_95 : i32
      %131 = arith.index_cast %130 : i32 to index
      %c0_96 = arith.constant 0 : index
      %c0_97 = arith.constant 0 : index
      %132 = vector.load %arg13[%131, %c0_96, %c0_97] : memref<440x16x84xf32, #tpu.memory_space<vmem>>, vector<1x16x84xf32>
      %133 = vector.shape_cast %132 : vector<1x16x84xf32> to vector<16x84xf32>
      %134 = vector.shape_cast %128 : vector<16x84xf32> to vector<1x16x84xf32>
      tpu.vector_store %arg13[%131, %c0_96, %c0_97], %134 {strides = array<i32>} : memref<440x16x84xf32, #tpu.memory_space<vmem>>, vector<1x16x84xf32>,
      %135 = vector.extract_strided_slice %127 {offsets = [0, 1], sizes = [16, 84], strides = [1, 1]} : vector<16x88xf32> to vector<16x84xf32>
      %c5_i32_98 = arith.constant 5 : i32
      %136 = arith.muli %124, %c5_i32_98 : i32
      %c1_i32_99 = arith.constant 1 : i32
      %137 = arith.addi %136, %c1_i32_99 : i32
      %138 = arith.index_cast %137 : i32 to index
      %c0_100 = arith.constant 0 : index
      %c0_101 = arith.constant 0 : index
      %139 = vector.load %arg13[%138, %c0_100, %c0_101] : memref<440x16x84xf32, #tpu.memory_space<vmem>>, vector<1x16x84xf32>
      %140 = vector.shape_cast %139 : vector<1x16x84xf32> to vector<16x84xf32>
      %141 = vector.shape_cast %135 : vector<16x84xf32> to vector<1x16x84xf32>
      tpu.vector_store %arg13[%138, %c0_100, %c0_101], %141 {strides = array<i32>} : memref<440x16x84xf32, #tpu.memory_space<vmem>>, vector<1x16x84xf32>,
      %142 = vector.extract_strided_slice %127 {offsets = [0, 2], sizes = [16, 84], strides = [1, 1]} : vector<16x88xf32> to vector<16x84xf32>
      %c5_i32_102 = arith.constant 5 : i32
      %143 = arith.muli %124, %c5_i32_102 : i32
      %c2_i32_103 = arith.constant 2 : i32
      %144 = arith.addi %143, %c2_i32_103 : i32
      %145 = arith.index_cast %144 : i32 to index
      %c0_104 = arith.constant 0 : index
      %c0_105 = arith.constant 0 : index
      %146 = vector.load %arg13[%145, %c0_104, %c0_105] : memref<440x16x84xf32, #tpu.memory_space<vmem>>, vector<1x16x84xf32>
      %147 = vector.shape_cast %146 : vector<1x16x84xf32> to vector<16x84xf32>
      %148 = vector.shape_cast %142 : vector<16x84xf32> to vector<1x16x84xf32>
      tpu.vector_store %arg13[%145, %c0_104, %c0_105], %148 {strides = array<i32>} : memref<440x16x84xf32, #tpu.memory_space<vmem>>, vector<1x16x84xf32>,
      %149 = vector.extract_strided_slice %127 {offsets = [0, 3], sizes = [16, 84], strides = [1, 1]} : vector<16x88xf32> to vector<16x84xf32>
      %c5_i32_106 = arith.constant 5 : i32
      %150 = arith.muli %124, %c5_i32_106 : i32
      %c3_i32_107 = arith.constant 3 : i32
      %151 = arith.addi %150, %c3_i32_107 : i32
      %152 = arith.index_cast %151 : i32 to index
      %c0_108 = arith.constant 0 : index
      %c0_109 = arith.constant 0 : index
      %153 = vector.load %arg13[%152, %c0_108, %c0_109] : memref<440x16x84xf32, #tpu.memory_space<vmem>>, vector<1x16x84xf32>
      %154 = vector.shape_cast %153 : vector<1x16x84xf32> to vector<16x84xf32>
      %155 = vector.shape_cast %149 : vector<16x84xf32> to vector<1x16x84xf32>
      tpu.vector_store %arg13[%152, %c0_108, %c0_109], %155 {strides = array<i32>} : memref<440x16x84xf32, #tpu.memory_space<vmem>>, vector<1x16x84xf32>,
      %156 = vector.extract_strided_slice %127 {offsets = [0, 4], sizes = [16, 84], strides = [1, 1]} : vector<16x88xf32> to vector<16x84xf32>
      %c5_i32_110 = arith.constant 5 : i32
      %157 = arith.muli %124, %c5_i32_110 : i32
      %c4_i32_111 = arith.constant 4 : i32
      %158 = arith.addi %157, %c4_i32_111 : i32
      %159 = arith.index_cast %158 : i32 to index
      %c0_112 = arith.constant 0 : index
      %c0_113 = arith.constant 0 : index
      %160 = vector.load %arg13[%159, %c0_112, %c0_113] : memref<440x16x84xf32, #tpu.memory_space<vmem>>, vector<1x16x84xf32>
      %161 = vector.shape_cast %160 : vector<1x16x84xf32> to vector<16x84xf32>
      %162 = vector.shape_cast %156 : vector<16x84xf32> to vector<1x16x84xf32>
      tpu.vector_store %arg13[%159, %c0_112, %c0_113], %162 {strides = array<i32>} : memref<440x16x84xf32, #tpu.memory_space<vmem>>, vector<1x16x84xf32>,
      %c2_i32_114 = arith.constant 2 : i32
      %163 = arith.muli %c2_i32_114, %arg14 : i32
      %c4_i32_115 = arith.constant 4 : i32
      %164 = arith.addi %c4_i32_115, %163 : i32
      %c1_i32_116 = arith.constant 1 : i32
      %165 = arith.addi %164, %c1_i32_116 : i32
      %c1_117 = arith.constant 1 : index
      %166 = arith.index_cast %arg14 : i32 to index
      %c0_118 = arith.constant 0 : index
      %c0_119 = arith.constant 0 : index
      %167 = vector.load %arg12[%c1_117, %166, %c0_118, %c0_119] : memref<2x40x16x88xf32, #tpu.memory_space<vmem>>, vector<1x1x16x88xf32>
      %168 = vector.shape_cast %167 : vector<1x1x16x88xf32> to vector<16x88xf32>
      %169 = vector.extract_strided_slice %168 {offsets = [0, 0], sizes = [16, 84], strides = [1, 1]} : vector<16x88xf32> to vector<16x84xf32>
      %c5_i32_120 = arith.constant 5 : i32
      %170 = arith.muli %165, %c5_i32_120 : i32
      %c0_i32_121 = arith.constant 0 : i32
      %171 = arith.addi %170, %c0_i32_121 : i32
      %172 = arith.index_cast %171 : i32 to index
      %c0_122 = arith.constant 0 : index
      %c0_123 = arith.constant 0 : index
      %173 = vector.load %arg13[%172, %c0_122, %c0_123] : memref<440x16x84xf32, #tpu.memory_space<vmem>>, vector<1x16x84xf32>
      %174 = vector.shape_cast %173 : vector<1x16x84xf32> to vector<16x84xf32>
      %175 = vector.shape_cast %169 : vector<16x84xf32> to vector<1x16x84xf32>
      tpu.vector_store %arg13[%172, %c0_122, %c0_123], %175 {strides = array<i32>} : memref<440x16x84xf32, #tpu.memory_space<vmem>>, vector<1x16x84xf32>,
      %176 = vector.extract_strided_slice %168 {offsets = [0, 1], sizes = [16, 84], strides = [1, 1]} : vector<16x88xf32> to vector<16x84xf32>
      %c5_i32_124 = arith.constant 5 : i32
      %177 = arith.muli %165, %c5_i32_124 : i32
      %c1_i32_125 = arith.constant 1 : i32
      %178 = arith.addi %177, %c1_i32_125 : i32
      %179 = arith.index_cast %178 : i32 to index
      %c0_126 = arith.constant 0 : index
      %c0_127 = arith.constant 0 : index
      %180 = vector.load %arg13[%179, %c0_126, %c0_127] : memref<440x16x84xf32, #tpu.memory_space<vmem>>, vector<1x16x84xf32>
      %181 = vector.shape_cast %180 : vector<1x16x84xf32> to vector<16x84xf32>
      %182 = vector.shape_cast %176 : vector<16x84xf32> to vector<1x16x84xf32>
      tpu.vector_store %arg13[%179, %c0_126, %c0_127], %182 {strides = array<i32>} : memref<440x16x84xf32, #tpu.memory_space<vmem>>, vector<1x16x84xf32>,
      %183 = vector.extract_strided_slice %168 {offsets = [0, 2], sizes = [16, 84], strides = [1, 1]} : vector<16x88xf32> to vector<16x84xf32>
      %c5_i32_128 = arith.constant 5 : i32
      %184 = arith.muli %165, %c5_i32_128 : i32
      %c2_i32_129 = arith.constant 2 : i32
      %185 = arith.addi %184, %c2_i32_129 : i32
      %186 = arith.index_cast %185 : i32 to index
      %c0_130 = arith.constant 0 : index
      %c0_131 = arith.constant 0 : index
      %187 = vector.load %arg13[%186, %c0_130, %c0_131] : memref<440x16x84xf32, #tpu.memory_space<vmem>>, vector<1x16x84xf32>
      %188 = vector.shape_cast %187 : vector<1x16x84xf32> to vector<16x84xf32>
      %189 = vector.shape_cast %183 : vector<16x84xf32> to vector<1x16x84xf32>
      tpu.vector_store %arg13[%186, %c0_130, %c0_131], %189 {strides = array<i32>} : memref<440x16x84xf32, #tpu.memory_space<vmem>>, vector<1x16x84xf32>,
      %190 = vector.extract_strided_slice %168 {offsets = [0, 3], sizes = [16, 84], strides = [1, 1]} : vector<16x88xf32> to vector<16x84xf32>
      %c5_i32_132 = arith.constant 5 : i32
      %191 = arith.muli %165, %c5_i32_132 : i32
      %c3_i32_133 = arith.constant 3 : i32
      %192 = arith.addi %191, %c3_i32_133 : i32
      %193 = arith.index_cast %192 : i32 to index
      %c0_134 = arith.constant 0 : index
      %c0_135 = arith.constant 0 : index
      %194 = vector.load %arg13[%193, %c0_134, %c0_135] : memref<440x16x84xf32, #tpu.memory_space<vmem>>, vector<1x16x84xf32>
      %195 = vector.shape_cast %194 : vector<1x16x84xf32> to vector<16x84xf32>
      %196 = vector.shape_cast %190 : vector<16x84xf32> to vector<1x16x84xf32>
      tpu.vector_store %arg13[%193, %c0_134, %c0_135], %196 {strides = array<i32>} : memref<440x16x84xf32, #tpu.memory_space<vmem>>, vector<1x16x84xf32>,
      %197 = vector.extract_strided_slice %168 {offsets = [0, 4], sizes = [16, 84], strides = [1, 1]} : vector<16x88xf32> to vector<16x84xf32>
      %c5_i32_136 = arith.constant 5 : i32
      %198 = arith.muli %165, %c5_i32_136 : i32
      %c4_i32_137 = arith.constant 4 : i32
      %199 = arith.addi %198, %c4_i32_137 : i32
      %200 = arith.index_cast %199 : i32 to index
      %c0_138 = arith.constant 0 : index
      %c0_139 = arith.constant 0 : index
      %201 = vector.load %arg13[%200, %c0_138, %c0_139] : memref<440x16x84xf32, #tpu.memory_space<vmem>>, vector<1x16x84xf32>
      %202 = vector.shape_cast %201 : vector<1x16x84xf32> to vector<16x84xf32>
      %203 = vector.shape_cast %197 : vector<16x84xf32> to vector<1x16x84xf32>
      tpu.vector_store %arg13[%200, %c0_138, %c0_139], %203 {strides = array<i32>} : memref<440x16x84xf32, #tpu.memory_space<vmem>>, vector<1x16x84xf32>,
    }
    %c40_i32_81 = arith.constant 40 : i32
    %c0_82 = arith.constant 0 : index
    %c0_83 = arith.constant 0 : index
    %119 = vector.load %arg6[%c0_82, %c0_83] : memref<3x400xf32, #tpu.memory_space<vmem>>, vector<3x400xf32>
    %c0_84 = arith.constant 0 : index
    %c0_85 = arith.constant 0 : index
    %120 = vector.load %arg7[%c0_84, %c0_85] : memref<3x1xf32, #tpu.memory_space<vmem>>, vector<3x1xf32>
    %c0_i32_86 = arith.constant 0 : i32
    %c84_i32 = arith.constant 84 : i32
    %121 = arith.addi %c0_i32_86, %c84_i32 : i32
    %c1_i32_87 = arith.constant 1 : i32
    scf.for %arg14 = %c0_i32_86 to %121 step %c1_i32_87  : i32 {
      %c5_i32 = arith.constant 5 : i32
      %122 = arith.muli %arg14, %c5_i32 : i32
      %123 = arith.index_cast %122 : i32 to index
      %c0_89 = arith.constant 0 : index
      %c0_90 = arith.constant 0 : index
      %124 = vector.load %arg13[%123, %c0_89, %c0_90] : memref<440x16x84xf32, #tpu.memory_space<vmem>>, vector<25x16x84xf32>
      %125 = vector.shape_cast %124 : vector<25x16x84xf32> to vector<400x84xf32>
      %cst_91 = arith.constant dense<0.000000e+00> : vector<3x84xf32>
      %126 = tpu.matmul %119, %125, %cst_91 {dimension_numbers = #tpu.dot_dimension_numbers<[1], [0], [0], [1], [0, 0, 1, 1], [], []>} : vector<3x400xf32>, vector<400x84xf32>, vector<3x84xf32> -> vector<3x84xf32>
      %127 = vector.broadcast %120 : vector<3x1xf32> to vector<3x84xf32>
      %128 = arith.addf %126, %127 : vector<3x84xf32>
      %129 = arith.negf %128 : vector<3x84xf32>
      %130 = math.exp %129 : vector<3x84xf32>
      %cst_92 = arith.constant 1.000000e+00 : f32
      %131 = vector.broadcast %cst_92 : f32 to vector<3x84xf32>
      %132 = arith.addf %131, %130 : vector<3x84xf32>
      %133 = arith.divf %131, %132 : vector<3x84xf32>
      %c0_93 = arith.constant 0 : index
      %134 = arith.index_cast %arg14 : i32 to index
      %c0_94 = arith.constant 0 : index
      %c0_95 = arith.constant 0 : index
      %135 = vector.load %arg8[%c0_93, %134, %c0_94, %c0_95] : memref<1x84x3x84xf32, #tpu.memory_space<vmem>>, vector<1x1x3x84xf32>
      %136 = vector.shape_cast %135 : vector<1x1x3x84xf32> to vector<3x84xf32>
      %137 = vector.shape_cast %133 : vector<3x84xf32> to vector<1x1x3x84xf32>
      tpu.vector_store %arg8[%c0_93, %134, %c0_94, %c0_95], %137 {strides = array<i32>} : memref<1x84x3x84xf32, #tpu.memory_space<vmem>>, vector<1x1x3x84xf32>,
    }
    %c84_i32_88 = arith.constant 84 : i32
    return
  }
  func.func @transform_0(%arg0: i32) -> (i32, i32, i32) {
    %c0_i32 = arith.constant 0 : i32
    %c0_i32_0 = arith.constant 0 : i32
    %c0_i32_1 = arith.constant 0 : i32
    return %arg0, %c0_i32, %c0_i32_0 : i32, i32, i32
  }
  func.func @transform_1(%arg0: i32) -> (i32, i32, i32) {
    %c0_i32 = arith.constant 0 : i32
    %c0_i32_0 = arith.constant 0 : i32
    %c0_i32_1 = arith.constant 0 : i32
    return %arg0, %c0_i32, %c0_i32_0 : i32, i32, i32
  }
  func.func @transform_2(%arg0: i32) -> (i32, i32, i32) {
    %c0_i32 = arith.constant 0 : i32
    %c0_i32_0 = arith.constant 0 : i32
    %c0_i32_1 = arith.constant 0 : i32
    return %arg0, %c0_i32, %c0_i32_0 : i32, i32, i32
  }
  func.func @transform_3(%arg0: i32) -> (i32, i32) {
    %c0_i32 = arith.constant 0 : i32
    %c0_i32_0 = arith.constant 0 : i32
    %c0_i32_1 = arith.constant 0 : i32
    return %c0_i32, %c0_i32_0 : i32, i32
  }
  func.func @transform_4(%arg0: i32) -> (i32, i32) {
    %c0_i32 = arith.constant 0 : i32
    %c0_i32_0 = arith.constant 0 : i32
    %c0_i32_1 = arith.constant 0 : i32
    return %c0_i32, %c0_i32_0 : i32, i32
  }
  func.func @transform_5(%arg0: i32) -> (i32, i32) {
    %c0_i32 = arith.constant 0 : i32
    %c0_i32_0 = arith.constant 0 : i32
    %c0_i32_1 = arith.constant 0 : i32
    return %c0_i32, %c0_i32_0 : i32, i32
  }
  func.func @transform_6(%arg0: i32) -> (i32, i32) {
    %c0_i32 = arith.constant 0 : i32
    %c0_i32_0 = arith.constant 0 : i32
    %c0_i32_1 = arith.constant 0 : i32
    return %c0_i32, %c0_i32_0 : i32, i32
  }
  func.func @transform_7(%arg0: i32) -> (i32, i32, i32, i32) {
    %c0_i32 = arith.constant 0 : i32
    %c0_i32_0 = arith.constant 0 : i32
    %c0_i32_1 = arith.constant 0 : i32
    %c0_i32_2 = arith.constant 0 : i32
    return %arg0, %c0_i32, %c0_i32_0, %c0_i32_1 : i32, i32, i32, i32
  }
}

</mosaic_0001>

<bundles_post_ra>
// kernel: tpu_custom_call.1
= control target key start
LH: loop header
LB: loop body
LE: loop exit
PB: predicated region body
PF: predicated region fallthrough
CT: control target
= control target key end

     0   :  { %s7330_s24 = smov 0   ;;  %s9262_s0 = inlined_call_operand.vmem [shape: f32[2,432,18], index: 0, kind: input, shape index: {}]   ;;  %s9263_s1 = inlined_call_operand.vmem [shape: s32[2,432,18], index: 1, kind: input, shape index: {}]   ;;  %s9264_s2 = inlined_call_operand.vmem [shape: s32[2,640,40], index: 2, kind: input, shape index: {}]   ;;  %s9265_s3 = inlined_call_operand.vmem [shape: f32[16,600], index: 3, kind: input, shape index: {}]   ;;  %s9266_s4 = inlined_call_operand.vmem [shape: f32[16,1], index: 4, kind: input, shape index: {}]   ;;  %s9267_s5 = inlined_call_operand.vmem [shape: f32[3,400], index: 5, kind: input, shape index: {}]   ;;  %s9268_s6 = inlined_call_operand.vmem [shape: f32[3,1], index: 6, kind: input, shape index: {}]   ;;  %s9269_s7 = inlined_call_operand.vmem [shape: f32[2,84,3,84], index: 7, kind: output, shape index: {}]  }
   0x1 LB: > { %s6456_s25 = sadd.s32 4294967295, %s7260_s24   ;;  %p6460_p0 = scmp.ge.s32.totalorder %s7260_s24, 1  ;;  %s7260_s24 = sphi %s7330_s24, %s17_s24  }
   0x2   : > { %p257_p1 = scmp.lt.s32.totalorder %s7260_s24, 3 }
   0x4   : > { %p258_p2 = pnand %p6460_p0, %p257_p1 }
   0x5   : > { %p299_p3 = scmp.lt.s32.totalorder (!%p258_p2), %s6456_s25, 1  ;;  %s8109_s18 = smov (!%p258_p2), 0  }
   0x6   : > { %261 = sbr.rel (%p258_p2) target bundleno = 2104 (0x838), region = 48 }
   0xb   : > { %v427_v0 = vlaneseq  ;;  %vm2374_vm0 = vcmask 326656   ;;  %v7278_v1 = vmov 0.0   ;;  %s9271_s25 = smov (!%p299_p3, %s6456_s25), 1  ;;  %vm839_vm1 = vcmask 1041408  }
   0xc   : > { %2375 = vst.msk [vmem:[#allocation3] sm:$0xff] %vm2374_vm0, %v7278_v1  ;;  %s7177_s26 = smul.u32 432, %s9271_s25  ;;  %v7279_v19 = vmov 1.0   ;;  %vm676_vm9 = vcmask 146432  }
   0xd   : > { %v7340_v2 = vshrl.u32 %v427_v0, 7  ;;  %2376 = vst.msk [vmem:[#allocation3 + $0x8] sm:$0xff] %vm2374_vm0, %v7278_v1  ;;  %s7178_s27 = smul.u32 640, %s9271_s25  ;;  %v7353_v6 = vand.u32 127, %v427_v0 }
   0xe   : > { %2377 = vst.msk [vmem:[#allocation3 + $0x10] sm:$0xff] %vm2374_vm0, %v7278_v1  ;;  %s7360_s30 = scalar_lea.vmem %s9263_s1, %s7177_s26  ;;  %s7179_s11 = smul.u32 336, %s9271_s25 }
   0xf   : > { %v430_v3 = vadd.s32 16, %v7340_v2  ;;  %2378 = vst.msk [vmem:[#allocation3 + $0x18] sm:$0xff] %vm2374_vm0, %v7278_v1  ;;  %v429_v4 = vadd.s32 8, %v7340_v2  ;;  %v433_v5 = vmul.u32 2, %v7340_v2  ;;  %s7369_s10 = scalar_lea.vmem %s9264_s2, %s7178_s27  ;;  %s7380_s14 = scalar_lea.vmem %s9262_s0, %s7177_s26  ;;  %v373_v12 = vld [vmem:[%s7360_s30] sm:$0xff]  ;;  %v374_v22 = vld [vmem:[%s7360_s30 + $0x8] sm:$0xff] }
  0x10   : > { %2379 = vst.msk [vmem:[#allocation3 + $0x20] sm:$0xff] %vm2374_vm0, %v7278_v1  ;;  %s7388_s17 = scalar_lea.vmem %s9269_s7, %s7179_s11  ;;  %v319_v17 = vld [vmem:[%s7380_s14] sm:$0xff]  ;;  %vm1421_vm4 = vcmp.eq.s32.totalorder %v373_v12, 2  ;;  %vm1529_vm8 = vcmp.eq.s32.totalorder %v373_v12, 3  ;;  %vm568_vm10 = vcmp.eq.s32.totalorder %v373_v12, 1  ;;  %vm460_vm11 = vcmp.eq.s32.totalorder %v373_v12, 0 }
  0x11   : > { %v435_v7 = vmul.u32 2, %v430_v3  ;;  %2380 = vst.msk [vmem:[#allocation3 + $0x28] sm:$0xff] %vm2374_vm0, %v7278_v1  ;;  %v434_v8 = vmul.u32 2, %v429_v4  ;;  %v7364_v9 = vadd.s32 4, %v433_v5  ;;  %v1475_v20 = vsel %vm1421_vm4, %v319_v17, 0.0  ;;  %v320_v25 = vld [vmem:[%s7380_s14 + $0x8] sm:$0xff] }
  0x12   : > { %2381 = vst.msk [vmem:[#allocation3 + $0x30] sm:$0xff] %vm2374_vm0, %v7278_v1  ;;  %v1583_v21 = vsel %vm1529_vm8, %v319_v17, 0.0  ;;  %v622_v23 = vsel %vm568_vm10, %v319_v17, 0.0  ;;  %v514_v24 = vsel %vm460_vm11, %v319_v17, 0.0  ;;  %vm1422_vm13 = vcmp.eq.s32.totalorder %v374_v22, 2  ;;  %v375_v28 = vld [vmem:[%s7360_s30 + $0x10] sm:$0xff] }
  0x13   : > { %v7371_v10 = vadd.s32 4, %v435_v7  ;;  %2382 = vst.msk [vmem:[#allocation3 + $0x38] sm:$0xff] %vm2374_vm0, %v7278_v1  ;;  %v7375_v11 = vadd.s32 4, %v434_v8  ;;  %v7409_v16 = vadd.s32 1, %v7364_v9  ;;  %vm439_vm7 = vcmp.eq.s32.totalorder %v7353_v6, %v7364_v9  ;;  %v321_v31 = vld [vmem:[%s7380_s14 + $0x10] sm:$0xff]  ;;  %v376_v34 = vld [vmem:[%s7360_s30 + $0x18] sm:$0xff] }
  0x14   : > { %2383 = vst.msk [vmem:[#allocation3 + $0x40] sm:$0xff] %vm2374_vm0, %v7278_v1  ;;  %vm1530_vm14 = vcmp.eq.s32.totalorder %v374_v22, 3  ;;  %v1476_v26 = vsel %vm1422_vm13, %v320_v25, 0.0  ;;  %vm569_vm15 = vcmp.eq.s32.totalorder %v374_v22, 1  ;;  %vm1423_vm4 = vcmp.eq.s32.totalorder %v375_v28, 2  ;;  %v322_v37 = vld [vmem:[%s7380_s14 + $0x18] sm:$0xff] }
  0x15   : > { %v7391_v13 = vadd.s32 1, %v7371_v10  ;;  %2384 = vst.msk [vmem:[#allocation3 + $0x48] sm:$0xff] %vm2374_vm0, %v7278_v1  ;;  %vm441_vm2 = vcmp.eq.s32.totalorder %v7353_v6, %v7371_v10  ;;  %v7398_v14 = vadd.s32 1, %v7375_v11  ;;  %vm440_vm3 = vcmp.eq.s32.totalorder %v7353_v6, %v7375_v11  ;;  %v377_v40 = vld [vmem:[%s7360_s30 + $0x20] sm:$0xff]  ;;  %v378_v46 = vld [vmem:[%s7360_s30 + $0x28] sm:$0xff]  ;;  %v379_v52 = vld [vmem:[%s7360_s30 + $0x30] sm:$0xff] }
  0x16   : > { %2385 = vst.msk [vmem:[#allocation3 + $0x50] sm:$0xff] %vm2374_vm0, %v7278_v1  ;;  %v6467_v15 = vsel %vm441_vm2, 1.0, %v7278_v1  ;;  %vm451_vm12 = vcmp.eq.s32.totalorder %v7353_v6, %v7409_v16  ;;  %v1584_v27 = vsel %vm1530_vm14, %v320_v25, 0.0  ;;  %v623_v29 = vsel %vm569_vm15, %v320_v25, 0.0  ;;  %v323_v43 = vld [vmem:[%s7380_s14 + $0x20] sm:$0xff]  ;;  %v324_v49 = vld [vmem:[%s7380_s14 + $0x28] sm:$0xff] }
  0x17   : > { %vm453_vm5 = vcmp.eq.s32.totalorder %v7353_v6, %v7391_v13  ;;  %2386 = vst.msk [vmem:[#allocation3 + $0x58] sm:$0xff] %vm2374_vm0, %v7278_v1  ;;  %6642 = vmatpush.msk.msra.mxu3 %vm839_vm1, %v6467_v15  ;;  %6528 = vmatpush.msk.msra.mxu1 %vm839_vm1, %v6467_v15  ;;  %vm452_vm6 = vcmp.eq.s32.totalorder %v7353_v6, %v7398_v14  ;;  %vm1531_vm8 = vcmp.eq.s32.totalorder %v375_v28, 3  ;;  %v1477_v32 = vsel %vm1423_vm4, %v321_v31, 0.0  ;;  %v325_v55 = vld [vmem:[%s7380_s14 + $0x30] sm:$0xff]  ;;  %v380_v58 = vld [vmem:[%s7360_s30 + $0x38] sm:$0xff]  ;;  %v381_v0 = vld [vmem:[%s7360_s30 + $0x40] sm:$0xff] }
  0x18   : > { %v6470_v18 = vsel %vm453_vm5, 1.0, %v7278_v1  ;;  %2387 = vst.msk [vmem:[#allocation3 + $0x60] sm:$0xff] %vm2374_vm0, %v7278_v1  ;;  %vm570_vm10 = vcmp.eq.s32.totalorder %v375_v28, 1  ;;  %vm462_vm11 = vcmp.eq.s32.totalorder %v375_v28, 0  ;;  %v1585_v33 = vsel %vm1531_vm8, %v321_v31, 0.0  ;;  %v326_v61 = vld [vmem:[%s7380_s14 + $0x38] sm:$0xff] }
  0x19   : > { %6585 = vmatpush.msk.msra.mxu2 %vm839_vm1, %v6470_v18  ;;  %2388 = vst.msk [vmem:[#allocation3 + $0x68] sm:$0xff] %vm2374_vm0, %v7278_v1  ;;  %6643 = vmatpush.msk.msra.mxu3 %vm440_vm3, %v7279_v19  ;;  %v624_v35 = vsel %vm570_vm10, %v321_v31, 0.0  ;;  %v516_v36 = vsel %vm462_vm11, %v321_v31, 0.0  ;;  %vm1424_vm13 = vcmp.eq.s32.totalorder %v376_v34, 2  ;;  %vm1532_vm14 = vcmp.eq.s32.totalorder %v376_v34, 3  ;;  %v327_v5 = vld [vmem:[%s7380_s14 + $0x40] sm:$0xff] }
  0x1a   : > { %2389 = vst.msk [vmem:[#allocation3 + $0x70] sm:$0xff] %vm2374_vm0, %v7278_v1  ;;  %6471 = vmatpush.msk.msra.mxu0 %vm839_vm1, %v6470_v18  ;;  %6529 = vmatpush.msk.msra.mxu1 %vm440_vm3, %v7279_v19  ;;  %vm461_vm1 = vcmp.eq.s32.totalorder %v374_v22, 0  ;;  %v1478_v38 = vsel %vm1424_vm13, %v322_v37, 0.0  ;;  %vm571_vm15 = vcmp.eq.s32.totalorder %v376_v34, 1  ;;  %v1586_v39 = vsel %vm1532_vm14, %v322_v37, 0.0  ;;  %v382_v12 = vld [vmem:[%s7360_s30 + $0x48] sm:$0xff] }
  0x1b   : > { %2390 = vst.msk [vmem:[#allocation3 + $0x78] sm:$0xff] %vm2374_vm0, %v7278_v1  ;;  %6586 = vmatpush.msk.msra.mxu2 %vm452_vm6, %v7279_v19  ;;  %6644 = vmatpush.msk.msra.mxu3 %vm439_vm7, %v7279_v19  ;;  %v515_v30 = vsel %vm461_vm1, %v320_v25, 0.0  ;;  %vm463_vm1 = vcmp.eq.s32.totalorder %v376_v34, 0  ;;  %v625_v41 = vsel %vm571_vm15, %v322_v37, 0.0  ;;  %vm1425_vm4 = vcmp.eq.s32.totalorder %v377_v40, 2  ;;  %v328_v18 = vld [vmem:[%s7380_s14 + $0x48] sm:$0xff] }
  0x1c   : > { %2391 = vst.msk [vmem:[#allocation3 + $0x80] sm:$0xff] %vm2374_vm0, %v7278_v1  ;;  %6645 = vmatmul.msk.f32.vlgmr.msra.gmra.mxu3 %vm676_vm9, %v1475_v20  ;;  %6472 = vmatpush.msk.msra.mxu0 %vm452_vm6, %v7279_v19  ;;  %v517_v42 = vsel %vm463_vm1, %v322_v37, 0.0  ;;  %vm1533_vm8 = vcmp.eq.s32.totalorder %v377_v40, 3  ;;  %v1479_v44 = vsel %vm1425_vm4, %v323_v43, 0.0  ;;  %vm572_vm10 = vcmp.eq.s32.totalorder %v377_v40, 1  ;;  %v383_v22 = vld [vmem:[%s7360_s30 + $0x50] sm:$0xff] }
  0x1d   : > { %2392 = vst.msk [vmem:[#allocation3 + $0x88] sm:$0xff] %vm2374_vm0, %v7278_v1  ;;  %6587 = vmatpush.msk.msra.mxu2 %vm451_vm12, %v7279_v19  ;;  %6530 = vmatpush.msk.msra.mxu1 %vm439_vm7, %v7279_v19  ;;  %vm464_vm11 = vcmp.eq.s32.totalorder %v377_v40, 0  ;;  %v1587_v45 = vsel %vm1533_vm8, %v323_v43, 0.0  ;;  %v626_v47 = vsel %vm572_vm10, %v323_v43, 0.0  ;;  %vm1426_vm13 = vcmp.eq.s32.totalorder %v378_v46, 2  ;;  %v329_v25 = vld [vmem:[%s7380_s14 + $0x50] sm:$0xff] }
  0x1e   : > { %2393 = vst.msk [vmem:[#allocation3 + $0x90] sm:$0xff] %vm2374_vm0, %v7278_v1  ;;  %6588 = vmatmul.msk.f32.vlgmr.msra.gmra.mxu2 %vm676_vm9, %v1583_v21  ;;  %6473 = vmatpush.msk.msra.mxu0 %vm451_vm12, %v7279_v19  ;;  %v518_v48 = vsel %vm464_vm11, %v323_v43, 0.0  ;;  %vm1534_vm14 = vcmp.eq.s32.totalorder %v378_v46, 3  ;;  %v1480_v50 = vsel %vm1426_vm13, %v324_v49, 0.0  ;;  %vm573_vm15 = vcmp.eq.s32.totalorder %v378_v46, 1  ;;  %v384_v28 = vld [vmem:[%s7360_s30 + $0x58] sm:$0xff] }
  0x1f   : > { %2394 = vst.msk [vmem:[#allocation3 + $0x98] sm:$0xff] %vm2374_vm0, %v7278_v1  ;;  %6474 = vmatmul.msk.f32.vlgmr.msra.gmra.mxu0 %vm676_vm9, %v622_v23  ;;  %6531 = vmatmul.msk.f32.vlgmr.msra.gmra.mxu1 %vm676_vm9, %v514_v24  ;;  %vm465_vm1 = vcmp.eq.s32.totalorder %v378_v46, 0  ;;  %v1588_v51 = vsel %vm1534_vm14, %v324_v49, 0.0  ;;  %v627_v53 = vsel %vm573_vm15, %v324_v49, 0.0  ;;  %vm1427_vm4 = vcmp.eq.s32.totalorder %v379_v52, 2  ;;  %v330_v31 = vld [vmem:[%s7380_s14 + $0x58] sm:$0xff] }
  0x20   : > { %2395 = vst.msk [vmem:[#allocation3 + $0xa0] sm:$0xff] %vm2374_vm0, %v7278_v1  ;;  %v519_v54 = vsel %vm465_vm1, %v324_v49, 0.0  ;;  %vm1535_vm8 = vcmp.eq.s32.totalorder %v379_v52, 3  ;;  %v1481_v56 = vsel %vm1427_vm4, %v325_v55, 0.0  ;;  %vm574_vm10 = vcmp.eq.s32.totalorder %v379_v52, 1  ;;  %v385_v34 = vld [vmem:[%s7360_s30 + $0x60] sm:$0xff] }
  0x21   : > { %2396 = vst.msk [vmem:[#allocation3 + $0xa8] sm:$0xff] %vm2374_vm0, %v7278_v1  ;;  %vm466_vm11 = vcmp.eq.s32.totalorder %v379_v52, 0  ;;  %v1589_v57 = vsel %vm1535_vm8, %v325_v55, 0.0  ;;  %v628_v59 = vsel %vm574_vm10, %v325_v55, 0.0  ;;  %vm1428_vm13 = vcmp.eq.s32.totalorder %v380_v58, 2  ;;  %v331_v37 = vld [vmem:[%s7380_s14 + $0x60] sm:$0xff] }
  0x22   : > { %2397 = vst.msk [vmem:[#allocation3 + $0xb0] sm:$0xff] %vm2374_vm0, %v7278_v1  ;;  %v520_v60 = vsel %vm466_vm11, %v325_v55, 0.0  ;;  %vm1536_vm14 = vcmp.eq.s32.totalorder %v380_v58, 3  ;;  %v1482_v62 = vsel %vm1428_vm13, %v326_v61, 0.0  ;;  %vm575_vm15 = vcmp.eq.s32.totalorder %v380_v58, 1  ;;  %v386_v40 = vld [vmem:[%s7360_s30 + $0x68] sm:$0xff] }
  0x23   : > { %2398 = vst.msk [vmem:[#allocation3 + $0xb8] sm:$0xff] %vm2374_vm0, %v7278_v1  ;;  %vm467_vm1 = vcmp.eq.s32.totalorder %v380_v58, 0  ;;  %v1590_v63 = vsel %vm1536_vm14, %v326_v61, 0.0  ;;  %v629_v3 = vsel %vm575_vm15, %v326_v61, 0.0  ;;  %vm1429_vm4 = vcmp.eq.s32.totalorder %v381_v0, 2  ;;  %v332_v43 = vld [vmem:[%s7380_s14 + $0x68] sm:$0xff] }
  0x24   : > { %2399 = vst.msk [vmem:[#allocation3 + $0xc0] sm:$0xff] %vm2374_vm0, %v7278_v1  ;;  %6646 = vmatmul.msk.f32.gmra.mxu3 %vm676_vm9, %v1476_v26  ;;  %v521_v4 = vsel %vm467_vm1, %v326_v61, 0.0  ;;  %vm1537_vm8 = vcmp.eq.s32.totalorder %v381_v0, 3  ;;  %v1483_v7 = vsel %vm1429_vm4, %v327_v5, 0.0  ;;  %vm576_vm10 = vcmp.eq.s32.totalorder %v381_v0, 1  ;;  %v387_v46 = vld [vmem:[%s7360_s30 + $0x70] sm:$0xff] }
  0x25   : > { %2400 = vst.msk [vmem:[#allocation3 + $0xc8] sm:$0xff] %vm2374_vm0, %v7278_v1  ;;  %vm468_vm11 = vcmp.eq.s32.totalorder %v381_v0, 0  ;;  %v1591_v8 = vsel %vm1537_vm8, %v327_v5, 0.0  ;;  %v630_v15 = vsel %vm576_vm10, %v327_v5, 0.0  ;;  %vm1430_vm13 = vcmp.eq.s32.totalorder %v382_v12, 2  ;;  %v333_v49 = vld [vmem:[%s7380_s14 + $0x70] sm:$0xff] }
  0x26   : > { %2401 = vst.msk [vmem:[#allocation3 + $0xd0] sm:$0xff] %vm2374_vm0, %v7278_v1  ;;  %6589 = vmatmul.msk.f32.gmra.mxu2 %vm676_vm9, %v1584_v27  ;;  %v522_v17 = vsel %vm468_vm11, %v327_v5, 0.0  ;;  %vm1538_vm14 = vcmp.eq.s32.totalorder %v382_v12, 3  ;;  %v1484_v20 = vsel %vm1430_vm13, %v328_v18, 0.0  ;;  %vm577_vm15 = vcmp.eq.s32.totalorder %v382_v12, 1  ;;  %v388_v52 = vld [vmem:[%s7360_s30 + $0x78] sm:$0xff] }
  0x27   : > { %2402 = vst.msk [vmem:[#allocation3 + $0xd8] sm:$0xff] %vm2374_vm0, %v7278_v1  ;;  %6475 = vmatmul.msk.f32.gmra.mxu0 %vm676_vm9, %v623_v29  ;;  %6532 = vmatmul.msk.f32.gmra.mxu1 %vm676_vm9, %v515_v30  ;;  %vm469_vm1 = vcmp.eq.s32.totalorder %v382_v12, 0  ;;  %v1592_v21 = vsel %vm1538_vm14, %v328_v18, 0.0  ;;  %v631_v23 = vsel %vm577_vm15, %v328_v18, 0.0  ;;  %vm1431_vm4 = vcmp.eq.s32.totalorder %v383_v22, 2  ;;  %v334_v55 = vld [vmem:[%s7380_s14 + $0x78] sm:$0xff] }
  0x28   : > { %2403 = vst.msk [vmem:[#allocation3 + $0xe0] sm:$0xff] %vm2374_vm0, %v7278_v1  ;;  %v523_v24 = vsel %vm469_vm1, %v328_v18, 0.0  ;;  %vm1539_vm8 = vcmp.eq.s32.totalorder %v383_v22, 3  ;;  %v1485_v26 = vsel %vm1431_vm4, %v329_v25, 0.0  ;;  %vm578_vm10 = vcmp.eq.s32.totalorder %v383_v22, 1  ;;  %v389_v58 = vld [vmem:[%s7360_s30 + $0x80] sm:$0xff] }
  0x29   : > { %2404 = vst.msk [vmem:[#allocation3 + $0xe8] sm:$0xff] %vm2374_vm0, %v7278_v1  ;;  %vm470_vm11 = vcmp.eq.s32.totalorder %v383_v22, 0  ;;  %v1593_v27 = vsel %vm1539_vm8, %v329_v25, 0.0  ;;  %v632_v29 = vsel %vm578_vm10, %v329_v25, 0.0  ;;  %vm1432_vm13 = vcmp.eq.s32.totalorder %v384_v28, 2  ;;  %v335_v61 = vld [vmem:[%s7380_s14 + $0x80] sm:$0xff] }
  0x2a   : > { %2405 = vst.msk [vmem:[#allocation3 + $0xf0] sm:$0xff] %vm2374_vm0, %v7278_v1  ;;  %v524_v30 = vsel %vm470_vm11, %v329_v25, 0.0  ;;  %vm1540_vm14 = vcmp.eq.s32.totalorder %v384_v28, 3  ;;  %vm579_vm15 = vcmp.eq.s32.totalorder %v384_v28, 1  ;;  %vm471_vm1 = vcmp.eq.s32.totalorder %v384_v28, 0  ;;  %v390_v0 = vld [vmem:[%s7360_s30 + $0x88] sm:$0xff] }
  0x2b   : > { %2406 = vst.msk [vmem:[#allocation3 + $0xf8] sm:$0xff] %vm2374_vm0, %v7278_v1  ;;  %vm1433_vm4 = vcmp.eq.s32.totalorder %v385_v34, 2  ;;  %vm1541_vm8 = vcmp.eq.s32.totalorder %v385_v34, 3  ;;  %vm580_vm10 = vcmp.eq.s32.totalorder %v385_v34, 1  ;;  %vm472_vm11 = vcmp.eq.s32.totalorder %v385_v34, 0  ;;  %v336_v12 = vld [vmem:[%s7380_s14 + $0x88] sm:$0xff] }
  0x2c   : > { %2407 = vst.msk [vmem:[#allocation3 + $0x100] sm:$0xff] %vm2374_vm0, %v7278_v1  ;;  %6647 = vmatmul.msk.f32.gmra.mxu3 %vm676_vm9, %v1477_v32  ;;  %v1486_v32 = vsel %vm1432_vm13, %v330_v31, 0.0  ;;  %vm1434_vm13 = vcmp.eq.s32.totalorder %v386_v40, 2  ;;  %v391_v22 = vld [vmem:[%s7360_s30 + $0x90] sm:$0xff]  ;;  %v392_v34 = vld [vmem:[%s7360_s30 + $0x98] sm:$0xff] }
  0x2d   : > { %2408 = vst.msk [vmem:[#allocation3 + $0x108] sm:$0xff] %vm2374_vm0, %v7278_v1  ;;  %v337_v28 = vld [vmem:[%s7380_s14 + $0x90] sm:$0xff] }
  0x2e   : > { %2409 = vst.msk [vmem:[#allocation3 + $0x110] sm:$0xff] %vm2374_vm0, %v7278_v1  ;;  %6590 = vmatmul.msk.f32.gmra.mxu2 %vm676_vm9, %v1585_v33  ;;  %v1594_v33 = vsel %vm1540_vm14, %v330_v31, 0.0  ;;  %vm1542_vm14 = vcmp.eq.s32.totalorder %v386_v40, 3 }
  0x2f   : > { %2410 = vst.msk [vmem:[#allocation3 + $0x118] sm:$0xff] %vm2374_vm0, %v7278_v1  ;;  %6476 = vmatmul.msk.f32.gmra.mxu0 %vm676_vm9, %v624_v35  ;;  %6533 = vmatmul.msk.f32.gmra.mxu1 %vm676_vm9, %v516_v36  ;;  %v633_v35 = vsel %vm579_vm15, %v330_v31, 0.0  ;;  %v525_v36 = vsel %vm471_vm1, %v330_v31, 0.0  ;;  %vm581_vm15 = vcmp.eq.s32.totalorder %v386_v40, 1  ;;  %vm473_vm1 = vcmp.eq.s32.totalorder %v386_v40, 0  ;;  %v338_v40 = vld [vmem:[%s7380_s14 + $0x98] sm:$0xff] }
  0x30   : > { %2411 = vst.msk [vmem:[#allocation3 + $0x120] sm:$0xff] %vm2374_vm0, %v7278_v1 }
  0x31   : > { %2412 = vst.msk [vmem:[#allocation3 + $0x128] sm:$0xff] %vm2374_vm0, %v7278_v1 }
  0x32   : > { %2413 = vst.msk [vmem:[#allocation3 + $0x130] sm:$0xff] %vm2374_vm0, %v7278_v1 }
  0x33   : > { %2414 = vst.msk [vmem:[#allocation3 + $0x138] sm:$0xff] %vm2374_vm0, %v7278_v1 }
  0x34   : > { %2415 = vst.msk [vmem:[#allocation3 + $0x140] sm:$0xff] %vm2374_vm0, %v7278_v1  ;;  %6648 = vmatmul.msk.f32.gmra.mxu3 %vm676_vm9, %v1478_v38  ;;  %v1487_v38 = vsel %vm1433_vm4, %v331_v37, 0.0  ;;  %vm1435_vm4 = vcmp.eq.s32.totalorder %v387_v46, 2 }
  0x35   : > { %2416 = vst.msk [vmem:[#allocation3 + $0x148] sm:$0xff] %vm2374_vm0, %v7278_v1 }
  0x36   : > { %2417 = vst.msk [vmem:[#allocation3 + $0x150] sm:$0xff] %vm2374_vm0, %v7278_v1  ;;  %6591 = vmatmul.msk.f32.gmra.mxu2 %vm676_vm9, %v1586_v39  ;;  %v1595_v39 = vsel %vm1541_vm8, %v331_v37, 0.0  ;;  %vm1543_vm8 = vcmp.eq.s32.totalorder %v387_v46, 3 }
  0x37   : > { %2418 = vst.msk [vmem:[#allocation3 + $0x158] sm:$0xff] %vm2374_vm0, %v7278_v1  ;;  %6477 = vmatmul.msk.f32.gmra.mxu0 %vm676_vm9, %v625_v41  ;;  %6534 = vmatmul.msk.f32.gmra.mxu1 %vm676_vm9, %v517_v42  ;;  %v634_v41 = vsel %vm580_vm10, %v331_v37, 0.0  ;;  %v526_v42 = vsel %vm472_vm11, %v331_v37, 0.0  ;;  %vm582_vm10 = vcmp.eq.s32.totalorder %v387_v46, 1  ;;  %vm474_vm11 = vcmp.eq.s32.totalorder %v387_v46, 0  ;;  %v393_v46 = vld [vmem:[%s7360_s30 + $0xa0] sm:$0xff] }
  0x38   : > { %2419 = vst.msk [vmem:[#allocation3 + $0x160] sm:$0xff] %vm2374_vm0, %v7278_v1 }
  0x39   : > { %2420 = vst.msk [vmem:[#allocation3 + $0x168] sm:$0xff] %vm2374_vm0, %v7278_v1 }
  0x3a   : > { %2421 = vst.msk [vmem:[#allocation3 + $0x170] sm:$0xff] %vm2374_vm0, %v7278_v1 }
  0x3b   : > { %2422 = vst.msk [vmem:[#allocation3 + $0x178] sm:$0xff] %vm2374_vm0, %v7278_v1 }
  0x3c   : > { %2423 = vst.msk [vmem:[#allocation3 + $0x180] sm:$0xff] %vm2374_vm0, %v7278_v1  ;;  %6649 = vmatmul.msk.f32.gmra.mxu3 %vm676_vm9, %v1479_v44  ;;  %v1488_v44 = vsel %vm1434_vm13, %v332_v43, 0.0  ;;  %vm1436_vm13 = vcmp.eq.s32.totalorder %v388_v52, 2 }
  0x3d   : > { %2424 = vst.msk [vmem:[#allocation3 + $0x188] sm:$0xff] %vm2374_vm0, %v7278_v1 }
  0x3e   : > { %2425 = vst.msk [vmem:[#allocation3 + $0x190] sm:$0xff] %vm2374_vm0, %v7278_v1  ;;  %6592 = vmatmul.msk.f32.gmra.mxu2 %vm676_vm9, %v1587_v45  ;;  %v1596_v45 = vsel %vm1542_vm14, %v332_v43, 0.0  ;;  %vm1544_vm14 = vcmp.eq.s32.totalorder %v388_v52, 3 }
  0x3f   : > { %2426 = vst.msk [vmem:[#allocation3 + $0x198] sm:$0xff] %vm2374_vm0, %v7278_v1  ;;  %6478 = vmatmul.msk.f32.gmra.mxu0 %vm676_vm9, %v626_v47  ;;  %6535 = vmatmul.msk.f32.gmra.mxu1 %vm676_vm9, %v518_v48  ;;  %v635_v47 = vsel %vm581_vm15, %v332_v43, 0.0  ;;  %v527_v48 = vsel %vm473_vm1, %v332_v43, 0.0  ;;  %vm583_vm15 = vcmp.eq.s32.totalorder %v388_v52, 1  ;;  %vm475_vm1 = vcmp.eq.s32.totalorder %v388_v52, 0  ;;  %v339_v52 = vld [vmem:[%s7380_s14 + $0xa0] sm:$0xff] }
  0x40   : > { %2427 = vst.msk [vmem:[#allocation3 + $0x1a0] sm:$0xff] %vm2374_vm0, %v7278_v1 }
  0x41   : > { %2428 = vst.msk [vmem:[#allocation3 + $0x1a8] sm:$0xff] %vm2374_vm0, %v7278_v1 }
  0x42   : > { %2429 = vst.msk [vmem:[#allocation3 + $0x1b0] sm:$0xff] %vm2374_vm0, %v7278_v1 }
  0x43   : > { %2430 = vst.msk [vmem:[#allocation3 + $0x1b8] sm:$0xff] %vm2374_vm0, %v7278_v1 }
  0x44   : > { %2431 = vst.msk [vmem:[#allocation3 + $0x1c0] sm:$0xff] %vm2374_vm0, %v7278_v1  ;;  %6650 = vmatmul.msk.f32.gmra.mxu3 %vm676_vm9, %v1480_v50  ;;  %v1489_v50 = vsel %vm1435_vm4, %v333_v49, 0.0  ;;  %vm1437_vm4 = vcmp.eq.s32.totalorder %v389_v58, 2 }
  0x45   : > { %2432 = vst.msk [vmem:[#allocation3 + $0x1c8] sm:$0xff] %vm2374_vm0, %v7278_v1 }
  0x46   : > { %2433 = vst.msk [vmem:[#allocation3 + $0x1d0] sm:$0xff] %vm2374_vm0, %v7278_v1  ;;  %6593 = vmatmul.msk.f32.gmra.mxu2 %vm676_vm9, %v1588_v51  ;;  %v1597_v51 = vsel %vm1543_vm8, %v333_v49, 0.0  ;;  %vm1545_vm8 = vcmp.eq.s32.totalorder %v389_v58, 3 }
  0x47   : > { %2434 = vst.msk [vmem:[#allocation3 + $0x1d8] sm:$0xff] %vm2374_vm0, %v7278_v1  ;;  %6479 = vmatmul.msk.f32.gmra.mxu0 %vm676_vm9, %v627_v53  ;;  %6536 = vmatmul.msk.f32.gmra.mxu1 %vm676_vm9, %v519_v54  ;;  %v636_v53 = vsel %vm582_vm10, %v333_v49, 0.0  ;;  %v528_v54 = vsel %vm474_vm11, %v333_v49, 0.0  ;;  %vm584_vm10 = vcmp.eq.s32.totalorder %v389_v58, 1  ;;  %vm476_vm11 = vcmp.eq.s32.totalorder %v389_v58, 0  ;;  %v394_v58 = vld [vmem:[%s7360_s30 + $0xa8] sm:$0xff] }
  0x48   : > { %2436 = vst.msk [vmem:[#allocation3 + $0x12c0] sm:$0xff] %vm2374_vm0, %v7278_v1  ;;  %v638_v5 = vsel %vm584_vm10, %v335_v61, 0.0  ;;  %vm1547_vm10 = vcmp.eq.s32.totalorder %v391_v22, 3 }
  0x49   : > { %2437 = vst.msk [vmem:[#allocation3 + $0x12c8] sm:$0xff] %vm2374_vm0, %v7278_v1 }
  0x4a   : > { %2438 = vst.msk [vmem:[#allocation3 + $0x12d0] sm:$0xff] %vm2374_vm0, %v7278_v1 }
  0x4b   : > { %2439 = vst.msk [vmem:[#allocation3 + $0x12d8] sm:$0xff] %vm2374_vm0, %v7278_v1 }
  0x4c   : > { %2440 = vst.msk [vmem:[#allocation3 + $0x12e0] sm:$0xff] %vm2374_vm0, %v7278_v1  ;;  %6651 = vmatmul.msk.f32.gmra.mxu3 %vm676_vm9, %v1481_v56  ;;  %v1490_v56 = vsel %vm1436_vm13, %v334_v55, 0.0  ;;  %vm1366_vm13 = vcmask 359424  }
  0x4d   : > { %2441 = vst.msk [vmem:[#allocation3 + $0x12e8] sm:$0xff] %vm2374_vm0, %v7278_v1 }
  0x4e   : > { %2442 = vst.msk [vmem:[#allocation3 + $0x12f0] sm:$0xff] %vm2374_vm0, %v7278_v1  ;;  %6594 = vmatmul.msk.f32.gmra.mxu2 %vm676_vm9, %v1589_v57  ;;  %v1598_v57 = vsel %vm1544_vm14, %v334_v55, 0.0  ;;  %vm1438_vm14 = vcmp.eq.s32.totalorder %v390_v0, 2 }
  0x4f   : > { %2443 = vst.msk [vmem:[#allocation3 + $0x12f8] sm:$0xff] %vm2374_vm0, %v7278_v1  ;;  %6480 = vmatmul.msk.f32.gmra.mxu0 %vm676_vm9, %v628_v59  ;;  %6537 = vmatmul.msk.f32.gmra.mxu1 %vm676_vm9, %v520_v60  ;;  %v637_v59 = vsel %vm583_vm15, %v334_v55, 0.0  ;;  %v529_v60 = vsel %vm475_vm1, %v334_v55, 0.0  ;;  %vm1546_vm15 = vcmp.eq.s32.totalorder %v390_v0, 3  ;;  %v1492_v18 = vsel %vm1438_vm14, %v336_v12, 0.0 }
  0x50   : > { %2444 = vst.msk [vmem:[#allocation3 + $0x1300] sm:$0xff] %vm2374_vm0, %v7278_v1  ;;  %vm585_vm1 = vcmp.eq.s32.totalorder %v390_v0, 1  ;;  %vm478_vm14 = vcmp.eq.s32.totalorder %v391_v22, 0 }
  0x51   : > { %2445 = vst.msk [vmem:[#allocation3 + $0x1308] sm:$0xff] %vm2374_vm0, %v7278_v1  ;;  %v639_v25 = vsel %vm585_vm1, %v336_v12, 0.0  ;;  %vm1548_vm1 = vcmp.eq.s32.totalorder %v392_v34, 3 }
  0x52   : > { %2446 = vst.msk [vmem:[#allocation3 + $0x1310] sm:$0xff] %vm2374_vm0, %v7278_v1 }
  0x53   : > { %2447 = vst.msk [vmem:[#allocation3 + $0x1318] sm:$0xff] %vm2374_vm0, %v7278_v1 }
  0x54   : > { %2448 = vst.msk [vmem:[#allocation3 + $0x1320] sm:$0xff] %vm2374_vm0, %v7278_v1  ;;  %6652 = vmatmul.msk.f32.gmra.mxu3 %vm676_vm9, %v1482_v62  ;;  %v1491_v62 = vsel %vm1437_vm4, %v335_v61, 0.0  ;;  %vm477_vm4 = vcmp.eq.s32.totalorder %v390_v0, 0  ;;  %v340_v0 = vld [vmem:[%s7380_s14 + $0xa8] sm:$0xff] }
  0x55   : > { %2449 = vst.msk [vmem:[#allocation3 + $0x1328] sm:$0xff] %vm2374_vm0, %v7278_v1 }
  0x56   : > { %2450 = vst.msk [vmem:[#allocation3 + $0x1330] sm:$0xff] %vm2374_vm0, %v7278_v1  ;;  %6595 = vmatmul.msk.f32.gmra.mxu2 %vm676_vm9, %v1590_v63  ;;  %v1599_v63 = vsel %vm1545_vm8, %v335_v61, 0.0  ;;  %vm1439_vm8 = vcmp.eq.s32.totalorder %v391_v22, 2 }
  0x57   : > { %2451 = vst.msk [vmem:[#allocation3 + $0x1338] sm:$0xff] %vm2374_vm0, %v7278_v1  ;;  %6481 = vmatmul.msk.f32.gmra.mxu0 %vm676_vm9, %v629_v3  ;;  %6538 = vmatmul.msk.f32.gmra.mxu1 %vm676_vm9, %v521_v4  ;;  %v1493_v31 = vsel %vm1439_vm8, %v337_v28, 0.0  ;;  %vm479_vm8 = vcmp.eq.s32.totalorder %v392_v34, 0 }
  0x58   : > { %2452 = vst.msk [vmem:[#allocation3 + $0x1340] sm:$0xff] %vm2374_vm0, %v7278_v1 }
  0x59   : > { %2453 = vst.msk [vmem:[#allocation3 + $0x1348] sm:$0xff] %vm2374_vm0, %v7278_v1 }
  0x5a   : > { %2454 = vst.msk [vmem:[#allocation3 + $0x1350] sm:$0xff] %vm2374_vm0, %v7278_v1 }
  0x5b   : > { %2455 = vst.msk [vmem:[#allocation3 + $0x1358] sm:$0xff] %vm2374_vm0, %v7278_v1 }
  0x5c   : > { %2456 = vst.msk [vmem:[#allocation3 + $0x1360] sm:$0xff] %vm2374_vm0, %v7278_v1  ;;  %6653 = vmatmul.msk.f32.gmra.mxu3 %vm676_vm9, %v1483_v7  ;;  %v530_v7 = vsel %vm476_vm11, %v335_v61, 0.0  ;;  %vm586_vm11 = vcmp.eq.s32.totalorder %v391_v22, 1  ;;  %v341_v22 = vld [vmem:[%s7380_s14 + $0xb0] sm:$0xff] }
  0x5d   : > { %2457 = vst.msk [vmem:[#allocation3 + $0x1368] sm:$0xff] %vm2374_vm0, %v7278_v1  ;;  %v640_v37 = vsel %vm586_vm11, %v337_v28, 0.0  ;;  %vm1549_vm11 = vcmp.eq.s32.totalorder %v393_v46, 3 }
  0x5e   : > { %2458 = vst.msk [vmem:[#allocation3 + $0x1370] sm:$0xff] %vm2374_vm0, %v7278_v1  ;;  %6596 = vmatmul.msk.f32.gmra.mxu2 %vm676_vm9, %v1591_v8 }
  0x5f   : > { %2459 = vst.msk [vmem:[#allocation3 + $0x1378] sm:$0xff] %vm2374_vm0, %v7278_v1  ;;  %6482 = vmatmul.msk.f32.gmra.mxu0 %vm676_vm9, %v630_v15  ;;  %6539 = vmatmul.msk.f32.gmra.mxu1 %vm676_vm9, %v522_v17 }
  0x60   : > { %2460 = vst.msk [vmem:[#allocation3 + $0x1380] sm:$0xff] %vm2374_vm0, %v7278_v1 }
  0x61   : > { %2461 = vst.msk [vmem:[#allocation3 + $0x1388] sm:$0xff] %vm2374_vm0, %v7278_v1 }
  0x62   : > { %2462 = vst.msk [vmem:[#allocation3 + $0x1390] sm:$0xff] %vm2374_vm0, %v7278_v1 }
  0x63   : > { %2463 = vst.msk [vmem:[#allocation3 + $0x1398] sm:$0xff] %vm2374_vm0, %v7278_v1 }
  0x64   : > { %2464 = vst.msk [vmem:[#allocation3 + $0x13a0] sm:$0xff] %vm2374_vm0, %v7278_v1  ;;  %6654 = vmatmul.msk.f32.gmra.mxu3 %vm676_vm9, %v1484_v20 }
  0x65   : > { %2465 = vst.msk [vmem:[#allocation3 + $0x13a8] sm:$0xff] %vm2374_vm0, %v7278_v1 }
  0x66   : > { %2466 = vst.msk [vmem:[#allocation3 + $0x13b0] sm:$0xff] %vm2374_vm0, %v7278_v1  ;;  %6597 = vmatmul.msk.f32.gmra.mxu2 %vm676_vm9, %v1592_v21  ;;  %v1600_v21 = vsel %vm1546_vm15, %v336_v12, 0.0  ;;  %vm1440_vm15 = vcmp.eq.s32.totalorder %v392_v34, 2 }
  0x67   : > { %2467 = vst.msk [vmem:[#allocation3 + $0x13b8] sm:$0xff] %vm2374_vm0, %v7278_v1  ;;  %6483 = vmatmul.msk.f32.gmra.mxu0 %vm676_vm9, %v631_v23  ;;  %6540 = vmatmul.msk.f32.gmra.mxu1 %vm676_vm9, %v523_v24  ;;  %v1494_v43 = vsel %vm1440_vm15, %v338_v40, 0.0  ;;  %vm480_vm15 = vcmp.eq.s32.totalorder %v393_v46, 0 }
  0x68   : > { %2468 = vst.msk [vmem:[#allocation3 + $0x13c0] sm:$0xff] %vm2374_vm0, %v7278_v1 }
  0x69   : > { %2469 = vst.msk [vmem:[#allocation3 + $0x13c8] sm:$0xff] %vm2374_vm0, %v7278_v1 }
  0x6a   : > { %2470 = vst.msk [vmem:[#allocation3 + $0x13d0] sm:$0xff] %vm2374_vm0, %v7278_v1 }
  0x6b   : > { %2471 = vst.msk [vmem:[#allocation3 + $0x13d8] sm:$0xff] %vm2374_vm0, %v7278_v1 }
  0x6c   : > { %2472 = vst.msk [vmem:[#allocation3 + $0x13e0] sm:$0xff] %vm2374_vm0, %v7278_v1  ;;  %6655 = vmatmul.msk.f32.gmra.mxu3 %vm676_vm9, %v1485_v26  ;;  %v531_v26 = vsel %vm477_vm4, %v336_v12, 0.0  ;;  %vm587_vm4 = vcmp.eq.s32.totalorder %v392_v34, 1  ;;  %v395_v12 = vld [vmem:[%s7360_s30 + $0xb0] sm:$0xff]  ;;  %v342_v34 = vld [vmem:[%s7380_s14 + $0xb8] sm:$0xff] }
  0x6d   : > { %2473 = vst.msk [vmem:[#allocation3 + $0x13e8] sm:$0xff] %vm2374_vm0, %v7278_v1  ;;  %v641_v49 = vsel %vm587_vm4, %v338_v40, 0.0  ;;  %vm1550_vm4 = vcmp.eq.s32.totalorder %v394_v58, 3 }
  0x6e   : > { %2474 = vst.msk [vmem:[#allocation3 + $0x13f0] sm:$0xff] %vm2374_vm0, %v7278_v1  ;;  %6598 = vmatmul.msk.f32.gmra.mxu2 %vm676_vm9, %v1593_v27 }
  0x6f   : > { %2475 = vst.msk [vmem:[#allocation3 + $0x13f8] sm:$0xff] %vm2374_vm0, %v7278_v1  ;;  %6484 = vmatmul.msk.f32.gmra.mxu0 %vm676_vm9, %v632_v29  ;;  %6541 = vmatmul.msk.f32.gmra.mxu1 %vm676_vm9, %v524_v30 }
  0x70   : > { %2476 = vst.msk [vmem:[#allocation3 + $0x1400] sm:$0xff] %vm2374_vm0, %v7278_v1 }
  0x71   : > { %2477 = vst.msk [vmem:[#allocation3 + $0x1408] sm:$0xff] %vm2374_vm0, %v7278_v1 }
  0x72   : > { %2478 = vst.msk [vmem:[#allocation3 + $0x1410] sm:$0xff] %vm2374_vm0, %v7278_v1 }
  0x73   : > { %2479 = vst.msk [vmem:[#allocation3 + $0x1418] sm:$0xff] %vm2374_vm0, %v7278_v1 }
  0x74   : > { %2480 = vst.msk [vmem:[#allocation3 + $0x1420] sm:$0xff] %vm2374_vm0, %v7278_v1  ;;  %6656 = vmatmul.msk.f32.gmra.mxu3 %vm676_vm9, %v1486_v32 }
  0x75   : > { %2481 = vst.msk [vmem:[#allocation3 + $0x1428] sm:$0xff] %vm2374_vm0, %v7278_v1 }
  0x76   : > { %2482 = vst.msk [vmem:[#allocation3 + $0x1430] sm:$0xff] %vm2374_vm0, %v7278_v1  ;;  %6599 = vmatmul.msk.f32.gmra.mxu2 %vm676_vm9, %v1594_v33  ;;  %v1601_v33 = vsel %vm1547_vm10, %v337_v28, 0.0  ;;  %vm1441_vm10 = vcmp.eq.s32.totalorder %v393_v46, 2 }
  0x77   : > { %2483 = vst.msk [vmem:[#allocation3 + $0x1438] sm:$0xff] %vm2374_vm0, %v7278_v1  ;;  %6485 = vmatmul.msk.f32.gmra.mxu0 %vm676_vm9, %v633_v35  ;;  %6542 = vmatmul.msk.f32.gmra.mxu1 %vm676_vm9, %v525_v36  ;;  %v1495_v55 = vsel %vm1441_vm10, %v339_v52, 0.0  ;;  %vm481_vm10 = vcmp.eq.s32.totalorder %v394_v58, 0 }
  0x78   : > { %2484 = vst.msk [vmem:[#allocation3 + $0x1440] sm:$0xff] %vm2374_vm0, %v7278_v1 }
  0x79   : > { %2485 = vst.msk [vmem:[#allocation3 + $0x1448] sm:$0xff] %vm2374_vm0, %v7278_v1 }
  0x7a   : > { %2486 = vst.msk [vmem:[#allocation3 + $0x1450] sm:$0xff] %vm2374_vm0, %v7278_v1 }
  0x7b   : > { %2487 = vst.msk [vmem:[#allocation3 + $0x1458] sm:$0xff] %vm2374_vm0, %v7278_v1 }
  0x7c   : > { %2488 = vst.msk [vmem:[#allocation3 + $0x1460] sm:$0xff] %vm2374_vm0, %v7278_v1  ;;  %6657 = vmatmul.msk.f32.gmra.mxu3 %vm676_vm9, %v1487_v38  ;;  %v532_v38 = vsel %vm478_vm14, %v337_v28, 0.0  ;;  %vm588_vm14 = vcmp.eq.s32.totalorder %v393_v46, 1  ;;  %v396_v28 = vld [vmem:[%s7360_s30 + $0xb8] sm:$0xff]  ;;  %v343_v46 = vld [vmem:[%s7380_s14 + $0xc0] sm:$0xff] }
  0x7d   : > { %2489 = vst.msk [vmem:[#allocation3 + $0x1468] sm:$0xff] %vm2374_vm0, %v7278_v1  ;;  %v642_v61 = vsel %vm588_vm14, %v339_v52, 0.0  ;;  %vm1551_vm14 = vcmp.eq.s32.totalorder %v395_v12, 3 }
  0x7e   : > { %2490 = vst.msk [vmem:[#allocation3 + $0x1470] sm:$0xff] %vm2374_vm0, %v7278_v1  ;;  %6600 = vmatmul.msk.f32.gmra.mxu2 %vm676_vm9, %v1595_v39 }
  0x7f   : > { %2491 = vst.msk [vmem:[#allocation3 + $0x1478] sm:$0xff] %vm2374_vm0, %v7278_v1  ;;  %6486 = vmatmul.msk.f32.gmra.mxu0 %vm676_vm9, %v634_v41  ;;  %6543 = vmatmul.msk.f32.gmra.mxu1 %vm676_vm9, %v526_v42 }
  0x80   : > { %2492 = vst.msk [vmem:[#allocation3 + $0x1480] sm:$0xff] %vm2374_vm0, %v7278_v1 }
  0x81   : > { %2493 = vst.msk [vmem:[#allocation3 + $0x1488] sm:$0xff] %vm2374_vm0, %v7278_v1 }
  0x82   : > { %2494 = vst.msk [vmem:[#allocation3 + $0x1490] sm:$0xff] %vm2374_vm0, %v7278_v1 }
  0x83   : > { %2495 = vst.msk [vmem:[#allocation3 + $0x1498] sm:$0xff] %vm2374_vm0, %v7278_v1 }
  0x84   : > { %6658 = vmatmul.msk.f32.gmra.mxu3 %vm676_vm9, %v1488_v44 }
  0x86   : > { %6601 = vmatmul.msk.f32.gmra.mxu2 %vm676_vm9, %v1596_v45  ;;  %v1602_v45 = vsel %vm1548_vm1, %v338_v40, 0.0  ;;  %vm1442_vm1 = vcmp.eq.s32.totalorder %v394_v58, 2 }
  0x87   : > { %6487 = vmatmul.msk.f32.gmra.mxu0 %vm676_vm9, %v635_v47  ;;  %6544 = vmatmul.msk.f32.gmra.mxu1 %vm676_vm9, %v527_v48 }
  0x8c   : > { %6659 = vmatmul.msk.f32.gmra.mxu3 %vm676_vm9, %v1489_v50  ;;  %v533_v50 = vsel %vm479_vm8, %v338_v40, 0.0  ;;  %vm589_vm8 = vcmp.eq.s32.totalorder %v394_v58, 1  ;;  %v397_v40 = vld [vmem:[%s7360_s30 + $0xc0] sm:$0xff]  ;;  %v344_v58 = vld [vmem:[%s7380_s14 + $0xc8] sm:$0xff] }
  0x8e   : > { %6602 = vmatmul.msk.f32.gmra.mxu2 %vm676_vm9, %v1597_v51 }
  0x8f   : > { %6488 = vmatmul.msk.f32.gmra.mxu0 %vm676_vm9, %v636_v53  ;;  %6545 = vmatmul.msk.f32.gmra.mxu1 %vm676_vm9, %v528_v54 }
  0x94   : > { %6660 = vmatmul.msk.f32.gmra.mxu3 %vm676_vm9, %v1490_v56 }
  0x96   : > { %6603 = vmatmul.msk.f32.gmra.mxu2 %vm676_vm9, %v1598_v57  ;;  %v1603_v57 = vsel %vm1549_vm11, %v339_v52, 0.0  ;;  %vm1443_vm11 = vcmp.eq.s32.totalorder %v395_v12, 2 }
  0x97   : > { %6489 = vmatmul.msk.f32.gmra.mxu0 %vm676_vm9, %v637_v59  ;;  %6546 = vmatmul.msk.f32.gmra.mxu1 %vm676_vm9, %v529_v60 }
  0x9c   : > { %6661 = vmatmul.msk.f32.gmra.mxu3 %vm676_vm9, %v1491_v62  ;;  %v860_v3 = vpop.f32.mrf.mxu0  ;;  %v1204_v4 = vpop.f32.mrf.mxu1  ;;  %v534_v62 = vsel %vm480_vm15, %v339_v52, 0.0  ;;  %vm590_vm15 = vcmp.eq.s32.totalorder %v395_v12, 1  ;;  %v398_v52 = vld [vmem:[%s7360_s30 + $0xc8] sm:$0xff] }
  0x9d   : > { %v1205_v8 = vadd.f32 %v1204_v4, %v860_v3 }
  0x9e   : > { %6604 = vmatmul.msk.f32.gmra.mxu2 %vm676_vm9, %v1599_v63 }
  0x9f   : > { %1367 = vst.msk [vmem:[#allocation2] sm:$0xff] %vm1366_vm13, %v1205_v8  ;;  %v2157_v15 = vpop.f32.mrf.mxu3  ;;  %6490 = vmatmul.msk.f32.gmra.mxu0 %vm676_vm9, %v638_v5  ;;  %6547 = vmatmul.msk.f32.gmra.mxu1 %vm676_vm9, %v530_v7  ;;  %v1496_v5 = vsel %vm1442_vm1, %v340_v0, 0.0  ;;  %v1604_v8 = vsel %vm1550_vm4, %v340_v0, 0.0  ;;  %vm482_vm1 = vcmp.eq.s32.totalorder %v395_v12, 0  ;;  %vm1444_vm4 = vcmp.eq.s32.totalorder %v396_v28, 2  ;;  %v345_v12 = vld [vmem:[%s7380_s14 + $0xd0] sm:$0xff] }
  0xa1   : > { %v1816_v17 = vpop.f32.mrf.mxu2 }
  0xa2   : > { %v2158_v20 = vadd.f32 %v2157_v15, %v1816_v17 }
  0xa4   : > { %2320 = vst.msk [vmem:[#allocation2 + $0x1b0] sm:$0xff] %vm1366_vm13, %v2158_v20  ;;  %6662 = vmatmul.msk.f32.gmra.mxu3 %vm676_vm9, %v1492_v18  ;;  %v863_v23 = vpop.f32.mrf.mxu0  ;;  %v1207_v24 = vpop.f32.mrf.mxu1  ;;  %v643_v18 = vsel %vm589_vm8, %v340_v0, 0.0  ;;  %v535_v20 = vsel %vm481_vm10, %v340_v0, 0.0  ;;  %vm1552_vm8 = vcmp.eq.s32.totalorder %v396_v28, 3  ;;  %vm591_vm10 = vcmp.eq.s32.totalorder %v396_v28, 1  ;;  %v399_v0 = vld [vmem:[%s7360_s30 + $0xd0] sm:$0xff] }
  0xa5   : > { %v1208_v27 = vadd.f32 %v1207_v24, %v863_v23 }
  0xa6   : > { %6605 = vmatmul.msk.f32.gmra.mxu2 %vm676_vm9, %v1600_v21 }
  0xa7   : > { %1368 = vst.msk [vmem:[#allocation2 + $0x8] sm:$0xff] %vm1366_vm13, %v1208_v27  ;;  %v2160_v29 = vpop.f32.mrf.mxu3  ;;  %6491 = vmatmul.msk.f32.gmra.mxu0 %vm676_vm9, %v639_v25  ;;  %6548 = vmatmul.msk.f32.gmra.mxu1 %vm676_vm9, %v531_v26  ;;  %v1497_v25 = vsel %vm1443_vm11, %v341_v22, 0.0  ;;  %v1605_v27 = vsel %vm1551_vm14, %v341_v22, 0.0  ;;  %vm483_vm11 = vcmp.eq.s32.totalorder %v396_v28, 0  ;;  %vm1445_vm14 = vcmp.eq.s32.totalorder %v397_v40, 2  ;;  %v346_v28 = vld [vmem:[%s7380_s14 + $0xd8] sm:$0xff] }
  0xa9   : > { %v1819_v30 = vpop.f32.mrf.mxu2 }
  0xaa   : > { %v2161_v32 = vadd.f32 %v2160_v29, %v1819_v30 }
  0xac   : > { %2321 = vst.msk [vmem:[#allocation2 + $0x1b8] sm:$0xff] %vm1366_vm13, %v2161_v32  ;;  %6663 = vmatmul.msk.f32.gmra.mxu3 %vm676_vm9, %v1493_v31  ;;  %v866_v35 = vpop.f32.mrf.mxu0  ;;  %v1210_v36 = vpop.f32.mrf.mxu1  ;;  %v644_v31 = vsel %vm590_vm15, %v341_v22, 0.0  ;;  %v536_v32 = vsel %vm482_vm1, %v341_v22, 0.0  ;;  %vm1553_vm15 = vcmp.eq.s32.totalorder %v397_v40, 3  ;;  %vm592_vm1 = vcmp.eq.s32.totalorder %v397_v40, 1  ;;  %v400_v22 = vld [vmem:[%s7360_s30 + $0xd8] sm:$0xff] }
  0xad   : > { %v1211_v39 = vadd.f32 %v1210_v36, %v866_v35 }
  0xae   : > { %6606 = vmatmul.msk.f32.gmra.mxu2 %vm676_vm9, %v1601_v33 }
  0xaf   : > { %1369 = vst.msk [vmem:[#allocation2 + $0x10] sm:$0xff] %vm1366_vm13, %v1211_v39  ;;  %v2163_v41 = vpop.f32.mrf.mxu3  ;;  %6492 = vmatmul.msk.f32.gmra.mxu0 %vm676_vm9, %v640_v37  ;;  %6549 = vmatmul.msk.f32.gmra.mxu1 %vm676_vm9, %v532_v38  ;;  %v1498_v37 = vsel %vm1444_vm4, %v342_v34, 0.0  ;;  %v1606_v39 = vsel %vm1552_vm8, %v342_v34, 0.0  ;;  %vm484_vm4 = vcmp.eq.s32.totalorder %v397_v40, 0  ;;  %vm1446_vm8 = vcmp.eq.s32.totalorder %v398_v52, 2  ;;  %v347_v40 = vld [vmem:[%s7380_s14 + $0xe0] sm:$0xff] }
  0xb1   : > { %v1822_v42 = vpop.f32.mrf.mxu2 }
  0xb2   : > { %v2164_v44 = vadd.f32 %v2163_v41, %v1822_v42 }
  0xb4   : > { %2322 = vst.msk [vmem:[#allocation2 + $0x1c0] sm:$0xff] %vm1366_vm13, %v2164_v44  ;;  %6664 = vmatmul.msk.f32.gmra.mxu3 %vm676_vm9, %v1494_v43  ;;  %v869_v47 = vpop.f32.mrf.mxu0  ;;  %v1213_v48 = vpop.f32.mrf.mxu1  ;;  %v645_v43 = vsel %vm591_vm10, %v342_v34, 0.0  ;;  %v537_v44 = vsel %vm483_vm11, %v342_v34, 0.0  ;;  %vm1554_vm10 = vcmp.eq.s32.totalorder %v398_v52, 3  ;;  %vm593_vm11 = vcmp.eq.s32.totalorder %v398_v52, 1  ;;  %v401_v34 = vld [vmem:[%s7360_s30 + $0xe0] sm:$0xff] }
  0xb5   : > { %v1214_v51 = vadd.f32 %v1213_v48, %v869_v47 }
  0xb6   : > { %6607 = vmatmul.msk.f32.gmra.mxu2 %vm676_vm9, %v1602_v45 }
  0xb7   : > { %1370 = vst.msk [vmem:[#allocation2 + $0x18] sm:$0xff] %vm1366_vm13, %v1214_v51  ;;  %v2166_v53 = vpop.f32.mrf.mxu3  ;;  %6493 = vmatmul.msk.f32.gmra.mxu0 %vm676_vm9, %v641_v49  ;;  %6550 = vmatmul.msk.f32.gmra.mxu1 %vm676_vm9, %v533_v50  ;;  %v1499_v49 = vsel %vm1445_vm14, %v343_v46, 0.0  ;;  %v1607_v51 = vsel %vm1553_vm15, %v343_v46, 0.0  ;;  %vm485_vm14 = vcmp.eq.s32.totalorder %v398_v52, 0  ;;  %vm1447_vm15 = vcmp.eq.s32.totalorder %v399_v0, 2  ;;  %v348_v52 = vld [vmem:[%s7380_s14 + $0xe8] sm:$0xff] }
  0xb9   : > { %v1825_v54 = vpop.f32.mrf.mxu2 }
  0xba   : > { %v2167_v56 = vadd.f32 %v2166_v53, %v1825_v54 }
  0xbc   : > { %2323 = vst.msk [vmem:[#allocation2 + $0x1c8] sm:$0xff] %vm1366_vm13, %v2167_v56  ;;  %6665 = vmatmul.msk.f32.gmra.mxu3 %vm676_vm9, %v1495_v55  ;;  %v872_v59 = vpop.f32.mrf.mxu0  ;;  %v1216_v60 = vpop.f32.mrf.mxu1  ;;  %v646_v55 = vsel %vm592_vm1, %v343_v46, 0.0  ;;  %v538_v56 = vsel %vm484_vm4, %v343_v46, 0.0  ;;  %vm1555_vm1 = vcmp.eq.s32.totalorder %v399_v0, 3  ;;  %vm594_vm4 = vcmp.eq.s32.totalorder %v399_v0, 1  ;;  %v402_v46 = vld [vmem:[%s7360_s30 + $0xe8] sm:$0xff] }
  0xbd   : > { %v1217_v63 = vadd.f32 %v1216_v60, %v872_v59 }
  0xbe   : > { %6608 = vmatmul.msk.f32.gmra.mxu2 %vm676_vm9, %v1603_v57 }
  0xbf   : > { %1371 = vst.msk [vmem:[#allocation2 + $0x20] sm:$0xff] %vm1366_vm13, %v1217_v63  ;;  %v2169_v3 = vpop.f32.mrf.mxu3  ;;  %6494 = vmatmul.msk.f32.gmra.mxu0 %vm676_vm9, %v642_v61  ;;  %6551 = vmatmul.msk.f32.gmra.mxu1 %vm676_vm9, %v534_v62  ;;  %v1500_v61 = vsel %vm1446_vm8, %v344_v58, 0.0  ;;  %v1608_v63 = vsel %vm1554_vm10, %v344_v58, 0.0  ;;  %vm486_vm8 = vcmp.eq.s32.totalorder %v399_v0, 0  ;;  %vm1448_vm10 = vcmp.eq.s32.totalorder %v400_v22, 2  ;;  %v349_v0 = vld [vmem:[%s7380_s14 + $0xf0] sm:$0xff] }
  0xc1   : > { %v1828_v4 = vpop.f32.mrf.mxu2 }
  0xc2   : > { %v2170_v7 = vadd.f32 %v2169_v3, %v1828_v4 }
  0xc4   : > { %2324 = vst.msk [vmem:[#allocation2 + $0x1d0] sm:$0xff] %vm1366_vm13, %v2170_v7  ;;  %6666 = vmatmul.msk.f32.gmra.mxu3 %vm676_vm9, %v1496_v5  ;;  %v875_v15 = vpop.f32.mrf.mxu0  ;;  %v1219_v17 = vpop.f32.mrf.mxu1  ;;  %v647_v5 = vsel %vm593_vm11, %v344_v58, 0.0  ;;  %v539_v7 = vsel %vm485_vm14, %v344_v58, 0.0  ;;  %vm1556_vm11 = vcmp.eq.s32.totalorder %v400_v22, 3  ;;  %vm595_vm14 = vcmp.eq.s32.totalorder %v400_v22, 1  ;;  %v403_v58 = vld [vmem:[%s7360_s30 + $0xf0] sm:$0xff] }
  0xc5   : > { %v1220_v21 = vadd.f32 %v1219_v17, %v875_v15 }
  0xc6   : > { %6609 = vmatmul.msk.f32.gmra.mxu2 %vm676_vm9, %v1604_v8 }
  0xc7   : > { %1372 = vst.msk [vmem:[#allocation2 + $0x28] sm:$0xff] %vm1366_vm13, %v1220_v21  ;;  %v2172_v23 = vpop.f32.mrf.mxu3  ;;  %6495 = vmatmul.msk.f32.gmra.mxu0 %vm676_vm9, %v643_v18  ;;  %6552 = vmatmul.msk.f32.gmra.mxu1 %vm676_vm9, %v535_v20  ;;  %v1501_v18 = vsel %vm1447_vm15, %v345_v12, 0.0  ;;  %v1609_v21 = vsel %vm1555_vm1, %v345_v12, 0.0  ;;  %vm487_vm15 = vcmp.eq.s32.totalorder %v400_v22, 0  ;;  %vm1449_vm1 = vcmp.eq.s32.totalorder %v401_v34, 2  ;;  %v350_v22 = vld [vmem:[%s7380_s14 + $0xf8] sm:$0xff] }
  0xc9   : > { %v1831_v24 = vpop.f32.mrf.mxu2 }
  0xca   : > { %v2173_v26 = vadd.f32 %v2172_v23, %v1831_v24 }
  0xcc   : > { %2325 = vst.msk [vmem:[#allocation2 + $0x1d8] sm:$0xff] %vm1366_vm13, %v2173_v26  ;;  %6667 = vmatmul.msk.f32.gmra.mxu3 %vm676_vm9, %v1497_v25  ;;  %v878_v29 = vpop.f32.mrf.mxu0  ;;  %v1222_v30 = vpop.f32.mrf.mxu1  ;;  %v648_v25 = vsel %vm594_vm4, %v345_v12, 0.0  ;;  %v540_v26 = vsel %vm486_vm8, %v345_v12, 0.0  ;;  %vm1557_vm4 = vcmp.eq.s32.totalorder %v401_v34, 3  ;;  %vm596_vm8 = vcmp.eq.s32.totalorder %v401_v34, 1  ;;  %v404_v12 = vld [vmem:[%s7360_s30 + $0xf8] sm:$0xff] }
  0xcd   : > { %v1223_v33 = vadd.f32 %v1222_v30, %v878_v29 }
  0xce   : > { %6610 = vmatmul.msk.f32.gmra.mxu2 %vm676_vm9, %v1605_v27 }
  0xcf   : > { %1373 = vst.msk [vmem:[#allocation2 + $0x30] sm:$0xff] %vm1366_vm13, %v1223_v33  ;;  %v2175_v35 = vpop.f32.mrf.mxu3  ;;  %6496 = vmatmul.msk.f32.gmra.mxu0 %vm676_vm9, %v644_v31  ;;  %6553 = vmatmul.msk.f32.gmra.mxu1 %vm676_vm9, %v536_v32  ;;  %v1502_v31 = vsel %vm1448_vm10, %v346_v28, 0.0  ;;  %v1610_v33 = vsel %vm1556_vm11, %v346_v28, 0.0  ;;  %vm488_vm10 = vcmp.eq.s32.totalorder %v401_v34, 0  ;;  %vm1450_vm11 = vcmp.eq.s32.totalorder %v402_v46, 2  ;;  %v351_v34 = vld [vmem:[%s7380_s14 + $0x100] sm:$0xff] }
  0xd1   : > { %v1834_v36 = vpop.f32.mrf.mxu2 }
  0xd2   : > { %v2176_v38 = vadd.f32 %v2175_v35, %v1834_v36 }
  0xd4   : > { %2326 = vst.msk [vmem:[#allocation2 + $0x1e0] sm:$0xff] %vm1366_vm13, %v2176_v38  ;;  %6668 = vmatmul.msk.f32.gmra.mxu3 %vm676_vm9, %v1498_v37  ;;  %v881_v41 = vpop.f32.mrf.mxu0  ;;  %v1225_v42 = vpop.f32.mrf.mxu1  ;;  %v649_v37 = vsel %vm595_vm14, %v346_v28, 0.0  ;;  %v541_v38 = vsel %vm487_vm15, %v346_v28, 0.0  ;;  %vm1558_vm14 = vcmp.eq.s32.totalorder %v402_v46, 3  ;;  %vm597_vm15 = vcmp.eq.s32.totalorder %v402_v46, 1  ;;  %v405_v28 = vld [vmem:[%s7360_s30 + $0x100] sm:$0xff] }
  0xd5   : > { %v1226_v45 = vadd.f32 %v1225_v42, %v881_v41 }
  0xd6   : > { %6611 = vmatmul.msk.f32.gmra.mxu2 %vm676_vm9, %v1606_v39 }
  0xd7   : > { %1374 = vst.msk [vmem:[#allocation2 + $0x38] sm:$0xff] %vm1366_vm13, %v1226_v45  ;;  %v2178_v47 = vpop.f32.mrf.mxu3  ;;  %6497 = vmatmul.msk.f32.gmra.mxu0 %vm676_vm9, %v645_v43  ;;  %6554 = vmatmul.msk.f32.gmra.mxu1 %vm676_vm9, %v537_v44  ;;  %v1503_v43 = vsel %vm1449_vm1, %v347_v40, 0.0  ;;  %v1611_v45 = vsel %vm1557_vm4, %v347_v40, 0.0  ;;  %vm489_vm1 = vcmp.eq.s32.totalorder %v402_v46, 0  ;;  %vm1451_vm4 = vcmp.eq.s32.totalorder %v403_v58, 2  ;;  %v352_v46 = vld [vmem:[%s7380_s14 + $0x108] sm:$0xff] }
  0xd9   : > { %v1837_v48 = vpop.f32.mrf.mxu2 }
  0xda   : > { %v2179_v50 = vadd.f32 %v2178_v47, %v1837_v48 }
  0xdc   : > { %2327 = vst.msk [vmem:[#allocation2 + $0x1e8] sm:$0xff] %vm1366_vm13, %v2179_v50  ;;  %6669 = vmatmul.msk.f32.gmra.mxu3 %vm676_vm9, %v1499_v49  ;;  %v884_v53 = vpop.f32.mrf.mxu0  ;;  %v1228_v54 = vpop.f32.mrf.mxu1  ;;  %v650_v49 = vsel %vm596_vm8, %v347_v40, 0.0  ;;  %v542_v50 = vsel %vm488_vm10, %v347_v40, 0.0  ;;  %vm1559_vm8 = vcmp.eq.s32.totalorder %v403_v58, 3  ;;  %vm598_vm10 = vcmp.eq.s32.totalorder %v403_v58, 1  ;;  %v406_v40 = vld [vmem:[%s7360_s30 + $0x108] sm:$0xff] }
  0xdd   : > { %v1229_v57 = vadd.f32 %v1228_v54, %v884_v53 }
  0xde   : > { %6612 = vmatmul.msk.f32.gmra.mxu2 %vm676_vm9, %v1607_v51 }
  0xdf   : > { %1375 = vst.msk [vmem:[#allocation2 + $0x40] sm:$0xff] %vm1366_vm13, %v1229_v57  ;;  %v2181_v59 = vpop.f32.mrf.mxu3  ;;  %6498 = vmatmul.msk.f32.gmra.mxu0 %vm676_vm9, %v646_v55  ;;  %6555 = vmatmul.msk.f32.gmra.mxu1 %vm676_vm9, %v538_v56  ;;  %v1504_v55 = vsel %vm1450_vm11, %v348_v52, 0.0  ;;  %v1612_v57 = vsel %vm1558_vm14, %v348_v52, 0.0  ;;  %vm490_vm11 = vcmp.eq.s32.totalorder %v403_v58, 0  ;;  %vm1452_vm14 = vcmp.eq.s32.totalorder %v404_v12, 2  ;;  %v353_v58 = vld [vmem:[%s7380_s14 + $0x110] sm:$0xff] }
  0xe1   : > { %v1840_v60 = vpop.f32.mrf.mxu2 }
  0xe2   : > { %v2182_v62 = vadd.f32 %v2181_v59, %v1840_v60 }
  0xe4   : > { %2328 = vst.msk [vmem:[#allocation2 + $0x1f0] sm:$0xff] %vm1366_vm13, %v2182_v62  ;;  %6670 = vmatmul.msk.f32.gmra.mxu3 %vm676_vm9, %v1500_v61  ;;  %v887_v3 = vpop.f32.mrf.mxu0  ;;  %v1231_v4 = vpop.f32.mrf.mxu1  ;;  %v651_v61 = vsel %vm597_vm15, %v348_v52, 0.0  ;;  %v543_v62 = vsel %vm489_vm1, %v348_v52, 0.0  ;;  %vm1560_vm15 = vcmp.eq.s32.totalorder %v404_v12, 3  ;;  %vm599_vm1 = vcmp.eq.s32.totalorder %v404_v12, 1  ;;  %v407_v52 = vld [vmem:[%s7360_s30 + $0x110] sm:$0xff] }
  0xe5   : > { %v1232_v8 = vadd.f32 %v1231_v4, %v887_v3 }
  0xe6   : > { %6613 = vmatmul.msk.f32.gmra.mxu2 %vm676_vm9, %v1608_v63 }
  0xe7   : > { %1376 = vst.msk [vmem:[#allocation2 + $0x48] sm:$0xff] %vm1366_vm13, %v1232_v8  ;;  %v2184_v15 = vpop.f32.mrf.mxu3  ;;  %6499 = vmatmul.msk.f32.gmra.mxu0 %vm676_vm9, %v647_v5  ;;  %6556 = vmatmul.msk.f32.gmra.mxu1 %vm676_vm9, %v539_v7  ;;  %v1505_v5 = vsel %vm1451_vm4, %v349_v0, 0.0  ;;  %v1613_v8 = vsel %vm1559_vm8, %v349_v0, 0.0  ;;  %vm491_vm4 = vcmp.eq.s32.totalorder %v404_v12, 0  ;;  %vm1453_vm8 = vcmp.eq.s32.totalorder %v405_v28, 2  ;;  %v354_v12 = vld [vmem:[%s7380_s14 + $0x118] sm:$0xff] }
  0xe9   : > { %v1843_v17 = vpop.f32.mrf.mxu2 }
  0xea   : > { %v2185_v20 = vadd.f32 %v2184_v15, %v1843_v17 }
  0xec   : > { %2329 = vst.msk [vmem:[#allocation2 + $0x1f8] sm:$0xff] %vm1366_vm13, %v2185_v20  ;;  %6671 = vmatmul.msk.f32.gmra.mxu3 %vm676_vm9, %v1501_v18  ;;  %v890_v23 = vpop.f32.mrf.mxu0  ;;  %v1234_v24 = vpop.f32.mrf.mxu1  ;;  %v652_v18 = vsel %vm598_vm10, %v349_v0, 0.0  ;;  %v544_v20 = vsel %vm490_vm11, %v349_v0, 0.0  ;;  %vm1561_vm10 = vcmp.eq.s32.totalorder %v405_v28, 3  ;;  %vm600_vm11 = vcmp.eq.s32.totalorder %v405_v28, 1  ;;  %v408_v0 = vld [vmem:[%s7360_s30 + $0x118] sm:$0xff] }
  0xed   : > { %v1235_v27 = vadd.f32 %v1234_v24, %v890_v23 }
  0xee   : > { %6614 = vmatmul.msk.f32.gmra.mxu2 %vm676_vm9, %v1609_v21 }
  0xef   : > { %1377 = vst.msk [vmem:[#allocation2 + $0x50] sm:$0xff] %vm1366_vm13, %v1235_v27  ;;  %v2187_v29 = vpop.f32.mrf.mxu3  ;;  %6500 = vmatmul.msk.f32.gmra.mxu0 %vm676_vm9, %v648_v25  ;;  %6557 = vmatmul.msk.f32.gmra.mxu1 %vm676_vm9, %v540_v26  ;;  %v1506_v25 = vsel %vm1452_vm14, %v350_v22, 0.0  ;;  %v1614_v27 = vsel %vm1560_vm15, %v350_v22, 0.0  ;;  %vm492_vm14 = vcmp.eq.s32.totalorder %v405_v28, 0  ;;  %vm1454_vm15 = vcmp.eq.s32.totalorder %v406_v40, 2  ;;  %v355_v28 = vld [vmem:[%s7380_s14 + $0x120] sm:$0xff] }
  0xf1   : > { %v1846_v30 = vpop.f32.mrf.mxu2 }
  0xf2   : > { %v2188_v32 = vadd.f32 %v2187_v29, %v1846_v30 }
  0xf4   : > { %2330 = vst.msk [vmem:[#allocation2 + $0x200] sm:$0xff] %vm1366_vm13, %v2188_v32  ;;  %6672 = vmatmul.msk.f32.gmra.mxu3 %vm676_vm9, %v1502_v31  ;;  %v893_v35 = vpop.f32.mrf.mxu0  ;;  %v1237_v36 = vpop.f32.mrf.mxu1  ;;  %v653_v31 = vsel %vm599_vm1, %v350_v22, 0.0  ;;  %v545_v32 = vsel %vm491_vm4, %v350_v22, 0.0  ;;  %vm1562_vm1 = vcmp.eq.s32.totalorder %v406_v40, 3  ;;  %vm601_vm4 = vcmp.eq.s32.totalorder %v406_v40, 1  ;;  %v409_v22 = vld [vmem:[%s7360_s30 + $0x120] sm:$0xff] }
  0xf5   : > { %v1238_v39 = vadd.f32 %v1237_v36, %v893_v35 }
  0xf6   : > { %6615 = vmatmul.msk.f32.gmra.mxu2 %vm676_vm9, %v1610_v33 }
  0xf7   : > { %1378 = vst.msk [vmem:[#allocation2 + $0x58] sm:$0xff] %vm1366_vm13, %v1238_v39  ;;  %v2190_v41 = vpop.f32.mrf.mxu3  ;;  %6501 = vmatmul.msk.f32.gmra.mxu0 %vm676_vm9, %v649_v37  ;;  %6558 = vmatmul.msk.f32.gmra.mxu1 %vm676_vm9, %v541_v38  ;;  %v1507_v37 = vsel %vm1453_vm8, %v351_v34, 0.0  ;;  %v1615_v39 = vsel %vm1561_vm10, %v351_v34, 0.0  ;;  %vm493_vm8 = vcmp.eq.s32.totalorder %v406_v40, 0  ;;  %vm1455_vm10 = vcmp.eq.s32.totalorder %v407_v52, 2  ;;  %v356_v40 = vld [vmem:[%s7380_s14 + $0x128] sm:$0xff] }
  0xf9   : > { %v1849_v42 = vpop.f32.mrf.mxu2 }
  0xfa   : > { %v2191_v44 = vadd.f32 %v2190_v41, %v1849_v42 }
  0xfc   : > { %2331 = vst.msk [vmem:[#allocation2 + $0x208] sm:$0xff] %vm1366_vm13, %v2191_v44  ;;  %6673 = vmatmul.msk.f32.gmra.mxu3 %vm676_vm9, %v1503_v43  ;;  %v896_v47 = vpop.f32.mrf.mxu0  ;;  %v1240_v48 = vpop.f32.mrf.mxu1  ;;  %v654_v43 = vsel %vm600_vm11, %v351_v34, 0.0  ;;  %v546_v44 = vsel %vm492_vm14, %v351_v34, 0.0  ;;  %vm1563_vm11 = vcmp.eq.s32.totalorder %v407_v52, 3  ;;  %vm602_vm14 = vcmp.eq.s32.totalorder %v407_v52, 1  ;;  %v410_v34 = vld [vmem:[%s7360_s30 + $0x128] sm:$0xff] }
  0xfd   : > { %v1241_v51 = vadd.f32 %v1240_v48, %v896_v47 }
  0xfe   : > { %6616 = vmatmul.msk.f32.gmra.mxu2 %vm676_vm9, %v1611_v45 }
  0xff   : > { %1379 = vst.msk [vmem:[#allocation2 + $0x60] sm:$0xff] %vm1366_vm13, %v1241_v51  ;;  %v2193_v53 = vpop.f32.mrf.mxu3  ;;  %6502 = vmatmul.msk.f32.gmra.mxu0 %vm676_vm9, %v650_v49  ;;  %6559 = vmatmul.msk.f32.gmra.mxu1 %vm676_vm9, %v542_v50  ;;  %v1508_v49 = vsel %vm1454_vm15, %v352_v46, 0.0  ;;  %v1616_v51 = vsel %vm1562_vm1, %v352_v46, 0.0  ;;  %vm494_vm15 = vcmp.eq.s32.totalorder %v407_v52, 0  ;;  %vm1456_vm1 = vcmp.eq.s32.totalorder %v408_v0, 2  ;;  %v357_v52 = vld [vmem:[%s7380_s14 + $0x130] sm:$0xff] }
 0x101   : > { %v1852_v54 = vpop.f32.mrf.mxu2 }
 0x102   : > { %v2194_v56 = vadd.f32 %v2193_v53, %v1852_v54 }
 0x104   : > { %2332 = vst.msk [vmem:[#allocation2 + $0x210] sm:$0xff] %vm1366_vm13, %v2194_v56  ;;  %6674 = vmatmul.msk.f32.gmra.mxu3 %vm676_vm9, %v1504_v55  ;;  %v899_v59 = vpop.f32.mrf.mxu0  ;;  %v1243_v60 = vpop.f32.mrf.mxu1  ;;  %v655_v55 = vsel %vm601_vm4, %v352_v46, 0.0  ;;  %v547_v56 = vsel %vm493_vm8, %v352_v46, 0.0  ;;  %vm1564_vm4 = vcmp.eq.s32.totalorder %v408_v0, 3  ;;  %vm603_vm8 = vcmp.eq.s32.totalorder %v408_v0, 1  ;;  %v411_v46 = vld [vmem:[%s7360_s30 + $0x130] sm:$0xff] }
 0x105   : > { %v1244_v63 = vadd.f32 %v1243_v60, %v899_v59 }
 0x106   : > { %6617 = vmatmul.msk.f32.gmra.mxu2 %vm676_vm9, %v1612_v57 }
 0x107   : > { %1380 = vst.msk [vmem:[#allocation2 + $0x68] sm:$0xff] %vm1366_vm13, %v1244_v63  ;;  %v2196_v3 = vpop.f32.mrf.mxu3  ;;  %6503 = vmatmul.msk.f32.gmra.mxu0 %vm676_vm9, %v651_v61  ;;  %6560 = vmatmul.msk.f32.gmra.mxu1 %vm676_vm9, %v543_v62  ;;  %v1509_v61 = vsel %vm1455_vm10, %v353_v58, 0.0  ;;  %v1617_v63 = vsel %vm1563_vm11, %v353_v58, 0.0  ;;  %vm495_vm10 = vcmp.eq.s32.totalorder %v408_v0, 0  ;;  %vm1457_vm11 = vcmp.eq.s32.totalorder %v409_v22, 2  ;;  %v358_v0 = vld [vmem:[%s7380_s14 + $0x138] sm:$0xff] }
 0x109   : > { %v1855_v4 = vpop.f32.mrf.mxu2 }
 0x10a   : > { %v2197_v7 = vadd.f32 %v2196_v3, %v1855_v4 }
 0x10c   : > { %2333 = vst.msk [vmem:[#allocation2 + $0x218] sm:$0xff] %vm1366_vm13, %v2197_v7  ;;  %6675 = vmatmul.msk.f32.gmra.mxu3 %vm676_vm9, %v1505_v5  ;;  %v902_v15 = vpop.f32.mrf.mxu0  ;;  %v1246_v17 = vpop.f32.mrf.mxu1  ;;  %v656_v5 = vsel %vm602_vm14, %v353_v58, 0.0  ;;  %v548_v7 = vsel %vm494_vm15, %v353_v58, 0.0  ;;  %vm1565_vm14 = vcmp.eq.s32.totalorder %v409_v22, 3  ;;  %vm604_vm15 = vcmp.eq.s32.totalorder %v409_v22, 1  ;;  %v412_v58 = vld [vmem:[%s7360_s30 + $0x138] sm:$0xff] }
 0x10d   : > { %v1247_v21 = vadd.f32 %v1246_v17, %v902_v15 }
 0x10e   : > { %6618 = vmatmul.msk.f32.gmra.mxu2 %vm676_vm9, %v1613_v8 }
 0x10f   : > { %1381 = vst.msk [vmem:[#allocation2 + $0x70] sm:$0xff] %vm1366_vm13, %v1247_v21  ;;  %v2199_v23 = vpop.f32.mrf.mxu3  ;;  %6504 = vmatmul.msk.f32.gmra.mxu0 %vm676_vm9, %v652_v18  ;;  %6561 = vmatmul.msk.f32.gmra.mxu1 %vm676_vm9, %v544_v20  ;;  %v1510_v18 = vsel %vm1456_vm1, %v354_v12, 0.0  ;;  %v1618_v21 = vsel %vm1564_vm4, %v354_v12, 0.0  ;;  %vm496_vm1 = vcmp.eq.s32.totalorder %v409_v22, 0  ;;  %vm1458_vm4 = vcmp.eq.s32.totalorder %v410_v34, 2  ;;  %v359_v22 = vld [vmem:[%s7380_s14 + $0x140] sm:$0xff] }
 0x111   : > { %v1858_v24 = vpop.f32.mrf.mxu2 }
 0x112   : > { %v2200_v26 = vadd.f32 %v2199_v23, %v1858_v24 }
 0x114   : > { %2334 = vst.msk [vmem:[#allocation2 + $0x220] sm:$0xff] %vm1366_vm13, %v2200_v26  ;;  %6676 = vmatmul.msk.f32.gmra.mxu3 %vm676_vm9, %v1506_v25  ;;  %v905_v29 = vpop.f32.mrf.mxu0  ;;  %v1249_v30 = vpop.f32.mrf.mxu1  ;;  %v657_v25 = vsel %vm603_vm8, %v354_v12, 0.0  ;;  %v549_v26 = vsel %vm495_vm10, %v354_v12, 0.0  ;;  %vm1566_vm8 = vcmp.eq.s32.totalorder %v410_v34, 3  ;;  %vm605_vm10 = vcmp.eq.s32.totalorder %v410_v34, 1  ;;  %v413_v12 = vld [vmem:[%s7360_s30 + $0x140] sm:$0xff] }
 0x115   : > { %v1250_v33 = vadd.f32 %v1249_v30, %v905_v29 }
 0x116   : > { %6619 = vmatmul.msk.f32.gmra.mxu2 %vm676_vm9, %v1614_v27 }
 0x117   : > { %1382 = vst.msk [vmem:[#allocation2 + $0x78] sm:$0xff] %vm1366_vm13, %v1250_v33  ;;  %v2202_v35 = vpop.f32.mrf.mxu3  ;;  %6505 = vmatmul.msk.f32.gmra.mxu0 %vm676_vm9, %v653_v31  ;;  %6562 = vmatmul.msk.f32.gmra.mxu1 %vm676_vm9, %v545_v32  ;;  %v1511_v31 = vsel %vm1457_vm11, %v355_v28, 0.0  ;;  %v1619_v33 = vsel %vm1565_vm14, %v355_v28, 0.0  ;;  %vm497_vm11 = vcmp.eq.s32.totalorder %v410_v34, 0  ;;  %vm1459_vm14 = vcmp.eq.s32.totalorder %v411_v46, 2  ;;  %v360_v34 = vld [vmem:[%s7380_s14 + $0x148] sm:$0xff] }
 0x119   : > { %v1861_v36 = vpop.f32.mrf.mxu2 }
 0x11a   : > { %v2203_v38 = vadd.f32 %v2202_v35, %v1861_v36 }
 0x11c   : > { %2335 = vst.msk [vmem:[#allocation2 + $0x228] sm:$0xff] %vm1366_vm13, %v2203_v38  ;;  %6677 = vmatmul.msk.f32.gmra.mxu3 %vm676_vm9, %v1507_v37  ;;  %v908_v41 = vpop.f32.mrf.mxu0  ;;  %v1252_v42 = vpop.f32.mrf.mxu1  ;;  %v658_v37 = vsel %vm604_vm15, %v355_v28, 0.0  ;;  %v550_v38 = vsel %vm496_vm1, %v355_v28, 0.0  ;;  %vm1567_vm15 = vcmp.eq.s32.totalorder %v411_v46, 3  ;;  %vm606_vm1 = vcmp.eq.s32.totalorder %v411_v46, 1  ;;  %v414_v28 = vld [vmem:[%s7360_s30 + $0x148] sm:$0xff] }
 0x11d   : > { %v1253_v45 = vadd.f32 %v1252_v42, %v908_v41 }
 0x11e   : > { %6620 = vmatmul.msk.f32.gmra.mxu2 %vm676_vm9, %v1615_v39 }
 0x11f   : > { %1383 = vst.msk [vmem:[#allocation2 + $0x80] sm:$0xff] %vm1366_vm13, %v1253_v45  ;;  %v2205_v47 = vpop.f32.mrf.mxu3  ;;  %6506 = vmatmul.msk.f32.gmra.mxu0 %vm676_vm9, %v654_v43  ;;  %6563 = vmatmul.msk.f32.gmra.mxu1 %vm676_vm9, %v546_v44  ;;  %v1512_v43 = vsel %vm1458_vm4, %v356_v40, 0.0  ;;  %v1620_v45 = vsel %vm1566_vm8, %v356_v40, 0.0  ;;  %vm498_vm4 = vcmp.eq.s32.totalorder %v411_v46, 0  ;;  %vm1460_vm8 = vcmp.eq.s32.totalorder %v412_v58, 2  ;;  %v361_v46 = vld [vmem:[%s7380_s14 + $0x150] sm:$0xff] }
 0x121   : > { %v1864_v48 = vpop.f32.mrf.mxu2 }
 0x122   : > { %v2206_v50 = vadd.f32 %v2205_v47, %v1864_v48 }
 0x124   : > { %2336 = vst.msk [vmem:[#allocation2 + $0x230] sm:$0xff] %vm1366_vm13, %v2206_v50  ;;  %6678 = vmatmul.msk.f32.gmra.mxu3 %vm676_vm9, %v1508_v49  ;;  %v911_v53 = vpop.f32.mrf.mxu0  ;;  %v1255_v54 = vpop.f32.mrf.mxu1  ;;  %v659_v49 = vsel %vm605_vm10, %v356_v40, 0.0  ;;  %v551_v50 = vsel %vm497_vm11, %v356_v40, 0.0  ;;  %vm1568_vm10 = vcmp.eq.s32.totalorder %v412_v58, 3  ;;  %vm607_vm11 = vcmp.eq.s32.totalorder %v412_v58, 1  ;;  %v415_v40 = vld [vmem:[%s7360_s30 + $0x150] sm:$0xff] }
 0x125   : > { %v1256_v57 = vadd.f32 %v1255_v54, %v911_v53 }
 0x126   : > { %6621 = vmatmul.msk.f32.gmra.mxu2 %vm676_vm9, %v1616_v51 }
 0x127   : > { %1384 = vst.msk [vmem:[#allocation2 + $0x88] sm:$0xff] %vm1366_vm13, %v1256_v57  ;;  %v2208_v59 = vpop.f32.mrf.mxu3  ;;  %6507 = vmatmul.msk.f32.gmra.mxu0 %vm676_vm9, %v655_v55  ;;  %6564 = vmatmul.msk.f32.gmra.mxu1 %vm676_vm9, %v547_v56  ;;  %v1513_v55 = vsel %vm1459_vm14, %v357_v52, 0.0  ;;  %v1621_v57 = vsel %vm1567_vm15, %v357_v52, 0.0  ;;  %vm499_vm14 = vcmp.eq.s32.totalorder %v412_v58, 0  ;;  %vm1461_vm15 = vcmp.eq.s32.totalorder %v413_v12, 2  ;;  %v362_v58 = vld [vmem:[%s7380_s14 + $0x158] sm:$0xff] }
 0x129   : > { %v1867_v60 = vpop.f32.mrf.mxu2 }
 0x12a   : > { %v2209_v62 = vadd.f32 %v2208_v59, %v1867_v60 }
 0x12c   : > { %2337 = vst.msk [vmem:[#allocation2 + $0x238] sm:$0xff] %vm1366_vm13, %v2209_v62  ;;  %6679 = vmatmul.msk.f32.gmra.mxu3 %vm676_vm9, %v1509_v61  ;;  %v914_v3 = vpop.f32.mrf.mxu0  ;;  %v1258_v4 = vpop.f32.mrf.mxu1  ;;  %v660_v61 = vsel %vm606_vm1, %v357_v52, 0.0  ;;  %v552_v62 = vsel %vm498_vm4, %v357_v52, 0.0  ;;  %vm1569_vm1 = vcmp.eq.s32.totalorder %v413_v12, 3  ;;  %vm608_vm4 = vcmp.eq.s32.totalorder %v413_v12, 1  ;;  %v416_v52 = vld [vmem:[%s7360_s30 + $0x158] sm:$0xff] }
 0x12d   : > { %v1259_v8 = vadd.f32 %v1258_v4, %v914_v3 }
 0x12e   : > { %6622 = vmatmul.msk.f32.gmra.mxu2 %vm676_vm9, %v1617_v63 }
 0x12f   : > { %1385 = vst.msk [vmem:[#allocation2 + $0x90] sm:$0xff] %vm1366_vm13, %v1259_v8  ;;  %v2211_v15 = vpop.f32.mrf.mxu3  ;;  %6508 = vmatmul.msk.f32.gmra.mxu0 %vm676_vm9, %v656_v5  ;;  %6565 = vmatmul.msk.f32.gmra.mxu1 %vm676_vm9, %v548_v7  ;;  %v1514_v5 = vsel %vm1460_vm8, %v358_v0, 0.0  ;;  %v1622_v8 = vsel %vm1568_vm10, %v358_v0, 0.0  ;;  %vm500_vm8 = vcmp.eq.s32.totalorder %v413_v12, 0  ;;  %vm1462_vm10 = vcmp.eq.s32.totalorder %v414_v28, 2  ;;  %v363_v12 = vld [vmem:[%s7380_s14 + $0x160] sm:$0xff] }
 0x131   : > { %v1870_v17 = vpop.f32.mrf.mxu2 }
 0x132   : > { %v2212_v20 = vadd.f32 %v2211_v15, %v1870_v17 }
 0x134   : > { %2338 = vst.msk [vmem:[#allocation2 + $0x240] sm:$0xff] %vm1366_vm13, %v2212_v20  ;;  %6680 = vmatmul.msk.f32.gmra.mxu3 %vm676_vm9, %v1510_v18  ;;  %v917_v23 = vpop.f32.mrf.mxu0  ;;  %v1261_v24 = vpop.f32.mrf.mxu1  ;;  %v661_v18 = vsel %vm607_vm11, %v358_v0, 0.0  ;;  %v553_v20 = vsel %vm499_vm14, %v358_v0, 0.0  ;;  %vm1570_vm11 = vcmp.eq.s32.totalorder %v414_v28, 3  ;;  %vm609_vm14 = vcmp.eq.s32.totalorder %v414_v28, 1  ;;  %v417_v0 = vld [vmem:[%s7360_s30 + $0x160] sm:$0xff] }
 0x135   : > { %v1262_v27 = vadd.f32 %v1261_v24, %v917_v23 }
 0x136   : > { %6623 = vmatmul.msk.f32.gmra.mxu2 %vm676_vm9, %v1618_v21 }
 0x137   : > { %1386 = vst.msk [vmem:[#allocation2 + $0x98] sm:$0xff] %vm1366_vm13, %v1262_v27  ;;  %v2214_v29 = vpop.f32.mrf.mxu3  ;;  %6509 = vmatmul.msk.f32.gmra.mxu0 %vm676_vm9, %v657_v25  ;;  %6566 = vmatmul.msk.f32.gmra.mxu1 %vm676_vm9, %v549_v26  ;;  %v1515_v25 = vsel %vm1461_vm15, %v359_v22, 0.0  ;;  %v1623_v27 = vsel %vm1569_vm1, %v359_v22, 0.0  ;;  %vm501_vm15 = vcmp.eq.s32.totalorder %v414_v28, 0  ;;  %vm1463_vm1 = vcmp.eq.s32.totalorder %v415_v40, 2  ;;  %v364_v28 = vld [vmem:[%s7380_s14 + $0x168] sm:$0xff] }
 0x139   : > { %v1873_v30 = vpop.f32.mrf.mxu2 }
 0x13a   : > { %v2215_v32 = vadd.f32 %v2214_v29, %v1873_v30 }
 0x13c   : > { %2339 = vst.msk [vmem:[#allocation2 + $0x248] sm:$0xff] %vm1366_vm13, %v2215_v32  ;;  %6681 = vmatmul.msk.f32.gmra.mxu3 %vm676_vm9, %v1511_v31  ;;  %v920_v35 = vpop.f32.mrf.mxu0  ;;  %v1264_v36 = vpop.f32.mrf.mxu1  ;;  %v662_v31 = vsel %vm608_vm4, %v359_v22, 0.0  ;;  %v554_v32 = vsel %vm500_vm8, %v359_v22, 0.0  ;;  %vm1571_vm4 = vcmp.eq.s32.totalorder %v415_v40, 3  ;;  %vm610_vm8 = vcmp.eq.s32.totalorder %v415_v40, 1  ;;  %v418_v22 = vld [vmem:[%s7360_s30 + $0x168] sm:$0xff] }
 0x13d   : > { %v1265_v39 = vadd.f32 %v1264_v36, %v920_v35 }
 0x13e   : > { %6624 = vmatmul.msk.f32.gmra.mxu2 %vm676_vm9, %v1619_v33 }
 0x13f   : > { %1387 = vst.msk [vmem:[#allocation2 + $0xa0] sm:$0xff] %vm1366_vm13, %v1265_v39  ;;  %v2217_v41 = vpop.f32.mrf.mxu3  ;;  %6510 = vmatmul.msk.f32.gmra.mxu0 %vm676_vm9, %v658_v37  ;;  %6567 = vmatmul.msk.f32.gmra.mxu1 %vm676_vm9, %v550_v38  ;;  %v1516_v37 = vsel %vm1462_vm10, %v360_v34, 0.0  ;;  %v1624_v39 = vsel %vm1570_vm11, %v360_v34, 0.0  ;;  %vm502_vm10 = vcmp.eq.s32.totalorder %v415_v40, 0  ;;  %vm1464_vm11 = vcmp.eq.s32.totalorder %v416_v52, 2  ;;  %v365_v40 = vld [vmem:[%s7380_s14 + $0x170] sm:$0xff] }
 0x141   : > { %v1876_v42 = vpop.f32.mrf.mxu2 }
 0x142   : > { %v2218_v44 = vadd.f32 %v2217_v41, %v1876_v42 }
 0x144   : > { %2340 = vst.msk [vmem:[#allocation2 + $0x250] sm:$0xff] %vm1366_vm13, %v2218_v44  ;;  %6682 = vmatmul.msk.f32.gmra.mxu3 %vm676_vm9, %v1512_v43  ;;  %v923_v47 = vpop.f32.mrf.mxu0  ;;  %v1267_v48 = vpop.f32.mrf.mxu1  ;;  %v663_v43 = vsel %vm609_vm14, %v360_v34, 0.0  ;;  %v555_v44 = vsel %vm501_vm15, %v360_v34, 0.0  ;;  %vm1572_vm14 = vcmp.eq.s32.totalorder %v416_v52, 3  ;;  %vm611_vm15 = vcmp.eq.s32.totalorder %v416_v52, 1  ;;  %v419_v34 = vld [vmem:[%s7360_s30 + $0x170] sm:$0xff] }
 0x145   : > { %v1268_v51 = vadd.f32 %v1267_v48, %v923_v47 }
 0x146   : > { %6625 = vmatmul.msk.f32.gmra.mxu2 %vm676_vm9, %v1620_v45 }
 0x147   : > { %1388 = vst.msk [vmem:[#allocation2 + $0xa8] sm:$0xff] %vm1366_vm13, %v1268_v51  ;;  %v2220_v53 = vpop.f32.mrf.mxu3  ;;  %6511 = vmatmul.msk.f32.gmra.mxu0 %vm676_vm9, %v659_v49  ;;  %6568 = vmatmul.msk.f32.gmra.mxu1 %vm676_vm9, %v551_v50  ;;  %v1517_v49 = vsel %vm1463_vm1, %v361_v46, 0.0  ;;  %v1625_v51 = vsel %vm1571_vm4, %v361_v46, 0.0  ;;  %vm503_vm1 = vcmp.eq.s32.totalorder %v416_v52, 0  ;;  %vm1465_vm4 = vcmp.eq.s32.totalorder %v417_v0, 2  ;;  %v366_v52 = vld [vmem:[%s7380_s14 + $0x178] sm:$0xff] }
 0x149   : > { %v1879_v54 = vpop.f32.mrf.mxu2 }
 0x14a   : > { %v2221_v56 = vadd.f32 %v2220_v53, %v1879_v54 }
 0x14c   : > { %2341 = vst.msk [vmem:[#allocation2 + $0x258] sm:$0xff] %vm1366_vm13, %v2221_v56  ;;  %6683 = vmatmul.msk.f32.gmra.mxu3 %vm676_vm9, %v1513_v55  ;;  %v926_v59 = vpop.f32.mrf.mxu0  ;;  %v1270_v60 = vpop.f32.mrf.mxu1  ;;  %v664_v55 = vsel %vm610_vm8, %v361_v46, 0.0  ;;  %v556_v56 = vsel %vm502_vm10, %v361_v46, 0.0  ;;  %vm1573_vm8 = vcmp.eq.s32.totalorder %v417_v0, 3  ;;  %vm612_vm10 = vcmp.eq.s32.totalorder %v417_v0, 1  ;;  %v420_v46 = vld [vmem:[%s7360_s30 + $0x178] sm:$0xff] }
 0x14d   : > { %v1271_v63 = vadd.f32 %v1270_v60, %v926_v59 }
 0x14e   : > { %6626 = vmatmul.msk.f32.gmra.mxu2 %vm676_vm9, %v1621_v57 }
 0x14f   : > { %1389 = vst.msk [vmem:[#allocation2 + $0xb0] sm:$0xff] %vm1366_vm13, %v1271_v63  ;;  %v2223_v3 = vpop.f32.mrf.mxu3  ;;  %6512 = vmatmul.msk.f32.gmra.mxu0 %vm676_vm9, %v660_v61  ;;  %6569 = vmatmul.msk.f32.gmra.mxu1 %vm676_vm9, %v552_v62  ;;  %v1518_v61 = vsel %vm1464_vm11, %v362_v58, 0.0  ;;  %v1626_v63 = vsel %vm1572_vm14, %v362_v58, 0.0  ;;  %vm504_vm11 = vcmp.eq.s32.totalorder %v417_v0, 0  ;;  %vm1466_vm14 = vcmp.eq.s32.totalorder %v418_v22, 2  ;;  %v367_v0 = vld [vmem:[%s7380_s14 + $0x180] sm:$0xff] }
 0x151   : > { %v1882_v4 = vpop.f32.mrf.mxu2 }
 0x152   : > { %v2224_v7 = vadd.f32 %v2223_v3, %v1882_v4 }
 0x154   : > { %2342 = vst.msk [vmem:[#allocation2 + $0x260] sm:$0xff] %vm1366_vm13, %v2224_v7  ;;  %6684 = vmatmul.msk.f32.gmra.mxu3 %vm676_vm9, %v1514_v5  ;;  %v929_v15 = vpop.f32.mrf.mxu0  ;;  %v1273_v17 = vpop.f32.mrf.mxu1  ;;  %v665_v5 = vsel %vm611_vm15, %v362_v58, 0.0  ;;  %v557_v7 = vsel %vm503_vm1, %v362_v58, 0.0  ;;  %vm1574_vm15 = vcmp.eq.s32.totalorder %v418_v22, 3  ;;  %vm613_vm1 = vcmp.eq.s32.totalorder %v418_v22, 1  ;;  %v421_v58 = vld [vmem:[%s7360_s30 + $0x180] sm:$0xff] }
 0x155   : > { %v1274_v21 = vadd.f32 %v1273_v17, %v929_v15 }
 0x156   : > { %6627 = vmatmul.msk.f32.gmra.mxu2 %vm676_vm9, %v1622_v8 }
 0x157   : > { %1390 = vst.msk [vmem:[#allocation2 + $0xb8] sm:$0xff] %vm1366_vm13, %v1274_v21  ;;  %v2226_v23 = vpop.f32.mrf.mxu3  ;;  %6513 = vmatmul.msk.f32.gmra.mxu0 %vm676_vm9, %v661_v18  ;;  %6570 = vmatmul.msk.f32.gmra.mxu1 %vm676_vm9, %v553_v20  ;;  %v1519_v18 = vsel %vm1465_vm4, %v363_v12, 0.0  ;;  %v1627_v21 = vsel %vm1573_vm8, %v363_v12, 0.0  ;;  %vm505_vm4 = vcmp.eq.s32.totalorder %v418_v22, 0  ;;  %vm1467_vm8 = vcmp.eq.s32.totalorder %v419_v34, 2  ;;  %v368_v22 = vld [vmem:[%s7380_s14 + $0x188] sm:$0xff] }
 0x159   : > { %v1885_v24 = vpop.f32.mrf.mxu2 }
 0x15a   : > { %v2227_v26 = vadd.f32 %v2226_v23, %v1885_v24 }
 0x15c   : > { %2343 = vst.msk [vmem:[#allocation2 + $0x268] sm:$0xff] %vm1366_vm13, %v2227_v26  ;;  %6685 = vmatmul.msk.f32.gmra.mxu3 %vm676_vm9, %v1515_v25  ;;  %v932_v29 = vpop.f32.mrf.mxu0  ;;  %v1276_v30 = vpop.f32.mrf.mxu1  ;;  %v666_v25 = vsel %vm612_vm10, %v363_v12, 0.0  ;;  %v558_v26 = vsel %vm504_vm11, %v363_v12, 0.0  ;;  %vm1575_vm10 = vcmp.eq.s32.totalorder %v419_v34, 3  ;;  %vm614_vm11 = vcmp.eq.s32.totalorder %v419_v34, 1  ;;  %v422_v12 = vld [vmem:[%s7360_s30 + $0x188] sm:$0xff] }
 0x15d   : > { %v1277_v33 = vadd.f32 %v1276_v30, %v932_v29 }
 0x15e   : > { %6628 = vmatmul.msk.f32.gmra.mxu2 %vm676_vm9, %v1623_v27 }
 0x15f   : > { %1391 = vst.msk [vmem:[#allocation2 + $0xc0] sm:$0xff] %vm1366_vm13, %v1277_v33  ;;  %v2229_v35 = vpop.f32.mrf.mxu3  ;;  %6514 = vmatmul.msk.f32.gmra.mxu0 %vm676_vm9, %v662_v31  ;;  %6571 = vmatmul.msk.f32.gmra.mxu1 %vm676_vm9, %v554_v32  ;;  %v1520_v31 = vsel %vm1466_vm14, %v364_v28, 0.0  ;;  %v1628_v33 = vsel %vm1574_vm15, %v364_v28, 0.0  ;;  %vm506_vm14 = vcmp.eq.s32.totalorder %v419_v34, 0  ;;  %vm1468_vm15 = vcmp.eq.s32.totalorder %v420_v46, 2  ;;  %v369_v34 = vld [vmem:[%s7380_s14 + $0x190] sm:$0xff] }
 0x161   : > { %v1888_v36 = vpop.f32.mrf.mxu2 }
 0x162   : > { %v2230_v38 = vadd.f32 %v2229_v35, %v1888_v36 }
 0x164   : > { %2344 = vst.msk [vmem:[#allocation2 + $0x270] sm:$0xff] %vm1366_vm13, %v2230_v38  ;;  %6686 = vmatmul.msk.f32.gmra.mxu3 %vm676_vm9, %v1516_v37  ;;  %v935_v41 = vpop.f32.mrf.mxu0  ;;  %v1279_v42 = vpop.f32.mrf.mxu1  ;;  %v667_v37 = vsel %vm613_vm1, %v364_v28, 0.0  ;;  %v559_v38 = vsel %vm505_vm4, %v364_v28, 0.0  ;;  %vm1576_vm1 = vcmp.eq.s32.totalorder %v420_v46, 3  ;;  %vm615_vm4 = vcmp.eq.s32.totalorder %v420_v46, 1  ;;  %v423_v28 = vld [vmem:[%s7360_s30 + $0x190] sm:$0xff] }
 0x165   : > { %v1280_v45 = vadd.f32 %v1279_v42, %v935_v41 }
 0x166   : > { %6629 = vmatmul.msk.f32.gmra.mxu2 %vm676_vm9, %v1624_v39 }
 0x167   : > { %1392 = vst.msk [vmem:[#allocation2 + $0xc8] sm:$0xff] %vm1366_vm13, %v1280_v45  ;;  %v2232_v47 = vpop.f32.mrf.mxu3  ;;  %6515 = vmatmul.msk.f32.gmra.mxu0 %vm676_vm9, %v663_v43  ;;  %6572 = vmatmul.msk.f32.gmra.mxu1 %vm676_vm9, %v555_v44  ;;  %v1521_v43 = vsel %vm1467_vm8, %v365_v40, 0.0  ;;  %v1629_v45 = vsel %vm1575_vm10, %v365_v40, 0.0  ;;  %vm507_vm8 = vcmp.eq.s32.totalorder %v420_v46, 0  ;;  %vm1469_vm10 = vcmp.eq.s32.totalorder %v421_v58, 2  ;;  %v370_v46 = vld [vmem:[%s7380_s14 + $0x198] sm:$0xff] }
 0x169   : > { %v1891_v48 = vpop.f32.mrf.mxu2 }
 0x16a   : > { %v2233_v50 = vadd.f32 %v2232_v47, %v1891_v48 }
 0x16c   : > { %2345 = vst.msk [vmem:[#allocation2 + $0x278] sm:$0xff] %vm1366_vm13, %v2233_v50  ;;  %6687 = vmatmul.msk.f32.gmra.mxu3 %vm676_vm9, %v1517_v49  ;;  %v938_v53 = vpop.f32.mrf.mxu0  ;;  %v1282_v54 = vpop.f32.mrf.mxu1  ;;  %v668_v49 = vsel %vm614_vm11, %v365_v40, 0.0  ;;  %v560_v50 = vsel %vm506_vm14, %v365_v40, 0.0  ;;  %vm1577_vm11 = vcmp.eq.s32.totalorder %v421_v58, 3  ;;  %vm616_vm14 = vcmp.eq.s32.totalorder %v421_v58, 1  ;;  %v424_v40 = vld [vmem:[%s7360_s30 + $0x198] sm:$0xff] }
 0x16d   : > { %v1283_v57 = vadd.f32 %v1282_v54, %v938_v53 }
 0x16e   : > { %6630 = vmatmul.msk.f32.gmra.mxu2 %vm676_vm9, %v1625_v51 }
 0x16f   : > { %1393 = vst.msk [vmem:[#allocation2 + $0xd0] sm:$0xff] %vm1366_vm13, %v1283_v57  ;;  %v2235_v59 = vpop.f32.mrf.mxu3  ;;  %6516 = vmatmul.msk.f32.gmra.mxu0 %vm676_vm9, %v664_v55  ;;  %6573 = vmatmul.msk.f32.gmra.mxu1 %vm676_vm9, %v556_v56  ;;  %v1522_v55 = vsel %vm1468_vm15, %v366_v52, 0.0  ;;  %v1630_v57 = vsel %vm1576_vm1, %v366_v52, 0.0  ;;  %vm508_vm15 = vcmp.eq.s32.totalorder %v421_v58, 0  ;;  %vm1470_vm1 = vcmp.eq.s32.totalorder %v422_v12, 2  ;;  %v371_v58 = vld [vmem:[%s7380_s14 + $0x1a0] sm:$0xff] }
 0x171   : > { %v1894_v60 = vpop.f32.mrf.mxu2 }
 0x172   : > { %v2236_v62 = vadd.f32 %v2235_v59, %v1894_v60 }
 0x174   : > { %2346 = vst.msk [vmem:[#allocation2 + $0x280] sm:$0xff] %vm1366_vm13, %v2236_v62  ;;  %6688 = vmatmul.msk.f32.gmra.mxu3 %vm676_vm9, %v1518_v61  ;;  %v941_v3 = vpop.f32.mrf.mxu0  ;;  %v1285_v4 = vpop.f32.mrf.mxu1  ;;  %v669_v61 = vsel %vm615_vm4, %v366_v52, 0.0  ;;  %v561_v62 = vsel %vm507_vm8, %v366_v52, 0.0  ;;  %vm1578_vm4 = vcmp.eq.s32.totalorder %v422_v12, 3  ;;  %vm617_vm8 = vcmp.eq.s32.totalorder %v422_v12, 1  ;;  %v425_v52 = vld [vmem:[%s7360_s30 + $0x1a0] sm:$0xff] }
 0x175   : > { %v1286_v8 = vadd.f32 %v1285_v4, %v941_v3 }
 0x176   : > { %6631 = vmatmul.msk.f32.gmra.mxu2 %vm676_vm9, %v1626_v63 }
 0x177   : > { %1394 = vst.msk [vmem:[#allocation2 + $0xd8] sm:$0xff] %vm1366_vm13, %v1286_v8  ;;  %v2238_v15 = vpop.f32.mrf.mxu3  ;;  %6517 = vmatmul.msk.f32.gmra.mxu0 %vm676_vm9, %v665_v5  ;;  %6574 = vmatmul.msk.f32.gmra.mxu1 %vm676_vm9, %v557_v7  ;;  %v1523_v5 = vsel %vm1469_vm10, %v367_v0, 0.0  ;;  %v1631_v8 = vsel %vm1577_vm11, %v367_v0, 0.0  ;;  %vm509_vm10 = vcmp.eq.s32.totalorder %v422_v12, 0  ;;  %vm1471_vm11 = vcmp.eq.s32.totalorder %v423_v28, 2  ;;  %v372_v12 = vld [vmem:[%s7380_s14 + $0x1a8] sm:$0xff] }
 0x179   : > { %v1897_v17 = vpop.f32.mrf.mxu2 }
 0x17a   : > { %v2239_v20 = vadd.f32 %v2238_v15, %v1897_v17 }
 0x17c   : > { %2347 = vst.msk [vmem:[#allocation2 + $0x288] sm:$0xff] %vm1366_vm13, %v2239_v20  ;;  %6689 = vmatmul.msk.f32.gmra.mxu3 %vm676_vm9, %v1519_v18  ;;  %v944_v23 = vpop.f32.mrf.mxu0  ;;  %v1288_v24 = vpop.f32.mrf.mxu1  ;;  %v670_v18 = vsel %vm616_vm14, %v367_v0, 0.0  ;;  %v562_v20 = vsel %vm508_vm15, %v367_v0, 0.0  ;;  %vm1579_vm14 = vcmp.eq.s32.totalorder %v423_v28, 3  ;;  %vm618_vm15 = vcmp.eq.s32.totalorder %v423_v28, 1  ;;  %v426_v0 = vld [vmem:[%s7360_s30 + $0x1a8] sm:$0xff] }
 0x17d   : > { %v1289_v27 = vadd.f32 %v1288_v24, %v944_v23 }
 0x17e   : > { %6632 = vmatmul.msk.f32.gmra.mxu2 %vm676_vm9, %v1627_v21 }
 0x17f   : > { %1395 = vst.msk [vmem:[#allocation2 + $0xe0] sm:$0xff] %vm1366_vm13, %v1289_v27  ;;  %v2241_v29 = vpop.f32.mrf.mxu3  ;;  %6518 = vmatmul.msk.f32.gmra.mxu0 %vm676_vm9, %v666_v25  ;;  %6575 = vmatmul.msk.f32.gmra.mxu1 %vm676_vm9, %v558_v26  ;;  %v1524_v25 = vsel %vm1470_vm1, %v368_v22, 0.0  ;;  %v1632_v27 = vsel %vm1578_vm4, %v368_v22, 0.0  ;;  %vm510_vm1 = vcmp.eq.s32.totalorder %v423_v28, 0  ;;  %vm1472_vm4 = vcmp.eq.s32.totalorder %v424_v40, 2 }
 0x181   : > { %v1900_v30 = vpop.f32.mrf.mxu2 }
 0x182   : > { %v2242_v32 = vadd.f32 %v2241_v29, %v1900_v30 }
 0x184   : > { %2348 = vst.msk [vmem:[#allocation2 + $0x290] sm:$0xff] %vm1366_vm13, %v2242_v32  ;;  %6690 = vmatmul.msk.f32.gmra.mxu3 %vm676_vm9, %v1520_v31  ;;  %v947_v35 = vpop.f32.mrf.mxu0  ;;  %v1291_v36 = vpop.f32.mrf.mxu1  ;;  %v671_v31 = vsel %vm617_vm8, %v368_v22, 0.0  ;;  %v563_v32 = vsel %vm509_vm10, %v368_v22, 0.0  ;;  %vm1580_vm8 = vcmp.eq.s32.totalorder %v424_v40, 3  ;;  %vm619_vm10 = vcmp.eq.s32.totalorder %v424_v40, 1 }
 0x185   : > { %v1292_v39 = vadd.f32 %v1291_v36, %v947_v35 }
 0x186   : > { %6633 = vmatmul.msk.f32.gmra.mxu2 %vm676_vm9, %v1628_v33 }
 0x187   : > { %1396 = vst.msk [vmem:[#allocation2 + $0xe8] sm:$0xff] %vm1366_vm13, %v1292_v39  ;;  %v2244_v41 = vpop.f32.mrf.mxu3  ;;  %6519 = vmatmul.msk.f32.gmra.mxu0 %vm676_vm9, %v667_v37  ;;  %6576 = vmatmul.msk.f32.gmra.mxu1 %vm676_vm9, %v559_v38  ;;  %v1525_v37 = vsel %vm1471_vm11, %v369_v34, 0.0  ;;  %v1633_v39 = vsel %vm1579_vm14, %v369_v34, 0.0  ;;  %vm511_vm11 = vcmp.eq.s32.totalorder %v424_v40, 0  ;;  %vm1473_vm14 = vcmp.eq.s32.totalorder %v425_v52, 2 }
 0x189   : > { %v1903_v42 = vpop.f32.mrf.mxu2 }
 0x18a   : > { %v2245_v44 = vadd.f32 %v2244_v41, %v1903_v42 }
 0x18c   : > { %2349 = vst.msk [vmem:[#allocation2 + $0x298] sm:$0xff] %vm1366_vm13, %v2245_v44  ;;  %6691 = vmatmul.msk.f32.gmra.mxu3 %vm676_vm9, %v1521_v43  ;;  %v950_v47 = vpop.f32.mrf.mxu0  ;;  %v1294_v48 = vpop.f32.mrf.mxu1  ;;  %v672_v43 = vsel %vm618_vm15, %v369_v34, 0.0  ;;  %v564_v44 = vsel %vm510_vm1, %v369_v34, 0.0  ;;  %vm1581_vm15 = vcmp.eq.s32.totalorder %v425_v52, 3  ;;  %vm620_vm1 = vcmp.eq.s32.totalorder %v425_v52, 1 }
 0x18d   : > { %v1295_v51 = vadd.f32 %v1294_v48, %v950_v47 }
 0x18e   : > { %6634 = vmatmul.msk.f32.gmra.mxu2 %vm676_vm9, %v1629_v45 }
 0x18f   : > { %1397 = vst.msk [vmem:[#allocation2 + $0xf0] sm:$0xff] %vm1366_vm13, %v1295_v51  ;;  %v2247_v53 = vpop.f32.mrf.mxu3  ;;  %6520 = vmatmul.msk.f32.gmra.mxu0 %vm676_vm9, %v668_v49  ;;  %6577 = vmatmul.msk.f32.gmra.mxu1 %vm676_vm9, %v560_v50  ;;  %v1526_v49 = vsel %vm1472_vm4, %v370_v46, 0.0  ;;  %v1634_v51 = vsel %vm1580_vm8, %v370_v46, 0.0  ;;  %vm512_vm4 = vcmp.eq.s32.totalorder %v425_v52, 0  ;;  %vm1474_vm8 = vcmp.eq.s32.totalorder %v426_v0, 2 }
 0x191   : > { %v1906_v54 = vpop.f32.mrf.mxu2 }
 0x192   : > { %v2248_v56 = vadd.f32 %v2247_v53, %v1906_v54 }
 0x194   : > { %2350 = vst.msk [vmem:[#allocation2 + $0x2a0] sm:$0xff] %vm1366_vm13, %v2248_v56  ;;  %6692 = vmatmul.msk.f32.gmra.mxu3 %vm676_vm9, %v1522_v55  ;;  %v953_v59 = vpop.f32.mrf.mxu0  ;;  %v1297_v60 = vpop.f32.mrf.mxu1  ;;  %v673_v55 = vsel %vm619_vm10, %v370_v46, 0.0  ;;  %v565_v56 = vsel %vm511_vm11, %v370_v46, 0.0  ;;  %vm1582_vm10 = vcmp.eq.s32.totalorder %v426_v0, 3  ;;  %vm621_vm11 = vcmp.eq.s32.totalorder %v426_v0, 1 }
 0x195   : > { %v1298_v63 = vadd.f32 %v1297_v60, %v953_v59 }
 0x196   : > { %6635 = vmatmul.msk.f32.gmra.mxu2 %vm676_vm9, %v1630_v57 }
 0x197   : > { %1398 = vst.msk [vmem:[#allocation2 + $0xf8] sm:$0xff] %vm1366_vm13, %v1298_v63  ;;  %v2250_v3 = vpop.f32.mrf.mxu3  ;;  %6521 = vmatmul.msk.f32.gmra.mxu0 %vm676_vm9, %v669_v61  ;;  %6578 = vmatmul.msk.f32.gmra.mxu1 %vm676_vm9, %v561_v62  ;;  %v1527_v61 = vsel %vm1473_vm14, %v371_v58, 0.0  ;;  %v1635_v63 = vsel %vm1581_vm15, %v371_v58, 0.0  ;;  %vm513_vm14 = vcmp.eq.s32.totalorder %v426_v0, 0 }
 0x199   : > { %v1909_v4 = vpop.f32.mrf.mxu2 }
 0x19a   : > { %v2251_v7 = vadd.f32 %v2250_v3, %v1909_v4 }
 0x19c   : > { %2351 = vst.msk [vmem:[#allocation2 + $0x2a8] sm:$0xff] %vm1366_vm13, %v2251_v7  ;;  %6693 = vmatmul.msk.f32.gmra.mxu3 %vm676_vm9, %v1523_v5  ;;  %v956_v15 = vpop.f32.mrf.mxu0  ;;  %v1300_v17 = vpop.f32.mrf.mxu1  ;;  %v674_v5 = vsel %vm620_vm1, %v371_v58, 0.0  ;;  %v566_v7 = vsel %vm512_vm4, %v371_v58, 0.0 }
 0x19d   : > { %v1301_v21 = vadd.f32 %v1300_v17, %v956_v15 }
 0x19e   : > { %6636 = vmatmul.msk.f32.gmra.mxu2 %vm676_vm9, %v1631_v8 }
 0x19f   : > { %1399 = vst.msk [vmem:[#allocation2 + $0x100] sm:$0xff] %vm1366_vm13, %v1301_v21  ;;  %v2253_v23 = vpop.f32.mrf.mxu3  ;;  %6522 = vmatmul.msk.f32.gmra.mxu0 %vm676_vm9, %v670_v18  ;;  %6579 = vmatmul.msk.f32.gmra.mxu1 %vm676_vm9, %v562_v20  ;;  %v1528_v18 = vsel %vm1474_vm8, %v372_v12, 0.0  ;;  %v1636_v21 = vsel %vm1582_vm10, %v372_v12, 0.0 }
 0x1a1   : > { %v1912_v24 = vpop.f32.mrf.mxu2 }
 0x1a2   : > { %v2254_v26 = vadd.f32 %v2253_v23, %v1912_v24  ;;  %v675_v24 = vsel %vm621_vm11, %v372_v12, 0.0 }
 0x1a4   : > { %2352 = vst.msk [vmem:[#allocation2 + $0x2b0] sm:$0xff] %vm1366_vm13, %v2254_v26  ;;  %6694 = vmatmul.msk.f32.gmra.mxu3 %vm676_vm9, %v1524_v25  ;;  %v959_v29 = vpop.f32.mrf.mxu0  ;;  %v1303_v30 = vpop.f32.mrf.mxu1  ;;  %v567_v25 = vsel %vm513_vm14, %v372_v12, 0.0 }
 0x1a5   : > { %v1304_v33 = vadd.f32 %v1303_v30, %v959_v29 }
 0x1a6   : > { %6637 = vmatmul.msk.f32.gmra.mxu2 %vm676_vm9, %v1632_v27 }
 0x1a7   : > { %1400 = vst.msk [vmem:[#allocation2 + $0x108] sm:$0xff] %vm1366_vm13, %v1304_v33  ;;  %v2256_v35 = vpop.f32.mrf.mxu3  ;;  %6523 = vmatmul.msk.f32.gmra.mxu0 %vm676_vm9, %v671_v31  ;;  %6580 = vmatmul.msk.f32.gmra.mxu1 %vm676_vm9, %v563_v32 }
 0x1a9   : > { %v1915_v36 = vpop.f32.mrf.mxu2 }
 0x1aa   : > { %v2257_v38 = vadd.f32 %v2256_v35, %v1915_v36 }
 0x1ac   : > { %2353 = vst.msk [vmem:[#allocation2 + $0x2b8] sm:$0xff] %vm1366_vm13, %v2257_v38  ;;  %6695 = vmatmul.msk.f32.gmra.mxu3 %vm676_vm9, %v1525_v37  ;;  %v962_v41 = vpop.f32.mrf.mxu0  ;;  %v1306_v42 = vpop.f32.mrf.mxu1 }
 0x1ad   : > { %v1307_v45 = vadd.f32 %v1306_v42, %v962_v41 }
 0x1ae   : > { %6638 = vmatmul.msk.f32.gmra.mxu2 %vm676_vm9, %v1633_v39 }
 0x1af   : > { %1401 = vst.msk [vmem:[#allocation2 + $0x110] sm:$0xff] %vm1366_vm13, %v1307_v45  ;;  %v2259_v47 = vpop.f32.mrf.mxu3  ;;  %6524 = vmatmul.msk.f32.gmra.mxu0 %vm676_vm9, %v672_v43  ;;  %6581 = vmatmul.msk.f32.gmra.mxu1 %vm676_vm9, %v564_v44 }
 0x1b1   : > { %v1918_v48 = vpop.f32.mrf.mxu2 }
 0x1b2   : > { %v2260_v50 = vadd.f32 %v2259_v47, %v1918_v48 }
 0x1b4   : > { %2354 = vst.msk [vmem:[#allocation2 + $0x2c0] sm:$0xff] %vm1366_vm13, %v2260_v50  ;;  %6696 = vmatmul.msk.f32.gmra.mxu3 %vm676_vm9, %v1526_v49  ;;  %v965_v53 = vpop.f32.mrf.mxu0  ;;  %v1309_v54 = vpop.f32.mrf.mxu1 }
 0x1b5   : > { %v1310_v57 = vadd.f32 %v1309_v54, %v965_v53 }
 0x1b6   : > { %6639 = vmatmul.msk.f32.gmra.mxu2 %vm676_vm9, %v1634_v51 }
 0x1b7   : > { %1402 = vst.msk [vmem:[#allocation2 + $0x118] sm:$0xff] %vm1366_vm13, %v1310_v57  ;;  %v2262_v59 = vpop.f32.mrf.mxu3  ;;  %6525 = vmatmul.msk.f32.gmra.mxu0 %vm676_vm9, %v673_v55  ;;  %6582 = vmatmul.msk.f32.gmra.mxu1 %vm676_vm9, %v565_v56 }
 0x1b9   : > { %v1921_v60 = vpop.f32.mrf.mxu2 }
 0x1ba   : > { %v2263_v62 = vadd.f32 %v2262_v59, %v1921_v60 }
 0x1bc   : > { %2355 = vst.msk [vmem:[#allocation2 + $0x2c8] sm:$0xff] %vm1366_vm13, %v2263_v62  ;;  %6697 = vmatmul.msk.f32.gmra.mxu3 %vm676_vm9, %v1527_v61  ;;  %v968_v3 = vpop.f32.mrf.mxu0  ;;  %v1312_v4 = vpop.f32.mrf.mxu1 }
 0x1bd   : > { %v1313_v8 = vadd.f32 %v1312_v4, %v968_v3 }
 0x1be   : > { %6640 = vmatmul.msk.f32.gmra.mxu2 %vm676_vm9, %v1635_v63 }
 0x1bf   : > { %1403 = vst.msk [vmem:[#allocation2 + $0x120] sm:$0xff] %vm1366_vm13, %v1313_v8  ;;  %v2265_v15 = vpop.f32.mrf.mxu3  ;;  %6526 = vmatmul.msk.f32.gmra.mxu0 %vm676_vm9, %v674_v5  ;;  %6583 = vmatmul.msk.f32.gmra.mxu1 %vm676_vm9, %v566_v7 }
 0x1c1   : > { %v1924_v17 = vpop.f32.mrf.mxu2 }
 0x1c2   : > { %v2266_v20 = vadd.f32 %v2265_v15, %v1924_v17 }
 0x1c4   : > { %2356 = vst.msk [vmem:[#allocation2 + $0x2d0] sm:$0xff] %vm1366_vm13, %v2266_v20  ;;  %6698 = vmatmul.msk.f32.gmra.mxu3 %vm676_vm9, %v1528_v18  ;;  %v971_v22 = vpop.f32.mrf.mxu0  ;;  %v1315_v23 = vpop.f32.mrf.mxu1 }
 0x1c5   : > { %v1316_v26 = vadd.f32 %v1315_v23, %v971_v22 }
 0x1c6   : > { %6641 = vmatmul.msk.f32.gmra.mxu2 %vm676_vm9, %v1636_v21 }
 0x1c7   : > { %1404 = vst.msk [vmem:[#allocation2 + $0x128] sm:$0xff] %vm1366_vm13, %v1316_v26  ;;  %v2268_v27 = vpop.f32.mrf.mxu3  ;;  %6527 = vmatmul.msk.f32.gmra.mxu0 %vm676_vm9, %v675_v24  ;;  %6584 = vmatmul.msk.f32.gmra.mxu1 %vm676_vm9, %v567_v25 }
 0x1c9   : > { %v1927_v28 = vpop.f32.mrf.mxu2 }
 0x1ca   : > { %v2269_v29 = vadd.f32 %v2268_v27, %v1927_v28 }
 0x1cc   : > { %2357 = vst.msk [vmem:[#allocation2 + $0x2d8] sm:$0xff] %vm1366_vm13, %v2269_v29  ;;  %v974_v30 = vpop.f32.mrf.mxu0  ;;  %v1318_v31 = vpop.f32.mrf.mxu1 }
 0x1cd   : > { %v1319_v32 = vadd.f32 %v1318_v31, %v974_v30 }
 0x1cf   : > { %1405 = vst.msk [vmem:[#allocation2 + $0x130] sm:$0xff] %vm1366_vm13, %v1319_v32  ;;  %v2271_v33 = vpop.f32.mrf.mxu3 }
 0x1d1   : > { %v1930_v34 = vpop.f32.mrf.mxu2 }
 0x1d2   : > { %v2272_v35 = vadd.f32 %v2271_v33, %v1930_v34 }
 0x1d4   : > { %2358 = vst.msk [vmem:[#allocation2 + $0x2e0] sm:$0xff] %vm1366_vm13, %v2272_v35  ;;  %v977_v36 = vpop.f32.mrf.mxu0  ;;  %v1321_v37 = vpop.f32.mrf.mxu1 }
 0x1d5   : > { %v1322_v38 = vadd.f32 %v1321_v37, %v977_v36 }
 0x1d7   : > { %1406 = vst.msk [vmem:[#allocation2 + $0x138] sm:$0xff] %vm1366_vm13, %v1322_v38  ;;  %v2274_v39 = vpop.f32.mrf.mxu3 }
 0x1d9   : > { %v1933_v40 = vpop.f32.mrf.mxu2 }
 0x1da   : > { %v2275_v41 = vadd.f32 %v2274_v39, %v1933_v40 }
 0x1dc   : > { %2359 = vst.msk [vmem:[#allocation2 + $0x2e8] sm:$0xff] %vm1366_vm13, %v2275_v41  ;;  %v980_v42 = vpop.f32.mrf.mxu0  ;;  %v1324_v43 = vpop.f32.mrf.mxu1 }
 0x1dd   : > { %v1325_v44 = vadd.f32 %v1324_v43, %v980_v42 }
 0x1df   : > { %1407 = vst.msk [vmem:[#allocation2 + $0x140] sm:$0xff] %vm1366_vm13, %v1325_v44  ;;  %v2277_v45 = vpop.f32.mrf.mxu3 }
 0x1e1   : > { %v1936_v46 = vpop.f32.mrf.mxu2 }
 0x1e2   : > { %v2278_v47 = vadd.f32 %v2277_v45, %v1936_v46 }
 0x1e4   : > { %2360 = vst.msk [vmem:[#allocation2 + $0x2f0] sm:$0xff] %vm1366_vm13, %v2278_v47  ;;  %v983_v48 = vpop.f32.mrf.mxu0  ;;  %v1327_v49 = vpop.f32.mrf.mxu1 }
 0x1e5   : > { %v1328_v50 = vadd.f32 %v1327_v49, %v983_v48 }
 0x1e7   : > { %1408 = vst.msk [vmem:[#allocation2 + $0x148] sm:$0xff] %vm1366_vm13, %v1328_v50  ;;  %v2280_v51 = vpop.f32.mrf.mxu3 }
 0x1e9   : > { %v1939_v52 = vpop.f32.mrf.mxu2 }
 0x1ea   : > { %v2281_v53 = vadd.f32 %v2280_v51, %v1939_v52 }
 0x1ec   : > { %2361 = vst.msk [vmem:[#allocation2 + $0x2f8] sm:$0xff] %vm1366_vm13, %v2281_v53  ;;  %v986_v54 = vpop.f32.mrf.mxu0  ;;  %v1330_v55 = vpop.f32.mrf.mxu1 }
 0x1ed   : > { %v1331_v56 = vadd.f32 %v1330_v55, %v986_v54 }
 0x1ef   : > { %1409 = vst.msk [vmem:[#allocation2 + $0x150] sm:$0xff] %vm1366_vm13, %v1331_v56  ;;  %v2283_v57 = vpop.f32.mrf.mxu3 }
 0x1f1   : > { %v1942_v58 = vpop.f32.mrf.mxu2 }
 0x1f2   : > { %v2284_v59 = vadd.f32 %v2283_v57, %v1942_v58 }
 0x1f4   : > { %2362 = vst.msk [vmem:[#allocation2 + $0x300] sm:$0xff] %vm1366_vm13, %v2284_v59  ;;  %v989_v60 = vpop.f32.mrf.mxu0  ;;  %v1333_v61 = vpop.f32.mrf.mxu1 }
 0x1f5   : > { %v1334_v62 = vadd.f32 %v1333_v61, %v989_v60 }
 0x1f7   : > { %1410 = vst.msk [vmem:[#allocation2 + $0x158] sm:$0xff] %vm1366_vm13, %v1334_v62  ;;  %v2286_v63 = vpop.f32.mrf.mxu3 }
 0x1f9   : > { %v1945_v0 = vpop.f32.mrf.mxu2 }
 0x1fa   : > { %v2287_v3 = vadd.f32 %v2286_v63, %v1945_v0 }
 0x1fc   : > { %2363 = vst.msk [vmem:[#allocation2 + $0x308] sm:$0xff] %vm1366_vm13, %v2287_v3  ;;  %v992_v4 = vpop.f32.mrf.mxu0  ;;  %v1336_v5 = vpop.f32.mrf.mxu1 }
 0x1fd   : > { %v1337_v7 = vadd.f32 %v1336_v5, %v992_v4 }
 0x1ff   : > { %1411 = vst.msk [vmem:[#allocation2 + $0x160] sm:$0xff] %vm1366_vm13, %v1337_v7  ;;  %v2289_v8 = vpop.f32.mrf.mxu3 }
 0x201   : > { %v1948_v12 = vpop.f32.mrf.mxu2 }
 0x202   : > { %v2290_v15 = vadd.f32 %v2289_v8, %v1948_v12 }
 0x204   : > { %2364 = vst.msk [vmem:[#allocation2 + $0x310] sm:$0xff] %vm1366_vm13, %v2290_v15  ;;  %v995_v17 = vpop.f32.mrf.mxu0  ;;  %v1339_v18 = vpop.f32.mrf.mxu1 }
 0x205   : > { %v1340_v20 = vadd.f32 %v1339_v18, %v995_v17 }
 0x207   : > { %1412 = vst.msk [vmem:[#allocation2 + $0x168] sm:$0xff] %vm1366_vm13, %v1340_v20  ;;  %v2292_v21 = vpop.f32.mrf.mxu3 }
 0x209   : > { %v1951_v22 = vpop.f32.mrf.mxu2 }
 0x20a   : > { %v2293_v23 = vadd.f32 %v2292_v21, %v1951_v22 }
 0x20c   : > { %2365 = vst.msk [vmem:[#allocation2 + $0x318] sm:$0xff] %vm1366_vm13, %v2293_v23  ;;  %v998_v24 = vpop.f32.mrf.mxu0  ;;  %v1342_v25 = vpop.f32.mrf.mxu1 }
 0x20d   : > { %v1343_v26 = vadd.f32 %v1342_v25, %v998_v24 }
 0x20f   : > { %1413 = vst.msk [vmem:[#allocation2 + $0x170] sm:$0xff] %vm1366_vm13, %v1343_v26  ;;  %v2295_v27 = vpop.f32.mrf.mxu3 }
 0x211   : > { %v1954_v28 = vpop.f32.mrf.mxu2 }
 0x212   : > { %v2296_v29 = vadd.f32 %v2295_v27, %v1954_v28 }
 0x214   : > { %2366 = vst.msk [vmem:[#allocation2 + $0x320] sm:$0xff] %vm1366_vm13, %v2296_v29  ;;  %v1001_v30 = vpop.f32.mrf.mxu0  ;;  %v1345_v31 = vpop.f32.mrf.mxu1 }
 0x215   : > { %v1346_v32 = vadd.f32 %v1345_v31, %v1001_v30 }
 0x217   : > { %1414 = vst.msk [vmem:[#allocation2 + $0x178] sm:$0xff] %vm1366_vm13, %v1346_v32  ;;  %v2298_v33 = vpop.f32.mrf.mxu3 }
 0x219   : > { %v1957_v34 = vpop.f32.mrf.mxu2 }
 0x21a   : > { %v2299_v35 = vadd.f32 %v2298_v33, %v1957_v34 }
 0x21c   : > { %2367 = vst.msk [vmem:[#allocation2 + $0x328] sm:$0xff] %vm1366_vm13, %v2299_v35  ;;  %v1004_v36 = vpop.f32.mrf.mxu0  ;;  %v1348_v37 = vpop.f32.mrf.mxu1 }
 0x21d   : > { %v1349_v38 = vadd.f32 %v1348_v37, %v1004_v36 }
 0x21f   : > { %1415 = vst.msk [vmem:[#allocation2 + $0x180] sm:$0xff] %vm1366_vm13, %v1349_v38  ;;  %v2301_v39 = vpop.f32.mrf.mxu3 }
 0x221   : > { %v1960_v40 = vpop.f32.mrf.mxu2 }
 0x222   : > { %v2302_v41 = vadd.f32 %v2301_v39, %v1960_v40 }
 0x224   : > { %2368 = vst.msk [vmem:[#allocation2 + $0x330] sm:$0xff] %vm1366_vm13, %v2302_v41  ;;  %v1007_v42 = vpop.f32.mrf.mxu0  ;;  %v1351_v43 = vpop.f32.mrf.mxu1 }
 0x225   : > { %v1352_v44 = vadd.f32 %v1351_v43, %v1007_v42 }
 0x227   : > { %1416 = vst.msk [vmem:[#allocation2 + $0x188] sm:$0xff] %vm1366_vm13, %v1352_v44  ;;  %v2304_v45 = vpop.f32.mrf.mxu3 }
 0x229   : > { %v1963_v46 = vpop.f32.mrf.mxu2 }
 0x22a   : > { %v2305_v47 = vadd.f32 %v2304_v45, %v1963_v46 }
 0x22c   : > { %2369 = vst.msk [vmem:[#allocation2 + $0x338] sm:$0xff] %vm1366_vm13, %v2305_v47  ;;  %v1010_v48 = vpop.f32.mrf.mxu0  ;;  %v1354_v49 = vpop.f32.mrf.mxu1 }
 0x22d   : > { %v1355_v50 = vadd.f32 %v1354_v49, %v1010_v48 }
 0x22f   : > { %1417 = vst.msk [vmem:[#allocation2 + $0x190] sm:$0xff] %vm1366_vm13, %v1355_v50  ;;  %v2307_v51 = vpop.f32.mrf.mxu3 }
 0x231   : > { %v1966_v52 = vpop.f32.mrf.mxu2 }
 0x232   : > { %v2308_v53 = vadd.f32 %v2307_v51, %v1966_v52 }
 0x234   : > { %2370 = vst.msk [vmem:[#allocation2 + $0x340] sm:$0xff] %vm1366_vm13, %v2308_v53  ;;  %v1013_v54 = vpop.f32.mrf.mxu0  ;;  %v1357_v55 = vpop.f32.mrf.mxu1 }
 0x235   : > { %v1358_v56 = vadd.f32 %v1357_v55, %v1013_v54 }
 0x237   : > { %1418 = vst.msk [vmem:[#allocation2 + $0x198] sm:$0xff] %vm1366_vm13, %v1358_v56  ;;  %v2310_v57 = vpop.f32.mrf.mxu3 }
 0x239   : > { %v1969_v58 = vpop.f32.mrf.mxu2 }
 0x23a   : > { %v2311_v59 = vadd.f32 %v2310_v57, %v1969_v58 }
 0x23c   : > { %2371 = vst.msk [vmem:[#allocation2 + $0x348] sm:$0xff] %vm1366_vm13, %v2311_v59  ;;  %v1016_v60 = vpop.f32.mrf.mxu0  ;;  %v1360_v61 = vpop.f32.mrf.mxu1 }
 0x23d   : > { %v1361_v62 = vadd.f32 %v1360_v61, %v1016_v60 }
 0x23f   : > { %1419 = vst.msk [vmem:[#allocation2 + $0x1a0] sm:$0xff] %vm1366_vm13, %v1361_v62  ;;  %v2313_v63 = vpop.f32.mrf.mxu3 }
 0x241   : > { %v1972_v0 = vpop.f32.mrf.mxu2 }
 0x242   : > { %v2314_v3 = vadd.f32 %v2313_v63, %v1972_v0 }
 0x244   : > { %2372 = vst.msk [vmem:[#allocation2 + $0x350] sm:$0xff] %vm1366_vm13, %v2314_v3  ;;  %v1019_v4 = vpop.f32.mrf.mxu0  ;;  %v1363_v5 = vpop.f32.mrf.mxu1 }
 0x245   : > { %v1364_v7 = vadd.f32 %v1363_v5, %v1019_v4 }
 0x247   : > { %1420 = vst.msk [vmem:[#allocation2 + $0x1a8] sm:$0xff] %vm1366_vm13, %v1364_v7  ;;  %v2316_v8 = vpop.f32.mrf.mxu3 }
 0x249   : > { %v1975_v12 = vpop.f32.mrf.mxu2 }
 0x24a   : > { %v2317_v15 = vadd.f32 %v2316_v8, %v1975_v12 }
 0x24c   : > { %2373 = vst.msk [vmem:[#allocation2 + $0x358] sm:$0xff] %vm1366_vm13, %v2317_v15 }
 0x24d LB: >> { %s2504_s19 = smul.u32 24, %s7264_s18  ;;  %s7280_s22 = smov 127   ;;  %s7264_s18 = sphi %s8109_s18, %s2501_s18  }
 0x24e   : >> { %s6700_s20 = smul.u32 240, %s7264_s18  ;;  %s7281_s25 = smov 126  }
 0x24f   : >> { %s2505_s21 = scalar_lea.vmem [#allocation2], %s2504_s19  ;;  %s7282_s26 = smov 125  }
 0x250   : >> { %s8116_s23 = scalar_lea.vmem [#allocation3], %s6700_s20  ;;  %s7283_s27 = smov 124  }
 0x251   : >> { %s2501_s18 = sadd.s32 1, %s7264_s18  }
 0x252   : >> { %p2498_p4 = scmp.ge.s32.totalorder %s2501_s18, 18  }
 0x253   : >> { %v2508_v17 = vld [vmem:[%s2505_s21 + $0x10] sm:$0xff]  ;;  %v2506_v18 = vld [vmem:[%s2505_s21] sm:$0xff]  ;;  %v2507_v20 = vld [vmem:[%s2505_s21 + $0x8] sm:$0xff]  ;;  %s8241_s9 = smov (%p2498_p4), 0  }
 0x254   : >> { %2523 = vrot.lane.b32.xlu1 %v2508_v17, %s7280_s22  ;;  %6703 = vst.msk [vmem:[%s8116_s23 + $0x1f0] sm:$0xff] %vm2374_vm0, %v2508_v17  ;;  %2519 = vrot.lane.b32.xlu0 %v2506_v18, %s7280_s22  ;;  %v6729_v21 = vld [vmem:[%s2505_s21 + $0x1b8] sm:$0xff] }
 0x255   : >> { %6701 = vst.msk [vmem:[%s8116_s23 + $0x1e0] sm:$0xff] %vm2374_vm0, %v2506_v18  ;;  %2536 = vrot.lane.b32.xlu2 %v2507_v20, %s7281_s25  ;;  %v6728_v22 = vld [vmem:[%s2505_s21 + $0x1b0] sm:$0xff]  ;;  %v6730_v23 = vld [vmem:[%s2505_s21 + $0x1c0] sm:$0xff] }
 0x256   : >> { %6702 = vst.msk [vmem:[%s8116_s23 + $0x1e8] sm:$0xff] %vm2374_vm0, %v2507_v20  ;;  %v8184_v48 = vld [vmem:[%s9265_s3] sm:$0xff] (%p2498_p4)  ;;  %v8189_v49 = vld [vmem:[%s9265_s3 + $0x8] sm:$0xff] (%p2498_p4)  ;;  %v8194_v50 = vld [vmem:[%s9265_s3 + $0x10] sm:$0xff] (%p2498_p4) }
 0x257   : >> { %6734 = vst.msk [vmem:[%s8116_s23 + $0x260] sm:$0xff] %vm2374_vm0, %v6729_v21  ;;  %v8199_v51 = vld [vmem:[%s9265_s3 + $0x18] sm:$0xff] (%p2498_p4)  ;;  %v8204_v52 = vld [vmem:[%s9265_s3 + $0x20] sm:$0xff] (%p2498_p4)  ;;  %v8209_v53 = vld [vmem:[%s9265_s3 + $0x28] sm:$0xff] (%p2498_p4) }
 0x258   : >> { %6733 = vst.msk [vmem:[%s8116_s23 + $0x258] sm:$0xff] %vm2374_vm0, %v6728_v22  ;;  %v8214_v54 = vld [vmem:[%s9265_s3 + $0x30] sm:$0xff] (%p2498_p4)  ;;  %v8219_v55 = vld [vmem:[%s9265_s3 + $0x38] sm:$0xff] (%p2498_p4)  ;;  %v8224_v56 = vld [vmem:[%s9265_s3 + $0x40] sm:$0xff] (%p2498_p4) }
 0x259   : >> { %6735 = vst.msk [vmem:[%s8116_s23 + $0x268] sm:$0xff] %vm2374_vm0, %v6730_v23  ;;  %v8229_v57 = vld [vmem:[%s9265_s3 + $0x48] sm:$0xff] (%p2498_p4)  ;;  %v8234_v58 = vld [vmem:[%s9266_s4] sm:$0xff] (%p2498_p4) }
 0x25a   : > { %v8239_v59 = vld [vmem:[%s9266_s4 + $0x8] sm:$0xff] (%p2498_p4) }
 0x25c   : >> { %2534 = vrot.lane.b32.xlu1 %v2506_v18, %s7281_s25  ;;  %2521 = vrot.lane.b32.xlu0 %v2507_v20, %s7280_s22 }
 0x25d   : >> { %2538 = vrot.lane.b32.xlu2 %v2508_v17, %s7281_s25 }
 0x264   : >> { %2551 = vrot.lane.b32.xlu1 %v2507_v20, %s7282_s26  ;;  %2549 = vrot.lane.b32.xlu0 %v2506_v18, %s7282_s26 }
 0x265   : >> { %2553 = vrot.lane.b32.xlu2 %v2508_v17, %s7282_s26 }
 0x26c   : >> { %2566 = vrot.lane.b32.xlu1 %v2507_v20, %s7283_s27  ;;  %2564 = vrot.lane.b32.xlu0 %v2506_v18, %s7283_s27 }
 0x26d   : >> { %2568 = vrot.lane.b32.xlu2 %v2508_v17, %s7283_s27 }
 0x274   : >> { %2596 = vrot.lane.b32.xlu1 %v6729_v21, %s7280_s22  ;;  %2594 = vrot.lane.b32.xlu0 %v6728_v22, %s7280_s22 }
 0x275   : >> { %2598 = vrot.lane.b32.xlu2 %v6730_v23, %s7280_s22 }
 0x27c   : >> { %2611 = vrot.lane.b32.xlu1 %v6729_v21, %s7281_s25  ;;  %2609 = vrot.lane.b32.xlu0 %v6728_v22, %s7281_s25 }
 0x27d   : >> { %2613 = vrot.lane.b32.xlu2 %v6730_v23, %s7281_s25 }
 0x284   : >> { %2626 = vrot.lane.b32.xlu1 %v6729_v21, %s7282_s26  ;;  %2624 = vrot.lane.b32.xlu0 %v6728_v22, %s7282_s26 }
 0x285   : >> { %2628 = vrot.lane.b32.xlu2 %v6730_v23, %s7282_s26 }
 0x28c   : >> { %2641 = vrot.lane.b32.xlu1 %v6729_v21, %s7283_s27  ;;  %2639 = vrot.lane.b32.xlu0 %v6728_v22, %s7283_s27 }
 0x28d   : >> { %2643 = vrot.lane.b32.xlu2 %v6730_v23, %s7283_s27 }
 0x2af   : >> { %v2537_v24 = vpop.permute.xlu2 %2536 }
 0x2b0   : >> { %6714 = vst.msk [vmem:[%s8116_s23 + $0x218] sm:$0xff] %vm2374_vm0, %v2537_v24 }
 0x2b7   : >> { %v2539_v25 = vpop.permute.xlu2 %2538 }
 0x2b8   : >> { %6715 = vst.msk [vmem:[%s8116_s23 + $0x220] sm:$0xff] %vm2374_vm0, %v2539_v25 }
 0x2bf   : >> { %v2554_v26 = vpop.permute.xlu2 %2553 }
 0x2c0   : >> { %6721 = vst.msk [vmem:[%s8116_s23 + $0x238] sm:$0xff] %vm2374_vm0, %v2554_v26 }
 0x2c6   : >> { %v2524_v27 = vpop.permute.xlu1 %2523  ;;  %v2520_v28 = vpop.permute.xlu0 %2519 }
 0x2c7   : >> { %6709 = vst.msk [vmem:[%s8116_s23 + $0x208] sm:$0xff] %vm2374_vm0, %v2524_v27  ;;  %v2569_v29 = vpop.permute.xlu2 %2568 }
 0x2c8   : >> { %6707 = vst.msk [vmem:[%s8116_s23 + $0x1f8] sm:$0xff] %vm2374_vm0, %v2520_v28 }
 0x2c9   : >> { %6727 = vst.msk [vmem:[%s8116_s23 + $0x250] sm:$0xff] %vm2374_vm0, %v2569_v29 }
 0x2ce   : >> { %v2535_v30 = vpop.permute.xlu1 %2534  ;;  %v2522_v31 = vpop.permute.xlu0 %2521 }
 0x2cf   : >> { %6713 = vst.msk [vmem:[%s8116_s23 + $0x210] sm:$0xff] %vm2374_vm0, %v2535_v30  ;;  %v2599_v32 = vpop.permute.xlu2 %2598 }
 0x2d0   : >> { %6708 = vst.msk [vmem:[%s8116_s23 + $0x200] sm:$0xff] %vm2374_vm0, %v2522_v31 }
 0x2d1   : >> { %6741 = vst.msk [vmem:[%s8116_s23 + $0x280] sm:$0xff] %vm2374_vm0, %v2599_v32 }
 0x2d6   : >> { %v2552_v33 = vpop.permute.xlu1 %2551  ;;  %v2550_v34 = vpop.permute.xlu0 %2549 }
 0x2d7   : >> { %6720 = vst.msk [vmem:[%s8116_s23 + $0x230] sm:$0xff] %vm2374_vm0, %v2552_v33  ;;  %v2614_v35 = vpop.permute.xlu2 %2613 }
 0x2d8   : >> { %6719 = vst.msk [vmem:[%s8116_s23 + $0x228] sm:$0xff] %vm2374_vm0, %v2550_v34 }
 0x2d9   : >> { %6747 = vst.msk [vmem:[%s8116_s23 + $0x298] sm:$0xff] %vm2374_vm0, %v2614_v35 }
 0x2de   : >> { %v2567_v36 = vpop.permute.xlu1 %2566  ;;  %v2565_v37 = vpop.permute.xlu0 %2564 }
 0x2df   : >> { %6726 = vst.msk [vmem:[%s8116_s23 + $0x248] sm:$0xff] %vm2374_vm0, %v2567_v36  ;;  %v2629_v38 = vpop.permute.xlu2 %2628 }
 0x2e0   : >> { %6725 = vst.msk [vmem:[%s8116_s23 + $0x240] sm:$0xff] %vm2374_vm0, %v2565_v37 }
 0x2e1   : >> { %6753 = vst.msk [vmem:[%s8116_s23 + $0x2b0] sm:$0xff] %vm2374_vm0, %v2629_v38 }
 0x2e6   : >> { %v2597_v39 = vpop.permute.xlu1 %2596  ;;  %v2595_v40 = vpop.permute.xlu0 %2594 }
 0x2e7   : >> { %6740 = vst.msk [vmem:[%s8116_s23 + $0x278] sm:$0xff] %vm2374_vm0, %v2597_v39  ;;  %v2644_v41 = vpop.permute.xlu2 %2643 }
 0x2e8   : >> { %6739 = vst.msk [vmem:[%s8116_s23 + $0x270] sm:$0xff] %vm2374_vm0, %v2595_v40 }
 0x2e9   : >> { %6759 = vst.msk [vmem:[%s8116_s23 + $0x2c8] sm:$0xff] %vm2374_vm0, %v2644_v41 }
 0x2ee   : >> { %v2612_v42 = vpop.permute.xlu1 %2611  ;;  %v2610_v43 = vpop.permute.xlu0 %2609 }
 0x2ef   : >> { %6746 = vst.msk [vmem:[%s8116_s23 + $0x290] sm:$0xff] %vm2374_vm0, %v2612_v42 }
 0x2f0   : >> { %6745 = vst.msk [vmem:[%s8116_s23 + $0x288] sm:$0xff] %vm2374_vm0, %v2610_v43 }
 0x2f6   : >> { %v2627_v44 = vpop.permute.xlu1 %2626  ;;  %v2625_v45 = vpop.permute.xlu0 %2624 }
 0x2f7   : >> { %6752 = vst.msk [vmem:[%s8116_s23 + $0x2a8] sm:$0xff] %vm2374_vm0, %v2627_v44 }
 0x2f8   : >> { %6751 = vst.msk [vmem:[%s8116_s23 + $0x2a0] sm:$0xff] %vm2374_vm0, %v2625_v45 }
 0x2fc   : > { %2500 = sbr.rel (!%p2498_p4) target bundleno = 589 (0x24d), region = 145 }
 0x2fe   : >> { %v2642_v46 = vpop.permute.xlu1 %2641  ;;  %v2640_v47 = vpop.permute.xlu0 %2639 }
 0x2ff   : >> { %6758 = vst.msk [vmem:[%s8116_s23 + $0x2c0] sm:$0xff] %vm2374_vm0, %v2642_v46 }
 0x300   : >> { %6757 = vst.msk [vmem:[%s8116_s23 + $0x2b8] sm:$0xff] %vm2374_vm0, %v2640_v47 }
 0x301 LB: >> { %s6760_s11 = smul.u32 120, %s7268_s9  ;;  %vm2759_vm9 = vcmask 719872   ;;  %s6763_s13 = sshll.u32 %s7268_s9, 4  ;;  %s7268_s9 = sphi %s8241_s9, %s2670_s9  }
 0x302   : >> { %s2884_s14 = scalar_lea.vmem [#allocation4], %s6763_s13  ;;  %s2670_s9 = sadd.s32 1, %s7268_s9  }
 0x303   : >> { %s8247_s12 = scalar_lea.vmem [#allocation3], %s6760_s11  ;;  %p2667_p5 = scmp.ge.s32.totalorder %s2670_s9, 40  }
 0x307   : >> { %v2689_v60 = vld [vmem:[%s8247_s12 + $0x78] sm:$0xff]  ;;  %v2688_v63 = vld [vmem:[%s8247_s12 + $0x70] sm:$0xff]  ;;  %v2687_v5 = vld [vmem:[%s8247_s12 + $0x68] sm:$0xff] }
 0x308   : >> { %v2705_v61 = vld [vmem:[%s8247_s12 + $0xf8] sm:$0xff]  ;;  %2766 = vmatpush.msra.mxu0 %v2689_v60  ;;  %v2704_v0 = vld [vmem:[%s8247_s12 + $0xf0] sm:$0xff]  ;;  %v2703_v7 = vld [vmem:[%s8247_s12 + $0xe8] sm:$0xff] }
 0x309   : >> { %v2721_v62 = vld [vmem:[%s8247_s12 + $0x178] sm:$0xff]  ;;  %2789 = vmatpush.msra.mxu1 %v2705_v61  ;;  %v2720_v3 = vld [vmem:[%s8247_s12 + $0x170] sm:$0xff]  ;;  %v2719_v8 = vld [vmem:[%s8247_s12 + $0x168] sm:$0xff] }
 0x30a   : >> { %2812 = vmatpush.msra.mxu2 %v2721_v62  ;;  %v2737_v4 = vld [vmem:[%s8247_s12 + $0x1f8] sm:$0xff]  ;;  %2767 = vmatpush.msra.mxu0 %v2688_v63  ;;  %v2736_v12 = vld [vmem:[%s8247_s12 + $0x1f0] sm:$0xff]  ;;  %v2686_v15 = vld [vmem:[%s8247_s12 + $0x60] sm:$0xff] }
 0x30b   : >> { %2790 = vmatpush.msra.mxu1 %v2704_v0  ;;  %2835 = vmatpush.msra.mxu3 %v2737_v4  ;;  %v2702_v17 = vld [vmem:[%s8247_s12 + $0xe0] sm:$0xff]  ;;  %v2735_v20 = vld [vmem:[%s8247_s12 + $0x1e8] sm:$0xff]  ;;  %v2685_v21 = vld [vmem:[%s8247_s12 + $0x58] sm:$0xff] }
 0x30c   : >> { %2813 = vmatpush.msra.mxu2 %v2720_v3  ;;  %2768 = vmatpush.msra.mxu0 %v2687_v5  ;;  %v2718_v18 = vld [vmem:[%s8247_s12 + $0x160] sm:$0xff]  ;;  %v2701_v22 = vld [vmem:[%s8247_s12 + $0xd8] sm:$0xff]  ;;  %v2684_v25 = vld [vmem:[%s8247_s12 + $0x50] sm:$0xff] }
 0x30d   : >> { %2791 = vmatpush.msra.mxu1 %v2703_v7  ;;  %2836 = vmatpush.msra.mxu3 %v2736_v12  ;;  %v2717_v23 = vld [vmem:[%s8247_s12 + $0x158] sm:$0xff]  ;;  %v2734_v24 = vld [vmem:[%s8247_s12 + $0x1e0] sm:$0xff]  ;;  %v2700_v26 = vld [vmem:[%s8247_s12 + $0xd0] sm:$0xff] }
 0x30e   : >> { %2814 = vmatpush.msra.mxu2 %v2719_v8  ;;  %2769 = vmatpush.msra.mxu0 %v2686_v15  ;;  %v2716_v27 = vld [vmem:[%s8247_s12 + $0x150] sm:$0xff]  ;;  %v2733_v28 = vld [vmem:[%s8247_s12 + $0x1d8] sm:$0xff]  ;;  %v2683_v29 = vld [vmem:[%s8247_s12 + $0x48] sm:$0xff] }
 0x30f   : >> { %2792 = vmatpush.msra.mxu1 %v2702_v17  ;;  %2837 = vmatpush.msra.mxu3 %v2735_v20  ;;  %v2699_v30 = vld [vmem:[%s8247_s12 + $0xc8] sm:$0xff]  ;;  %v2732_v32 = vld [vmem:[%s8247_s12 + $0x1d0] sm:$0xff]  ;;  %v2682_v33 = vld [vmem:[%s8247_s12 + $0x40] sm:$0xff] }
 0x310   : >> { %2815 = vmatpush.msra.mxu2 %v2718_v18  ;;  %2770 = vmatpush.msra.mxu0 %v2685_v21  ;;  %v2715_v31 = vld [vmem:[%s8247_s12 + $0x148] sm:$0xff]  ;;  %v2698_v34 = vld [vmem:[%s8247_s12 + $0xc0] sm:$0xff]  ;;  %v2681_v37 = vld [vmem:[%s8247_s12 + $0x38] sm:$0xff] }
 0x311   : >> { %2793 = vmatpush.msra.mxu1 %v2701_v22  ;;  %2838 = vmatpush.msra.mxu3 %v2734_v24  ;;  %v2714_v35 = vld [vmem:[%s8247_s12 + $0x140] sm:$0xff]  ;;  %v2731_v36 = vld [vmem:[%s8247_s12 + $0x1c8] sm:$0xff]  ;;  %v2697_v38 = vld [vmem:[%s8247_s12 + $0xb8] sm:$0xff] }
 0x312   : >> { %2816 = vmatpush.msra.mxu2 %v2717_v23  ;;  %2771 = vmatpush.msra.mxu0 %v2684_v25  ;;  %v2713_v39 = vld [vmem:[%s8247_s12 + $0x138] sm:$0xff]  ;;  %v2730_v40 = vld [vmem:[%s8247_s12 + $0x1c0] sm:$0xff]  ;;  %v2680_v41 = vld [vmem:[%s8247_s12 + $0x30] sm:$0xff] }
 0x313   : >> { %2794 = vmatpush.msra.mxu1 %v2700_v26  ;;  %2839 = vmatpush.msra.mxu3 %v2733_v28  ;;  %v2696_v42 = vld [vmem:[%s8247_s12 + $0xb0] sm:$0xff]  ;;  %v2729_v44 = vld [vmem:[%s8247_s12 + $0x1b8] sm:$0xff]  ;;  %v2679_v45 = vld [vmem:[%s8247_s12 + $0x28] sm:$0xff] }
 0x314   : >> { %2817 = vmatpush.msra.mxu2 %v2716_v27  ;;  %2772 = vmatpush.msra.mxu0 %v2683_v29  ;;  %v2712_v43 = vld [vmem:[%s8247_s12 + $0x130] sm:$0xff]  ;;  %v2695_v46 = vld [vmem:[%s8247_s12 + $0xa8] sm:$0xff]  ;;  %v2678_v61 = vld [vmem:[%s8247_s12 + $0x20] sm:$0xff] }
 0x315   : >> { %2795 = vmatpush.msra.mxu1 %v2699_v30  ;;  %2840 = vmatpush.msra.mxu3 %v2732_v32  ;;  %v2711_v47 = vld [vmem:[%s8247_s12 + $0x128] sm:$0xff]  ;;  %v2728_v60 = vld [vmem:[%s8247_s12 + $0x1b0] sm:$0xff]  ;;  %v2694_v62 = vld [vmem:[%s8247_s12 + $0xa0] sm:$0xff]  ;;  %v7284_v32 = vmov 0  }
 0x316   : >> { %2818 = vmatpush.msra.mxu2 %v2715_v31  ;;  %2773 = vmatpush.msra.mxu0 %v2682_v33  ;;  %v2710_v63 = vld [vmem:[%s8247_s12 + $0x120] sm:$0xff]  ;;  %v2727_v0 = vld [vmem:[%s8247_s12 + $0x1a8] sm:$0xff]  ;;  %v2677_v3 = vld [vmem:[%s8247_s12 + $0x18] sm:$0xff] }
 0x317   : >> { %2796 = vmatpush.msra.mxu1 %v2698_v34  ;;  %2841 = vmatpush.msra.mxu3 %v2731_v36  ;;  %v2693_v4 = vld [vmem:[%s8247_s12 + $0x98] sm:$0xff]  ;;  %v2726_v7 = vld [vmem:[%s8247_s12 + $0x1a0] sm:$0xff]  ;;  %v2676_v8 = vld [vmem:[%s8247_s12 + $0x10] sm:$0xff] }
 0x318   : >> { %2819 = vmatpush.msra.mxu2 %v2714_v35  ;;  %2774 = vmatpush.msra.mxu0 %v2681_v37  ;;  %v2709_v5 = vld [vmem:[%s8247_s12 + $0x118] sm:$0xff]  ;;  %v2692_v12 = vld [vmem:[%s8247_s12 + $0x90] sm:$0xff]  ;;  %v2675_v18 = vld [vmem:[%s8247_s12 + $0x8] sm:$0xff] }
 0x319   : >> { %2797 = vmatpush.msra.mxu1 %v2697_v38  ;;  %2842 = vmatpush.msra.mxu3 %v2730_v40  ;;  %v2708_v15 = vld [vmem:[%s8247_s12 + $0x110] sm:$0xff]  ;;  %v2725_v17 = vld [vmem:[%s8247_s12 + $0x198] sm:$0xff]  ;;  %v2691_v20 = vld [vmem:[%s8247_s12 + $0x88] sm:$0xff] }
 0x31a   : >> { %2820 = vmatpush.msra.mxu2 %v2713_v39  ;;  %2775 = vmatpush.msra.mxu0 %v2680_v41  ;;  %v2707_v21 = vld [vmem:[%s8247_s12 + $0x108] sm:$0xff]  ;;  %v2724_v22 = vld [vmem:[%s8247_s12 + $0x190] sm:$0xff]  ;;  %v2674_v23 = vld [vmem:[%s8247_s12] sm:$0xff] }
 0x31b   : >> { %2798 = vmatpush.msra.mxu1 %v2696_v42  ;;  %2843 = vmatpush.msra.mxu3 %v2729_v44  ;;  %v2690_v24 = vld [vmem:[%s8247_s12 + $0x80] sm:$0xff]  ;;  %v2723_v26 = vld [vmem:[%s8247_s12 + $0x188] sm:$0xff]  ;;  %v2748_v27 = vld [vmem:[%s8247_s12 + $0x250] sm:$0xff] }
 0x31c   : >> { %2821 = vmatpush.msra.mxu2 %v2712_v43  ;;  %2776 = vmatpush.msra.mxu0 %v2679_v45  ;;  %v2706_v25 = vld [vmem:[%s8247_s12 + $0x100] sm:$0xff]  ;;  %v2747_v29 = vld [vmem:[%s8247_s12 + $0x248] sm:$0xff]  ;;  %v2745_v31 = vld [vmem:[%s8247_s12 + $0x238] sm:$0xff] }
 0x31d   : >> { %2799 = vmatpush.msra.mxu1 %v2695_v46  ;;  %2844 = vmatpush.msra.mxu3 %v2728_v60  ;;  %v2722_v28 = vld [vmem:[%s8247_s12 + $0x180] sm:$0xff]  ;;  %v2744_v33 = vld [vmem:[%s8247_s12 + $0x230] sm:$0xff]  ;;  %v2743_v34 = vld [vmem:[%s8247_s12 + $0x228] sm:$0xff] }
 0x31e   : >> { %2822 = vmatpush.msra.mxu2 %v2711_v47  ;;  %2777 = vmatpush.msra.mxu0 %v2678_v61  ;;  %v2746_v30 = vld [vmem:[%s8247_s12 + $0x240] sm:$0xff]  ;;  %v2741_v36 = vld [vmem:[%s8247_s12 + $0x218] sm:$0xff]  ;;  %v2740_v37 = vld [vmem:[%s8247_s12 + $0x210] sm:$0xff] }
 0x31f   : >> { %2800 = vmatpush.msra.mxu1 %v2694_v62  ;;  %2845 = vmatpush.msra.mxu3 %v2727_v0  ;;  %v2742_v35 = vld [vmem:[%s8247_s12 + $0x220] sm:$0xff]  ;;  %v2739_v38 = vld [vmem:[%s8247_s12 + $0x208] sm:$0xff] }
 0x320   : >> { %2823 = vmatpush.msra.mxu2 %v2710_v63  ;;  %2778 = vmatpush.msra.mxu0 %v2677_v3  ;;  %v2738_v39 = vld [vmem:[%s8247_s12 + $0x200] sm:$0xff] }
 0x321   : >> { %2801 = vmatpush.msra.mxu1 %v2693_v4  ;;  %2846 = vmatpush.msra.mxu3 %v2726_v7 }
 0x322   : >> { %2824 = vmatpush.msra.mxu2 %v2709_v5  ;;  %2779 = vmatpush.msra.mxu0 %v2676_v8 }
 0x323   : >> { %2802 = vmatpush.msra.mxu1 %v2692_v12  ;;  %2847 = vmatpush.msra.mxu3 %v2725_v17 }
 0x324   : >> { %2825 = vmatpush.msra.mxu2 %v2708_v15  ;;  %2780 = vmatpush.msra.mxu0 %v2675_v18 }
 0x325   : >> { %2803 = vmatpush.msra.mxu1 %v2691_v20  ;;  %2848 = vmatpush.msra.mxu3 %v2724_v22  ;;  %v3048_v22 = vadd.s32 (%p2667_p5), 32, %v7340_v2 }
 0x326   : >> { %2826 = vmatpush.msra.mxu2 %v2707_v21  ;;  %2781 = vmatpush.msra.mxu0 %v2674_v23  ;;  %v3047_v23 = vadd.s32 (%p2667_p5), 24, %v7340_v2 }
 0x327   : >> { %2804 = vmatpush.msra.mxu1 %v2690_v24  ;;  %2849 = vmatpush.msra.mxu3 %v2723_v26  ;;  %v3050_v24 = vmul.u32 (%p2667_p5), 2, %v3048_v22 }
 0x328   : >> { %2827 = vmatpush.msra.mxu2 %v2706_v25  ;;  %2782 = vmatmul.f32.vlgmr.msra.gmra.mxu0 %v8184_v48  ;;  %v3049_v25 = vmul.u32 (%p2667_p5), 2, %v3047_v23 }
 0x329   : >> { %2828 = vmatmul.f32.vlgmr.msra.gmra.mxu2 %v8194_v50  ;;  %2863 = vmatpush.msrb.mxu0 %v2748_v27  ;;  %v3052_v26 = vadd.s32 (%p2667_p5), 4, %v3050_v24 }
 0x32a   : >> { %7166 = vmatpush.msrb.mxu1 %v2748_v27  ;;  %2850 = vmatpush.msra.mxu3 %v2722_v28  ;;  %v3051_v27 = vadd.s32 (%p2667_p5), 4, %v3049_v25  ;;  %v2977_v25 = vld [vmem:[%s7369_s10 + $0x50] sm:$0xff] (%p2667_p5) }
 0x32b   : >> { %2805 = vmatmul.f32.vlgmr.msra.gmra.mxu1 %v8189_v49  ;;  %2851 = vmatmul.f32.vlgmr.msra.gmra.mxu3 %v8199_v51  ;;  %v3060_v28 = vadd.s32 (%p2667_p5), 1, %v3052_v26  ;;  %vm3054_vm13 = vcmp.eq.s32.totalorder (%p2667_p5), %v7353_v6, %v3052_v26  ;;  %v2968_v49 = vld [vmem:[%s7369_s10 + $0x8] sm:$0xff] (%p2667_p5)  ;;  %v2969_v51 = vld [vmem:[%s7369_s10 + $0x10] sm:$0xff] (%p2667_p5) }
 0x32c   : >> { %2864 = vmatpush.msrb.mxu0 %v2747_v29  ;;  %7167 = vmatpush.msrb.mxu1 %v2747_v29  ;;  %v3059_v29 = vadd.s32 (%p2667_p5), 1, %v3051_v27  ;;  %vm3053_vm15 = vcmp.eq.s32.totalorder (%p2667_p5), %v7353_v6, %v3051_v27 }
 0x32d   : >> { %7232 = vset.pattern.permute.xlu0 %v7284_v32  ;;  %7023 = vmatpush.msk.msra.mxu3 (%p2667_p5), %vm3054_vm13, %v7279_v19  ;;  %vm3062_vm1 = vcmp.eq.s32.totalorder (%p2667_p5), %v7353_v6, %v3060_v28 }
 0x32e   : >> { %2865 = vmatpush.msrb.mxu0 %v2746_v30  ;;  %2751 = vperm.xlu0 %7232, %v8234_v58   ;;  %vm3061_vm4 = vcmp.eq.s32.totalorder (%p2667_p5), %v7353_v6, %v3059_v29 }
 0x32f   : >> { %7168 = vmatpush.msrb.mxu1 %v2746_v30  ;;  %v2967_v30 = vld [vmem:[%s7369_s10] sm:$0xff] (%p2667_p5)  ;;  %6938 = vmatpush.msk.msra.mxu2 (%p2667_p5), %vm3062_vm1, %v7279_v19 }
 0x330   : >> { %2866 = vmatpush.msrb.mxu0 %v2745_v31  ;;  %7024 = vmatpush.msk.msra.mxu3 (%p2667_p5), %vm3053_vm15, %v7279_v19  ;;  %vm4462_vm8 = vcmp.eq.s32.totalorder (%p2667_p5), %v2967_v30, 2  ;;  %vm4622_vm10 = vcmp.eq.s32.totalorder (%p2667_p5), %v2967_v30, 3  ;;  %vm3227_vm11 = vcmp.eq.s32.totalorder (%p2667_p5), %v2967_v30, 1  ;;  %vm3067_vm14 = vcmp.eq.s32.totalorder (%p2667_p5), %v2967_v30, 0 }
 0x331   : >> { %7169 = vmatpush.msrb.mxu1 %v2745_v31  ;;  %2785 = vmatmul.f32.gmra.mxu0 %v8209_v53  ;;  %v2971_v31 = vld [vmem:[%s7369_s10 + $0x20] sm:$0xff] (%p2667_p5) }
 0x332   : >> { %2831 = vmatmul.f32.gmra.mxu2 %v8219_v55  ;;  %2867 = vmatpush.msrb.mxu0 %v2744_v33 }
 0x333   : >> { %7170 = vmatpush.msrb.mxu1 %v2744_v33  ;;  %2854 = vmatmul.f32.gmra.mxu3 %v8224_v56 }
 0x334   : >> { %2808 = vmatmul.f32.gmra.mxu1 %v8214_v54  ;;  %2868 = vmatpush.msrb.mxu0 %v2743_v34  ;;  %v2970_v54 = vld [vmem:[%s7369_s10 + $0x18] sm:$0xff] (%p2667_p5) }
 0x335   : >> { %7171 = vmatpush.msrb.mxu1 %v2743_v34  ;;  %6939 = vmatpush.msk.msra.mxu2 (%p2667_p5), %vm3061_vm4, %v7279_v19 }
 0x336   : >> { %2756 = vperm.xlu0 %7232, %v8239_v59   ;;  %2869 = vmatpush.msrb.mxu0 %v2742_v35 }
 0x337   : >> { %7172 = vmatpush.msrb.mxu1 %v2742_v35  ;;  %7025 = vmatpush.msk.msra.mxu3 (%p2667_p5), %vm441_vm2, %v7279_v19 }
 0x338   : >> { %2870 = vmatpush.msrb.mxu0 %v2741_v36  ;;  %6940 = vmatpush.msk.msra.mxu2 (%p2667_p5), %vm453_vm5, %v7279_v19 }
 0x339   : >> { %7173 = vmatpush.msrb.mxu1 %v2741_v36  ;;  %7026 = vmatpush.msk.msra.mxu3 (%p2667_p5), %vm440_vm3, %v7279_v19 }
 0x33a   : >> { %2871 = vmatpush.msrb.mxu0 %v2740_v37  ;;  %6941 = vmatpush.msk.msra.mxu2 (%p2667_p5), %vm452_vm6, %v7279_v19 }
 0x33b   : >> { %7174 = vmatpush.msrb.mxu1 %v2740_v37  ;;  %7027 = vmatpush.msk.msra.mxu3 (%p2667_p5), %vm439_vm7, %v7279_v19  ;;  %v2972_v37 = vld [vmem:[%s7369_s10 + $0x28] sm:$0xff] (%p2667_p5) }
 0x33c   : >> { %2872 = vmatpush.msrb.mxu0 %v2739_v38  ;;  %6942 = vmatpush.msk.msra.mxu2 (%p2667_p5), %vm451_vm12, %v7279_v19 }
 0x33d   : >> { %7175 = vmatpush.msrb.mxu1 %v2739_v38 }
 0x33e   : >> { %2873 = vmatpush.msrb.mxu0 %v2738_v39 }
 0x33f   : >> { %7176 = vmatpush.msrb.mxu1 %v2738_v39  ;;  %6761 = vmatmul.msk.f32.vlgmr.msrb.gmra.mxu0 %vm2759_vm9, %v8204_v52 }
 0x340   : >> { %6762 = vmatmul.msk.f32.vlgmr.msrb.gmra.mxu1 %vm2759_vm9, %v8229_v57  ;;  %6768 = vmatpush.msk.msra.mxu0 (%p2667_p5), %vm3062_vm1, %v7279_v19  ;;  %vm4465_vm1 = vcmp.eq.s32.totalorder (%p2667_p5), %v2970_v54, 2 }
 0x341   : > { %6853 = vmatpush.msk.msra.mxu1 (%p2667_p5), %vm3054_vm13, %v7279_v19  ;;  %vm3229_vm13 = vcmp.eq.s32.totalorder (%p2667_p5), %v2969_v51, 1 }
 0x342   : > { %6769 = vmatpush.msk.msra.mxu0 (%p2667_p5), %vm3061_vm4, %v7279_v19  ;;  %vm4625_vm4 = vcmp.eq.s32.totalorder (%p2667_p5), %v2970_v54, 3 }
 0x343   : > { %6854 = vmatpush.msk.msra.mxu1 (%p2667_p5), %vm3053_vm15, %v7279_v19  ;;  %vm3069_vm15 = vcmp.eq.s32.totalorder (%p2667_p5), %v2969_v51, 0 }
 0x344   : > { %6770 = vmatpush.msk.msra.mxu0 (%p2667_p5), %vm453_vm5, %v7279_v19  ;;  %vm3228_vm5 = vcmp.eq.s32.totalorder (%p2667_p5), %v2968_v49, 1 }
 0x345   : > { %6855 = vmatpush.msk.msra.mxu1 (%p2667_p5), %vm441_vm2, %v7279_v19  ;;  %vm4463_vm2 = vcmp.eq.s32.totalorder (%p2667_p5), %v2968_v49, 2 }
 0x346   : > { %6771 = vmatpush.msk.msra.mxu0 (%p2667_p5), %vm452_vm6, %v7279_v19  ;;  %vm3068_vm6 = vcmp.eq.s32.totalorder (%p2667_p5), %v2968_v49, 0 }
 0x347   : > { %6856 = vmatpush.msk.msra.mxu1 (%p2667_p5), %vm440_vm3, %v7279_v19  ;;  %vm4623_vm3 = vcmp.eq.s32.totalorder (%p2667_p5), %v2968_v49, 3 }
 0x348   : > { %6772 = vmatpush.msk.msra.mxu0 (%p2667_p5), %vm451_vm12, %v7279_v19  ;;  %vm4624_vm12 = vcmp.eq.s32.totalorder (%p2667_p5), %v2969_v51, 3 }
 0x349   : > { %6857 = vmatpush.msk.msra.mxu1 (%p2667_p5), %vm439_vm7, %v7279_v19  ;;  %vm4464_vm7 = vcmp.eq.s32.totalorder (%p2667_p5), %v2969_v51, 2 }
 0x3a0   : >> { %v2752_v41 = vpop.permute.xlu0 %2751 }
 0x3a5   : >> { %v2783_v40 = vpop.f32.mrf.mxu0 }
 0x3a6   : >> { %v2784_v46 = vadd.f32 %v2783_v40, %v2752_v41 }
 0x3a8   : >> { %v2806_v42 = vpop.f32.mrf.mxu1  ;;  %v2757_v47 = vpop.permute.xlu0 %2756 }
 0x3a9   : >> { %v2807_v62 = vadd.f32 %v2806_v42, %v2784_v46 }
 0x3ac   : >> { %v2829_v43 = vpop.f32.mrf.mxu2 }
 0x3ad   : >> { %v2830_v3 = vadd.f32 %v2829_v43, %v2807_v62  ;;  %v2973_v43 = vld [vmem:[%s7369_s10 + $0x30] sm:$0xff] (%p2667_p5) }
 0x3ae   : >> { %v2786_v44 = vpop.f32.mrf.mxu0  ;;  %v2852_v45 = vpop.f32.mrf.mxu3 }
 0x3af   : >> { %v2787_v60 = vadd.f32 %v2786_v44, %v2757_v47  ;;  %v2853_v7 = vadd.f32 %v2852_v45, %v2830_v3 }
 0x3b1   : >> { %v2809_v61 = vpop.f32.mrf.mxu1 }
 0x3b2   : >> { %v2810_v0 = vadd.f32 %v2809_v61, %v2787_v60  ;;  %v2974_v61 = vld [vmem:[%s7369_s10 + $0x38] sm:$0xff] (%p2667_p5) }
 0x3b5   : >> { %v2832_v63 = vpop.f32.mrf.mxu2 }
 0x3b6   : >> { %v2833_v4 = vadd.f32 %v2832_v63, %v2810_v0  ;;  %v2855_v5 = vpop.f32.mrf.mxu3 }
 0x3b8   : >> { %v2856_v8 = vadd.f32 %v2855_v5, %v2833_v4  ;;  %v2975_v5 = vld [vmem:[%s7369_s10 + $0x40] sm:$0xff] (%p2667_p5) }
 0x3bc   : >> { %v2875_v12 = vpop.f32.mrf.mxu0 }
 0x3bd   : >> { %v2878_v15 = vpop.f32.mrf.mxu1  ;;  %v2876_v17 = vadd.f32 %v2875_v12, %v2853_v7 }
 0x3be   : >> { %v2879_v18 = vadd.f32 %v2878_v15, %v2856_v8  ;;  %2669 = sbr.rel (!%p2667_p5) target bundleno = 769 (0x301), region = 156 }
 0x3bf   : >> { %v2881_v20 = vmax.f32 %v2876_v17, 0.0 }
 0x3c0   : >> { %v2882_v21 = vmax.f32 %v2879_v18, 0.0  ;;  %v2976_v18 = vld [vmem:[%s7369_s10 + $0x48] sm:$0xff] (%p2667_p5) }
 0x3c1   : >> { %2885 = vst.msk [vmem:[%s2884_s14] sm:$0xff] %vm2374_vm0, %v2881_v20 }
 0x3c2   : >> { %2886 = vst.msk [vmem:[%s2884_s14 + $0x8] sm:$0xff] %vm2374_vm0, %v2882_v21 }
 0x3c9   : > { %v2887_v2 = vld [vmem:[#allocation4] sm:$0xff]  ;;  %v2888_v14 = vld [vmem:[#allocation4 + $0x8] sm:$0xff]  ;;  %v2889_v6 = vld [vmem:[#allocation4 + $0x10] sm:$0xff] }
 0x3ca   : > { %v4542_v48 = vsel %vm4462_vm8, %v2887_v2, 0.0  ;;  %v4702_v10 = vsel %vm4622_vm10, %v2887_v2, 0.0  ;;  %v3307_v11 = vsel %vm3227_vm11, %v2887_v2, 0.0  ;;  %v3147_v13 = vsel %vm3067_vm14, %v2887_v2, 0.0  ;;  %v2890_v57 = vld [vmem:[#allocation4 + $0x18] sm:$0xff]  ;;  %v2891_v34 = vld [vmem:[#allocation4 + $0x20] sm:$0xff] }
 0x3cb   : > { %7028 = vmatmul.msk.f32.vlgmr.msra.gmra.mxu3 %vm2374_vm0, %v4542_v48  ;;  %6943 = vmatmul.msk.f32.vlgmr.msra.gmra.mxu2 %vm2374_vm0, %v4702_v10  ;;  %v4543_v50 = vsel %vm4463_vm2, %v2888_v14, 0.0  ;;  %v4703_v9 = vsel %vm4623_vm3, %v2888_v14, 0.0  ;;  %v3308_v52 = vsel %vm3228_vm5, %v2888_v14, 0.0  ;;  %v3148_v53 = vsel %vm3068_vm6, %v2888_v14, 0.0  ;;  %v2892_v40 = vld [vmem:[#allocation4 + $0x28] sm:$0xff]  ;;  %v2893_v46 = vld [vmem:[#allocation4 + $0x30] sm:$0xff] }
 0x3cc   : > { %6773 = vmatmul.msk.f32.vlgmr.msra.gmra.mxu0 %vm2374_vm0, %v3307_v11  ;;  %6858 = vmatmul.msk.f32.vlgmr.msra.gmra.mxu1 %vm2374_vm0, %v3147_v13  ;;  %v4544_v16 = vsel %vm4464_vm7, %v2889_v6, 0.0  ;;  %v4704_v19 = vsel %vm4624_vm12, %v2889_v6, 0.0  ;;  %v3309_v55 = vsel %vm3229_vm13, %v2889_v6, 0.0  ;;  %v3149_v56 = vsel %vm3069_vm15, %v2889_v6, 0.0  ;;  %v2894_v0 = vld [vmem:[#allocation4 + $0x38] sm:$0xff]  ;;  %v2895_v12 = vld [vmem:[#allocation4 + $0x40] sm:$0xff] }
 0x3cd   : > { %v4545_v58 = vsel %vm4465_vm1, %v2890_v57, 0.0  ;;  %vm3230_vm8 = vcmp.eq.s32.totalorder %v2970_v54, 1  ;;  %vm3070_vm10 = vcmp.eq.s32.totalorder %v2970_v54, 0  ;;  %v4705_v59 = vsel %vm4625_vm4, %v2890_v57, 0.0  ;;  %v2896_v22 = vld [vmem:[#allocation4 + $0x48] sm:$0xff]  ;;  %v2897_v28 = vld [vmem:[#allocation4 + $0x50] sm:$0xff] }
 0x3ce   : > { %v3310_v32 = vsel %vm3230_vm8, %v2890_v57, 0.0  ;;  %v3150_v33 = vsel %vm3070_vm10, %v2890_v57, 0.0  ;;  %vm4466_vm11 = vcmp.eq.s32.totalorder %v2971_v31, 2  ;;  %vm4626_vm14 = vcmp.eq.s32.totalorder %v2971_v31, 3  ;;  %v2978_v2 = vld [vmem:[%s7369_s10 + $0x58] sm:$0xff]  ;;  %v2898_v49 = vld [vmem:[#allocation4 + $0x58] sm:$0xff] }
 0x3cf   : > { %v4546_v35 = vsel %vm4466_vm11, %v2891_v34, 0.0  ;;  %vm3231_vm2 = vcmp.eq.s32.totalorder %v2971_v31, 1  ;;  %vm3071_vm3 = vcmp.eq.s32.totalorder %v2971_v31, 0  ;;  %v4706_v36 = vsel %vm4626_vm14, %v2891_v34, 0.0  ;;  %v2979_v14 = vld [vmem:[%s7369_s10 + $0x60] sm:$0xff]  ;;  %v2899_v51 = vld [vmem:[#allocation4 + $0x60] sm:$0xff] }
 0x3d0   : > { %v3311_v38 = vsel %vm3231_vm2, %v2891_v34, 0.0  ;;  %v3151_v39 = vsel %vm3071_vm3, %v2891_v34, 0.0  ;;  %vm4467_vm5 = vcmp.eq.s32.totalorder %v2972_v37, 2  ;;  %vm4627_vm6 = vcmp.eq.s32.totalorder %v2972_v37, 3  ;;  %v2980_v6 = vld [vmem:[%s7369_s10 + $0x68] sm:$0xff]  ;;  %v2900_v54 = vld [vmem:[#allocation4 + $0x68] sm:$0xff] }
 0x3d1   : > { %v4547_v41 = vsel %vm4467_vm5, %v2892_v40, 0.0  ;;  %vm3232_vm7 = vcmp.eq.s32.totalorder %v2972_v37, 1  ;;  %vm3072_vm12 = vcmp.eq.s32.totalorder %v2972_v37, 0  ;;  %v4707_v42 = vsel %vm4627_vm6, %v2892_v40, 0.0  ;;  %v2981_v57 = vld [vmem:[%s7369_s10 + $0x70] sm:$0xff]  ;;  %v2901_v31 = vld [vmem:[#allocation4 + $0x70] sm:$0xff] }
 0x3d2   : > { %v3312_v44 = vsel %vm3232_vm7, %v2892_v40, 0.0  ;;  %v3152_v45 = vsel %vm3072_vm12, %v2892_v40, 0.0  ;;  %vm4468_vm13 = vcmp.eq.s32.totalorder %v2973_v43, 2  ;;  %vm4628_vm15 = vcmp.eq.s32.totalorder %v2973_v43, 3  ;;  %v2982_v34 = vld [vmem:[%s7369_s10 + $0x78] sm:$0xff]  ;;  %v2902_v37 = vld [vmem:[#allocation4 + $0x78] sm:$0xff] }
 0x3d3   : > { %7029 = vmatmul.msk.f32.gmra.mxu3 %vm2374_vm0, %v4543_v50  ;;  %6944 = vmatmul.msk.f32.gmra.mxu2 %vm2374_vm0, %v4703_v9  ;;  %v4548_v47 = vsel %vm4468_vm13, %v2893_v46, 0.0  ;;  %vm3233_vm1 = vcmp.eq.s32.totalorder %v2973_v43, 1  ;;  %vm3073_vm4 = vcmp.eq.s32.totalorder %v2973_v43, 0  ;;  %v4708_v60 = vsel %vm4628_vm15, %v2893_v46, 0.0  ;;  %v2983_v40 = vld [vmem:[%s7369_s10 + $0x80] sm:$0xff]  ;;  %v2903_v43 = vld [vmem:[#allocation4 + $0x80] sm:$0xff] }
 0x3d4   : > { %6774 = vmatmul.msk.f32.gmra.mxu0 %vm2374_vm0, %v3308_v52  ;;  %6859 = vmatmul.msk.f32.gmra.mxu1 %vm2374_vm0, %v3148_v53  ;;  %v3313_v62 = vsel %vm3233_vm1, %v2893_v46, 0.0  ;;  %v3153_v63 = vsel %vm3073_vm4, %v2893_v46, 0.0  ;;  %vm4469_vm8 = vcmp.eq.s32.totalorder %v2974_v61, 2  ;;  %vm4629_vm10 = vcmp.eq.s32.totalorder %v2974_v61, 3  ;;  %v2984_v46 = vld [vmem:[%s7369_s10 + $0x88] sm:$0xff] }
 0x3d5   : > { %v4549_v3 = vsel %vm4469_vm8, %v2894_v0, 0.0  ;;  %vm3234_vm11 = vcmp.eq.s32.totalorder %v2974_v61, 1  ;;  %vm3074_vm14 = vcmp.eq.s32.totalorder %v2974_v61, 0  ;;  %v4709_v4 = vsel %vm4629_vm10, %v2894_v0, 0.0 }
 0x3d6   : > { %v3314_v7 = vsel %vm3234_vm11, %v2894_v0, 0.0  ;;  %v3154_v8 = vsel %vm3074_vm14, %v2894_v0, 0.0  ;;  %vm4470_vm2 = vcmp.eq.s32.totalorder %v2975_v5, 2  ;;  %vm4630_vm3 = vcmp.eq.s32.totalorder %v2975_v5, 3  ;;  %v2904_v0 = vld [vmem:[#allocation4 + $0x88] sm:$0xff] }
 0x3d7   : > { %v4550_v15 = vsel %vm4470_vm2, %v2895_v12, 0.0  ;;  %vm3235_vm5 = vcmp.eq.s32.totalorder %v2975_v5, 1  ;;  %vm3075_vm6 = vcmp.eq.s32.totalorder %v2975_v5, 0  ;;  %v4710_v17 = vsel %vm4630_vm3, %v2895_v12, 0.0 }
 0x3d8   : > { %v3315_v20 = vsel %vm3235_vm5, %v2895_v12, 0.0  ;;  %v3155_v21 = vsel %vm3075_vm6, %v2895_v12, 0.0  ;;  %vm4471_vm7 = vcmp.eq.s32.totalorder %v2976_v18, 2  ;;  %vm4631_vm12 = vcmp.eq.s32.totalorder %v2976_v18, 3  ;;  %v2985_v12 = vld [vmem:[%s7369_s10 + $0x90] sm:$0xff] }
 0x3d9   : > { %v4551_v23 = vsel %vm4471_vm7, %v2896_v22, 0.0  ;;  %vm3236_vm13 = vcmp.eq.s32.totalorder %v2976_v18, 1  ;;  %vm3076_vm15 = vcmp.eq.s32.totalorder %v2976_v18, 0  ;;  %v4711_v24 = vsel %vm4631_vm12, %v2896_v22, 0.0 }
 0x3da   : > { %v3316_v26 = vsel %vm3236_vm13, %v2896_v22, 0.0  ;;  %v3156_v27 = vsel %vm3076_vm15, %v2896_v22, 0.0  ;;  %vm4472_vm1 = vcmp.eq.s32.totalorder %v2977_v25, 2  ;;  %vm4632_vm4 = vcmp.eq.s32.totalorder %v2977_v25, 3  ;;  %v2905_v22 = vld [vmem:[#allocation4 + $0x90] sm:$0xff] }
 0x3db   : > { %7030 = vmatmul.msk.f32.gmra.mxu3 %vm2374_vm0, %v4544_v16  ;;  %6945 = vmatmul.msk.f32.gmra.mxu2 %vm2374_vm0, %v4704_v19  ;;  %v4552_v29 = vsel %vm4472_vm1, %v2897_v28, 0.0  ;;  %vm3237_vm8 = vcmp.eq.s32.totalorder %v2977_v25, 1  ;;  %vm3077_vm10 = vcmp.eq.s32.totalorder %v2977_v25, 0  ;;  %v4712_v30 = vsel %vm4632_vm4, %v2897_v28, 0.0 }
 0x3dc   : > { %6775 = vmatmul.msk.f32.gmra.mxu0 %vm2374_vm0, %v3309_v55  ;;  %6860 = vmatmul.msk.f32.gmra.mxu1 %vm2374_vm0, %v3149_v56  ;;  %v3317_v48 = vsel %vm3237_vm8, %v2897_v28, 0.0  ;;  %v3157_v10 = vsel %vm3077_vm10, %v2897_v28, 0.0  ;;  %vm4473_vm11 = vcmp.eq.s32.totalorder %v2978_v2, 2  ;;  %vm4633_vm14 = vcmp.eq.s32.totalorder %v2978_v2, 3  ;;  %v2986_v28 = vld [vmem:[%s7369_s10 + $0x98] sm:$0xff] }
 0x3dd   : > { %v4553_v11 = vsel %vm4473_vm11, %v2898_v49, 0.0  ;;  %vm3238_vm2 = vcmp.eq.s32.totalorder %v2978_v2, 1  ;;  %vm3078_vm3 = vcmp.eq.s32.totalorder %v2978_v2, 0  ;;  %v4713_v13 = vsel %vm4633_vm14, %v2898_v49, 0.0 }
 0x3de   : > { %v3318_v50 = vsel %vm3238_vm2, %v2898_v49, 0.0  ;;  %v3158_v9 = vsel %vm3078_vm3, %v2898_v49, 0.0  ;;  %vm4474_vm5 = vcmp.eq.s32.totalorder %v2979_v14, 2  ;;  %vm4634_vm6 = vcmp.eq.s32.totalorder %v2979_v14, 3  ;;  %v2906_v49 = vld [vmem:[#allocation4 + $0x98] sm:$0xff] }
 0x3df   : > { %v4554_v52 = vsel %vm4474_vm5, %v2899_v51, 0.0  ;;  %vm3239_vm7 = vcmp.eq.s32.totalorder %v2979_v14, 1  ;;  %vm3079_vm12 = vcmp.eq.s32.totalorder %v2979_v14, 0  ;;  %v4714_v53 = vsel %vm4634_vm6, %v2899_v51, 0.0 }
 0x3e0   : > { %v3319_v16 = vsel %vm3239_vm7, %v2899_v51, 0.0  ;;  %v3159_v19 = vsel %vm3079_vm12, %v2899_v51, 0.0  ;;  %vm4475_vm13 = vcmp.eq.s32.totalorder %v2980_v6, 2  ;;  %vm4635_vm15 = vcmp.eq.s32.totalorder %v2980_v6, 3  ;;  %v2987_v51 = vld [vmem:[%s7369_s10 + $0xa0] sm:$0xff] }
 0x3e1   : > { %v4555_v55 = vsel %vm4475_vm13, %v2900_v54, 0.0  ;;  %vm3240_vm1 = vcmp.eq.s32.totalorder %v2980_v6, 1  ;;  %vm3080_vm4 = vcmp.eq.s32.totalorder %v2980_v6, 0  ;;  %v4715_v56 = vsel %vm4635_vm15, %v2900_v54, 0.0 }
 0x3e2   : > { %vm4476_vm8 = vcmp.eq.s32.totalorder %v2981_v57, 2  ;;  %vm4636_vm10 = vcmp.eq.s32.totalorder %v2981_v57, 3  ;;  %vm3241_vm11 = vcmp.eq.s32.totalorder %v2981_v57, 1  ;;  %vm3081_vm14 = vcmp.eq.s32.totalorder %v2981_v57, 0 }
 0x3e3   : > { %7031 = vmatmul.msk.f32.gmra.mxu3 %vm2374_vm0, %v4545_v58  ;;  %6946 = vmatmul.msk.f32.gmra.mxu2 %vm2374_vm0, %v4705_v59  ;;  %v3320_v58 = vsel %vm3240_vm1, %v2900_v54, 0.0  ;;  %v3160_v59 = vsel %vm3080_vm4, %v2900_v54, 0.0  ;;  %vm4477_vm2 = vcmp.eq.s32.totalorder %v2982_v34, 2  ;;  %vm4637_vm3 = vcmp.eq.s32.totalorder %v2982_v34, 3  ;;  %v2907_v54 = vld [vmem:[#allocation4 + $0xa0] sm:$0xff] }
 0x3e4   : > { %6776 = vmatmul.msk.f32.gmra.mxu0 %vm2374_vm0, %v3310_v32  ;;  %6861 = vmatmul.msk.f32.gmra.mxu1 %vm2374_vm0, %v3150_v33  ;;  %v4556_v32 = vsel %vm4476_vm8, %v2901_v31, 0.0  ;;  %v4716_v33 = vsel %vm4636_vm10, %v2901_v31, 0.0  ;;  %vm3242_vm5 = vcmp.eq.s32.totalorder %v2982_v34, 1  ;;  %vm3082_vm6 = vcmp.eq.s32.totalorder %v2982_v34, 0 }
 0x3e5   : > { %vm4478_vm7 = vcmp.eq.s32.totalorder %v2983_v40, 2  ;;  %vm4638_vm12 = vcmp.eq.s32.totalorder %v2983_v40, 3  ;;  %vm3243_vm13 = vcmp.eq.s32.totalorder %v2983_v40, 1  ;;  %vm3083_vm15 = vcmp.eq.s32.totalorder %v2983_v40, 0 }
 0x3e6   : > { %v3323_v61 = vsel %vm3243_vm13, %v2903_v43, 0.0  ;;  %vm4479_vm1 = vcmp.eq.s32.totalorder %v2984_v46, 2  ;;  %vm4639_vm4 = vcmp.eq.s32.totalorder %v2984_v46, 3  ;;  %vm3244_vm8 = vcmp.eq.s32.totalorder %v2984_v46, 1 }
 0x3e7   : > { %v4559_v5 = vsel %vm4479_vm1, %v2904_v0, 0.0  ;;  %vm3084_vm10 = vcmp.eq.s32.totalorder %v2984_v46, 0  ;;  %v3324_v18 = vsel %vm3244_vm8, %v2904_v0, 0.0  ;;  %vm4482_vm13 = vcmp.eq.s32.totalorder %v2987_v51, 2 }
 0x3e8   : > { %v4562_v57 = vsel %vm4482_vm13, %v2907_v54, 0.0  ;;  %vm3247_vm1 = vcmp.eq.s32.totalorder %v2987_v51, 1 }
 0x3e9   : > { %v3327_v34 = vsel %vm3247_vm1, %v2907_v54, 0.0 }
 0x3eb   : > { %7032 = vmatmul.msk.f32.gmra.mxu3 %vm2374_vm0, %v4546_v35  ;;  %6947 = vmatmul.msk.f32.gmra.mxu2 %vm2374_vm0, %v4706_v36  ;;  %v3321_v35 = vsel %vm3241_vm11, %v2901_v31, 0.0  ;;  %v3161_v36 = vsel %vm3081_vm14, %v2901_v31, 0.0  ;;  %vm4480_vm11 = vcmp.eq.s32.totalorder %v2985_v12, 2  ;;  %vm4640_vm14 = vcmp.eq.s32.totalorder %v2985_v12, 3  ;;  %v2988_v31 = vld [vmem:[%s7369_s10 + $0xa8] sm:$0xff] }
 0x3ec   : > { %6777 = vmatmul.msk.f32.gmra.mxu0 %vm2374_vm0, %v3311_v38  ;;  %6862 = vmatmul.msk.f32.gmra.mxu1 %vm2374_vm0, %v3151_v39  ;;  %v4557_v38 = vsel %vm4477_vm2, %v2902_v37, 0.0  ;;  %v4717_v39 = vsel %vm4637_vm3, %v2902_v37, 0.0  ;;  %v4560_v25 = vsel %vm4480_vm11, %v2905_v22, 0.0  ;;  %vm3245_vm2 = vcmp.eq.s32.totalorder %v2985_v12, 1 }
 0x3ed   : > { %vm3085_vm3 = vcmp.eq.s32.totalorder %v2985_v12, 0  ;;  %v3325_v2 = vsel %vm3245_vm2, %v2905_v22, 0.0  ;;  %vm4483_vm8 = vcmp.eq.s32.totalorder %v2988_v31, 2  ;;  %vm3248_vm11 = vcmp.eq.s32.totalorder %v2988_v31, 1 }
 0x3f3   : > { %7033 = vmatmul.msk.f32.gmra.mxu3 %vm2374_vm0, %v4547_v41  ;;  %6948 = vmatmul.msk.f32.gmra.mxu2 %vm2374_vm0, %v4707_v42  ;;  %v3322_v41 = vsel %vm3242_vm5, %v2902_v37, 0.0  ;;  %v3162_v42 = vsel %vm3082_vm6, %v2902_v37, 0.0  ;;  %vm4481_vm5 = vcmp.eq.s32.totalorder %v2986_v28, 2  ;;  %vm4641_vm6 = vcmp.eq.s32.totalorder %v2986_v28, 3  ;;  %v2908_v37 = vld [vmem:[#allocation4 + $0xa8] sm:$0xff] }
 0x3f4   : > { %6778 = vmatmul.msk.f32.gmra.mxu0 %vm2374_vm0, %v3312_v44  ;;  %6863 = vmatmul.msk.f32.gmra.mxu1 %vm2374_vm0, %v3152_v45  ;;  %v4558_v44 = vsel %vm4478_vm7, %v2903_v43, 0.0  ;;  %v4718_v45 = vsel %vm4638_vm12, %v2903_v43, 0.0  ;;  %v4561_v14 = vsel %vm4481_vm5, %v2906_v49, 0.0  ;;  %vm3246_vm7 = vcmp.eq.s32.totalorder %v2986_v28, 1 }
 0x3f5   : > { %vm3086_vm12 = vcmp.eq.s32.totalorder %v2986_v28, 0  ;;  %v3326_v6 = vsel %vm3246_vm7, %v2906_v49, 0.0  ;;  %v4563_v40 = vsel %vm4483_vm8, %v2908_v37, 0.0  ;;  %v3328_v46 = vsel %vm3248_vm11, %v2908_v37, 0.0 }
 0x3fb   : > { %7034 = vmatmul.msk.f32.gmra.mxu3 %vm2374_vm0, %v4548_v47  ;;  %6949 = vmatmul.msk.f32.gmra.mxu2 %vm2374_vm0, %v4708_v60 }
 0x3fc   : > { %6779 = vmatmul.msk.f32.gmra.mxu0 %vm2374_vm0, %v3313_v62  ;;  %6864 = vmatmul.msk.f32.gmra.mxu1 %vm2374_vm0, %v3153_v63  ;;  %v3163_v62 = vsel %vm3083_vm15, %v2903_v43, 0.0  ;;  %vm4642_vm15 = vcmp.eq.s32.totalorder %v2987_v51, 3  ;;  %v2989_v43 = vld [vmem:[%s7369_s10 + $0xb0] sm:$0xff] }
 0x3fd   : > { %vm4484_vm2 = vcmp.eq.s32.totalorder %v2989_v43, 2  ;;  %vm3249_vm5 = vcmp.eq.s32.totalorder %v2989_v43, 1 }
 0x403   : > { %7035 = vmatmul.msk.f32.gmra.mxu3 %vm2374_vm0, %v4549_v3  ;;  %6950 = vmatmul.msk.f32.gmra.mxu2 %vm2374_vm0, %v4709_v4 }
 0x404   : > { %6780 = vmatmul.msk.f32.gmra.mxu0 %vm2374_vm0, %v3314_v7  ;;  %6865 = vmatmul.msk.f32.gmra.mxu1 %vm2374_vm0, %v3154_v8  ;;  %v4719_v8 = vsel %vm4639_vm4, %v2904_v0, 0.0  ;;  %vm3087_vm4 = vcmp.eq.s32.totalorder %v2987_v51, 0 }
 0x40b   : > { %7036 = vmatmul.msk.f32.gmra.mxu3 %vm2374_vm0, %v4550_v15  ;;  %6951 = vmatmul.msk.f32.gmra.mxu2 %vm2374_vm0, %v4710_v17 }
 0x40c   : > { %6781 = vmatmul.msk.f32.gmra.mxu0 %vm2374_vm0, %v3315_v20  ;;  %6866 = vmatmul.msk.f32.gmra.mxu1 %vm2374_vm0, %v3155_v21  ;;  %v3164_v20 = vsel %vm3084_vm10, %v2904_v0, 0.0  ;;  %vm4643_vm10 = vcmp.eq.s32.totalorder %v2988_v31, 3 }
 0x413   : > { %7037 = vmatmul.msk.f32.gmra.mxu3 %vm2374_vm0, %v4551_v23  ;;  %6952 = vmatmul.msk.f32.gmra.mxu2 %vm2374_vm0, %v4711_v24 }
 0x414   : > { %6782 = vmatmul.msk.f32.gmra.mxu0 %vm2374_vm0, %v3316_v26  ;;  %6867 = vmatmul.msk.f32.gmra.mxu1 %vm2374_vm0, %v3156_v27  ;;  %v4720_v27 = vsel %vm4640_vm14, %v2905_v22, 0.0  ;;  %vm3088_vm14 = vcmp.eq.s32.totalorder %v2988_v31, 0 }
 0x41b   : > { %7038 = vmatmul.msk.f32.gmra.mxu3 %vm2374_vm0, %v4552_v29  ;;  %6953 = vmatmul.msk.f32.gmra.mxu2 %vm2374_vm0, %v4712_v30 }
 0x41c   : > { %6783 = vmatmul.msk.f32.gmra.mxu0 %vm2374_vm0, %v3317_v48  ;;  %6868 = vmatmul.msk.f32.gmra.mxu1 %vm2374_vm0, %v3157_v10  ;;  %v3165_v48 = vsel %vm3085_vm3, %v2905_v22, 0.0  ;;  %vm4644_vm3 = vcmp.eq.s32.totalorder %v2989_v43, 3 }
 0x423   : > { %7039 = vmatmul.msk.f32.gmra.mxu3 %vm2374_vm0, %v4553_v11  ;;  %6954 = vmatmul.msk.f32.gmra.mxu2 %vm2374_vm0, %v4713_v13 }
 0x424   : > { %6784 = vmatmul.msk.f32.gmra.mxu0 %vm2374_vm0, %v3318_v50  ;;  %6869 = vmatmul.msk.f32.gmra.mxu1 %vm2374_vm0, %v3158_v9  ;;  %v4721_v9 = vsel %vm4641_vm6, %v2906_v49, 0.0  ;;  %vm3089_vm6 = vcmp.eq.s32.totalorder %v2989_v43, 0 }
 0x42b   : > { %7040 = vmatmul.msk.f32.gmra.mxu3 %vm2374_vm0, %v4554_v52  ;;  %6955 = vmatmul.msk.f32.gmra.mxu2 %vm2374_vm0, %v4714_v53 }
 0x42c   : > { %6785 = vmatmul.msk.f32.gmra.mxu0 %vm2374_vm0, %v3319_v16  ;;  %6870 = vmatmul.msk.f32.gmra.mxu1 %vm2374_vm0, %v3159_v19  ;;  %v3166_v16 = vsel %vm3086_vm12, %v2906_v49, 0.0 }
 0x433   : > { %7041 = vmatmul.msk.f32.gmra.mxu3 %vm2374_vm0, %v4555_v55  ;;  %6956 = vmatmul.msk.f32.gmra.mxu2 %vm2374_vm0, %v4715_v56 }
 0x434   : > { %6786 = vmatmul.msk.f32.gmra.mxu0 %vm2374_vm0, %v3320_v58  ;;  %6871 = vmatmul.msk.f32.gmra.mxu1 %vm2374_vm0, %v3160_v59  ;;  %v4722_v59 = vsel %vm4642_vm15, %v2907_v54, 0.0 }
 0x43b   : > { %7042 = vmatmul.msk.f32.gmra.mxu3 %vm2374_vm0, %v4556_v32  ;;  %6957 = vmatmul.msk.f32.gmra.mxu2 %vm2374_vm0, %v4716_v33 }
 0x43c   : > { %6787 = vmatmul.msk.f32.gmra.mxu0 %vm2374_vm0, %v3321_v35  ;;  %6872 = vmatmul.msk.f32.gmra.mxu1 %vm2374_vm0, %v3161_v36  ;;  %v3167_v35 = vsel %vm3087_vm4, %v2907_v54, 0.0 }
 0x443   : > { %7043 = vmatmul.msk.f32.gmra.mxu3 %vm2374_vm0, %v4557_v38  ;;  %6958 = vmatmul.msk.f32.gmra.mxu2 %vm2374_vm0, %v4717_v39 }
 0x444   : > { %6788 = vmatmul.msk.f32.gmra.mxu0 %vm2374_vm0, %v3322_v41  ;;  %6873 = vmatmul.msk.f32.gmra.mxu1 %vm2374_vm0, %v3162_v42  ;;  %v4723_v42 = vsel %vm4643_vm10, %v2908_v37, 0.0 }
 0x449   : > { %v3644_v47 = vpop.f32.mrf.mxu0  ;;  %v4141_v60 = vpop.f32.mrf.mxu1 }
 0x44a   : > { %v4142_v63 = vadd.f32 %v4141_v60, %v3644_v47  ;;  %v3168_v47 = vsel %vm3088_vm14, %v2908_v37, 0.0 }
 0x44b   : > { %7044 = vmatmul.msk.f32.gmra.mxu3 %vm2374_vm0, %v4558_v44  ;;  %6959 = vmatmul.msk.f32.gmra.mxu2 %vm2374_vm0, %v4718_v45 }
 0x44c   : > { %4382 = vst.msk [vmem:[#allocation5] sm:$0xff] %vm2759_vm9, %v4142_v63  ;;  %6789 = vmatmul.msk.f32.gmra.mxu0 %vm2374_vm0, %v3323_v61  ;;  %6874 = vmatmul.msk.f32.gmra.mxu1 %vm2374_vm0, %v3163_v62  ;;  %v2909_v61 = vld [vmem:[#allocation4 + $0xb0] sm:$0xff] }
 0x44d   : > { %v4564_v0 = vsel %vm4484_vm2, %v2909_v61, 0.0  ;;  %v3329_v12 = vsel %vm3249_vm5, %v2909_v61, 0.0 }
 0x44e   : > { %v5536_v3 = vpop.f32.mrf.mxu3  ;;  %v5039_v4 = vpop.f32.mrf.mxu2 }
 0x44f   : > { %v5537_v7 = vadd.f32 %v5536_v3, %v5039_v4  ;;  %v4724_v4 = vsel %vm4644_vm3, %v2909_v61, 0.0 }
 0x451   : > { %5777 = vst.msk [vmem:[#allocation5 + $0x280] sm:$0xff] %vm2759_vm9, %v5537_v7  ;;  %v3647_v15 = vpop.f32.mrf.mxu0  ;;  %v4144_v17 = vpop.f32.mrf.mxu1 }
 0x452   : > { %v4145_v21 = vadd.f32 %v4144_v17, %v3647_v15  ;;  %v3169_v15 = vsel %vm3089_vm6, %v2909_v61, 0.0 }
 0x453   : > { %7045 = vmatmul.msk.f32.gmra.mxu3 %vm2374_vm0, %v4559_v5  ;;  %6960 = vmatmul.msk.f32.gmra.mxu2 %vm2374_vm0, %v4719_v8  ;;  %v2990_v5 = vld [vmem:[%s7369_s10 + $0xb8] sm:$0xff] }
 0x454   : > { %4383 = vst.msk [vmem:[#allocation5 + $0x8] sm:$0xff] %vm2759_vm9, %v4145_v21  ;;  %6790 = vmatmul.msk.f32.gmra.mxu0 %vm2374_vm0, %v3324_v18  ;;  %6875 = vmatmul.msk.f32.gmra.mxu1 %vm2374_vm0, %v3164_v20  ;;  %v2910_v18 = vld [vmem:[#allocation4 + $0xb8] sm:$0xff]  ;;  %vm4485_vm7 = vcmp.eq.s32.totalorder %v2990_v5, 2  ;;  %vm4645_vm12 = vcmp.eq.s32.totalorder %v2990_v5, 3  ;;  %vm3250_vm13 = vcmp.eq.s32.totalorder %v2990_v5, 1  ;;  %vm3090_vm15 = vcmp.eq.s32.totalorder %v2990_v5, 0 }
 0x455   : > { %v4565_v22 = vsel %vm4485_vm7, %v2910_v18, 0.0  ;;  %v3330_v28 = vsel %vm3250_vm13, %v2910_v18, 0.0 }
 0x456   : > { %v5539_v23 = vpop.f32.mrf.mxu3  ;;  %v5042_v24 = vpop.f32.mrf.mxu2 }
 0x457   : > { %v5540_v26 = vadd.f32 %v5539_v23, %v5042_v24  ;;  %v4725_v24 = vsel %vm4645_vm12, %v2910_v18, 0.0 }
 0x459   : > { %5778 = vst.msk [vmem:[#allocation5 + $0x288] sm:$0xff] %vm2759_vm9, %v5540_v26  ;;  %v3650_v29 = vpop.f32.mrf.mxu0  ;;  %v4147_v30 = vpop.f32.mrf.mxu1 }
 0x45a   : > { %v4148_v10 = vadd.f32 %v4147_v30, %v3650_v29  ;;  %v3170_v29 = vsel %vm3090_vm15, %v2910_v18, 0.0 }
 0x45b   : > { %7046 = vmatmul.msk.f32.gmra.mxu3 %vm2374_vm0, %v4560_v25  ;;  %6961 = vmatmul.msk.f32.gmra.mxu2 %vm2374_vm0, %v4720_v27  ;;  %v2991_v25 = vld [vmem:[%s7369_s10 + $0xc0] sm:$0xff] }
 0x45c   : > { %4384 = vst.msk [vmem:[#allocation5 + $0x10] sm:$0xff] %vm2759_vm9, %v4148_v10  ;;  %6791 = vmatmul.msk.f32.gmra.mxu0 %vm2374_vm0, %v3325_v2  ;;  %6876 = vmatmul.msk.f32.gmra.mxu1 %vm2374_vm0, %v3165_v48  ;;  %v2911_v2 = vld [vmem:[#allocation4 + $0xc0] sm:$0xff]  ;;  %vm4486_vm1 = vcmp.eq.s32.totalorder %v2991_v25, 2  ;;  %vm4646_vm4 = vcmp.eq.s32.totalorder %v2991_v25, 3  ;;  %vm3251_vm8 = vcmp.eq.s32.totalorder %v2991_v25, 1  ;;  %vm3091_vm10 = vcmp.eq.s32.totalorder %v2991_v25, 0 }
 0x45d   : > { %v4566_v49 = vsel %vm4486_vm1, %v2911_v2, 0.0  ;;  %v3331_v51 = vsel %vm3251_vm8, %v2911_v2, 0.0 }
 0x45e   : > { %v5542_v11 = vpop.f32.mrf.mxu3  ;;  %v5045_v13 = vpop.f32.mrf.mxu2 }
 0x45f   : > { %v5543_v50 = vadd.f32 %v5542_v11, %v5045_v13  ;;  %v4726_v13 = vsel %vm4646_vm4, %v2911_v2, 0.0 }
 0x461   : > { %5779 = vst.msk [vmem:[#allocation5 + $0x290] sm:$0xff] %vm2759_vm9, %v5543_v50  ;;  %v3653_v52 = vpop.f32.mrf.mxu0  ;;  %v4150_v53 = vpop.f32.mrf.mxu1 }
 0x462   : > { %v4151_v19 = vadd.f32 %v4150_v53, %v3653_v52  ;;  %v3171_v52 = vsel %vm3091_vm10, %v2911_v2, 0.0 }
 0x463   : > { %7047 = vmatmul.msk.f32.gmra.mxu3 %vm2374_vm0, %v4561_v14  ;;  %6962 = vmatmul.msk.f32.gmra.mxu2 %vm2374_vm0, %v4721_v9  ;;  %v2992_v14 = vld [vmem:[%s7369_s10 + $0xc8] sm:$0xff] }
 0x464   : > { %4385 = vst.msk [vmem:[#allocation5 + $0x18] sm:$0xff] %vm2759_vm9, %v4151_v19  ;;  %6792 = vmatmul.msk.f32.gmra.mxu0 %vm2374_vm0, %v3326_v6  ;;  %6877 = vmatmul.msk.f32.gmra.mxu1 %vm2374_vm0, %v3166_v16  ;;  %v2912_v6 = vld [vmem:[#allocation4 + $0xc8] sm:$0xff]  ;;  %vm4487_vm11 = vcmp.eq.s32.totalorder %v2992_v14, 2  ;;  %vm4647_vm14 = vcmp.eq.s32.totalorder %v2992_v14, 3  ;;  %vm3252_vm2 = vcmp.eq.s32.totalorder %v2992_v14, 1  ;;  %vm3092_vm3 = vcmp.eq.s32.totalorder %v2992_v14, 0 }
 0x465   : > { %v4567_v54 = vsel %vm4487_vm11, %v2912_v6, 0.0  ;;  %v3332_v31 = vsel %vm3252_vm2, %v2912_v6, 0.0 }
 0x466   : > { %v5545_v55 = vpop.f32.mrf.mxu3  ;;  %v5048_v56 = vpop.f32.mrf.mxu2 }
 0x467   : > { %v5546_v58 = vadd.f32 %v5545_v55, %v5048_v56  ;;  %v4727_v56 = vsel %vm4647_vm14, %v2912_v6, 0.0 }
 0x469   : > { %5780 = vst.msk [vmem:[#allocation5 + $0x298] sm:$0xff] %vm2759_vm9, %v5546_v58  ;;  %v3656_v32 = vpop.f32.mrf.mxu0  ;;  %v4153_v33 = vpop.f32.mrf.mxu1 }
 0x46a   : > { %v4154_v36 = vadd.f32 %v4153_v33, %v3656_v32  ;;  %v3172_v32 = vsel %vm3092_vm3, %v2912_v6, 0.0 }
 0x46b   : > { %7048 = vmatmul.msk.f32.gmra.mxu3 %vm2374_vm0, %v4562_v57  ;;  %6963 = vmatmul.msk.f32.gmra.mxu2 %vm2374_vm0, %v4722_v59  ;;  %v2993_v57 = vld [vmem:[%s7369_s10 + $0xd0] sm:$0xff] }
 0x46c   : > { %4386 = vst.msk [vmem:[#allocation5 + $0x20] sm:$0xff] %vm2759_vm9, %v4154_v36  ;;  %6793 = vmatmul.msk.f32.gmra.mxu0 %vm2374_vm0, %v3327_v34  ;;  %6878 = vmatmul.msk.f32.gmra.mxu1 %vm2374_vm0, %v3167_v35  ;;  %v2913_v34 = vld [vmem:[#allocation4 + $0xd0] sm:$0xff]  ;;  %vm4488_vm5 = vcmp.eq.s32.totalorder %v2993_v57, 2  ;;  %vm4648_vm6 = vcmp.eq.s32.totalorder %v2993_v57, 3  ;;  %vm3253_vm7 = vcmp.eq.s32.totalorder %v2993_v57, 1  ;;  %vm3093_vm12 = vcmp.eq.s32.totalorder %v2993_v57, 0 }
 0x46d   : > { %v4568_v37 = vsel %vm4488_vm5, %v2913_v34, 0.0  ;;  %v3333_v43 = vsel %vm3253_vm7, %v2913_v34, 0.0 }
 0x46e   : > { %v5548_v38 = vpop.f32.mrf.mxu3  ;;  %v5051_v39 = vpop.f32.mrf.mxu2 }
 0x46f   : > { %v5549_v41 = vadd.f32 %v5548_v38, %v5051_v39  ;;  %v4728_v39 = vsel %vm4648_vm6, %v2913_v34, 0.0 }
 0x471   : > { %5781 = vst.msk [vmem:[#allocation5 + $0x2a0] sm:$0xff] %vm2759_vm9, %v5549_v41  ;;  %v3659_v44 = vpop.f32.mrf.mxu0  ;;  %v4156_v45 = vpop.f32.mrf.mxu1 }
 0x472   : > { %v4157_v60 = vadd.f32 %v4156_v45, %v3659_v44  ;;  %v3173_v44 = vsel %vm3093_vm12, %v2913_v34, 0.0 }
 0x473   : > { %7049 = vmatmul.msk.f32.gmra.mxu3 %vm2374_vm0, %v4563_v40  ;;  %6964 = vmatmul.msk.f32.gmra.mxu2 %vm2374_vm0, %v4723_v42  ;;  %v2994_v40 = vld [vmem:[%s7369_s10 + $0xd8] sm:$0xff] }
 0x474   : > { %4387 = vst.msk [vmem:[#allocation5 + $0x28] sm:$0xff] %vm2759_vm9, %v4157_v60  ;;  %6794 = vmatmul.msk.f32.gmra.mxu0 %vm2374_vm0, %v3328_v46  ;;  %6879 = vmatmul.msk.f32.gmra.mxu1 %vm2374_vm0, %v3168_v47  ;;  %v2914_v46 = vld [vmem:[#allocation4 + $0xd8] sm:$0xff]  ;;  %vm4489_vm13 = vcmp.eq.s32.totalorder %v2994_v40, 2  ;;  %vm4649_vm15 = vcmp.eq.s32.totalorder %v2994_v40, 3  ;;  %vm3254_vm1 = vcmp.eq.s32.totalorder %v2994_v40, 1  ;;  %vm3094_vm4 = vcmp.eq.s32.totalorder %v2994_v40, 0 }
 0x475   : > { %v4569_v61 = vsel %vm4489_vm13, %v2914_v46, 0.0  ;;  %v3334_v5 = vsel %vm3254_vm1, %v2914_v46, 0.0 }
 0x476   : > { %v5551_v62 = vpop.f32.mrf.mxu3  ;;  %v5054_v63 = vpop.f32.mrf.mxu2 }
 0x477   : > { %v5552_v3 = vadd.f32 %v5551_v62, %v5054_v63  ;;  %v4729_v63 = vsel %vm4649_vm15, %v2914_v46, 0.0 }
 0x479   : > { %5782 = vst.msk [vmem:[#allocation5 + $0x2a8] sm:$0xff] %vm2759_vm9, %v5552_v3  ;;  %v3662_v7 = vpop.f32.mrf.mxu0  ;;  %v4159_v8 = vpop.f32.mrf.mxu1 }
 0x47a   : > { %v4160_v17 = vadd.f32 %v4159_v8, %v3662_v7  ;;  %v3174_v7 = vsel %vm3094_vm4, %v2914_v46, 0.0 }
 0x47b   : > { %7050 = vmatmul.msk.f32.gmra.mxu3 %vm2374_vm0, %v4564_v0  ;;  %6965 = vmatmul.msk.f32.gmra.mxu2 %vm2374_vm0, %v4724_v4  ;;  %v2995_v0 = vld [vmem:[%s7369_s10 + $0xe0] sm:$0xff] }
 0x47c   : > { %4388 = vst.msk [vmem:[#allocation5 + $0x30] sm:$0xff] %vm2759_vm9, %v4160_v17  ;;  %6795 = vmatmul.msk.f32.gmra.mxu0 %vm2374_vm0, %v3329_v12  ;;  %6880 = vmatmul.msk.f32.gmra.mxu1 %vm2374_vm0, %v3169_v15  ;;  %v2915_v12 = vld [vmem:[#allocation4 + $0xe0] sm:$0xff]  ;;  %vm4490_vm8 = vcmp.eq.s32.totalorder %v2995_v0, 2  ;;  %vm4650_vm10 = vcmp.eq.s32.totalorder %v2995_v0, 3  ;;  %vm3255_vm11 = vcmp.eq.s32.totalorder %v2995_v0, 1  ;;  %vm3095_vm14 = vcmp.eq.s32.totalorder %v2995_v0, 0 }
 0x47d   : > { %v4570_v18 = vsel %vm4490_vm8, %v2915_v12, 0.0  ;;  %v3335_v25 = vsel %vm3255_vm11, %v2915_v12, 0.0 }
 0x47e   : > { %v5554_v20 = vpop.f32.mrf.mxu3  ;;  %v5057_v21 = vpop.f32.mrf.mxu2 }
 0x47f   : > { %v5555_v23 = vadd.f32 %v5554_v20, %v5057_v21  ;;  %v4730_v21 = vsel %vm4650_vm10, %v2915_v12, 0.0 }
 0x481   : > { %5783 = vst.msk [vmem:[#allocation5 + $0x2b0] sm:$0xff] %vm2759_vm9, %v5555_v23  ;;  %v3665_v26 = vpop.f32.mrf.mxu0  ;;  %v4162_v27 = vpop.f32.mrf.mxu1 }
 0x482   : > { %v4163_v30 = vadd.f32 %v4162_v27, %v3665_v26  ;;  %v3175_v26 = vsel %vm3095_vm14, %v2915_v12, 0.0 }
 0x483   : > { %7051 = vmatmul.msk.f32.gmra.mxu3 %vm2374_vm0, %v4565_v22  ;;  %6966 = vmatmul.msk.f32.gmra.mxu2 %vm2374_vm0, %v4725_v24  ;;  %v2996_v22 = vld [vmem:[%s7369_s10 + $0xe8] sm:$0xff] }
 0x484   : > { %4389 = vst.msk [vmem:[#allocation5 + $0x38] sm:$0xff] %vm2759_vm9, %v4163_v30  ;;  %6796 = vmatmul.msk.f32.gmra.mxu0 %vm2374_vm0, %v3330_v28  ;;  %6881 = vmatmul.msk.f32.gmra.mxu1 %vm2374_vm0, %v3170_v29  ;;  %v2916_v28 = vld [vmem:[#allocation4 + $0xe8] sm:$0xff]  ;;  %vm4491_vm2 = vcmp.eq.s32.totalorder %v2996_v22, 2  ;;  %vm4651_vm3 = vcmp.eq.s32.totalorder %v2996_v22, 3  ;;  %vm3256_vm5 = vcmp.eq.s32.totalorder %v2996_v22, 1  ;;  %vm3096_vm6 = vcmp.eq.s32.totalorder %v2996_v22, 0 }
 0x485   : > { %v4571_v2 = vsel %vm4491_vm2, %v2916_v28, 0.0  ;;  %v3336_v14 = vsel %vm3256_vm5, %v2916_v28, 0.0 }
 0x486   : > { %v5557_v48 = vpop.f32.mrf.mxu3  ;;  %v5060_v10 = vpop.f32.mrf.mxu2 }
 0x487   : > { %v5558_v11 = vadd.f32 %v5557_v48, %v5060_v10  ;;  %v4731_v10 = vsel %vm4651_vm3, %v2916_v28, 0.0 }
 0x489   : > { %5784 = vst.msk [vmem:[#allocation5 + $0x2b8] sm:$0xff] %vm2759_vm9, %v5558_v11  ;;  %v3668_v50 = vpop.f32.mrf.mxu0  ;;  %v4165_v9 = vpop.f32.mrf.mxu1 }
 0x48a   : > { %v4166_v53 = vadd.f32 %v4165_v9, %v3668_v50  ;;  %v3176_v50 = vsel %vm3096_vm6, %v2916_v28, 0.0 }
 0x48b   : > { %7052 = vmatmul.msk.f32.gmra.mxu3 %vm2374_vm0, %v4566_v49  ;;  %6967 = vmatmul.msk.f32.gmra.mxu2 %vm2374_vm0, %v4726_v13  ;;  %v2997_v49 = vld [vmem:[%s7369_s10 + $0xf0] sm:$0xff] }
 0x48c   : > { %4390 = vst.msk [vmem:[#allocation5 + $0x40] sm:$0xff] %vm2759_vm9, %v4166_v53  ;;  %6797 = vmatmul.msk.f32.gmra.mxu0 %vm2374_vm0, %v3331_v51  ;;  %6882 = vmatmul.msk.f32.gmra.mxu1 %vm2374_vm0, %v3171_v52  ;;  %v2917_v51 = vld [vmem:[#allocation4 + $0xf0] sm:$0xff]  ;;  %vm4492_vm7 = vcmp.eq.s32.totalorder %v2997_v49, 2  ;;  %vm4652_vm12 = vcmp.eq.s32.totalorder %v2997_v49, 3  ;;  %vm3257_vm13 = vcmp.eq.s32.totalorder %v2997_v49, 1  ;;  %vm3097_vm15 = vcmp.eq.s32.totalorder %v2997_v49, 0 }
 0x48d   : > { %v4572_v6 = vsel %vm4492_vm7, %v2917_v51, 0.0  ;;  %v3337_v57 = vsel %vm3257_vm13, %v2917_v51, 0.0 }
 0x48e   : > { %v5560_v16 = vpop.f32.mrf.mxu3  ;;  %v5063_v19 = vpop.f32.mrf.mxu2 }
 0x48f   : > { %v5561_v55 = vadd.f32 %v5560_v16, %v5063_v19  ;;  %v4732_v19 = vsel %vm4652_vm12, %v2917_v51, 0.0 }
 0x491   : > { %5785 = vst.msk [vmem:[#allocation5 + $0x2c0] sm:$0xff] %vm2759_vm9, %v5561_v55  ;;  %v3671_v58 = vpop.f32.mrf.mxu0  ;;  %v4168_v59 = vpop.f32.mrf.mxu1 }
 0x492   : > { %v4169_v33 = vadd.f32 %v4168_v59, %v3671_v58  ;;  %v3177_v58 = vsel %vm3097_vm15, %v2917_v51, 0.0 }
 0x493   : > { %7053 = vmatmul.msk.f32.gmra.mxu3 %vm2374_vm0, %v4567_v54  ;;  %6968 = vmatmul.msk.f32.gmra.mxu2 %vm2374_vm0, %v4727_v56  ;;  %v2998_v54 = vld [vmem:[%s7369_s10 + $0xf8] sm:$0xff] }
 0x494   : > { %4391 = vst.msk [vmem:[#allocation5 + $0x48] sm:$0xff] %vm2759_vm9, %v4169_v33  ;;  %6798 = vmatmul.msk.f32.gmra.mxu0 %vm2374_vm0, %v3332_v31  ;;  %6883 = vmatmul.msk.f32.gmra.mxu1 %vm2374_vm0, %v3172_v32  ;;  %v2918_v31 = vld [vmem:[#allocation4 + $0xf8] sm:$0xff]  ;;  %vm4493_vm1 = vcmp.eq.s32.totalorder %v2998_v54, 2  ;;  %vm4653_vm4 = vcmp.eq.s32.totalorder %v2998_v54, 3  ;;  %vm3258_vm8 = vcmp.eq.s32.totalorder %v2998_v54, 1  ;;  %vm3098_vm10 = vcmp.eq.s32.totalorder %v2998_v54, 0 }
 0x495   : > { %v4573_v34 = vsel %vm4493_vm1, %v2918_v31, 0.0  ;;  %v3338_v40 = vsel %vm3258_vm8, %v2918_v31, 0.0 }
 0x496   : > { %v5563_v35 = vpop.f32.mrf.mxu3  ;;  %v5066_v36 = vpop.f32.mrf.mxu2 }
 0x497   : > { %v5564_v38 = vadd.f32 %v5563_v35, %v5066_v36  ;;  %v4733_v36 = vsel %vm4653_vm4, %v2918_v31, 0.0 }
 0x499   : > { %5786 = vst.msk [vmem:[#allocation5 + $0x2c8] sm:$0xff] %vm2759_vm9, %v5564_v38  ;;  %v3674_v41 = vpop.f32.mrf.mxu0  ;;  %v4171_v42 = vpop.f32.mrf.mxu1 }
 0x49a   : > { %v4172_v45 = vadd.f32 %v4171_v42, %v3674_v41  ;;  %v3178_v41 = vsel %vm3098_vm10, %v2918_v31, 0.0 }
 0x49b   : > { %7054 = vmatmul.msk.f32.gmra.mxu3 %vm2374_vm0, %v4568_v37  ;;  %6969 = vmatmul.msk.f32.gmra.mxu2 %vm2374_vm0, %v4728_v39  ;;  %v2999_v37 = vld [vmem:[%s7369_s10 + $0x100] sm:$0xff] }
 0x49c   : > { %4392 = vst.msk [vmem:[#allocation5 + $0x50] sm:$0xff] %vm2759_vm9, %v4172_v45  ;;  %6799 = vmatmul.msk.f32.gmra.mxu0 %vm2374_vm0, %v3333_v43  ;;  %6884 = vmatmul.msk.f32.gmra.mxu1 %vm2374_vm0, %v3173_v44  ;;  %v2919_v43 = vld [vmem:[#allocation4 + $0x100] sm:$0xff]  ;;  %vm4494_vm11 = vcmp.eq.s32.totalorder %v2999_v37, 2  ;;  %vm4654_vm14 = vcmp.eq.s32.totalorder %v2999_v37, 3  ;;  %vm3259_vm2 = vcmp.eq.s32.totalorder %v2999_v37, 1  ;;  %vm3099_vm3 = vcmp.eq.s32.totalorder %v2999_v37, 0 }
 0x49d   : > { %v4574_v46 = vsel %vm4494_vm11, %v2919_v43, 0.0  ;;  %v3339_v0 = vsel %vm3259_vm2, %v2919_v43, 0.0 }
 0x49e   : > { %v5566_v47 = vpop.f32.mrf.mxu3  ;;  %v5069_v60 = vpop.f32.mrf.mxu2 }
 0x49f   : > { %v5567_v62 = vadd.f32 %v5566_v47, %v5069_v60  ;;  %v4734_v60 = vsel %vm4654_vm14, %v2919_v43, 0.0 }
 0x4a1   : > { %5787 = vst.msk [vmem:[#allocation5 + $0x2d0] sm:$0xff] %vm2759_vm9, %v5567_v62  ;;  %v3677_v3 = vpop.f32.mrf.mxu0  ;;  %v4174_v4 = vpop.f32.mrf.mxu1 }
 0x4a2   : > { %v4175_v8 = vadd.f32 %v4174_v4, %v3677_v3  ;;  %v3179_v3 = vsel %vm3099_vm3, %v2919_v43, 0.0 }
 0x4a3   : > { %7055 = vmatmul.msk.f32.gmra.mxu3 %vm2374_vm0, %v4569_v61  ;;  %6970 = vmatmul.msk.f32.gmra.mxu2 %vm2374_vm0, %v4729_v63  ;;  %v3000_v61 = vld [vmem:[%s7369_s10 + $0x108] sm:$0xff] }
 0x4a4   : > { %4393 = vst.msk [vmem:[#allocation5 + $0x58] sm:$0xff] %vm2759_vm9, %v4175_v8  ;;  %6800 = vmatmul.msk.f32.gmra.mxu0 %vm2374_vm0, %v3334_v5  ;;  %6885 = vmatmul.msk.f32.gmra.mxu1 %vm2374_vm0, %v3174_v7  ;;  %v2920_v5 = vld [vmem:[#allocation4 + $0x108] sm:$0xff]  ;;  %vm4495_vm5 = vcmp.eq.s32.totalorder %v3000_v61, 2  ;;  %vm4655_vm6 = vcmp.eq.s32.totalorder %v3000_v61, 3  ;;  %vm3260_vm7 = vcmp.eq.s32.totalorder %v3000_v61, 1  ;;  %vm3100_vm12 = vcmp.eq.s32.totalorder %v3000_v61, 0 }
 0x4a5   : > { %v4575_v12 = vsel %vm4495_vm5, %v2920_v5, 0.0  ;;  %v3340_v22 = vsel %vm3260_vm7, %v2920_v5, 0.0 }
 0x4a6   : > { %v5569_v15 = vpop.f32.mrf.mxu3  ;;  %v5072_v17 = vpop.f32.mrf.mxu2 }
 0x4a7   : > { %v5570_v20 = vadd.f32 %v5569_v15, %v5072_v17  ;;  %v4735_v17 = vsel %vm4655_vm6, %v2920_v5, 0.0 }
 0x4a9   : > { %5788 = vst.msk [vmem:[#allocation5 + $0x2d8] sm:$0xff] %vm2759_vm9, %v5570_v20  ;;  %v3680_v23 = vpop.f32.mrf.mxu0  ;;  %v4177_v24 = vpop.f32.mrf.mxu1 }
 0x4aa   : > { %v4178_v27 = vadd.f32 %v4177_v24, %v3680_v23  ;;  %v3180_v23 = vsel %vm3100_vm12, %v2920_v5, 0.0 }
 0x4ab   : > { %7056 = vmatmul.msk.f32.gmra.mxu3 %vm2374_vm0, %v4570_v18  ;;  %6971 = vmatmul.msk.f32.gmra.mxu2 %vm2374_vm0, %v4730_v21  ;;  %v3001_v18 = vld [vmem:[%s7369_s10 + $0x110] sm:$0xff] }
 0x4ac   : > { %4394 = vst.msk [vmem:[#allocation5 + $0x60] sm:$0xff] %vm2759_vm9, %v4178_v27  ;;  %6801 = vmatmul.msk.f32.gmra.mxu0 %vm2374_vm0, %v3335_v25  ;;  %6886 = vmatmul.msk.f32.gmra.mxu1 %vm2374_vm0, %v3175_v26  ;;  %v2921_v25 = vld [vmem:[#allocation4 + $0x110] sm:$0xff]  ;;  %vm4496_vm13 = vcmp.eq.s32.totalorder %v3001_v18, 2  ;;  %vm4656_vm15 = vcmp.eq.s32.totalorder %v3001_v18, 3  ;;  %vm3261_vm1 = vcmp.eq.s32.totalorder %v3001_v18, 1  ;;  %vm3101_vm4 = vcmp.eq.s32.totalorder %v3001_v18, 0 }
 0x4ad   : > { %v4576_v28 = vsel %vm4496_vm13, %v2921_v25, 0.0  ;;  %v3341_v49 = vsel %vm3261_vm1, %v2921_v25, 0.0 }
 0x4ae   : > { %v5572_v29 = vpop.f32.mrf.mxu3  ;;  %v5075_v30 = vpop.f32.mrf.mxu2 }
 0x4af   : > { %v5573_v48 = vadd.f32 %v5572_v29, %v5075_v30  ;;  %v4736_v30 = vsel %vm4656_vm15, %v2921_v25, 0.0 }
 0x4b1   : > { %5789 = vst.msk [vmem:[#allocation5 + $0x2e0] sm:$0xff] %vm2759_vm9, %v5573_v48  ;;  %v3683_v11 = vpop.f32.mrf.mxu0  ;;  %v4180_v13 = vpop.f32.mrf.mxu1 }
 0x4b2   : > { %v4181_v9 = vadd.f32 %v4180_v13, %v3683_v11  ;;  %v3181_v11 = vsel %vm3101_vm4, %v2921_v25, 0.0 }
 0x4b3   : > { %7057 = vmatmul.msk.f32.gmra.mxu3 %vm2374_vm0, %v4571_v2  ;;  %6972 = vmatmul.msk.f32.gmra.mxu2 %vm2374_vm0, %v4731_v10  ;;  %v3002_v2 = vld [vmem:[%s7369_s10 + $0x118] sm:$0xff] }
 0x4b4   : > { %4395 = vst.msk [vmem:[#allocation5 + $0x68] sm:$0xff] %vm2759_vm9, %v4181_v9  ;;  %6802 = vmatmul.msk.f32.gmra.mxu0 %vm2374_vm0, %v3336_v14  ;;  %6887 = vmatmul.msk.f32.gmra.mxu1 %vm2374_vm0, %v3176_v50  ;;  %v2922_v14 = vld [vmem:[#allocation4 + $0x118] sm:$0xff]  ;;  %vm4497_vm8 = vcmp.eq.s32.totalorder %v3002_v2, 2  ;;  %vm4657_vm10 = vcmp.eq.s32.totalorder %v3002_v2, 3  ;;  %vm3262_vm11 = vcmp.eq.s32.totalorder %v3002_v2, 1  ;;  %vm3102_vm14 = vcmp.eq.s32.totalorder %v3002_v2, 0 }
 0x4b5   : > { %v4577_v51 = vsel %vm4497_vm8, %v2922_v14, 0.0  ;;  %v3342_v54 = vsel %vm3262_vm11, %v2922_v14, 0.0 }
 0x4b6   : > { %v5575_v52 = vpop.f32.mrf.mxu3  ;;  %v5078_v53 = vpop.f32.mrf.mxu2 }
 0x4b7   : > { %v5576_v16 = vadd.f32 %v5575_v52, %v5078_v53  ;;  %v4737_v53 = vsel %vm4657_vm10, %v2922_v14, 0.0 }
 0x4b9   : > { %5790 = vst.msk [vmem:[#allocation5 + $0x2e8] sm:$0xff] %vm2759_vm9, %v5576_v16  ;;  %v3686_v55 = vpop.f32.mrf.mxu0  ;;  %v4183_v56 = vpop.f32.mrf.mxu1 }
 0x4ba   : > { %v4184_v59 = vadd.f32 %v4183_v56, %v3686_v55  ;;  %v3182_v55 = vsel %vm3102_vm14, %v2922_v14, 0.0 }
 0x4bb   : > { %7058 = vmatmul.msk.f32.gmra.mxu3 %vm2374_vm0, %v4572_v6  ;;  %6973 = vmatmul.msk.f32.gmra.mxu2 %vm2374_vm0, %v4732_v19  ;;  %v3003_v6 = vld [vmem:[%s7369_s10 + $0x120] sm:$0xff] }
 0x4bc   : > { %4396 = vst.msk [vmem:[#allocation5 + $0x70] sm:$0xff] %vm2759_vm9, %v4184_v59  ;;  %6803 = vmatmul.msk.f32.gmra.mxu0 %vm2374_vm0, %v3337_v57  ;;  %6888 = vmatmul.msk.f32.gmra.mxu1 %vm2374_vm0, %v3177_v58  ;;  %v2923_v57 = vld [vmem:[#allocation4 + $0x120] sm:$0xff]  ;;  %vm4498_vm2 = vcmp.eq.s32.totalorder %v3003_v6, 2  ;;  %vm4658_vm3 = vcmp.eq.s32.totalorder %v3003_v6, 3  ;;  %vm3263_vm5 = vcmp.eq.s32.totalorder %v3003_v6, 1  ;;  %vm3103_vm6 = vcmp.eq.s32.totalorder %v3003_v6, 0 }
 0x4bd   : > { %v4578_v31 = vsel %vm4498_vm2, %v2923_v57, 0.0  ;;  %v3343_v37 = vsel %vm3263_vm5, %v2923_v57, 0.0 }
 0x4be   : > { %v5578_v32 = vpop.f32.mrf.mxu3  ;;  %v5081_v33 = vpop.f32.mrf.mxu2 }
 0x4bf   : > { %v5579_v35 = vadd.f32 %v5578_v32, %v5081_v33  ;;  %v4738_v33 = vsel %vm4658_vm3, %v2923_v57, 0.0 }
 0x4c1   : > { %5791 = vst.msk [vmem:[#allocation5 + $0x2f0] sm:$0xff] %vm2759_vm9, %v5579_v35  ;;  %v3689_v38 = vpop.f32.mrf.mxu0  ;;  %v4186_v39 = vpop.f32.mrf.mxu1 }
 0x4c2   : > { %v4187_v42 = vadd.f32 %v4186_v39, %v3689_v38  ;;  %v3183_v38 = vsel %vm3103_vm6, %v2923_v57, 0.0 }
 0x4c3   : > { %7059 = vmatmul.msk.f32.gmra.mxu3 %vm2374_vm0, %v4573_v34  ;;  %6974 = vmatmul.msk.f32.gmra.mxu2 %vm2374_vm0, %v4733_v36  ;;  %v3004_v34 = vld [vmem:[%s7369_s10 + $0x128] sm:$0xff] }
 0x4c4   : > { %4397 = vst.msk [vmem:[#allocation5 + $0x78] sm:$0xff] %vm2759_vm9, %v4187_v42  ;;  %6804 = vmatmul.msk.f32.gmra.mxu0 %vm2374_vm0, %v3338_v40  ;;  %6889 = vmatmul.msk.f32.gmra.mxu1 %vm2374_vm0, %v3178_v41  ;;  %v2924_v40 = vld [vmem:[#allocation4 + $0x128] sm:$0xff]  ;;  %vm4499_vm7 = vcmp.eq.s32.totalorder %v3004_v34, 2  ;;  %vm4659_vm12 = vcmp.eq.s32.totalorder %v3004_v34, 3  ;;  %vm3264_vm13 = vcmp.eq.s32.totalorder %v3004_v34, 1  ;;  %vm3104_vm15 = vcmp.eq.s32.totalorder %v3004_v34, 0 }
 0x4c5   : > { %v4579_v43 = vsel %vm4499_vm7, %v2924_v40, 0.0  ;;  %v3344_v61 = vsel %vm3264_vm13, %v2924_v40, 0.0 }
 0x4c6   : > { %v5581_v44 = vpop.f32.mrf.mxu3  ;;  %v5084_v45 = vpop.f32.mrf.mxu2 }
 0x4c7   : > { %v5582_v47 = vadd.f32 %v5581_v44, %v5084_v45  ;;  %v4739_v45 = vsel %vm4659_vm12, %v2924_v40, 0.0 }
 0x4c9   : > { %5792 = vst.msk [vmem:[#allocation5 + $0x2f8] sm:$0xff] %vm2759_vm9, %v5582_v47  ;;  %v3692_v62 = vpop.f32.mrf.mxu0  ;;  %v4189_v63 = vpop.f32.mrf.mxu1 }
 0x4ca   : > { %v4190_v4 = vadd.f32 %v4189_v63, %v3692_v62  ;;  %v3184_v62 = vsel %vm3104_vm15, %v2924_v40, 0.0 }
 0x4cb   : > { %7060 = vmatmul.msk.f32.gmra.mxu3 %vm2374_vm0, %v4574_v46  ;;  %6975 = vmatmul.msk.f32.gmra.mxu2 %vm2374_vm0, %v4734_v60  ;;  %v3005_v46 = vld [vmem:[%s7369_s10 + $0x130] sm:$0xff] }
 0x4cc   : > { %4398 = vst.msk [vmem:[#allocation5 + $0x80] sm:$0xff] %vm2759_vm9, %v4190_v4  ;;  %6805 = vmatmul.msk.f32.gmra.mxu0 %vm2374_vm0, %v3339_v0  ;;  %6890 = vmatmul.msk.f32.gmra.mxu1 %vm2374_vm0, %v3179_v3  ;;  %v2925_v0 = vld [vmem:[#allocation4 + $0x130] sm:$0xff]  ;;  %vm4500_vm1 = vcmp.eq.s32.totalorder %v3005_v46, 2  ;;  %vm4660_vm4 = vcmp.eq.s32.totalorder %v3005_v46, 3  ;;  %vm3265_vm8 = vcmp.eq.s32.totalorder %v3005_v46, 1  ;;  %vm3105_vm10 = vcmp.eq.s32.totalorder %v3005_v46, 0 }
 0x4cd   : > { %v4580_v5 = vsel %vm4500_vm1, %v2925_v0, 0.0  ;;  %v3345_v18 = vsel %vm3265_vm8, %v2925_v0, 0.0 }
 0x4ce   : > { %v5584_v7 = vpop.f32.mrf.mxu3  ;;  %v5087_v8 = vpop.f32.mrf.mxu2 }
 0x4cf   : > { %v5585_v15 = vadd.f32 %v5584_v7, %v5087_v8  ;;  %v4740_v8 = vsel %vm4660_vm4, %v2925_v0, 0.0 }
 0x4d1   : > { %5793 = vst.msk [vmem:[#allocation5 + $0x300] sm:$0xff] %vm2759_vm9, %v5585_v15  ;;  %v3695_v20 = vpop.f32.mrf.mxu0  ;;  %v4192_v21 = vpop.f32.mrf.mxu1 }
 0x4d2   : > { %v4193_v24 = vadd.f32 %v4192_v21, %v3695_v20  ;;  %v3185_v20 = vsel %vm3105_vm10, %v2925_v0, 0.0 }
 0x4d3   : > { %7061 = vmatmul.msk.f32.gmra.mxu3 %vm2374_vm0, %v4575_v12  ;;  %6976 = vmatmul.msk.f32.gmra.mxu2 %vm2374_vm0, %v4735_v17  ;;  %v3006_v12 = vld [vmem:[%s7369_s10 + $0x138] sm:$0xff] }
 0x4d4   : > { %4399 = vst.msk [vmem:[#allocation5 + $0x88] sm:$0xff] %vm2759_vm9, %v4193_v24  ;;  %6806 = vmatmul.msk.f32.gmra.mxu0 %vm2374_vm0, %v3340_v22  ;;  %6891 = vmatmul.msk.f32.gmra.mxu1 %vm2374_vm0, %v3180_v23  ;;  %v2926_v22 = vld [vmem:[#allocation4 + $0x138] sm:$0xff]  ;;  %vm4501_vm11 = vcmp.eq.s32.totalorder %v3006_v12, 2  ;;  %vm4661_vm14 = vcmp.eq.s32.totalorder %v3006_v12, 3  ;;  %vm3266_vm2 = vcmp.eq.s32.totalorder %v3006_v12, 1  ;;  %vm3106_vm3 = vcmp.eq.s32.totalorder %v3006_v12, 0 }
 0x4d5   : > { %v4581_v25 = vsel %vm4501_vm11, %v2926_v22, 0.0  ;;  %v3346_v2 = vsel %vm3266_vm2, %v2926_v22, 0.0 }
 0x4d6   : > { %v5587_v26 = vpop.f32.mrf.mxu3  ;;  %v5090_v27 = vpop.f32.mrf.mxu2 }
 0x4d7   : > { %v5588_v29 = vadd.f32 %v5587_v26, %v5090_v27  ;;  %v4741_v27 = vsel %vm4661_vm14, %v2926_v22, 0.0 }
 0x4d9   : > { %5794 = vst.msk [vmem:[#allocation5 + $0x308] sm:$0xff] %vm2759_vm9, %v5588_v29  ;;  %v3698_v48 = vpop.f32.mrf.mxu0  ;;  %v4195_v10 = vpop.f32.mrf.mxu1 }
 0x4da   : > { %v4196_v13 = vadd.f32 %v4195_v10, %v3698_v48  ;;  %v3186_v48 = vsel %vm3106_vm3, %v2926_v22, 0.0 }
 0x4db   : > { %7062 = vmatmul.msk.f32.gmra.mxu3 %vm2374_vm0, %v4576_v28  ;;  %6977 = vmatmul.msk.f32.gmra.mxu2 %vm2374_vm0, %v4736_v30  ;;  %v3007_v28 = vld [vmem:[%s7369_s10 + $0x140] sm:$0xff] }
 0x4dc   : > { %4400 = vst.msk [vmem:[#allocation5 + $0x90] sm:$0xff] %vm2759_vm9, %v4196_v13  ;;  %6807 = vmatmul.msk.f32.gmra.mxu0 %vm2374_vm0, %v3341_v49  ;;  %6892 = vmatmul.msk.f32.gmra.mxu1 %vm2374_vm0, %v3181_v11  ;;  %v2927_v49 = vld [vmem:[#allocation4 + $0x140] sm:$0xff]  ;;  %vm4502_vm5 = vcmp.eq.s32.totalorder %v3007_v28, 2  ;;  %vm4662_vm6 = vcmp.eq.s32.totalorder %v3007_v28, 3  ;;  %vm3267_vm7 = vcmp.eq.s32.totalorder %v3007_v28, 1  ;;  %vm3107_vm12 = vcmp.eq.s32.totalorder %v3007_v28, 0 }
 0x4dd   : > { %v4582_v14 = vsel %vm4502_vm5, %v2927_v49, 0.0  ;;  %v3347_v6 = vsel %vm3267_vm7, %v2927_v49, 0.0 }
 0x4de   : > { %v5590_v50 = vpop.f32.mrf.mxu3  ;;  %v5093_v9 = vpop.f32.mrf.mxu2 }
 0x4df   : > { %v5591_v52 = vadd.f32 %v5590_v50, %v5093_v9  ;;  %v4742_v9 = vsel %vm4662_vm6, %v2927_v49, 0.0 }
 0x4e1   : > { %5795 = vst.msk [vmem:[#allocation5 + $0x310] sm:$0xff] %vm2759_vm9, %v5591_v52  ;;  %v3701_v16 = vpop.f32.mrf.mxu0  ;;  %v4198_v19 = vpop.f32.mrf.mxu1 }
 0x4e2   : > { %v4199_v56 = vadd.f32 %v4198_v19, %v3701_v16  ;;  %v3187_v16 = vsel %vm3107_vm12, %v2927_v49, 0.0 }
 0x4e3   : > { %7063 = vmatmul.msk.f32.gmra.mxu3 %vm2374_vm0, %v4577_v51  ;;  %6978 = vmatmul.msk.f32.gmra.mxu2 %vm2374_vm0, %v4737_v53  ;;  %v3008_v51 = vld [vmem:[%s7369_s10 + $0x148] sm:$0xff] }
 0x4e4   : > { %4401 = vst.msk [vmem:[#allocation5 + $0x98] sm:$0xff] %vm2759_vm9, %v4199_v56  ;;  %6808 = vmatmul.msk.f32.gmra.mxu0 %vm2374_vm0, %v3342_v54  ;;  %6893 = vmatmul.msk.f32.gmra.mxu1 %vm2374_vm0, %v3182_v55  ;;  %v2928_v54 = vld [vmem:[#allocation4 + $0x148] sm:$0xff]  ;;  %vm4503_vm13 = vcmp.eq.s32.totalorder %v3008_v51, 2  ;;  %vm4663_vm15 = vcmp.eq.s32.totalorder %v3008_v51, 3  ;;  %vm3268_vm1 = vcmp.eq.s32.totalorder %v3008_v51, 1  ;;  %vm3108_vm4 = vcmp.eq.s32.totalorder %v3008_v51, 0 }
 0x4e5   : > { %v4583_v57 = vsel %vm4503_vm13, %v2928_v54, 0.0  ;;  %v3348_v34 = vsel %vm3268_vm1, %v2928_v54, 0.0 }
 0x4e6   : > { %v5593_v58 = vpop.f32.mrf.mxu3  ;;  %v5096_v59 = vpop.f32.mrf.mxu2 }
 0x4e7   : > { %v5594_v32 = vadd.f32 %v5593_v58, %v5096_v59  ;;  %v4743_v59 = vsel %vm4663_vm15, %v2928_v54, 0.0 }
 0x4e9   : > { %5796 = vst.msk [vmem:[#allocation5 + $0x318] sm:$0xff] %vm2759_vm9, %v5594_v32  ;;  %v3704_v35 = vpop.f32.mrf.mxu0  ;;  %v4201_v36 = vpop.f32.mrf.mxu1 }
 0x4ea   : > { %v4202_v39 = vadd.f32 %v4201_v36, %v3704_v35  ;;  %v3188_v35 = vsel %vm3108_vm4, %v2928_v54, 0.0 }
 0x4eb   : > { %7064 = vmatmul.msk.f32.gmra.mxu3 %vm2374_vm0, %v4578_v31  ;;  %6979 = vmatmul.msk.f32.gmra.mxu2 %vm2374_vm0, %v4738_v33  ;;  %v3009_v31 = vld [vmem:[%s7369_s10 + $0x150] sm:$0xff] }
 0x4ec   : > { %4402 = vst.msk [vmem:[#allocation5 + $0xa0] sm:$0xff] %vm2759_vm9, %v4202_v39  ;;  %6809 = vmatmul.msk.f32.gmra.mxu0 %vm2374_vm0, %v3343_v37  ;;  %6894 = vmatmul.msk.f32.gmra.mxu1 %vm2374_vm0, %v3183_v38  ;;  %v2929_v37 = vld [vmem:[#allocation4 + $0x150] sm:$0xff]  ;;  %vm4504_vm8 = vcmp.eq.s32.totalorder %v3009_v31, 2  ;;  %vm4664_vm10 = vcmp.eq.s32.totalorder %v3009_v31, 3  ;;  %vm3269_vm11 = vcmp.eq.s32.totalorder %v3009_v31, 1  ;;  %vm3109_vm14 = vcmp.eq.s32.totalorder %v3009_v31, 0 }
 0x4ed   : > { %v4584_v40 = vsel %vm4504_vm8, %v2929_v37, 0.0  ;;  %v3349_v46 = vsel %vm3269_vm11, %v2929_v37, 0.0 }
 0x4ee   : > { %v5596_v41 = vpop.f32.mrf.mxu3  ;;  %v5099_v42 = vpop.f32.mrf.mxu2 }
 0x4ef   : > { %v5597_v44 = vadd.f32 %v5596_v41, %v5099_v42  ;;  %v4744_v42 = vsel %vm4664_vm10, %v2929_v37, 0.0 }
 0x4f1   : > { %5797 = vst.msk [vmem:[#allocation5 + $0x320] sm:$0xff] %vm2759_vm9, %v5597_v44  ;;  %v3707_v47 = vpop.f32.mrf.mxu0  ;;  %v4204_v60 = vpop.f32.mrf.mxu1 }
 0x4f2   : > { %v4205_v63 = vadd.f32 %v4204_v60, %v3707_v47  ;;  %v3189_v47 = vsel %vm3109_vm14, %v2929_v37, 0.0 }
 0x4f3   : > { %7065 = vmatmul.msk.f32.gmra.mxu3 %vm2374_vm0, %v4579_v43  ;;  %6980 = vmatmul.msk.f32.gmra.mxu2 %vm2374_vm0, %v4739_v45  ;;  %v3010_v43 = vld [vmem:[%s7369_s10 + $0x158] sm:$0xff] }
 0x4f4   : > { %4403 = vst.msk [vmem:[#allocation5 + $0xa8] sm:$0xff] %vm2759_vm9, %v4205_v63  ;;  %6810 = vmatmul.msk.f32.gmra.mxu0 %vm2374_vm0, %v3344_v61  ;;  %6895 = vmatmul.msk.f32.gmra.mxu1 %vm2374_vm0, %v3184_v62  ;;  %v2930_v61 = vld [vmem:[#allocation4 + $0x158] sm:$0xff]  ;;  %vm4505_vm2 = vcmp.eq.s32.totalorder %v3010_v43, 2  ;;  %vm4665_vm3 = vcmp.eq.s32.totalorder %v3010_v43, 3  ;;  %vm3270_vm5 = vcmp.eq.s32.totalorder %v3010_v43, 1  ;;  %vm3110_vm6 = vcmp.eq.s32.totalorder %v3010_v43, 0 }
 0x4f5   : > { %v4585_v0 = vsel %vm4505_vm2, %v2930_v61, 0.0  ;;  %v3350_v12 = vsel %vm3270_vm5, %v2930_v61, 0.0 }
 0x4f6   : > { %v5599_v3 = vpop.f32.mrf.mxu3  ;;  %v5102_v4 = vpop.f32.mrf.mxu2 }
 0x4f7   : > { %v5600_v7 = vadd.f32 %v5599_v3, %v5102_v4  ;;  %v4745_v4 = vsel %vm4665_vm3, %v2930_v61, 0.0 }
 0x4f9   : > { %5798 = vst.msk [vmem:[#allocation5 + $0x328] sm:$0xff] %vm2759_vm9, %v5600_v7  ;;  %v3710_v15 = vpop.f32.mrf.mxu0  ;;  %v4207_v17 = vpop.f32.mrf.mxu1 }
 0x4fa   : > { %v4208_v21 = vadd.f32 %v4207_v17, %v3710_v15  ;;  %v3190_v15 = vsel %vm3110_vm6, %v2930_v61, 0.0 }
 0x4fb   : > { %7066 = vmatmul.msk.f32.gmra.mxu3 %vm2374_vm0, %v4580_v5  ;;  %6981 = vmatmul.msk.f32.gmra.mxu2 %vm2374_vm0, %v4740_v8  ;;  %v3011_v5 = vld [vmem:[%s7369_s10 + $0x160] sm:$0xff] }
 0x4fc   : > { %4404 = vst.msk [vmem:[#allocation5 + $0xb0] sm:$0xff] %vm2759_vm9, %v4208_v21  ;;  %6811 = vmatmul.msk.f32.gmra.mxu0 %vm2374_vm0, %v3345_v18  ;;  %6896 = vmatmul.msk.f32.gmra.mxu1 %vm2374_vm0, %v3185_v20  ;;  %v2931_v18 = vld [vmem:[#allocation4 + $0x160] sm:$0xff]  ;;  %vm4506_vm7 = vcmp.eq.s32.totalorder %v3011_v5, 2  ;;  %vm4666_vm12 = vcmp.eq.s32.totalorder %v3011_v5, 3  ;;  %vm3271_vm13 = vcmp.eq.s32.totalorder %v3011_v5, 1  ;;  %vm3111_vm15 = vcmp.eq.s32.totalorder %v3011_v5, 0 }
 0x4fd   : > { %v4586_v22 = vsel %vm4506_vm7, %v2931_v18, 0.0  ;;  %v3351_v28 = vsel %vm3271_vm13, %v2931_v18, 0.0 }
 0x4fe   : > { %v5602_v23 = vpop.f32.mrf.mxu3  ;;  %v5105_v24 = vpop.f32.mrf.mxu2 }
 0x4ff   : > { %v5603_v26 = vadd.f32 %v5602_v23, %v5105_v24  ;;  %v4746_v24 = vsel %vm4666_vm12, %v2931_v18, 0.0 }
 0x501   : > { %5799 = vst.msk [vmem:[#allocation5 + $0x330] sm:$0xff] %vm2759_vm9, %v5603_v26  ;;  %v3713_v29 = vpop.f32.mrf.mxu0  ;;  %v4210_v30 = vpop.f32.mrf.mxu1 }
 0x502   : > { %v4211_v10 = vadd.f32 %v4210_v30, %v3713_v29  ;;  %v3191_v29 = vsel %vm3111_vm15, %v2931_v18, 0.0 }
 0x503   : > { %7067 = vmatmul.msk.f32.gmra.mxu3 %vm2374_vm0, %v4581_v25  ;;  %6982 = vmatmul.msk.f32.gmra.mxu2 %vm2374_vm0, %v4741_v27  ;;  %v3012_v25 = vld [vmem:[%s7369_s10 + $0x168] sm:$0xff] }
 0x504   : > { %4405 = vst.msk [vmem:[#allocation5 + $0xb8] sm:$0xff] %vm2759_vm9, %v4211_v10  ;;  %6812 = vmatmul.msk.f32.gmra.mxu0 %vm2374_vm0, %v3346_v2  ;;  %6897 = vmatmul.msk.f32.gmra.mxu1 %vm2374_vm0, %v3186_v48  ;;  %v2932_v2 = vld [vmem:[#allocation4 + $0x168] sm:$0xff]  ;;  %vm4507_vm1 = vcmp.eq.s32.totalorder %v3012_v25, 2  ;;  %vm4667_vm4 = vcmp.eq.s32.totalorder %v3012_v25, 3  ;;  %vm3272_vm8 = vcmp.eq.s32.totalorder %v3012_v25, 1  ;;  %vm3112_vm10 = vcmp.eq.s32.totalorder %v3012_v25, 0 }
 0x505   : > { %v4587_v49 = vsel %vm4507_vm1, %v2932_v2, 0.0  ;;  %v3352_v51 = vsel %vm3272_vm8, %v2932_v2, 0.0 }
 0x506   : > { %v5605_v11 = vpop.f32.mrf.mxu3  ;;  %v5108_v13 = vpop.f32.mrf.mxu2 }
 0x507   : > { %v5606_v50 = vadd.f32 %v5605_v11, %v5108_v13  ;;  %v4747_v13 = vsel %vm4667_vm4, %v2932_v2, 0.0 }
 0x509   : > { %5800 = vst.msk [vmem:[#allocation5 + $0x338] sm:$0xff] %vm2759_vm9, %v5606_v50  ;;  %v3716_v52 = vpop.f32.mrf.mxu0  ;;  %v4213_v53 = vpop.f32.mrf.mxu1 }
 0x50a   : > { %v4214_v19 = vadd.f32 %v4213_v53, %v3716_v52  ;;  %v3192_v52 = vsel %vm3112_vm10, %v2932_v2, 0.0 }
 0x50b   : > { %7068 = vmatmul.msk.f32.gmra.mxu3 %vm2374_vm0, %v4582_v14  ;;  %6983 = vmatmul.msk.f32.gmra.mxu2 %vm2374_vm0, %v4742_v9  ;;  %v3013_v14 = vld [vmem:[%s7369_s10 + $0x170] sm:$0xff] }
 0x50c   : > { %4406 = vst.msk [vmem:[#allocation5 + $0xc0] sm:$0xff] %vm2759_vm9, %v4214_v19  ;;  %6813 = vmatmul.msk.f32.gmra.mxu0 %vm2374_vm0, %v3347_v6  ;;  %6898 = vmatmul.msk.f32.gmra.mxu1 %vm2374_vm0, %v3187_v16  ;;  %v2933_v6 = vld [vmem:[#allocation4 + $0x170] sm:$0xff]  ;;  %vm4508_vm11 = vcmp.eq.s32.totalorder %v3013_v14, 2  ;;  %vm4668_vm14 = vcmp.eq.s32.totalorder %v3013_v14, 3  ;;  %vm3273_vm2 = vcmp.eq.s32.totalorder %v3013_v14, 1  ;;  %vm3113_vm3 = vcmp.eq.s32.totalorder %v3013_v14, 0 }
 0x50d   : > { %v4588_v54 = vsel %vm4508_vm11, %v2933_v6, 0.0  ;;  %v3353_v31 = vsel %vm3273_vm2, %v2933_v6, 0.0 }
 0x50e   : > { %v5608_v55 = vpop.f32.mrf.mxu3  ;;  %v5111_v56 = vpop.f32.mrf.mxu2 }
 0x50f   : > { %v5609_v58 = vadd.f32 %v5608_v55, %v5111_v56  ;;  %v4748_v56 = vsel %vm4668_vm14, %v2933_v6, 0.0 }
 0x511   : > { %5801 = vst.msk [vmem:[#allocation5 + $0x340] sm:$0xff] %vm2759_vm9, %v5609_v58  ;;  %v3719_v32 = vpop.f32.mrf.mxu0  ;;  %v4216_v33 = vpop.f32.mrf.mxu1 }
 0x512   : > { %v4217_v36 = vadd.f32 %v4216_v33, %v3719_v32  ;;  %v3193_v32 = vsel %vm3113_vm3, %v2933_v6, 0.0 }
 0x513   : > { %7069 = vmatmul.msk.f32.gmra.mxu3 %vm2374_vm0, %v4583_v57  ;;  %6984 = vmatmul.msk.f32.gmra.mxu2 %vm2374_vm0, %v4743_v59  ;;  %v3014_v57 = vld [vmem:[%s7369_s10 + $0x178] sm:$0xff] }
 0x514   : > { %4407 = vst.msk [vmem:[#allocation5 + $0xc8] sm:$0xff] %vm2759_vm9, %v4217_v36  ;;  %6814 = vmatmul.msk.f32.gmra.mxu0 %vm2374_vm0, %v3348_v34  ;;  %6899 = vmatmul.msk.f32.gmra.mxu1 %vm2374_vm0, %v3188_v35  ;;  %v2934_v34 = vld [vmem:[#allocation4 + $0x178] sm:$0xff]  ;;  %vm4509_vm5 = vcmp.eq.s32.totalorder %v3014_v57, 2  ;;  %vm4669_vm6 = vcmp.eq.s32.totalorder %v3014_v57, 3  ;;  %vm3274_vm7 = vcmp.eq.s32.totalorder %v3014_v57, 1  ;;  %vm3114_vm12 = vcmp.eq.s32.totalorder %v3014_v57, 0 }
 0x515   : > { %v4589_v37 = vsel %vm4509_vm5, %v2934_v34, 0.0  ;;  %v3354_v43 = vsel %vm3274_vm7, %v2934_v34, 0.0 }
 0x516   : > { %v5611_v38 = vpop.f32.mrf.mxu3  ;;  %v5114_v39 = vpop.f32.mrf.mxu2 }
 0x517   : > { %v5612_v41 = vadd.f32 %v5611_v38, %v5114_v39  ;;  %v4749_v39 = vsel %vm4669_vm6, %v2934_v34, 0.0 }
 0x519   : > { %5802 = vst.msk [vmem:[#allocation5 + $0x348] sm:$0xff] %vm2759_vm9, %v5612_v41  ;;  %v3722_v44 = vpop.f32.mrf.mxu0  ;;  %v4219_v45 = vpop.f32.mrf.mxu1 }
 0x51a   : > { %v4220_v60 = vadd.f32 %v4219_v45, %v3722_v44  ;;  %v3194_v44 = vsel %vm3114_vm12, %v2934_v34, 0.0 }
 0x51b   : > { %7070 = vmatmul.msk.f32.gmra.mxu3 %vm2374_vm0, %v4584_v40  ;;  %6985 = vmatmul.msk.f32.gmra.mxu2 %vm2374_vm0, %v4744_v42  ;;  %v3015_v40 = vld [vmem:[%s7369_s10 + $0x180] sm:$0xff] }
 0x51c   : > { %4408 = vst.msk [vmem:[#allocation5 + $0xd0] sm:$0xff] %vm2759_vm9, %v4220_v60  ;;  %6815 = vmatmul.msk.f32.gmra.mxu0 %vm2374_vm0, %v3349_v46  ;;  %6900 = vmatmul.msk.f32.gmra.mxu1 %vm2374_vm0, %v3189_v47  ;;  %v2935_v46 = vld [vmem:[#allocation4 + $0x180] sm:$0xff]  ;;  %vm4510_vm13 = vcmp.eq.s32.totalorder %v3015_v40, 2  ;;  %vm4670_vm15 = vcmp.eq.s32.totalorder %v3015_v40, 3  ;;  %vm3275_vm1 = vcmp.eq.s32.totalorder %v3015_v40, 1  ;;  %vm3115_vm4 = vcmp.eq.s32.totalorder %v3015_v40, 0 }
 0x51d   : > { %v4590_v61 = vsel %vm4510_vm13, %v2935_v46, 0.0  ;;  %v3355_v5 = vsel %vm3275_vm1, %v2935_v46, 0.0 }
 0x51e   : > { %v5614_v62 = vpop.f32.mrf.mxu3  ;;  %v5117_v63 = vpop.f32.mrf.mxu2 }
 0x51f   : > { %v5615_v3 = vadd.f32 %v5614_v62, %v5117_v63  ;;  %v4750_v63 = vsel %vm4670_vm15, %v2935_v46, 0.0 }
 0x521   : > { %5803 = vst.msk [vmem:[#allocation5 + $0x350] sm:$0xff] %vm2759_vm9, %v5615_v3  ;;  %v3725_v7 = vpop.f32.mrf.mxu0  ;;  %v4222_v8 = vpop.f32.mrf.mxu1 }
 0x522   : > { %v4223_v17 = vadd.f32 %v4222_v8, %v3725_v7  ;;  %v3195_v7 = vsel %vm3115_vm4, %v2935_v46, 0.0 }
 0x523   : > { %7071 = vmatmul.msk.f32.gmra.mxu3 %vm2374_vm0, %v4585_v0  ;;  %6986 = vmatmul.msk.f32.gmra.mxu2 %vm2374_vm0, %v4745_v4  ;;  %v3016_v0 = vld [vmem:[%s7369_s10 + $0x188] sm:$0xff] }
 0x524   : > { %4409 = vst.msk [vmem:[#allocation5 + $0xd8] sm:$0xff] %vm2759_vm9, %v4223_v17  ;;  %6816 = vmatmul.msk.f32.gmra.mxu0 %vm2374_vm0, %v3350_v12  ;;  %6901 = vmatmul.msk.f32.gmra.mxu1 %vm2374_vm0, %v3190_v15  ;;  %v2936_v12 = vld [vmem:[#allocation4 + $0x188] sm:$0xff]  ;;  %vm4511_vm8 = vcmp.eq.s32.totalorder %v3016_v0, 2  ;;  %vm4671_vm10 = vcmp.eq.s32.totalorder %v3016_v0, 3  ;;  %vm3276_vm11 = vcmp.eq.s32.totalorder %v3016_v0, 1  ;;  %vm3116_vm14 = vcmp.eq.s32.totalorder %v3016_v0, 0 }
 0x525   : > { %v4591_v18 = vsel %vm4511_vm8, %v2936_v12, 0.0  ;;  %v3356_v25 = vsel %vm3276_vm11, %v2936_v12, 0.0 }
 0x526   : > { %v5617_v20 = vpop.f32.mrf.mxu3  ;;  %v5120_v21 = vpop.f32.mrf.mxu2 }
 0x527   : > { %v5618_v23 = vadd.f32 %v5617_v20, %v5120_v21  ;;  %v4751_v21 = vsel %vm4671_vm10, %v2936_v12, 0.0 }
 0x529   : > { %5804 = vst.msk [vmem:[#allocation5 + $0x358] sm:$0xff] %vm2759_vm9, %v5618_v23  ;;  %v3728_v26 = vpop.f32.mrf.mxu0  ;;  %v4225_v27 = vpop.f32.mrf.mxu1 }
 0x52a   : > { %v4226_v30 = vadd.f32 %v4225_v27, %v3728_v26  ;;  %v3196_v26 = vsel %vm3116_vm14, %v2936_v12, 0.0 }
 0x52b   : > { %7072 = vmatmul.msk.f32.gmra.mxu3 %vm2374_vm0, %v4586_v22  ;;  %6987 = vmatmul.msk.f32.gmra.mxu2 %vm2374_vm0, %v4746_v24  ;;  %v3017_v22 = vld [vmem:[%s7369_s10 + $0x190] sm:$0xff] }
 0x52c   : > { %4410 = vst.msk [vmem:[#allocation5 + $0xe0] sm:$0xff] %vm2759_vm9, %v4226_v30  ;;  %6817 = vmatmul.msk.f32.gmra.mxu0 %vm2374_vm0, %v3351_v28  ;;  %6902 = vmatmul.msk.f32.gmra.mxu1 %vm2374_vm0, %v3191_v29  ;;  %v2937_v28 = vld [vmem:[#allocation4 + $0x190] sm:$0xff]  ;;  %vm4512_vm2 = vcmp.eq.s32.totalorder %v3017_v22, 2  ;;  %vm4672_vm3 = vcmp.eq.s32.totalorder %v3017_v22, 3  ;;  %vm3277_vm5 = vcmp.eq.s32.totalorder %v3017_v22, 1  ;;  %vm3117_vm6 = vcmp.eq.s32.totalorder %v3017_v22, 0 }
 0x52d   : > { %v4592_v2 = vsel %vm4512_vm2, %v2937_v28, 0.0  ;;  %v3357_v14 = vsel %vm3277_vm5, %v2937_v28, 0.0 }
 0x52e   : > { %v5620_v48 = vpop.f32.mrf.mxu3  ;;  %v5123_v10 = vpop.f32.mrf.mxu2 }
 0x52f   : > { %v5621_v11 = vadd.f32 %v5620_v48, %v5123_v10  ;;  %v4752_v10 = vsel %vm4672_vm3, %v2937_v28, 0.0 }
 0x531   : > { %5805 = vst.msk [vmem:[#allocation5 + $0x360] sm:$0xff] %vm2759_vm9, %v5621_v11  ;;  %v3731_v50 = vpop.f32.mrf.mxu0  ;;  %v4228_v9 = vpop.f32.mrf.mxu1 }
 0x532   : > { %v4229_v53 = vadd.f32 %v4228_v9, %v3731_v50  ;;  %v3197_v50 = vsel %vm3117_vm6, %v2937_v28, 0.0 }
 0x533   : > { %7073 = vmatmul.msk.f32.gmra.mxu3 %vm2374_vm0, %v4587_v49  ;;  %6988 = vmatmul.msk.f32.gmra.mxu2 %vm2374_vm0, %v4747_v13  ;;  %v3018_v49 = vld [vmem:[%s7369_s10 + $0x198] sm:$0xff] }
 0x534   : > { %4411 = vst.msk [vmem:[#allocation5 + $0xe8] sm:$0xff] %vm2759_vm9, %v4229_v53  ;;  %6818 = vmatmul.msk.f32.gmra.mxu0 %vm2374_vm0, %v3352_v51  ;;  %6903 = vmatmul.msk.f32.gmra.mxu1 %vm2374_vm0, %v3192_v52  ;;  %v2938_v51 = vld [vmem:[#allocation4 + $0x198] sm:$0xff]  ;;  %vm4513_vm7 = vcmp.eq.s32.totalorder %v3018_v49, 2  ;;  %vm4673_vm12 = vcmp.eq.s32.totalorder %v3018_v49, 3  ;;  %vm3278_vm13 = vcmp.eq.s32.totalorder %v3018_v49, 1  ;;  %vm3118_vm15 = vcmp.eq.s32.totalorder %v3018_v49, 0 }
 0x535   : > { %v4593_v6 = vsel %vm4513_vm7, %v2938_v51, 0.0  ;;  %v3358_v57 = vsel %vm3278_vm13, %v2938_v51, 0.0 }
 0x536   : > { %v5623_v16 = vpop.f32.mrf.mxu3  ;;  %v5126_v19 = vpop.f32.mrf.mxu2 }
 0x537   : > { %v5624_v55 = vadd.f32 %v5623_v16, %v5126_v19  ;;  %v4753_v19 = vsel %vm4673_vm12, %v2938_v51, 0.0 }
 0x539   : > { %5806 = vst.msk [vmem:[#allocation5 + $0x368] sm:$0xff] %vm2759_vm9, %v5624_v55  ;;  %v3734_v58 = vpop.f32.mrf.mxu0  ;;  %v4231_v59 = vpop.f32.mrf.mxu1 }
 0x53a   : > { %v4232_v33 = vadd.f32 %v4231_v59, %v3734_v58  ;;  %v3198_v58 = vsel %vm3118_vm15, %v2938_v51, 0.0 }
 0x53b   : > { %7074 = vmatmul.msk.f32.gmra.mxu3 %vm2374_vm0, %v4588_v54  ;;  %6989 = vmatmul.msk.f32.gmra.mxu2 %vm2374_vm0, %v4748_v56  ;;  %v3019_v54 = vld [vmem:[%s7369_s10 + $0x1a0] sm:$0xff] }
 0x53c   : > { %4412 = vst.msk [vmem:[#allocation5 + $0xf0] sm:$0xff] %vm2759_vm9, %v4232_v33  ;;  %6819 = vmatmul.msk.f32.gmra.mxu0 %vm2374_vm0, %v3353_v31  ;;  %6904 = vmatmul.msk.f32.gmra.mxu1 %vm2374_vm0, %v3193_v32  ;;  %v2939_v31 = vld [vmem:[#allocation4 + $0x1a0] sm:$0xff]  ;;  %vm4514_vm1 = vcmp.eq.s32.totalorder %v3019_v54, 2  ;;  %vm4674_vm4 = vcmp.eq.s32.totalorder %v3019_v54, 3  ;;  %vm3279_vm8 = vcmp.eq.s32.totalorder %v3019_v54, 1  ;;  %vm3119_vm10 = vcmp.eq.s32.totalorder %v3019_v54, 0 }
 0x53d   : > { %v4594_v34 = vsel %vm4514_vm1, %v2939_v31, 0.0  ;;  %v3359_v40 = vsel %vm3279_vm8, %v2939_v31, 0.0 }
 0x53e   : > { %v5626_v35 = vpop.f32.mrf.mxu3  ;;  %v5129_v36 = vpop.f32.mrf.mxu2 }
 0x53f   : > { %v5627_v38 = vadd.f32 %v5626_v35, %v5129_v36  ;;  %v4754_v36 = vsel %vm4674_vm4, %v2939_v31, 0.0 }
 0x541   : > { %5807 = vst.msk [vmem:[#allocation5 + $0x370] sm:$0xff] %vm2759_vm9, %v5627_v38  ;;  %v3737_v41 = vpop.f32.mrf.mxu0  ;;  %v4234_v42 = vpop.f32.mrf.mxu1 }
 0x542   : > { %v4235_v45 = vadd.f32 %v4234_v42, %v3737_v41  ;;  %v3199_v41 = vsel %vm3119_vm10, %v2939_v31, 0.0 }
 0x543   : > { %7075 = vmatmul.msk.f32.gmra.mxu3 %vm2374_vm0, %v4589_v37  ;;  %6990 = vmatmul.msk.f32.gmra.mxu2 %vm2374_vm0, %v4749_v39  ;;  %v3020_v37 = vld [vmem:[%s7369_s10 + $0x1a8] sm:$0xff] }
 0x544   : > { %4413 = vst.msk [vmem:[#allocation5 + $0xf8] sm:$0xff] %vm2759_vm9, %v4235_v45  ;;  %6820 = vmatmul.msk.f32.gmra.mxu0 %vm2374_vm0, %v3354_v43  ;;  %6905 = vmatmul.msk.f32.gmra.mxu1 %vm2374_vm0, %v3194_v44  ;;  %v2940_v43 = vld [vmem:[#allocation4 + $0x1a8] sm:$0xff]  ;;  %vm4515_vm11 = vcmp.eq.s32.totalorder %v3020_v37, 2  ;;  %vm4675_vm14 = vcmp.eq.s32.totalorder %v3020_v37, 3  ;;  %vm3280_vm2 = vcmp.eq.s32.totalorder %v3020_v37, 1  ;;  %vm3120_vm3 = vcmp.eq.s32.totalorder %v3020_v37, 0 }
 0x545   : > { %v4595_v46 = vsel %vm4515_vm11, %v2940_v43, 0.0  ;;  %v3360_v0 = vsel %vm3280_vm2, %v2940_v43, 0.0 }
 0x546   : > { %v5629_v47 = vpop.f32.mrf.mxu3  ;;  %v5132_v60 = vpop.f32.mrf.mxu2 }
 0x547   : > { %v5630_v62 = vadd.f32 %v5629_v47, %v5132_v60  ;;  %v4755_v60 = vsel %vm4675_vm14, %v2940_v43, 0.0 }
 0x549   : > { %5808 = vst.msk [vmem:[#allocation5 + $0x378] sm:$0xff] %vm2759_vm9, %v5630_v62  ;;  %v3740_v3 = vpop.f32.mrf.mxu0  ;;  %v4237_v4 = vpop.f32.mrf.mxu1 }
 0x54a   : > { %v4238_v8 = vadd.f32 %v4237_v4, %v3740_v3  ;;  %v3200_v3 = vsel %vm3120_vm3, %v2940_v43, 0.0 }
 0x54b   : > { %7076 = vmatmul.msk.f32.gmra.mxu3 %vm2374_vm0, %v4590_v61  ;;  %6991 = vmatmul.msk.f32.gmra.mxu2 %vm2374_vm0, %v4750_v63  ;;  %v3021_v61 = vld [vmem:[%s7369_s10 + $0x1b0] sm:$0xff] }
 0x54c   : > { %4414 = vst.msk [vmem:[#allocation5 + $0x100] sm:$0xff] %vm2759_vm9, %v4238_v8  ;;  %6821 = vmatmul.msk.f32.gmra.mxu0 %vm2374_vm0, %v3355_v5  ;;  %6906 = vmatmul.msk.f32.gmra.mxu1 %vm2374_vm0, %v3195_v7  ;;  %v2941_v5 = vld [vmem:[#allocation4 + $0x1b0] sm:$0xff]  ;;  %vm4516_vm5 = vcmp.eq.s32.totalorder %v3021_v61, 2  ;;  %vm4676_vm6 = vcmp.eq.s32.totalorder %v3021_v61, 3  ;;  %vm3281_vm7 = vcmp.eq.s32.totalorder %v3021_v61, 1  ;;  %vm3121_vm12 = vcmp.eq.s32.totalorder %v3021_v61, 0 }
 0x54d   : > { %v4596_v12 = vsel %vm4516_vm5, %v2941_v5, 0.0  ;;  %v3361_v22 = vsel %vm3281_vm7, %v2941_v5, 0.0 }
 0x54e   : > { %v5632_v15 = vpop.f32.mrf.mxu3  ;;  %v5135_v17 = vpop.f32.mrf.mxu2 }
 0x54f   : > { %v5633_v20 = vadd.f32 %v5632_v15, %v5135_v17  ;;  %v4756_v17 = vsel %vm4676_vm6, %v2941_v5, 0.0 }
 0x551   : > { %5809 = vst.msk [vmem:[#allocation5 + $0x380] sm:$0xff] %vm2759_vm9, %v5633_v20  ;;  %v3743_v23 = vpop.f32.mrf.mxu0  ;;  %v4240_v24 = vpop.f32.mrf.mxu1 }
 0x552   : > { %v4241_v27 = vadd.f32 %v4240_v24, %v3743_v23  ;;  %v3201_v23 = vsel %vm3121_vm12, %v2941_v5, 0.0 }
 0x553   : > { %7077 = vmatmul.msk.f32.gmra.mxu3 %vm2374_vm0, %v4591_v18  ;;  %6992 = vmatmul.msk.f32.gmra.mxu2 %vm2374_vm0, %v4751_v21  ;;  %v3022_v18 = vld [vmem:[%s7369_s10 + $0x1b8] sm:$0xff] }
 0x554   : > { %4415 = vst.msk [vmem:[#allocation5 + $0x108] sm:$0xff] %vm2759_vm9, %v4241_v27  ;;  %6822 = vmatmul.msk.f32.gmra.mxu0 %vm2374_vm0, %v3356_v25  ;;  %6907 = vmatmul.msk.f32.gmra.mxu1 %vm2374_vm0, %v3196_v26  ;;  %v2942_v25 = vld [vmem:[#allocation4 + $0x1b8] sm:$0xff]  ;;  %vm4517_vm13 = vcmp.eq.s32.totalorder %v3022_v18, 2  ;;  %vm4677_vm15 = vcmp.eq.s32.totalorder %v3022_v18, 3  ;;  %vm3282_vm1 = vcmp.eq.s32.totalorder %v3022_v18, 1  ;;  %vm3122_vm4 = vcmp.eq.s32.totalorder %v3022_v18, 0 }
 0x555   : > { %v4597_v28 = vsel %vm4517_vm13, %v2942_v25, 0.0  ;;  %v3362_v49 = vsel %vm3282_vm1, %v2942_v25, 0.0 }
 0x556   : > { %v5635_v29 = vpop.f32.mrf.mxu3  ;;  %v5138_v30 = vpop.f32.mrf.mxu2 }
 0x557   : > { %v5636_v48 = vadd.f32 %v5635_v29, %v5138_v30  ;;  %v4757_v30 = vsel %vm4677_vm15, %v2942_v25, 0.0 }
 0x559   : > { %5810 = vst.msk [vmem:[#allocation5 + $0x388] sm:$0xff] %vm2759_vm9, %v5636_v48  ;;  %v3746_v11 = vpop.f32.mrf.mxu0  ;;  %v4243_v13 = vpop.f32.mrf.mxu1 }
 0x55a   : > { %v4244_v9 = vadd.f32 %v4243_v13, %v3746_v11  ;;  %v3202_v11 = vsel %vm3122_vm4, %v2942_v25, 0.0 }
 0x55b   : > { %7078 = vmatmul.msk.f32.gmra.mxu3 %vm2374_vm0, %v4592_v2  ;;  %6993 = vmatmul.msk.f32.gmra.mxu2 %vm2374_vm0, %v4752_v10  ;;  %v3023_v2 = vld [vmem:[%s7369_s10 + $0x1c0] sm:$0xff] }
 0x55c   : > { %4416 = vst.msk [vmem:[#allocation5 + $0x110] sm:$0xff] %vm2759_vm9, %v4244_v9  ;;  %6823 = vmatmul.msk.f32.gmra.mxu0 %vm2374_vm0, %v3357_v14  ;;  %6908 = vmatmul.msk.f32.gmra.mxu1 %vm2374_vm0, %v3197_v50  ;;  %v2943_v14 = vld [vmem:[#allocation4 + $0x1c0] sm:$0xff]  ;;  %vm4518_vm8 = vcmp.eq.s32.totalorder %v3023_v2, 2  ;;  %vm4678_vm10 = vcmp.eq.s32.totalorder %v3023_v2, 3  ;;  %vm3283_vm11 = vcmp.eq.s32.totalorder %v3023_v2, 1  ;;  %vm3123_vm14 = vcmp.eq.s32.totalorder %v3023_v2, 0 }
 0x55d   : > { %v4598_v51 = vsel %vm4518_vm8, %v2943_v14, 0.0  ;;  %v3363_v54 = vsel %vm3283_vm11, %v2943_v14, 0.0 }
 0x55e   : > { %v5638_v52 = vpop.f32.mrf.mxu3  ;;  %v5141_v53 = vpop.f32.mrf.mxu2 }
 0x55f   : > { %v5639_v16 = vadd.f32 %v5638_v52, %v5141_v53  ;;  %v4758_v53 = vsel %vm4678_vm10, %v2943_v14, 0.0 }
 0x561   : > { %5811 = vst.msk [vmem:[#allocation5 + $0x390] sm:$0xff] %vm2759_vm9, %v5639_v16  ;;  %v3749_v55 = vpop.f32.mrf.mxu0  ;;  %v4246_v56 = vpop.f32.mrf.mxu1 }
 0x562   : > { %v4247_v59 = vadd.f32 %v4246_v56, %v3749_v55  ;;  %v3203_v55 = vsel %vm3123_vm14, %v2943_v14, 0.0 }
 0x563   : > { %7079 = vmatmul.msk.f32.gmra.mxu3 %vm2374_vm0, %v4593_v6  ;;  %6994 = vmatmul.msk.f32.gmra.mxu2 %vm2374_vm0, %v4753_v19  ;;  %v3024_v6 = vld [vmem:[%s7369_s10 + $0x1c8] sm:$0xff] }
 0x564   : > { %4417 = vst.msk [vmem:[#allocation5 + $0x118] sm:$0xff] %vm2759_vm9, %v4247_v59  ;;  %6824 = vmatmul.msk.f32.gmra.mxu0 %vm2374_vm0, %v3358_v57  ;;  %6909 = vmatmul.msk.f32.gmra.mxu1 %vm2374_vm0, %v3198_v58  ;;  %v2944_v57 = vld [vmem:[#allocation4 + $0x1c8] sm:$0xff]  ;;  %vm4519_vm2 = vcmp.eq.s32.totalorder %v3024_v6, 2  ;;  %vm4679_vm3 = vcmp.eq.s32.totalorder %v3024_v6, 3  ;;  %vm3284_vm5 = vcmp.eq.s32.totalorder %v3024_v6, 1  ;;  %vm3124_vm6 = vcmp.eq.s32.totalorder %v3024_v6, 0 }
 0x565   : > { %v4599_v31 = vsel %vm4519_vm2, %v2944_v57, 0.0  ;;  %v3364_v37 = vsel %vm3284_vm5, %v2944_v57, 0.0 }
 0x566   : > { %v5641_v32 = vpop.f32.mrf.mxu3  ;;  %v5144_v33 = vpop.f32.mrf.mxu2 }
 0x567   : > { %v5642_v35 = vadd.f32 %v5641_v32, %v5144_v33  ;;  %v4759_v33 = vsel %vm4679_vm3, %v2944_v57, 0.0 }
 0x569   : > { %5812 = vst.msk [vmem:[#allocation5 + $0x398] sm:$0xff] %vm2759_vm9, %v5642_v35  ;;  %v3752_v38 = vpop.f32.mrf.mxu0  ;;  %v4249_v39 = vpop.f32.mrf.mxu1 }
 0x56a   : > { %v4250_v42 = vadd.f32 %v4249_v39, %v3752_v38  ;;  %v3204_v38 = vsel %vm3124_vm6, %v2944_v57, 0.0 }
 0x56b   : > { %7080 = vmatmul.msk.f32.gmra.mxu3 %vm2374_vm0, %v4594_v34  ;;  %6995 = vmatmul.msk.f32.gmra.mxu2 %vm2374_vm0, %v4754_v36  ;;  %v3025_v34 = vld [vmem:[%s7369_s10 + $0x1d0] sm:$0xff] }
 0x56c   : > { %4418 = vst.msk [vmem:[#allocation5 + $0x120] sm:$0xff] %vm2759_vm9, %v4250_v42  ;;  %6825 = vmatmul.msk.f32.gmra.mxu0 %vm2374_vm0, %v3359_v40  ;;  %6910 = vmatmul.msk.f32.gmra.mxu1 %vm2374_vm0, %v3199_v41  ;;  %v2945_v40 = vld [vmem:[#allocation4 + $0x1d0] sm:$0xff]  ;;  %vm4520_vm7 = vcmp.eq.s32.totalorder %v3025_v34, 2  ;;  %vm4680_vm12 = vcmp.eq.s32.totalorder %v3025_v34, 3  ;;  %vm3285_vm13 = vcmp.eq.s32.totalorder %v3025_v34, 1  ;;  %vm3125_vm15 = vcmp.eq.s32.totalorder %v3025_v34, 0 }
 0x56d   : > { %v4600_v43 = vsel %vm4520_vm7, %v2945_v40, 0.0  ;;  %v3365_v61 = vsel %vm3285_vm13, %v2945_v40, 0.0 }
 0x56e   : > { %v5644_v44 = vpop.f32.mrf.mxu3  ;;  %v5147_v45 = vpop.f32.mrf.mxu2 }
 0x56f   : > { %v5645_v47 = vadd.f32 %v5644_v44, %v5147_v45  ;;  %v4760_v45 = vsel %vm4680_vm12, %v2945_v40, 0.0 }
 0x571   : > { %5813 = vst.msk [vmem:[#allocation5 + $0x3a0] sm:$0xff] %vm2759_vm9, %v5645_v47  ;;  %v3755_v62 = vpop.f32.mrf.mxu0  ;;  %v4252_v63 = vpop.f32.mrf.mxu1 }
 0x572   : > { %v4253_v4 = vadd.f32 %v4252_v63, %v3755_v62  ;;  %v3205_v62 = vsel %vm3125_vm15, %v2945_v40, 0.0 }
 0x573   : > { %7081 = vmatmul.msk.f32.gmra.mxu3 %vm2374_vm0, %v4595_v46  ;;  %6996 = vmatmul.msk.f32.gmra.mxu2 %vm2374_vm0, %v4755_v60  ;;  %v3026_v46 = vld [vmem:[%s7369_s10 + $0x1d8] sm:$0xff] }
 0x574   : > { %4419 = vst.msk [vmem:[#allocation5 + $0x128] sm:$0xff] %vm2759_vm9, %v4253_v4  ;;  %6826 = vmatmul.msk.f32.gmra.mxu0 %vm2374_vm0, %v3360_v0  ;;  %6911 = vmatmul.msk.f32.gmra.mxu1 %vm2374_vm0, %v3200_v3  ;;  %v2946_v0 = vld [vmem:[#allocation4 + $0x1d8] sm:$0xff]  ;;  %vm4521_vm1 = vcmp.eq.s32.totalorder %v3026_v46, 2  ;;  %vm4681_vm4 = vcmp.eq.s32.totalorder %v3026_v46, 3  ;;  %vm3286_vm8 = vcmp.eq.s32.totalorder %v3026_v46, 1  ;;  %vm3126_vm10 = vcmp.eq.s32.totalorder %v3026_v46, 0 }
 0x575   : > { %v4601_v5 = vsel %vm4521_vm1, %v2946_v0, 0.0  ;;  %v3366_v18 = vsel %vm3286_vm8, %v2946_v0, 0.0 }
 0x576   : > { %v5647_v7 = vpop.f32.mrf.mxu3  ;;  %v5150_v8 = vpop.f32.mrf.mxu2 }
 0x577   : > { %v5648_v15 = vadd.f32 %v5647_v7, %v5150_v8  ;;  %v4761_v8 = vsel %vm4681_vm4, %v2946_v0, 0.0 }
 0x579   : > { %5814 = vst.msk [vmem:[#allocation5 + $0x3a8] sm:$0xff] %vm2759_vm9, %v5648_v15  ;;  %v3758_v20 = vpop.f32.mrf.mxu0  ;;  %v4255_v21 = vpop.f32.mrf.mxu1 }
 0x57a   : > { %v4256_v24 = vadd.f32 %v4255_v21, %v3758_v20  ;;  %v3206_v20 = vsel %vm3126_vm10, %v2946_v0, 0.0 }
 0x57b   : > { %7082 = vmatmul.msk.f32.gmra.mxu3 %vm2374_vm0, %v4596_v12  ;;  %6997 = vmatmul.msk.f32.gmra.mxu2 %vm2374_vm0, %v4756_v17  ;;  %v3027_v12 = vld [vmem:[%s7369_s10 + $0x1e0] sm:$0xff] }
 0x57c   : > { %4420 = vst.msk [vmem:[#allocation5 + $0x130] sm:$0xff] %vm2759_vm9, %v4256_v24  ;;  %6827 = vmatmul.msk.f32.gmra.mxu0 %vm2374_vm0, %v3361_v22  ;;  %6912 = vmatmul.msk.f32.gmra.mxu1 %vm2374_vm0, %v3201_v23  ;;  %v2947_v22 = vld [vmem:[#allocation4 + $0x1e0] sm:$0xff]  ;;  %vm4522_vm11 = vcmp.eq.s32.totalorder %v3027_v12, 2  ;;  %vm4682_vm14 = vcmp.eq.s32.totalorder %v3027_v12, 3  ;;  %vm3287_vm2 = vcmp.eq.s32.totalorder %v3027_v12, 1  ;;  %vm3127_vm3 = vcmp.eq.s32.totalorder %v3027_v12, 0 }
 0x57d   : > { %v4602_v25 = vsel %vm4522_vm11, %v2947_v22, 0.0  ;;  %v3367_v2 = vsel %vm3287_vm2, %v2947_v22, 0.0 }
 0x57e   : > { %v5650_v26 = vpop.f32.mrf.mxu3  ;;  %v5153_v27 = vpop.f32.mrf.mxu2 }
 0x57f   : > { %v5651_v29 = vadd.f32 %v5650_v26, %v5153_v27  ;;  %v4762_v27 = vsel %vm4682_vm14, %v2947_v22, 0.0 }
 0x581   : > { %5815 = vst.msk [vmem:[#allocation5 + $0x3b0] sm:$0xff] %vm2759_vm9, %v5651_v29  ;;  %v3761_v48 = vpop.f32.mrf.mxu0  ;;  %v4258_v10 = vpop.f32.mrf.mxu1 }
 0x582   : > { %v4259_v13 = vadd.f32 %v4258_v10, %v3761_v48  ;;  %v3207_v48 = vsel %vm3127_vm3, %v2947_v22, 0.0 }
 0x583   : > { %7083 = vmatmul.msk.f32.gmra.mxu3 %vm2374_vm0, %v4597_v28  ;;  %6998 = vmatmul.msk.f32.gmra.mxu2 %vm2374_vm0, %v4757_v30  ;;  %v3028_v28 = vld [vmem:[%s7369_s10 + $0x1e8] sm:$0xff] }
 0x584   : > { %4421 = vst.msk [vmem:[#allocation5 + $0x138] sm:$0xff] %vm2759_vm9, %v4259_v13  ;;  %6828 = vmatmul.msk.f32.gmra.mxu0 %vm2374_vm0, %v3362_v49  ;;  %6913 = vmatmul.msk.f32.gmra.mxu1 %vm2374_vm0, %v3202_v11  ;;  %v2948_v49 = vld [vmem:[#allocation4 + $0x1e8] sm:$0xff]  ;;  %vm4523_vm5 = vcmp.eq.s32.totalorder %v3028_v28, 2  ;;  %vm4683_vm6 = vcmp.eq.s32.totalorder %v3028_v28, 3  ;;  %vm3288_vm7 = vcmp.eq.s32.totalorder %v3028_v28, 1  ;;  %vm3128_vm12 = vcmp.eq.s32.totalorder %v3028_v28, 0 }
 0x585   : > { %v4603_v14 = vsel %vm4523_vm5, %v2948_v49, 0.0  ;;  %v3368_v6 = vsel %vm3288_vm7, %v2948_v49, 0.0 }
 0x586   : > { %v5653_v50 = vpop.f32.mrf.mxu3  ;;  %v5156_v9 = vpop.f32.mrf.mxu2 }
 0x587   : > { %v5654_v52 = vadd.f32 %v5653_v50, %v5156_v9  ;;  %v4763_v9 = vsel %vm4683_vm6, %v2948_v49, 0.0 }
 0x589   : > { %5816 = vst.msk [vmem:[#allocation5 + $0x3b8] sm:$0xff] %vm2759_vm9, %v5654_v52  ;;  %v3764_v16 = vpop.f32.mrf.mxu0  ;;  %v4261_v19 = vpop.f32.mrf.mxu1 }
 0x58a   : > { %v4262_v56 = vadd.f32 %v4261_v19, %v3764_v16  ;;  %v3208_v16 = vsel %vm3128_vm12, %v2948_v49, 0.0 }
 0x58b   : > { %7084 = vmatmul.msk.f32.gmra.mxu3 %vm2374_vm0, %v4598_v51  ;;  %6999 = vmatmul.msk.f32.gmra.mxu2 %vm2374_vm0, %v4758_v53  ;;  %v3029_v51 = vld [vmem:[%s7369_s10 + $0x1f0] sm:$0xff] }
 0x58c   : > { %4422 = vst.msk [vmem:[#allocation5 + $0x140] sm:$0xff] %vm2759_vm9, %v4262_v56  ;;  %6829 = vmatmul.msk.f32.gmra.mxu0 %vm2374_vm0, %v3363_v54  ;;  %6914 = vmatmul.msk.f32.gmra.mxu1 %vm2374_vm0, %v3203_v55  ;;  %v2949_v54 = vld [vmem:[#allocation4 + $0x1f0] sm:$0xff]  ;;  %vm4524_vm13 = vcmp.eq.s32.totalorder %v3029_v51, 2  ;;  %vm4684_vm15 = vcmp.eq.s32.totalorder %v3029_v51, 3  ;;  %vm3289_vm1 = vcmp.eq.s32.totalorder %v3029_v51, 1  ;;  %vm3129_vm4 = vcmp.eq.s32.totalorder %v3029_v51, 0 }
 0x58d   : > { %v4604_v57 = vsel %vm4524_vm13, %v2949_v54, 0.0  ;;  %v3369_v34 = vsel %vm3289_vm1, %v2949_v54, 0.0 }
 0x58e   : > { %v5656_v58 = vpop.f32.mrf.mxu3  ;;  %v5159_v59 = vpop.f32.mrf.mxu2 }
 0x58f   : > { %v5657_v32 = vadd.f32 %v5656_v58, %v5159_v59  ;;  %v4764_v59 = vsel %vm4684_vm15, %v2949_v54, 0.0 }
 0x591   : > { %5817 = vst.msk [vmem:[#allocation5 + $0x3c0] sm:$0xff] %vm2759_vm9, %v5657_v32  ;;  %v3767_v35 = vpop.f32.mrf.mxu0  ;;  %v4264_v36 = vpop.f32.mrf.mxu1 }
 0x592   : > { %v4265_v39 = vadd.f32 %v4264_v36, %v3767_v35  ;;  %v3209_v35 = vsel %vm3129_vm4, %v2949_v54, 0.0 }
 0x593   : > { %7085 = vmatmul.msk.f32.gmra.mxu3 %vm2374_vm0, %v4599_v31  ;;  %7000 = vmatmul.msk.f32.gmra.mxu2 %vm2374_vm0, %v4759_v33  ;;  %v3030_v31 = vld [vmem:[%s7369_s10 + $0x1f8] sm:$0xff] }
 0x594   : > { %4423 = vst.msk [vmem:[#allocation5 + $0x148] sm:$0xff] %vm2759_vm9, %v4265_v39  ;;  %6830 = vmatmul.msk.f32.gmra.mxu0 %vm2374_vm0, %v3364_v37  ;;  %6915 = vmatmul.msk.f32.gmra.mxu1 %vm2374_vm0, %v3204_v38  ;;  %v2950_v37 = vld [vmem:[#allocation4 + $0x1f8] sm:$0xff]  ;;  %vm4525_vm8 = vcmp.eq.s32.totalorder %v3030_v31, 2  ;;  %vm4685_vm10 = vcmp.eq.s32.totalorder %v3030_v31, 3  ;;  %vm3290_vm11 = vcmp.eq.s32.totalorder %v3030_v31, 1  ;;  %vm3130_vm14 = vcmp.eq.s32.totalorder %v3030_v31, 0 }
 0x595   : > { %v4605_v40 = vsel %vm4525_vm8, %v2950_v37, 0.0  ;;  %v3370_v46 = vsel %vm3290_vm11, %v2950_v37, 0.0 }
 0x596   : > { %v5659_v41 = vpop.f32.mrf.mxu3  ;;  %v5162_v42 = vpop.f32.mrf.mxu2 }
 0x597   : > { %v5660_v44 = vadd.f32 %v5659_v41, %v5162_v42  ;;  %v4765_v42 = vsel %vm4685_vm10, %v2950_v37, 0.0 }
 0x599   : > { %5818 = vst.msk [vmem:[#allocation5 + $0x3c8] sm:$0xff] %vm2759_vm9, %v5660_v44  ;;  %v3770_v47 = vpop.f32.mrf.mxu0  ;;  %v4267_v60 = vpop.f32.mrf.mxu1 }
 0x59a   : > { %v4268_v63 = vadd.f32 %v4267_v60, %v3770_v47  ;;  %v3210_v47 = vsel %vm3130_vm14, %v2950_v37, 0.0 }
 0x59b   : > { %7086 = vmatmul.msk.f32.gmra.mxu3 %vm2374_vm0, %v4600_v43  ;;  %7001 = vmatmul.msk.f32.gmra.mxu2 %vm2374_vm0, %v4760_v45  ;;  %v3031_v43 = vld [vmem:[%s7369_s10 + $0x200] sm:$0xff] }
 0x59c   : > { %4424 = vst.msk [vmem:[#allocation5 + $0x150] sm:$0xff] %vm2759_vm9, %v4268_v63  ;;  %6831 = vmatmul.msk.f32.gmra.mxu0 %vm2374_vm0, %v3365_v61  ;;  %6916 = vmatmul.msk.f32.gmra.mxu1 %vm2374_vm0, %v3205_v62  ;;  %v2951_v61 = vld [vmem:[#allocation4 + $0x200] sm:$0xff]  ;;  %vm4526_vm2 = vcmp.eq.s32.totalorder %v3031_v43, 2  ;;  %vm4686_vm3 = vcmp.eq.s32.totalorder %v3031_v43, 3  ;;  %vm3291_vm5 = vcmp.eq.s32.totalorder %v3031_v43, 1  ;;  %vm3131_vm6 = vcmp.eq.s32.totalorder %v3031_v43, 0 }
 0x59d   : > { %v4606_v0 = vsel %vm4526_vm2, %v2951_v61, 0.0  ;;  %v3371_v12 = vsel %vm3291_vm5, %v2951_v61, 0.0 }
 0x59e   : > { %v5662_v3 = vpop.f32.mrf.mxu3  ;;  %v5165_v4 = vpop.f32.mrf.mxu2 }
 0x59f   : > { %v5663_v7 = vadd.f32 %v5662_v3, %v5165_v4  ;;  %v4766_v4 = vsel %vm4686_vm3, %v2951_v61, 0.0 }
 0x5a1   : > { %5819 = vst.msk [vmem:[#allocation5 + $0x3d0] sm:$0xff] %vm2759_vm9, %v5663_v7  ;;  %v3773_v15 = vpop.f32.mrf.mxu0  ;;  %v4270_v17 = vpop.f32.mrf.mxu1 }
 0x5a2   : > { %v4271_v21 = vadd.f32 %v4270_v17, %v3773_v15  ;;  %v3211_v15 = vsel %vm3131_vm6, %v2951_v61, 0.0 }
 0x5a3   : > { %7087 = vmatmul.msk.f32.gmra.mxu3 %vm2374_vm0, %v4601_v5  ;;  %7002 = vmatmul.msk.f32.gmra.mxu2 %vm2374_vm0, %v4761_v8  ;;  %v3032_v5 = vld [vmem:[%s7369_s10 + $0x208] sm:$0xff] }
 0x5a4   : > { %4425 = vst.msk [vmem:[#allocation5 + $0x158] sm:$0xff] %vm2759_vm9, %v4271_v21  ;;  %6832 = vmatmul.msk.f32.gmra.mxu0 %vm2374_vm0, %v3366_v18  ;;  %6917 = vmatmul.msk.f32.gmra.mxu1 %vm2374_vm0, %v3206_v20  ;;  %v2952_v18 = vld [vmem:[#allocation4 + $0x208] sm:$0xff]  ;;  %vm4527_vm7 = vcmp.eq.s32.totalorder %v3032_v5, 2  ;;  %vm4687_vm12 = vcmp.eq.s32.totalorder %v3032_v5, 3  ;;  %vm3292_vm13 = vcmp.eq.s32.totalorder %v3032_v5, 1  ;;  %vm3132_vm15 = vcmp.eq.s32.totalorder %v3032_v5, 0 }
 0x5a5   : > { %v4607_v22 = vsel %vm4527_vm7, %v2952_v18, 0.0  ;;  %v3372_v28 = vsel %vm3292_vm13, %v2952_v18, 0.0 }
 0x5a6   : > { %v5665_v23 = vpop.f32.mrf.mxu3  ;;  %v5168_v24 = vpop.f32.mrf.mxu2 }
 0x5a7   : > { %v5666_v26 = vadd.f32 %v5665_v23, %v5168_v24  ;;  %v4767_v24 = vsel %vm4687_vm12, %v2952_v18, 0.0 }
 0x5a9   : > { %5820 = vst.msk [vmem:[#allocation5 + $0x3d8] sm:$0xff] %vm2759_vm9, %v5666_v26  ;;  %v3776_v29 = vpop.f32.mrf.mxu0  ;;  %v4273_v30 = vpop.f32.mrf.mxu1 }
 0x5aa   : > { %v4274_v10 = vadd.f32 %v4273_v30, %v3776_v29  ;;  %v3212_v29 = vsel %vm3132_vm15, %v2952_v18, 0.0 }
 0x5ab   : > { %7088 = vmatmul.msk.f32.gmra.mxu3 %vm2374_vm0, %v4602_v25  ;;  %7003 = vmatmul.msk.f32.gmra.mxu2 %vm2374_vm0, %v4762_v27  ;;  %v3033_v25 = vld [vmem:[%s7369_s10 + $0x210] sm:$0xff] }
 0x5ac   : > { %4426 = vst.msk [vmem:[#allocation5 + $0x160] sm:$0xff] %vm2759_vm9, %v4274_v10  ;;  %6833 = vmatmul.msk.f32.gmra.mxu0 %vm2374_vm0, %v3367_v2  ;;  %6918 = vmatmul.msk.f32.gmra.mxu1 %vm2374_vm0, %v3207_v48  ;;  %v2953_v2 = vld [vmem:[#allocation4 + $0x210] sm:$0xff]  ;;  %vm4528_vm1 = vcmp.eq.s32.totalorder %v3033_v25, 2  ;;  %vm4688_vm4 = vcmp.eq.s32.totalorder %v3033_v25, 3  ;;  %vm3293_vm8 = vcmp.eq.s32.totalorder %v3033_v25, 1  ;;  %vm3133_vm10 = vcmp.eq.s32.totalorder %v3033_v25, 0 }
 0x5ad   : > { %v4608_v49 = vsel %vm4528_vm1, %v2953_v2, 0.0  ;;  %v3373_v51 = vsel %vm3293_vm8, %v2953_v2, 0.0 }
 0x5ae   : > { %v5668_v11 = vpop.f32.mrf.mxu3  ;;  %v5171_v13 = vpop.f32.mrf.mxu2 }
 0x5af   : > { %v5669_v50 = vadd.f32 %v5668_v11, %v5171_v13  ;;  %v4768_v13 = vsel %vm4688_vm4, %v2953_v2, 0.0 }
 0x5b1   : > { %5821 = vst.msk [vmem:[#allocation5 + $0x3e0] sm:$0xff] %vm2759_vm9, %v5669_v50  ;;  %v3779_v52 = vpop.f32.mrf.mxu0  ;;  %v4276_v53 = vpop.f32.mrf.mxu1 }
 0x5b2   : > { %v4277_v19 = vadd.f32 %v4276_v53, %v3779_v52  ;;  %v3213_v52 = vsel %vm3133_vm10, %v2953_v2, 0.0 }
 0x5b3   : > { %7089 = vmatmul.msk.f32.gmra.mxu3 %vm2374_vm0, %v4603_v14  ;;  %7004 = vmatmul.msk.f32.gmra.mxu2 %vm2374_vm0, %v4763_v9  ;;  %v3034_v14 = vld [vmem:[%s7369_s10 + $0x218] sm:$0xff] }
 0x5b4   : > { %4427 = vst.msk [vmem:[#allocation5 + $0x168] sm:$0xff] %vm2759_vm9, %v4277_v19  ;;  %6834 = vmatmul.msk.f32.gmra.mxu0 %vm2374_vm0, %v3368_v6  ;;  %6919 = vmatmul.msk.f32.gmra.mxu1 %vm2374_vm0, %v3208_v16  ;;  %v2954_v6 = vld [vmem:[#allocation4 + $0x218] sm:$0xff]  ;;  %vm4529_vm11 = vcmp.eq.s32.totalorder %v3034_v14, 2  ;;  %vm4689_vm14 = vcmp.eq.s32.totalorder %v3034_v14, 3  ;;  %vm3294_vm2 = vcmp.eq.s32.totalorder %v3034_v14, 1  ;;  %vm3134_vm3 = vcmp.eq.s32.totalorder %v3034_v14, 0 }
 0x5b5   : > { %v4609_v54 = vsel %vm4529_vm11, %v2954_v6, 0.0  ;;  %v3374_v31 = vsel %vm3294_vm2, %v2954_v6, 0.0 }
 0x5b6   : > { %v5671_v55 = vpop.f32.mrf.mxu3  ;;  %v5174_v56 = vpop.f32.mrf.mxu2 }
 0x5b7   : > { %v5672_v58 = vadd.f32 %v5671_v55, %v5174_v56  ;;  %v4769_v56 = vsel %vm4689_vm14, %v2954_v6, 0.0 }
 0x5b9   : > { %5822 = vst.msk [vmem:[#allocation5 + $0x3e8] sm:$0xff] %vm2759_vm9, %v5672_v58  ;;  %v3782_v32 = vpop.f32.mrf.mxu0  ;;  %v4279_v33 = vpop.f32.mrf.mxu1 }
 0x5ba   : > { %v4280_v36 = vadd.f32 %v4279_v33, %v3782_v32  ;;  %v3214_v32 = vsel %vm3134_vm3, %v2954_v6, 0.0 }
 0x5bb   : > { %7090 = vmatmul.msk.f32.gmra.mxu3 %vm2374_vm0, %v4604_v57  ;;  %7005 = vmatmul.msk.f32.gmra.mxu2 %vm2374_vm0, %v4764_v59  ;;  %v3035_v57 = vld [vmem:[%s7369_s10 + $0x220] sm:$0xff] }
 0x5bc   : > { %4428 = vst.msk [vmem:[#allocation5 + $0x170] sm:$0xff] %vm2759_vm9, %v4280_v36  ;;  %6835 = vmatmul.msk.f32.gmra.mxu0 %vm2374_vm0, %v3369_v34  ;;  %6920 = vmatmul.msk.f32.gmra.mxu1 %vm2374_vm0, %v3209_v35  ;;  %v2955_v34 = vld [vmem:[#allocation4 + $0x220] sm:$0xff]  ;;  %vm4530_vm5 = vcmp.eq.s32.totalorder %v3035_v57, 2  ;;  %vm4690_vm6 = vcmp.eq.s32.totalorder %v3035_v57, 3  ;;  %vm3295_vm7 = vcmp.eq.s32.totalorder %v3035_v57, 1  ;;  %vm3135_vm12 = vcmp.eq.s32.totalorder %v3035_v57, 0 }
 0x5bd   : > { %v4610_v37 = vsel %vm4530_vm5, %v2955_v34, 0.0  ;;  %v3375_v43 = vsel %vm3295_vm7, %v2955_v34, 0.0 }
 0x5be   : > { %v5674_v38 = vpop.f32.mrf.mxu3  ;;  %v5177_v39 = vpop.f32.mrf.mxu2 }
 0x5bf   : > { %v5675_v41 = vadd.f32 %v5674_v38, %v5177_v39  ;;  %v4770_v39 = vsel %vm4690_vm6, %v2955_v34, 0.0 }
 0x5c1   : > { %5823 = vst.msk [vmem:[#allocation5 + $0x3f0] sm:$0xff] %vm2759_vm9, %v5675_v41  ;;  %v3785_v44 = vpop.f32.mrf.mxu0  ;;  %v4282_v45 = vpop.f32.mrf.mxu1 }
 0x5c2   : > { %v4283_v60 = vadd.f32 %v4282_v45, %v3785_v44  ;;  %v3215_v44 = vsel %vm3135_vm12, %v2955_v34, 0.0 }
 0x5c3   : > { %7091 = vmatmul.msk.f32.gmra.mxu3 %vm2374_vm0, %v4605_v40  ;;  %7006 = vmatmul.msk.f32.gmra.mxu2 %vm2374_vm0, %v4765_v42  ;;  %v3036_v40 = vld [vmem:[%s7369_s10 + $0x228] sm:$0xff] }
 0x5c4   : > { %4429 = vst.msk [vmem:[#allocation5 + $0x178] sm:$0xff] %vm2759_vm9, %v4283_v60  ;;  %6836 = vmatmul.msk.f32.gmra.mxu0 %vm2374_vm0, %v3370_v46  ;;  %6921 = vmatmul.msk.f32.gmra.mxu1 %vm2374_vm0, %v3210_v47  ;;  %v2956_v46 = vld [vmem:[#allocation4 + $0x228] sm:$0xff]  ;;  %vm4531_vm13 = vcmp.eq.s32.totalorder %v3036_v40, 2  ;;  %vm4691_vm15 = vcmp.eq.s32.totalorder %v3036_v40, 3  ;;  %vm3296_vm1 = vcmp.eq.s32.totalorder %v3036_v40, 1  ;;  %vm3136_vm4 = vcmp.eq.s32.totalorder %v3036_v40, 0 }
 0x5c5   : > { %v4611_v61 = vsel %vm4531_vm13, %v2956_v46, 0.0  ;;  %v3376_v5 = vsel %vm3296_vm1, %v2956_v46, 0.0 }
 0x5c6   : > { %v5677_v62 = vpop.f32.mrf.mxu3  ;;  %v5180_v63 = vpop.f32.mrf.mxu2 }
 0x5c7   : > { %v5678_v3 = vadd.f32 %v5677_v62, %v5180_v63  ;;  %v4771_v63 = vsel %vm4691_vm15, %v2956_v46, 0.0 }
 0x5c9   : > { %5824 = vst.msk [vmem:[#allocation5 + $0x3f8] sm:$0xff] %vm2759_vm9, %v5678_v3  ;;  %v3788_v7 = vpop.f32.mrf.mxu0  ;;  %v4285_v8 = vpop.f32.mrf.mxu1 }
 0x5ca   : > { %v4286_v17 = vadd.f32 %v4285_v8, %v3788_v7  ;;  %v3216_v7 = vsel %vm3136_vm4, %v2956_v46, 0.0 }
 0x5cb   : > { %7092 = vmatmul.msk.f32.gmra.mxu3 %vm2374_vm0, %v4606_v0  ;;  %7007 = vmatmul.msk.f32.gmra.mxu2 %vm2374_vm0, %v4766_v4  ;;  %v3037_v0 = vld [vmem:[%s7369_s10 + $0x230] sm:$0xff] }
 0x5cc   : > { %4430 = vst.msk [vmem:[#allocation5 + $0x180] sm:$0xff] %vm2759_vm9, %v4286_v17  ;;  %6837 = vmatmul.msk.f32.gmra.mxu0 %vm2374_vm0, %v3371_v12  ;;  %6922 = vmatmul.msk.f32.gmra.mxu1 %vm2374_vm0, %v3211_v15  ;;  %v2957_v12 = vld [vmem:[#allocation4 + $0x230] sm:$0xff]  ;;  %vm4532_vm8 = vcmp.eq.s32.totalorder %v3037_v0, 2  ;;  %vm4692_vm10 = vcmp.eq.s32.totalorder %v3037_v0, 3  ;;  %vm3297_vm11 = vcmp.eq.s32.totalorder %v3037_v0, 1  ;;  %vm3137_vm14 = vcmp.eq.s32.totalorder %v3037_v0, 0 }
 0x5cd   : > { %v4612_v18 = vsel %vm4532_vm8, %v2957_v12, 0.0  ;;  %v3377_v25 = vsel %vm3297_vm11, %v2957_v12, 0.0 }
 0x5ce   : > { %v5680_v20 = vpop.f32.mrf.mxu3  ;;  %v5183_v21 = vpop.f32.mrf.mxu2 }
 0x5cf   : > { %v5681_v23 = vadd.f32 %v5680_v20, %v5183_v21  ;;  %v4772_v21 = vsel %vm4692_vm10, %v2957_v12, 0.0 }
 0x5d1   : > { %5825 = vst.msk [vmem:[#allocation5 + $0x400] sm:$0xff] %vm2759_vm9, %v5681_v23  ;;  %v3791_v26 = vpop.f32.mrf.mxu0  ;;  %v4288_v27 = vpop.f32.mrf.mxu1 }
 0x5d2   : > { %v4289_v30 = vadd.f32 %v4288_v27, %v3791_v26  ;;  %v3217_v26 = vsel %vm3137_vm14, %v2957_v12, 0.0 }
 0x5d3   : > { %7093 = vmatmul.msk.f32.gmra.mxu3 %vm2374_vm0, %v4607_v22  ;;  %7008 = vmatmul.msk.f32.gmra.mxu2 %vm2374_vm0, %v4767_v24  ;;  %v3038_v22 = vld [vmem:[%s7369_s10 + $0x238] sm:$0xff] }
 0x5d4   : > { %4431 = vst.msk [vmem:[#allocation5 + $0x188] sm:$0xff] %vm2759_vm9, %v4289_v30  ;;  %6838 = vmatmul.msk.f32.gmra.mxu0 %vm2374_vm0, %v3372_v28  ;;  %6923 = vmatmul.msk.f32.gmra.mxu1 %vm2374_vm0, %v3212_v29  ;;  %v2958_v28 = vld [vmem:[#allocation4 + $0x238] sm:$0xff]  ;;  %vm4533_vm2 = vcmp.eq.s32.totalorder %v3038_v22, 2  ;;  %vm4693_vm3 = vcmp.eq.s32.totalorder %v3038_v22, 3  ;;  %vm3298_vm5 = vcmp.eq.s32.totalorder %v3038_v22, 1  ;;  %vm3138_vm6 = vcmp.eq.s32.totalorder %v3038_v22, 0 }
 0x5d5   : > { %v4613_v2 = vsel %vm4533_vm2, %v2958_v28, 0.0  ;;  %v3378_v14 = vsel %vm3298_vm5, %v2958_v28, 0.0 }
 0x5d6   : > { %v5683_v48 = vpop.f32.mrf.mxu3  ;;  %v5186_v10 = vpop.f32.mrf.mxu2 }
 0x5d7   : > { %v5684_v11 = vadd.f32 %v5683_v48, %v5186_v10  ;;  %v4773_v10 = vsel %vm4693_vm3, %v2958_v28, 0.0 }
 0x5d9   : > { %5826 = vst.msk [vmem:[#allocation5 + $0x408] sm:$0xff] %vm2759_vm9, %v5684_v11  ;;  %v3794_v50 = vpop.f32.mrf.mxu0  ;;  %v4291_v9 = vpop.f32.mrf.mxu1 }
 0x5da   : > { %v4292_v53 = vadd.f32 %v4291_v9, %v3794_v50  ;;  %v3218_v50 = vsel %vm3138_vm6, %v2958_v28, 0.0 }
 0x5db   : > { %7094 = vmatmul.msk.f32.gmra.mxu3 %vm2374_vm0, %v4608_v49  ;;  %7009 = vmatmul.msk.f32.gmra.mxu2 %vm2374_vm0, %v4768_v13  ;;  %v3039_v49 = vld [vmem:[%s7369_s10 + $0x240] sm:$0xff] }
 0x5dc   : > { %4432 = vst.msk [vmem:[#allocation5 + $0x190] sm:$0xff] %vm2759_vm9, %v4292_v53  ;;  %6839 = vmatmul.msk.f32.gmra.mxu0 %vm2374_vm0, %v3373_v51  ;;  %6924 = vmatmul.msk.f32.gmra.mxu1 %vm2374_vm0, %v3213_v52  ;;  %v2959_v51 = vld [vmem:[#allocation4 + $0x240] sm:$0xff]  ;;  %vm4534_vm7 = vcmp.eq.s32.totalorder %v3039_v49, 2  ;;  %vm4694_vm12 = vcmp.eq.s32.totalorder %v3039_v49, 3  ;;  %vm3299_vm13 = vcmp.eq.s32.totalorder %v3039_v49, 1  ;;  %vm3139_vm15 = vcmp.eq.s32.totalorder %v3039_v49, 0 }
 0x5dd   : > { %v4614_v6 = vsel %vm4534_vm7, %v2959_v51, 0.0  ;;  %v3379_v57 = vsel %vm3299_vm13, %v2959_v51, 0.0 }
 0x5de   : > { %v5686_v16 = vpop.f32.mrf.mxu3  ;;  %v5189_v19 = vpop.f32.mrf.mxu2 }
 0x5df   : > { %v5687_v55 = vadd.f32 %v5686_v16, %v5189_v19  ;;  %v4774_v19 = vsel %vm4694_vm12, %v2959_v51, 0.0 }
 0x5e1   : > { %5827 = vst.msk [vmem:[#allocation5 + $0x410] sm:$0xff] %vm2759_vm9, %v5687_v55  ;;  %v3797_v58 = vpop.f32.mrf.mxu0  ;;  %v4294_v59 = vpop.f32.mrf.mxu1 }
 0x5e2   : > { %v4295_v33 = vadd.f32 %v4294_v59, %v3797_v58  ;;  %v3219_v58 = vsel %vm3139_vm15, %v2959_v51, 0.0 }
 0x5e3   : > { %7095 = vmatmul.msk.f32.gmra.mxu3 %vm2374_vm0, %v4609_v54  ;;  %7010 = vmatmul.msk.f32.gmra.mxu2 %vm2374_vm0, %v4769_v56  ;;  %v3040_v54 = vld [vmem:[%s7369_s10 + $0x248] sm:$0xff] }
 0x5e4   : > { %4433 = vst.msk [vmem:[#allocation5 + $0x198] sm:$0xff] %vm2759_vm9, %v4295_v33  ;;  %6840 = vmatmul.msk.f32.gmra.mxu0 %vm2374_vm0, %v3374_v31  ;;  %6925 = vmatmul.msk.f32.gmra.mxu1 %vm2374_vm0, %v3214_v32  ;;  %v2960_v31 = vld [vmem:[#allocation4 + $0x248] sm:$0xff]  ;;  %vm4535_vm1 = vcmp.eq.s32.totalorder %v3040_v54, 2  ;;  %vm4695_vm4 = vcmp.eq.s32.totalorder %v3040_v54, 3  ;;  %vm3300_vm8 = vcmp.eq.s32.totalorder %v3040_v54, 1  ;;  %vm3140_vm10 = vcmp.eq.s32.totalorder %v3040_v54, 0 }
 0x5e5   : > { %v4615_v34 = vsel %vm4535_vm1, %v2960_v31, 0.0  ;;  %v3380_v40 = vsel %vm3300_vm8, %v2960_v31, 0.0 }
 0x5e6   : > { %v5689_v35 = vpop.f32.mrf.mxu3  ;;  %v5192_v36 = vpop.f32.mrf.mxu2 }
 0x5e7   : > { %v5690_v38 = vadd.f32 %v5689_v35, %v5192_v36  ;;  %v4775_v36 = vsel %vm4695_vm4, %v2960_v31, 0.0 }
 0x5e9   : > { %5828 = vst.msk [vmem:[#allocation5 + $0x418] sm:$0xff] %vm2759_vm9, %v5690_v38  ;;  %v3800_v41 = vpop.f32.mrf.mxu0  ;;  %v4297_v42 = vpop.f32.mrf.mxu1 }
 0x5ea   : > { %v4298_v45 = vadd.f32 %v4297_v42, %v3800_v41  ;;  %v3220_v41 = vsel %vm3140_vm10, %v2960_v31, 0.0 }
 0x5eb   : > { %7096 = vmatmul.msk.f32.gmra.mxu3 %vm2374_vm0, %v4610_v37  ;;  %7011 = vmatmul.msk.f32.gmra.mxu2 %vm2374_vm0, %v4770_v39  ;;  %v3041_v37 = vld [vmem:[%s7369_s10 + $0x250] sm:$0xff] }
 0x5ec   : > { %4434 = vst.msk [vmem:[#allocation5 + $0x1a0] sm:$0xff] %vm2759_vm9, %v4298_v45  ;;  %6841 = vmatmul.msk.f32.gmra.mxu0 %vm2374_vm0, %v3375_v43  ;;  %6926 = vmatmul.msk.f32.gmra.mxu1 %vm2374_vm0, %v3215_v44  ;;  %v2961_v43 = vld [vmem:[#allocation4 + $0x250] sm:$0xff]  ;;  %vm4536_vm11 = vcmp.eq.s32.totalorder %v3041_v37, 2  ;;  %vm4696_vm14 = vcmp.eq.s32.totalorder %v3041_v37, 3  ;;  %vm3301_vm2 = vcmp.eq.s32.totalorder %v3041_v37, 1  ;;  %vm3141_vm3 = vcmp.eq.s32.totalorder %v3041_v37, 0 }
 0x5ed   : > { %v4616_v46 = vsel %vm4536_vm11, %v2961_v43, 0.0  ;;  %v3381_v0 = vsel %vm3301_vm2, %v2961_v43, 0.0 }
 0x5ee   : > { %v5692_v47 = vpop.f32.mrf.mxu3  ;;  %v5195_v60 = vpop.f32.mrf.mxu2 }
 0x5ef   : > { %v5693_v62 = vadd.f32 %v5692_v47, %v5195_v60  ;;  %v4776_v60 = vsel %vm4696_vm14, %v2961_v43, 0.0 }
 0x5f1   : > { %5829 = vst.msk [vmem:[#allocation5 + $0x420] sm:$0xff] %vm2759_vm9, %v5693_v62  ;;  %v3803_v3 = vpop.f32.mrf.mxu0  ;;  %v4300_v4 = vpop.f32.mrf.mxu1 }
 0x5f2   : > { %v4301_v8 = vadd.f32 %v4300_v4, %v3803_v3  ;;  %v3221_v3 = vsel %vm3141_vm3, %v2961_v43, 0.0 }
 0x5f3   : > { %7097 = vmatmul.msk.f32.gmra.mxu3 %vm2374_vm0, %v4611_v61  ;;  %7012 = vmatmul.msk.f32.gmra.mxu2 %vm2374_vm0, %v4771_v63  ;;  %v3042_v61 = vld [vmem:[%s7369_s10 + $0x258] sm:$0xff] }
 0x5f4   : > { %4435 = vst.msk [vmem:[#allocation5 + $0x1a8] sm:$0xff] %vm2759_vm9, %v4301_v8  ;;  %6842 = vmatmul.msk.f32.gmra.mxu0 %vm2374_vm0, %v3376_v5  ;;  %6927 = vmatmul.msk.f32.gmra.mxu1 %vm2374_vm0, %v3216_v7  ;;  %v2962_v5 = vld [vmem:[#allocation4 + $0x258] sm:$0xff]  ;;  %vm4537_vm5 = vcmp.eq.s32.totalorder %v3042_v61, 2  ;;  %vm4697_vm6 = vcmp.eq.s32.totalorder %v3042_v61, 3  ;;  %vm3302_vm7 = vcmp.eq.s32.totalorder %v3042_v61, 1  ;;  %vm3142_vm12 = vcmp.eq.s32.totalorder %v3042_v61, 0 }
 0x5f5   : > { %v4617_v12 = vsel %vm4537_vm5, %v2962_v5, 0.0  ;;  %v3382_v22 = vsel %vm3302_vm7, %v2962_v5, 0.0 }
 0x5f6   : > { %v5695_v15 = vpop.f32.mrf.mxu3  ;;  %v5198_v17 = vpop.f32.mrf.mxu2 }
 0x5f7   : > { %v5696_v20 = vadd.f32 %v5695_v15, %v5198_v17  ;;  %v4777_v17 = vsel %vm4697_vm6, %v2962_v5, 0.0 }
 0x5f9   : > { %5830 = vst.msk [vmem:[#allocation5 + $0x428] sm:$0xff] %vm2759_vm9, %v5696_v20  ;;  %v3806_v23 = vpop.f32.mrf.mxu0  ;;  %v4303_v24 = vpop.f32.mrf.mxu1 }
 0x5fa   : > { %v4304_v27 = vadd.f32 %v4303_v24, %v3806_v23  ;;  %v3222_v23 = vsel %vm3142_vm12, %v2962_v5, 0.0 }
 0x5fb   : > { %7098 = vmatmul.msk.f32.gmra.mxu3 %vm2374_vm0, %v4612_v18  ;;  %7013 = vmatmul.msk.f32.gmra.mxu2 %vm2374_vm0, %v4772_v21  ;;  %v3043_v18 = vld [vmem:[%s7369_s10 + $0x260] sm:$0xff] }
 0x5fc   : > { %4436 = vst.msk [vmem:[#allocation5 + $0x1b0] sm:$0xff] %vm2759_vm9, %v4304_v27  ;;  %6843 = vmatmul.msk.f32.gmra.mxu0 %vm2374_vm0, %v3377_v25  ;;  %6928 = vmatmul.msk.f32.gmra.mxu1 %vm2374_vm0, %v3217_v26  ;;  %v2963_v25 = vld [vmem:[#allocation4 + $0x260] sm:$0xff]  ;;  %vm4538_vm13 = vcmp.eq.s32.totalorder %v3043_v18, 2  ;;  %vm4698_vm15 = vcmp.eq.s32.totalorder %v3043_v18, 3  ;;  %vm3303_vm1 = vcmp.eq.s32.totalorder %v3043_v18, 1  ;;  %vm3143_vm4 = vcmp.eq.s32.totalorder %v3043_v18, 0 }
 0x5fd   : > { %v4618_v28 = vsel %vm4538_vm13, %v2963_v25, 0.0  ;;  %v3383_v49 = vsel %vm3303_vm1, %v2963_v25, 0.0 }
 0x5fe   : > { %v5698_v29 = vpop.f32.mrf.mxu3  ;;  %v5201_v30 = vpop.f32.mrf.mxu2 }
 0x5ff   : > { %v5699_v48 = vadd.f32 %v5698_v29, %v5201_v30  ;;  %v4778_v30 = vsel %vm4698_vm15, %v2963_v25, 0.0 }
 0x601   : > { %5831 = vst.msk [vmem:[#allocation5 + $0x430] sm:$0xff] %vm2759_vm9, %v5699_v48  ;;  %v3809_v11 = vpop.f32.mrf.mxu0  ;;  %v4306_v13 = vpop.f32.mrf.mxu1 }
 0x602   : > { %v4307_v9 = vadd.f32 %v4306_v13, %v3809_v11  ;;  %v3223_v11 = vsel %vm3143_vm4, %v2963_v25, 0.0 }
 0x603   : > { %7099 = vmatmul.msk.f32.gmra.mxu3 %vm2374_vm0, %v4613_v2  ;;  %7014 = vmatmul.msk.f32.gmra.mxu2 %vm2374_vm0, %v4773_v10  ;;  %v3044_v2 = vld [vmem:[%s7369_s10 + $0x268] sm:$0xff] }
 0x604   : > { %4437 = vst.msk [vmem:[#allocation5 + $0x1b8] sm:$0xff] %vm2759_vm9, %v4307_v9  ;;  %6844 = vmatmul.msk.f32.gmra.mxu0 %vm2374_vm0, %v3378_v14  ;;  %6929 = vmatmul.msk.f32.gmra.mxu1 %vm2374_vm0, %v3218_v50  ;;  %v2964_v14 = vld [vmem:[#allocation4 + $0x268] sm:$0xff]  ;;  %vm4539_vm8 = vcmp.eq.s32.totalorder %v3044_v2, 2  ;;  %vm4699_vm10 = vcmp.eq.s32.totalorder %v3044_v2, 3  ;;  %vm3304_vm11 = vcmp.eq.s32.totalorder %v3044_v2, 1  ;;  %vm3144_vm14 = vcmp.eq.s32.totalorder %v3044_v2, 0 }
 0x605   : > { %v4619_v51 = vsel %vm4539_vm8, %v2964_v14, 0.0  ;;  %v3384_v54 = vsel %vm3304_vm11, %v2964_v14, 0.0 }
 0x606   : > { %v5701_v52 = vpop.f32.mrf.mxu3  ;;  %v5204_v53 = vpop.f32.mrf.mxu2 }
 0x607   : > { %v5702_v16 = vadd.f32 %v5701_v52, %v5204_v53  ;;  %v4779_v53 = vsel %vm4699_vm10, %v2964_v14, 0.0 }
 0x609   : > { %5832 = vst.msk [vmem:[#allocation5 + $0x438] sm:$0xff] %vm2759_vm9, %v5702_v16  ;;  %v3812_v55 = vpop.f32.mrf.mxu0  ;;  %v4309_v56 = vpop.f32.mrf.mxu1 }
 0x60a   : > { %v4310_v59 = vadd.f32 %v4309_v56, %v3812_v55  ;;  %v3224_v55 = vsel %vm3144_vm14, %v2964_v14, 0.0 }
 0x60b   : > { %7100 = vmatmul.msk.f32.gmra.mxu3 %vm2374_vm0, %v4614_v6  ;;  %7015 = vmatmul.msk.f32.gmra.mxu2 %vm2374_vm0, %v4774_v19  ;;  %v3045_v6 = vld [vmem:[%s7369_s10 + $0x270] sm:$0xff] }
 0x60c   : > { %4438 = vst.msk [vmem:[#allocation5 + $0x1c0] sm:$0xff] %vm2759_vm9, %v4310_v59  ;;  %6845 = vmatmul.msk.f32.gmra.mxu0 %vm2374_vm0, %v3379_v57  ;;  %6930 = vmatmul.msk.f32.gmra.mxu1 %vm2374_vm0, %v3219_v58  ;;  %v2965_v57 = vld [vmem:[#allocation4 + $0x270] sm:$0xff]  ;;  %vm4540_vm2 = vcmp.eq.s32.totalorder %v3045_v6, 2  ;;  %vm4700_vm3 = vcmp.eq.s32.totalorder %v3045_v6, 3  ;;  %vm3305_vm5 = vcmp.eq.s32.totalorder %v3045_v6, 1  ;;  %vm3145_vm6 = vcmp.eq.s32.totalorder %v3045_v6, 0 }
 0x60d   : > { %v4620_v31 = vsel %vm4540_vm2, %v2965_v57, 0.0  ;;  %v3385_v37 = vsel %vm3305_vm5, %v2965_v57, 0.0 }
 0x60e   : > { %v5704_v32 = vpop.f32.mrf.mxu3  ;;  %v5207_v33 = vpop.f32.mrf.mxu2 }
 0x60f   : > { %v5705_v35 = vadd.f32 %v5704_v32, %v5207_v33  ;;  %v4780_v33 = vsel %vm4700_vm3, %v2965_v57, 0.0 }
 0x611   : > { %5833 = vst.msk [vmem:[#allocation5 + $0x440] sm:$0xff] %vm2759_vm9, %v5705_v35  ;;  %v3815_v38 = vpop.f32.mrf.mxu0  ;;  %v4312_v39 = vpop.f32.mrf.mxu1 }
 0x612   : > { %v4313_v42 = vadd.f32 %v4312_v39, %v3815_v38  ;;  %v3225_v38 = vsel %vm3145_vm6, %v2965_v57, 0.0 }
 0x613   : > { %7101 = vmatmul.msk.f32.gmra.mxu3 %vm2374_vm0, %v4615_v34  ;;  %7016 = vmatmul.msk.f32.gmra.mxu2 %vm2374_vm0, %v4775_v36  ;;  %v3046_v34 = vld [vmem:[%s7369_s10 + $0x278] sm:$0xff]  ;;  %s9126_s10 = smov 0  }
 0x614   : > { %4439 = vst.msk [vmem:[#allocation5 + $0x1c8] sm:$0xff] %vm2759_vm9, %v4313_v42  ;;  %6846 = vmatmul.msk.f32.gmra.mxu0 %vm2374_vm0, %v3380_v40  ;;  %6931 = vmatmul.msk.f32.gmra.mxu1 %vm2374_vm0, %v3220_v41  ;;  %v2966_v40 = vld [vmem:[#allocation4 + $0x278] sm:$0xff]  ;;  %vm4541_vm7 = vcmp.eq.s32.totalorder %v3046_v34, 2  ;;  %vm4701_vm12 = vcmp.eq.s32.totalorder %v3046_v34, 3  ;;  %vm3306_vm13 = vcmp.eq.s32.totalorder %v3046_v34, 1  ;;  %vm3146_vm15 = vcmp.eq.s32.totalorder %v3046_v34, 0 }
 0x615   : > { %v4621_v43 = vsel %vm4541_vm7, %v2966_v40, 0.0  ;;  %v3226_v61 = vsel %vm3146_vm15, %v2966_v40, 0.0 }
 0x616   : > { %v5707_v44 = vpop.f32.mrf.mxu3  ;;  %v5210_v45 = vpop.f32.mrf.mxu2 }
 0x617   : > { %v5708_v47 = vadd.f32 %v5707_v44, %v5210_v45  ;;  %v4781_v45 = vsel %vm4701_vm12, %v2966_v40, 0.0 }
 0x619   : > { %5834 = vst.msk [vmem:[#allocation5 + $0x448] sm:$0xff] %vm2759_vm9, %v5708_v47  ;;  %v3818_v62 = vpop.f32.mrf.mxu0  ;;  %v4315_v63 = vpop.f32.mrf.mxu1 }
 0x61a   : > { %v4316_v4 = vadd.f32 %v4315_v63, %v3818_v62 }
 0x61b   : > { %7102 = vmatmul.msk.f32.gmra.mxu3 %vm2374_vm0, %v4616_v46  ;;  %7017 = vmatmul.msk.f32.gmra.mxu2 %vm2374_vm0, %v4776_v60  ;;  %v3386_v60 = vsel %vm3306_vm13, %v2966_v40, 0.0 }
 0x61c   : > { %4440 = vst.msk [vmem:[#allocation5 + $0x1d0] sm:$0xff] %vm2759_vm9, %v4316_v4  ;;  %6847 = vmatmul.msk.f32.gmra.mxu0 %vm2374_vm0, %v3381_v0  ;;  %6932 = vmatmul.msk.f32.gmra.mxu1 %vm2374_vm0, %v3221_v3 }
 0x61e   : > { %v5710_v7 = vpop.f32.mrf.mxu3  ;;  %v5213_v8 = vpop.f32.mrf.mxu2 }
 0x61f   : > { %v5711_v15 = vadd.f32 %v5710_v7, %v5213_v8 }
 0x621   : > { %5835 = vst.msk [vmem:[#allocation5 + $0x450] sm:$0xff] %vm2759_vm9, %v5711_v15  ;;  %v3821_v20 = vpop.f32.mrf.mxu0  ;;  %v4318_v21 = vpop.f32.mrf.mxu1 }
 0x622   : > { %v4319_v24 = vadd.f32 %v4318_v21, %v3821_v20 }
 0x623   : > { %7103 = vmatmul.msk.f32.gmra.mxu3 %vm2374_vm0, %v4617_v12  ;;  %7018 = vmatmul.msk.f32.gmra.mxu2 %vm2374_vm0, %v4777_v17 }
 0x624   : > { %4441 = vst.msk [vmem:[#allocation5 + $0x1d8] sm:$0xff] %vm2759_vm9, %v4319_v24  ;;  %6848 = vmatmul.msk.f32.gmra.mxu0 %vm2374_vm0, %v3382_v22  ;;  %6933 = vmatmul.msk.f32.gmra.mxu1 %vm2374_vm0, %v3222_v23 }
 0x626   : > { %v5713_v26 = vpop.f32.mrf.mxu3  ;;  %v5216_v27 = vpop.f32.mrf.mxu2 }
 0x627   : > { %v5714_v29 = vadd.f32 %v5713_v26, %v5216_v27 }
 0x629   : > { %5836 = vst.msk [vmem:[#allocation5 + $0x458] sm:$0xff] %vm2759_vm9, %v5714_v29  ;;  %v3824_v48 = vpop.f32.mrf.mxu0  ;;  %v4321_v10 = vpop.f32.mrf.mxu1 }
 0x62a   : > { %v4322_v13 = vadd.f32 %v4321_v10, %v3824_v48 }
 0x62b   : > { %7104 = vmatmul.msk.f32.gmra.mxu3 %vm2374_vm0, %v4618_v28  ;;  %7019 = vmatmul.msk.f32.gmra.mxu2 %vm2374_vm0, %v4778_v30 }
 0x62c   : > { %4442 = vst.msk [vmem:[#allocation5 + $0x1e0] sm:$0xff] %vm2759_vm9, %v4322_v13  ;;  %6849 = vmatmul.msk.f32.gmra.mxu0 %vm2374_vm0, %v3383_v49  ;;  %6934 = vmatmul.msk.f32.gmra.mxu1 %vm2374_vm0, %v3223_v11 }
 0x62e   : > { %v5716_v50 = vpop.f32.mrf.mxu3  ;;  %v5219_v9 = vpop.f32.mrf.mxu2 }
 0x62f   : > { %v5717_v52 = vadd.f32 %v5716_v50, %v5219_v9 }
 0x631   : > { %5837 = vst.msk [vmem:[#allocation5 + $0x460] sm:$0xff] %vm2759_vm9, %v5717_v52  ;;  %v3827_v16 = vpop.f32.mrf.mxu0  ;;  %v4324_v19 = vpop.f32.mrf.mxu1 }
 0x632   : > { %v4325_v56 = vadd.f32 %v4324_v19, %v3827_v16 }
 0x633   : > { %7105 = vmatmul.msk.f32.gmra.mxu3 %vm2374_vm0, %v4619_v51  ;;  %7020 = vmatmul.msk.f32.gmra.mxu2 %vm2374_vm0, %v4779_v53 }
 0x634   : > { %4443 = vst.msk [vmem:[#allocation5 + $0x1e8] sm:$0xff] %vm2759_vm9, %v4325_v56  ;;  %6850 = vmatmul.msk.f32.gmra.mxu0 %vm2374_vm0, %v3384_v54  ;;  %6935 = vmatmul.msk.f32.gmra.mxu1 %vm2374_vm0, %v3224_v55 }
 0x636   : > { %v5719_v58 = vpop.f32.mrf.mxu3  ;;  %v5222_v59 = vpop.f32.mrf.mxu2 }
 0x637   : > { %v5720_v32 = vadd.f32 %v5719_v58, %v5222_v59 }
 0x639   : > { %5838 = vst.msk [vmem:[#allocation5 + $0x468] sm:$0xff] %vm2759_vm9, %v5720_v32  ;;  %v3830_v35 = vpop.f32.mrf.mxu0  ;;  %v4327_v36 = vpop.f32.mrf.mxu1 }
 0x63a   : > { %v4328_v39 = vadd.f32 %v4327_v36, %v3830_v35 }
 0x63b   : > { %7106 = vmatmul.msk.f32.gmra.mxu3 %vm2374_vm0, %v4620_v31  ;;  %7021 = vmatmul.msk.f32.gmra.mxu2 %vm2374_vm0, %v4780_v33 }
 0x63c   : > { %4444 = vst.msk [vmem:[#allocation5 + $0x1f0] sm:$0xff] %vm2759_vm9, %v4328_v39  ;;  %6851 = vmatmul.msk.f32.gmra.mxu0 %vm2374_vm0, %v3385_v37  ;;  %6936 = vmatmul.msk.f32.gmra.mxu1 %vm2374_vm0, %v3225_v38 }
 0x63e   : > { %v5722_v41 = vpop.f32.mrf.mxu3  ;;  %v5225_v42 = vpop.f32.mrf.mxu2 }
 0x63f   : > { %v5723_v44 = vadd.f32 %v5722_v41, %v5225_v42 }
 0x641   : > { %5839 = vst.msk [vmem:[#allocation5 + $0x470] sm:$0xff] %vm2759_vm9, %v5723_v44  ;;  %v3833_v46 = vpop.f32.mrf.mxu0  ;;  %v4330_v47 = vpop.f32.mrf.mxu1 }
 0x642   : > { %v4331_v62 = vadd.f32 %v4330_v47, %v3833_v46 }
 0x643   : > { %7107 = vmatmul.msk.f32.gmra.mxu3 %vm2374_vm0, %v4621_v43  ;;  %7022 = vmatmul.msk.f32.gmra.mxu2 %vm2374_vm0, %v4781_v45 }
 0x644   : > { %4445 = vst.msk [vmem:[#allocation5 + $0x1f8] sm:$0xff] %vm2759_vm9, %v4331_v62  ;;  %6852 = vmatmul.msk.f32.gmra.mxu0 %vm2374_vm0, %v3386_v60  ;;  %6937 = vmatmul.msk.f32.gmra.mxu1 %vm2374_vm0, %v3226_v61  ;;  %vm5857_vm0 = vcmask 687104  }
 0x645   : > { %5858 = vst.msk [vmem:[#allocation6] sm:$0xff] %vm5857_vm0, %v7278_v1 }
 0x646   : > { %v5725_v63 = vpop.f32.mrf.mxu3  ;;  %v5228_v0 = vpop.f32.mrf.mxu2  ;;  %5859 = vst.msk [vmem:[#allocation6 + $0x8] sm:$0xff] %vm5857_vm0, %v7278_v1 }
 0x647   : > { %v5726_v3 = vadd.f32 %v5725_v63, %v5228_v0  ;;  %5860 = vst.msk [vmem:[#allocation6 + $0x10] sm:$0xff] %vm5857_vm0, %v7278_v1 }
 0x648   : > { %5861 = vst.msk [vmem:[#allocation6 + $0x18] sm:$0xff] %vm5857_vm0, %v7278_v1 }
 0x649   : > { %5840 = vst.msk [vmem:[#allocation5 + $0x478] sm:$0xff] %vm2759_vm9, %v5726_v3  ;;  %v3836_v4 = vpop.f32.mrf.mxu0  ;;  %v4333_v5 = vpop.f32.mrf.mxu1 }
 0x64a   : > { %v4334_v7 = vadd.f32 %v4333_v5, %v3836_v4  ;;  %5862 = vst.msk [vmem:[#allocation6 + $0x20] sm:$0xff] %vm5857_vm0, %v7278_v1 }
 0x64b   : > { %5863 = vst.msk [vmem:[#allocation6 + $0x28] sm:$0xff] %vm5857_vm0, %v7278_v1 }
 0x64c   : > { %4446 = vst.msk [vmem:[#allocation5 + $0x200] sm:$0xff] %vm2759_vm9, %v4334_v7 }
 0x64d   : > { %5864 = vst.msk [vmem:[#allocation6 + $0x30] sm:$0xff] %vm5857_vm0, %v7278_v1 }
 0x64e   : > { %v5728_v8 = vpop.f32.mrf.mxu3  ;;  %v5231_v12 = vpop.f32.mrf.mxu2  ;;  %5865 = vst.msk [vmem:[#allocation6 + $0x38] sm:$0xff] %vm5857_vm0, %v7278_v1 }
 0x64f   : > { %v5729_v15 = vadd.f32 %v5728_v8, %v5231_v12  ;;  %5866 = vst.msk [vmem:[#allocation6 + $0x40] sm:$0xff] %vm5857_vm0, %v7278_v1 }
 0x650   : > { %5867 = vst.msk [vmem:[#allocation6 + $0x48] sm:$0xff] %vm5857_vm0, %v7278_v1 }
 0x651   : > { %5841 = vst.msk [vmem:[#allocation5 + $0x480] sm:$0xff] %vm2759_vm9, %v5729_v15  ;;  %v3839_v17 = vpop.f32.mrf.mxu0  ;;  %v4336_v18 = vpop.f32.mrf.mxu1 }
 0x652   : > { %v4337_v20 = vadd.f32 %v4336_v18, %v3839_v17  ;;  %5868 = vst.msk [vmem:[#allocation6 + $0x50] sm:$0xff] %vm5857_vm0, %v7278_v1 }
 0x653   : > { %5869 = vst.msk [vmem:[#allocation6 + $0x58] sm:$0xff] %vm5857_vm0, %v7278_v1 }
 0x654   : > { %4447 = vst.msk [vmem:[#allocation5 + $0x208] sm:$0xff] %vm2759_vm9, %v4337_v20 }
 0x655   : > { %5870 = vst.msk [vmem:[#allocation6 + $0x60] sm:$0xff] %vm5857_vm0, %v7278_v1 }
 0x656   : > { %v5731_v21 = vpop.f32.mrf.mxu3  ;;  %v5234_v22 = vpop.f32.mrf.mxu2  ;;  %5871 = vst.msk [vmem:[#allocation6 + $0x68] sm:$0xff] %vm5857_vm0, %v7278_v1 }
 0x657   : > { %v5732_v23 = vadd.f32 %v5731_v21, %v5234_v22  ;;  %5872 = vst.msk [vmem:[#allocation6 + $0x70] sm:$0xff] %vm5857_vm0, %v7278_v1 }
 0x658   : > { %5873 = vst.msk [vmem:[#allocation6 + $0x78] sm:$0xff] %vm5857_vm0, %v7278_v1 }
 0x659   : > { %5842 = vst.msk [vmem:[#allocation5 + $0x488] sm:$0xff] %vm2759_vm9, %v5732_v23  ;;  %v3842_v24 = vpop.f32.mrf.mxu0  ;;  %v4339_v25 = vpop.f32.mrf.mxu1 }
 0x65a   : > { %v4340_v26 = vadd.f32 %v4339_v25, %v3842_v24  ;;  %5874 = vst.msk [vmem:[#allocation6 + $0x80] sm:$0xff] %vm5857_vm0, %v7278_v1 }
 0x65b   : > { %5875 = vst.msk [vmem:[#allocation6 + $0x88] sm:$0xff] %vm5857_vm0, %v7278_v1 }
 0x65c   : > { %4448 = vst.msk [vmem:[#allocation5 + $0x210] sm:$0xff] %vm2759_vm9, %v4340_v26 }
 0x65d   : > { %5876 = vst.msk [vmem:[#allocation6 + $0x90] sm:$0xff] %vm5857_vm0, %v7278_v1 }
 0x65e   : > { %v5734_v27 = vpop.f32.mrf.mxu3  ;;  %v5237_v28 = vpop.f32.mrf.mxu2  ;;  %5877 = vst.msk [vmem:[#allocation6 + $0x98] sm:$0xff] %vm5857_vm0, %v7278_v1 }
 0x65f   : > { %v5735_v29 = vadd.f32 %v5734_v27, %v5237_v28  ;;  %5878 = vst.msk [vmem:[#allocation6 + $0xa0] sm:$0xff] %vm5857_vm0, %v7278_v1 }
 0x660   : > { %5879 = vst.msk [vmem:[#allocation6 + $0xa8] sm:$0xff] %vm5857_vm0, %v7278_v1 }
 0x661   : > { %5843 = vst.msk [vmem:[#allocation5 + $0x490] sm:$0xff] %vm2759_vm9, %v5735_v29  ;;  %v3845_v30 = vpop.f32.mrf.mxu0  ;;  %v4342_v2 = vpop.f32.mrf.mxu1 }
 0x662   : > { %v4343_v48 = vadd.f32 %v4342_v2, %v3845_v30  ;;  %5880 = vst.msk [vmem:[#allocation6 + $0xb0] sm:$0xff] %vm5857_vm0, %v7278_v1 }
 0x663   : > { %5881 = vst.msk [vmem:[#allocation6 + $0xb8] sm:$0xff] %vm5857_vm0, %v7278_v1 }
 0x664   : > { %4449 = vst.msk [vmem:[#allocation5 + $0x218] sm:$0xff] %vm2759_vm9, %v4343_v48 }
 0x665   : > { %5882 = vst.msk [vmem:[#allocation6 + $0xc0] sm:$0xff] %vm5857_vm0, %v7278_v1 }
 0x666   : > { %v5737_v10 = vpop.f32.mrf.mxu3  ;;  %v5240_v49 = vpop.f32.mrf.mxu2  ;;  %5883 = vst.msk [vmem:[#allocation6 + $0xc8] sm:$0xff] %vm5857_vm0, %v7278_v1 }
 0x667   : > { %v5738_v11 = vadd.f32 %v5737_v10, %v5240_v49  ;;  %5884 = vst.msk [vmem:[#allocation6 + $0xd0] sm:$0xff] %vm5857_vm0, %v7278_v1 }
 0x668   : > { %5885 = vst.msk [vmem:[#allocation6 + $0xd8] sm:$0xff] %vm5857_vm0, %v7278_v1 }
 0x669   : > { %5844 = vst.msk [vmem:[#allocation5 + $0x498] sm:$0xff] %vm2759_vm9, %v5738_v11  ;;  %v3848_v13 = vpop.f32.mrf.mxu0  ;;  %v4345_v14 = vpop.f32.mrf.mxu1 }
 0x66a   : > { %v4346_v50 = vadd.f32 %v4345_v14, %v3848_v13  ;;  %5886 = vst.msk [vmem:[#allocation6 + $0xe0] sm:$0xff] %vm5857_vm0, %v7278_v1 }
 0x66b   : > { %5887 = vst.msk [vmem:[#allocation6 + $0xe8] sm:$0xff] %vm5857_vm0, %v7278_v1 }
 0x66c   : > { %4450 = vst.msk [vmem:[#allocation5 + $0x220] sm:$0xff] %vm2759_vm9, %v4346_v50 }
 0x66d   : > { %5888 = vst.msk [vmem:[#allocation6 + $0xf0] sm:$0xff] %vm5857_vm0, %v7278_v1 }
 0x66e   : > { %v5740_v9 = vpop.f32.mrf.mxu3  ;;  %v5243_v51 = vpop.f32.mrf.mxu2  ;;  %5889 = vst.msk [vmem:[#allocation6 + $0xf8] sm:$0xff] %vm5857_vm0, %v7278_v1 }
 0x66f   : > { %v5741_v52 = vadd.f32 %v5740_v9, %v5243_v51  ;;  %5890 = vst.msk [vmem:[#allocation6 + $0x100] sm:$0xff] %vm5857_vm0, %v7278_v1 }
 0x670   : > { %5891 = vst.msk [vmem:[#allocation6 + $0x108] sm:$0xff] %vm5857_vm0, %v7278_v1 }
 0x671   : > { %5845 = vst.msk [vmem:[#allocation5 + $0x4a0] sm:$0xff] %vm2759_vm9, %v5741_v52  ;;  %v3851_v53 = vpop.f32.mrf.mxu0  ;;  %v4348_v6 = vpop.f32.mrf.mxu1 }
 0x672   : > { %v4349_v16 = vadd.f32 %v4348_v6, %v3851_v53  ;;  %5892 = vst.msk [vmem:[#allocation6 + $0x110] sm:$0xff] %vm5857_vm0, %v7278_v1 }
 0x673   : > { %5893 = vst.msk [vmem:[#allocation6 + $0x118] sm:$0xff] %vm5857_vm0, %v7278_v1 }
 0x674   : > { %4451 = vst.msk [vmem:[#allocation5 + $0x228] sm:$0xff] %vm2759_vm9, %v4349_v16 }
 0x675   : > { %5894 = vst.msk [vmem:[#allocation6 + $0x120] sm:$0xff] %vm5857_vm0, %v7278_v1 }
 0x676   : > { %v5743_v19 = vpop.f32.mrf.mxu3  ;;  %v5246_v54 = vpop.f32.mrf.mxu2  ;;  %5895 = vst.msk [vmem:[#allocation6 + $0x128] sm:$0xff] %vm5857_vm0, %v7278_v1 }
 0x677   : > { %v5744_v55 = vadd.f32 %v5743_v19, %v5246_v54  ;;  %5896 = vst.msk [vmem:[#allocation6 + $0x130] sm:$0xff] %vm5857_vm0, %v7278_v1 }
 0x678   : > { %5897 = vst.msk [vmem:[#allocation6 + $0x138] sm:$0xff] %vm5857_vm0, %v7278_v1 }
 0x679   : > { %5846 = vst.msk [vmem:[#allocation5 + $0x4a8] sm:$0xff] %vm2759_vm9, %v5744_v55  ;;  %v3854_v56 = vpop.f32.mrf.mxu0  ;;  %v4351_v57 = vpop.f32.mrf.mxu1 }
 0x67a   : > { %v4352_v58 = vadd.f32 %v4351_v57, %v3854_v56  ;;  %5899 = vst.msk [vmem:[#allocation6 + $0x1a40] sm:$0xff] %vm5857_vm0, %v7278_v1 }
 0x67b   : > { %5900 = vst.msk [vmem:[#allocation6 + $0x1a48] sm:$0xff] %vm5857_vm0, %v7278_v1 }
 0x67c   : > { %4452 = vst.msk [vmem:[#allocation5 + $0x230] sm:$0xff] %vm2759_vm9, %v4352_v58 }
 0x67d   : > { %5901 = vst.msk [vmem:[#allocation6 + $0x1a50] sm:$0xff] %vm5857_vm0, %v7278_v1 }
 0x67e   : > { %v5746_v59 = vpop.f32.mrf.mxu3  ;;  %v5249_v31 = vpop.f32.mrf.mxu2  ;;  %5902 = vst.msk [vmem:[#allocation6 + $0x1a58] sm:$0xff] %vm5857_vm0, %v7278_v1 }
 0x67f   : > { %v5747_v32 = vadd.f32 %v5746_v59, %v5249_v31  ;;  %5903 = vst.msk [vmem:[#allocation6 + $0x1a60] sm:$0xff] %vm5857_vm0, %v7278_v1 }
 0x680   : > { %5904 = vst.msk [vmem:[#allocation6 + $0x1a68] sm:$0xff] %vm5857_vm0, %v7278_v1 }
 0x681   : > { %5847 = vst.msk [vmem:[#allocation5 + $0x4b0] sm:$0xff] %vm2759_vm9, %v5747_v32  ;;  %v3857_v33 = vpop.f32.mrf.mxu0  ;;  %v4354_v34 = vpop.f32.mrf.mxu1 }
 0x682   : > { %v4355_v35 = vadd.f32 %v4354_v34, %v3857_v33  ;;  %5905 = vst.msk [vmem:[#allocation6 + $0x1a70] sm:$0xff] %vm5857_vm0, %v7278_v1 }
 0x683   : > { %5906 = vst.msk [vmem:[#allocation6 + $0x1a78] sm:$0xff] %vm5857_vm0, %v7278_v1 }
 0x684   : > { %4453 = vst.msk [vmem:[#allocation5 + $0x238] sm:$0xff] %vm2759_vm9, %v4355_v35 }
 0x685   : > { %5907 = vst.msk [vmem:[#allocation6 + $0x1a80] sm:$0xff] %vm5857_vm0, %v7278_v1 }
 0x686   : > { %v5749_v36 = vpop.f32.mrf.mxu3  ;;  %v5252_v37 = vpop.f32.mrf.mxu2  ;;  %5908 = vst.msk [vmem:[#allocation6 + $0x1a88] sm:$0xff] %vm5857_vm0, %v7278_v1 }
 0x687   : > { %v5750_v38 = vadd.f32 %v5749_v36, %v5252_v37  ;;  %5909 = vst.msk [vmem:[#allocation6 + $0x1a90] sm:$0xff] %vm5857_vm0, %v7278_v1 }
 0x688   : > { %5910 = vst.msk [vmem:[#allocation6 + $0x1a98] sm:$0xff] %vm5857_vm0, %v7278_v1 }
 0x689   : > { %5848 = vst.msk [vmem:[#allocation5 + $0x4b8] sm:$0xff] %vm2759_vm9, %v5750_v38  ;;  %v3860_v39 = vpop.f32.mrf.mxu0  ;;  %v4357_v40 = vpop.f32.mrf.mxu1 }
 0x68a   : > { %v4358_v41 = vadd.f32 %v4357_v40, %v3860_v39  ;;  %5911 = vst.msk [vmem:[#allocation6 + $0x1aa0] sm:$0xff] %vm5857_vm0, %v7278_v1 }
 0x68b   : > { %5912 = vst.msk [vmem:[#allocation6 + $0x1aa8] sm:$0xff] %vm5857_vm0, %v7278_v1 }
 0x68c   : > { %4454 = vst.msk [vmem:[#allocation5 + $0x240] sm:$0xff] %vm2759_vm9, %v4358_v41 }
 0x68d   : > { %5913 = vst.msk [vmem:[#allocation6 + $0x1ab0] sm:$0xff] %vm5857_vm0, %v7278_v1 }
 0x68e   : > { %v5752_v42 = vpop.f32.mrf.mxu3  ;;  %v5255_v43 = vpop.f32.mrf.mxu2  ;;  %5914 = vst.msk [vmem:[#allocation6 + $0x1ab8] sm:$0xff] %vm5857_vm0, %v7278_v1 }
 0x68f   : > { %v5753_v44 = vadd.f32 %v5752_v42, %v5255_v43  ;;  %5915 = vst.msk [vmem:[#allocation6 + $0x1ac0] sm:$0xff] %vm5857_vm0, %v7278_v1 }
 0x690   : > { %5916 = vst.msk [vmem:[#allocation6 + $0x1ac8] sm:$0xff] %vm5857_vm0, %v7278_v1 }
 0x691   : > { %5849 = vst.msk [vmem:[#allocation5 + $0x4c0] sm:$0xff] %vm2759_vm9, %v5753_v44  ;;  %v3863_v45 = vpop.f32.mrf.mxu0  ;;  %v4360_v46 = vpop.f32.mrf.mxu1 }
 0x692   : > { %v4361_v47 = vadd.f32 %v4360_v46, %v3863_v45  ;;  %5917 = vst.msk [vmem:[#allocation6 + $0x1ad0] sm:$0xff] %vm5857_vm0, %v7278_v1 }
 0x693   : > { %5918 = vst.msk [vmem:[#allocation6 + $0x1ad8] sm:$0xff] %vm5857_vm0, %v7278_v1 }
 0x694   : > { %4455 = vst.msk [vmem:[#allocation5 + $0x248] sm:$0xff] %vm2759_vm9, %v4361_v47 }
 0x695   : > { %5919 = vst.msk [vmem:[#allocation6 + $0x1ae0] sm:$0xff] %vm5857_vm0, %v7278_v1 }
 0x696   : > { %v5755_v60 = vpop.f32.mrf.mxu3  ;;  %v5258_v61 = vpop.f32.mrf.mxu2  ;;  %5920 = vst.msk [vmem:[#allocation6 + $0x1ae8] sm:$0xff] %vm5857_vm0, %v7278_v1 }
 0x697   : > { %v5756_v62 = vadd.f32 %v5755_v60, %v5258_v61  ;;  %5921 = vst.msk [vmem:[#allocation6 + $0x1af0] sm:$0xff] %vm5857_vm0, %v7278_v1 }
 0x698   : > { %5922 = vst.msk [vmem:[#allocation6 + $0x1af8] sm:$0xff] %vm5857_vm0, %v7278_v1 }
 0x699   : > { %5850 = vst.msk [vmem:[#allocation5 + $0x4c8] sm:$0xff] %vm2759_vm9, %v5756_v62  ;;  %v3866_v63 = vpop.f32.mrf.mxu0  ;;  %v4363_v0 = vpop.f32.mrf.mxu1 }
 0x69a   : > { %v4364_v3 = vadd.f32 %v4363_v0, %v3866_v63  ;;  %5923 = vst.msk [vmem:[#allocation6 + $0x1b00] sm:$0xff] %vm5857_vm0, %v7278_v1 }
 0x69b   : > { %5924 = vst.msk [vmem:[#allocation6 + $0x1b08] sm:$0xff] %vm5857_vm0, %v7278_v1 }
 0x69c   : > { %4456 = vst.msk [vmem:[#allocation5 + $0x250] sm:$0xff] %vm2759_vm9, %v4364_v3 }
 0x69d   : > { %5925 = vst.msk [vmem:[#allocation6 + $0x1b10] sm:$0xff] %vm5857_vm0, %v7278_v1 }
 0x69e   : > { %v5758_v4 = vpop.f32.mrf.mxu3  ;;  %v5261_v5 = vpop.f32.mrf.mxu2  ;;  %5926 = vst.msk [vmem:[#allocation6 + $0x1b18] sm:$0xff] %vm5857_vm0, %v7278_v1 }
 0x69f   : > { %v5759_v7 = vadd.f32 %v5758_v4, %v5261_v5  ;;  %5927 = vst.msk [vmem:[#allocation6 + $0x1b20] sm:$0xff] %vm5857_vm0, %v7278_v1 }
 0x6a0   : > { %5928 = vst.msk [vmem:[#allocation6 + $0x1b28] sm:$0xff] %vm5857_vm0, %v7278_v1 }
 0x6a1   : > { %5851 = vst.msk [vmem:[#allocation5 + $0x4d0] sm:$0xff] %vm2759_vm9, %v5759_v7  ;;  %v3869_v8 = vpop.f32.mrf.mxu0  ;;  %v4366_v12 = vpop.f32.mrf.mxu1 }
 0x6a2   : > { %v4367_v15 = vadd.f32 %v4366_v12, %v3869_v8  ;;  %5929 = vst.msk [vmem:[#allocation6 + $0x1b30] sm:$0xff] %vm5857_vm0, %v7278_v1 }
 0x6a3   : > { %5930 = vst.msk [vmem:[#allocation6 + $0x1b38] sm:$0xff] %vm5857_vm0, %v7278_v1 }
 0x6a4   : > { %4457 = vst.msk [vmem:[#allocation5 + $0x258] sm:$0xff] %vm2759_vm9, %v4367_v15 }
 0x6a5   : > { %5931 = vst.msk [vmem:[#allocation6 + $0x1b40] sm:$0xff] %vm5857_vm0, %v7278_v1 }
 0x6a6   : > { %v5761_v17 = vpop.f32.mrf.mxu3  ;;  %v5264_v18 = vpop.f32.mrf.mxu2  ;;  %5932 = vst.msk [vmem:[#allocation6 + $0x1b48] sm:$0xff] %vm5857_vm0, %v7278_v1 }
 0x6a7   : > { %v5762_v20 = vadd.f32 %v5761_v17, %v5264_v18  ;;  %5933 = vst.msk [vmem:[#allocation6 + $0x1b50] sm:$0xff] %vm5857_vm0, %v7278_v1 }
 0x6a8   : > { %5934 = vst.msk [vmem:[#allocation6 + $0x1b58] sm:$0xff] %vm5857_vm0, %v7278_v1 }
 0x6a9   : > { %5852 = vst.msk [vmem:[#allocation5 + $0x4d8] sm:$0xff] %vm2759_vm9, %v5762_v20  ;;  %v3872_v21 = vpop.f32.mrf.mxu0  ;;  %v4369_v22 = vpop.f32.mrf.mxu1 }
 0x6aa   : > { %v4370_v23 = vadd.f32 %v4369_v22, %v3872_v21  ;;  %5935 = vst.msk [vmem:[#allocation6 + $0x1b60] sm:$0xff] %vm5857_vm0, %v7278_v1 }
 0x6ab   : > { %5936 = vst.msk [vmem:[#allocation6 + $0x1b68] sm:$0xff] %vm5857_vm0, %v7278_v1 }
 0x6ac   : > { %4458 = vst.msk [vmem:[#allocation5 + $0x260] sm:$0xff] %vm2759_vm9, %v4370_v23 }
 0x6ad   : > { %5937 = vst.msk [vmem:[#allocation6 + $0x1b70] sm:$0xff] %vm5857_vm0, %v7278_v1 }
 0x6ae   : > { %v5764_v24 = vpop.f32.mrf.mxu3  ;;  %v5267_v25 = vpop.f32.mrf.mxu2  ;;  %5938 = vst.msk [vmem:[#allocation6 + $0x1b78] sm:$0xff] %vm5857_vm0, %v7278_v1 }
 0x6af   : > { %v5765_v26 = vadd.f32 %v5764_v24, %v5267_v25 }
 0x6b1   : > { %5853 = vst.msk [vmem:[#allocation5 + $0x4e0] sm:$0xff] %vm2759_vm9, %v5765_v26  ;;  %v3875_v27 = vpop.f32.mrf.mxu0  ;;  %v4372_v28 = vpop.f32.mrf.mxu1 }
 0x6b2   : > { %v4373_v29 = vadd.f32 %v4372_v28, %v3875_v27 }
 0x6b4   : > { %4459 = vst.msk [vmem:[#allocation5 + $0x268] sm:$0xff] %vm2759_vm9, %v4373_v29 }
 0x6b6   : > { %v5767_v30 = vpop.f32.mrf.mxu3  ;;  %v5270_v2 = vpop.f32.mrf.mxu2 }
 0x6b7   : > { %v5768_v48 = vadd.f32 %v5767_v30, %v5270_v2 }
 0x6b9   : > { %5854 = vst.msk [vmem:[#allocation5 + $0x4e8] sm:$0xff] %vm2759_vm9, %v5768_v48  ;;  %v3878_v10 = vpop.f32.mrf.mxu0  ;;  %v4375_v49 = vpop.f32.mrf.mxu1 }
 0x6ba   : > { %v4376_v11 = vadd.f32 %v4375_v49, %v3878_v10 }
 0x6bc   : > { %4460 = vst.msk [vmem:[#allocation5 + $0x270] sm:$0xff] %vm2759_vm9, %v4376_v11 }
 0x6be   : > { %v5770_v13 = vpop.f32.mrf.mxu3  ;;  %v5273_v14 = vpop.f32.mrf.mxu2 }
 0x6bf   : > { %v5771_v50 = vadd.f32 %v5770_v13, %v5273_v14 }
 0x6c1   : > { %5855 = vst.msk [vmem:[#allocation5 + $0x4f0] sm:$0xff] %vm2759_vm9, %v5771_v50  ;;  %v3881_v9 = vpop.f32.mrf.mxu0  ;;  %v4378_v51 = vpop.f32.mrf.mxu1 }
 0x6c2   : > { %v4379_v52 = vadd.f32 %v4378_v51, %v3881_v9 }
 0x6c4   : > { %4461 = vst.msk [vmem:[#allocation5 + $0x278] sm:$0xff] %vm2759_vm9, %v4379_v52 }
 0x6c6   : > { %v5773_v53 = vpop.f32.mrf.mxu3  ;;  %v5276_v6 = vpop.f32.mrf.mxu2 }
 0x6c7   : > { %v5774_v16 = vadd.f32 %v5773_v53, %v5276_v6 }
 0x6c9   : > { %5856 = vst.msk [vmem:[#allocation5 + $0x4f8] sm:$0xff] %vm2759_vm9, %v5774_v16 }
 0x6ca LB: >> { %s7108_s15 = sshll.u32 %s7272_s10, 4  ;;  %s7110_s16 = smul.u32 160, %s7272_s10  ;;  %s7272_s10 = sphi %s9126_s10, %s5944_s10  }
 0x6cb   : >> { %s5948_s18 = scalar_lea.vmem [#allocation5], %s7108_s15  ;;  %s7285_s19 = smov 127  }
 0x6cc   : >> { %s9133_s20 = scalar_lea.vmem [#allocation6], %s7110_s16  ;;  %s7286_s21 = smov 126  }
 0x6cd   : >> { %s7287_s22 = smov 125   ;;  %s7288_s23 = smov 124  }
 0x6ce   : >> { %s5944_s10 = sadd.s32 1, %s7272_s10  }
 0x6cf   : >> { %p5941_p6 = scmp.ge.s32.totalorder %s5944_s10, 40  }
 0x6d0   : >> { %v5949_v19 = vld [vmem:[%s5948_s18] sm:$0xff]  ;;  %v5950_v1 = vld [vmem:[%s5948_s18 + $0x8] sm:$0xff]  ;;  %s9193_s8 = smov (%p5941_p6), 0  }
 0x6d1   : >> { %5959 = vrot.lane.b32.xlu0 %v5949_v19, %s7285_s19  ;;  %7111 = vst.msk [vmem:[%s9133_s20 + $0x140] sm:$0xff] %vm5857_vm0, %v5949_v19  ;;  %5970 = vrot.lane.b32.xlu1 %v5949_v19, %s7286_s21  ;;  %v7135_v54 = vld [vmem:[%s5948_s18 + $0x288] sm:$0xff] }
 0x6d2   : >> { %7112 = vst.msk [vmem:[%s9133_s20 + $0x148] sm:$0xff] %vm5857_vm0, %v5950_v1  ;;  %5981 = vrot.lane.b32.xlu2 %v5949_v19, %s7287_s22  ;;  %v7134_v55 = vld [vmem:[%s5948_s18 + $0x280] sm:$0xff]  ;;  %v9186_v44 = vld [vmem:[%s9267_s5 + $0x8] sm:$0x77] (%p5941_p6) }
 0x6d3   : >> { %7139 = vst.msk [vmem:[%s9133_s20 + $0x198] sm:$0xff] %vm5857_vm0, %v7135_v54  ;;  %v9181_v43 = vld [vmem:[%s9267_s5] sm:$0x77] (%p5941_p6) }
 0x6d4   : >> { %7138 = vst.msk [vmem:[%s9133_s20 + $0x190] sm:$0xff] %vm5857_vm0, %v7134_v55  ;;  %v9191_v45 = vld [vmem:[%s9268_s6] sm:$0x7] (%p5941_p6) }
 0x6d9   : >> { %5961 = vrot.lane.b32.xlu0 %v5950_v1, %s7285_s19  ;;  %5972 = vrot.lane.b32.xlu1 %v5950_v1, %s7286_s21 }
 0x6da   : >> { %5983 = vrot.lane.b32.xlu2 %v5950_v1, %s7287_s22 }
 0x6e1   : >> { %5992 = vrot.lane.b32.xlu0 %v5949_v19, %s7288_s23  ;;  %5994 = vrot.lane.b32.xlu1 %v5950_v1, %s7288_s23 }
 0x6e2   : >> { %6015 = vrot.lane.b32.xlu2 %v7134_v55, %s7285_s19 }
 0x6e9   : >> { %6017 = vrot.lane.b32.xlu0 %v7135_v54, %s7285_s19  ;;  %6026 = vrot.lane.b32.xlu1 %v7134_v55, %s7286_s21 }
 0x6ea   : >> { %6028 = vrot.lane.b32.xlu2 %v7135_v54, %s7286_s21 }
 0x6f1   : >> { %6037 = vrot.lane.b32.xlu0 %v7134_v55, %s7287_s22  ;;  %6039 = vrot.lane.b32.xlu1 %v7135_v54, %s7287_s22 }
 0x6f2   : >> { %6048 = vrot.lane.b32.xlu2 %v7134_v55, %s7288_s23 }
 0x6f9   : >> { %6050 = vrot.lane.b32.xlu0 %v7135_v54, %s7288_s23 }
 0x72c   : >> { %v5982_v56 = vpop.permute.xlu2 %5981 }
 0x72d   : >> { %7126 = vst.msk [vmem:[%s9133_s20 + $0x170] sm:$0xff] %vm5857_vm0, %v5982_v56 }
 0x734   : >> { %v5984_v57 = vpop.permute.xlu2 %5983 }
 0x735   : >> { %7127 = vst.msk [vmem:[%s9133_s20 + $0x178] sm:$0xff] %vm5857_vm0, %v5984_v57 }
 0x73c   : >> { %v6016_v58 = vpop.permute.xlu2 %6015 }
 0x73d   : >> { %7143 = vst.msk [vmem:[%s9133_s20 + $0x1a0] sm:$0xff] %vm5857_vm0, %v6016_v58 }
 0x743   : >> { %v5960_v59 = vpop.permute.xlu0 %5959  ;;  %v5971_v31 = vpop.permute.xlu1 %5970 }
 0x744   : >> { %7116 = vst.msk [vmem:[%s9133_s20 + $0x150] sm:$0xff] %vm5857_vm0, %v5960_v59  ;;  %v6029_v32 = vpop.permute.xlu2 %6028 }
 0x745   : >> { %7121 = vst.msk [vmem:[%s9133_s20 + $0x160] sm:$0xff] %vm5857_vm0, %v5971_v31 }
 0x746   : >> { %7149 = vst.msk [vmem:[%s9133_s20 + $0x1b8] sm:$0xff] %vm5857_vm0, %v6029_v32 }
 0x74b   : >> { %v5962_v33 = vpop.permute.xlu0 %5961  ;;  %v5973_v34 = vpop.permute.xlu1 %5972 }
 0x74c   : >> { %7117 = vst.msk [vmem:[%s9133_s20 + $0x158] sm:$0xff] %vm5857_vm0, %v5962_v33  ;;  %v6049_v35 = vpop.permute.xlu2 %6048 }
 0x74d   : >> { %7122 = vst.msk [vmem:[%s9133_s20 + $0x168] sm:$0xff] %vm5857_vm0, %v5973_v34 }
 0x74e   : >> { %7158 = vst.msk [vmem:[%s9133_s20 + $0x1d0] sm:$0xff] %vm5857_vm0, %v6049_v35 }
 0x753   : >> { %v5993_v36 = vpop.permute.xlu0 %5992  ;;  %v5995_v37 = vpop.permute.xlu1 %5994 }
 0x754   : >> { %7131 = vst.msk [vmem:[%s9133_s20 + $0x180] sm:$0xff] %vm5857_vm0, %v5993_v36 }
 0x755   : >> { %7132 = vst.msk [vmem:[%s9133_s20 + $0x188] sm:$0xff] %vm5857_vm0, %v5995_v37 }
 0x75b   : >> { %v6018_v38 = vpop.permute.xlu0 %6017  ;;  %v6027_v39 = vpop.permute.xlu1 %6026 }
 0x75c   : >> { %7144 = vst.msk [vmem:[%s9133_s20 + $0x1a8] sm:$0xff] %vm5857_vm0, %v6018_v38 }
 0x75d   : >> { %7148 = vst.msk [vmem:[%s9133_s20 + $0x1b0] sm:$0xff] %vm5857_vm0, %v6027_v39 }
 0x763   : >> { %v6038_v40 = vpop.permute.xlu0 %6037  ;;  %v6040_v41 = vpop.permute.xlu1 %6039 }
 0x764   : >> { %7153 = vst.msk [vmem:[%s9133_s20 + $0x1c0] sm:$0xff] %vm5857_vm0, %v6038_v40 }
 0x765   : >> { %7154 = vst.msk [vmem:[%s9133_s20 + $0x1c8] sm:$0xff] %vm5857_vm0, %v6040_v41 }
 0x768   : > { %5943 = sbr.rel (!%p5941_p6) target bundleno = 1738 (0x6ca), region = 167 }
 0x76b   : >> { %v6051_v42 = vpop.permute.xlu0 %6050 }
 0x76c   : >> { %7159 = vst.msk [vmem:[%s9133_s20 + $0x1d8] sm:$0xff] %vm5857_vm0, %v6051_v42 }
 0x76d LB: >> { %6129 = vst [vmem:[#allocation1 + $0x10] ss:$2 sm:$0xff] %v9186_v44  ;;  %s7160_s9 = smul.u32 80, %s7276_s8  ;;  %v7289_v8 = vmov 0   ;;  %vm6137_vm9 = vcmask 130048   ;;  %s7163_s12 = sshll.u32 %s7276_s8, 2  ;;  %s7276_s8 = sphi %s9193_s8, %s6066_s8  }
 0x76e   : >> { %6127 = vst [vmem:[#allocation1] ss:$2 sm:$0xff] %v9181_v43  ;;  %7233 = vset.pattern.permute.xlu0 %v7289_v8  ;;  %s6240_s13 = scalar_lea.vmem %s7388_s17, %s7163_s12  ;;  %vm6241_vm10 = vcmask 681984   ;;  %s6066_s8 = sadd.s32 1, %s7276_s8  }
 0x76f   : >> { %s9201_s11 = scalar_lea.vmem [#allocation6], %s7160_s9  ;;  %6122 = vperm.xlu0 %7233, %v9191_v45   ;;  %p6063_p7 = scmp.ge.s32.totalorder %s6066_s8, 84  }
 0x773   : >> { %v6117_v46 = vld [vmem:[%s9201_s11 + $0x178] sm:$0xff]  ;;  %v6116_v60 = vld [vmem:[%s9201_s11 + $0x170] sm:$0xff]  ;;  %v6115_v63 = vld [vmem:[%s9201_s11 + $0x168] sm:$0xff] }
 0x774   : >> { %v6085_v47 = vld [vmem:[%s9201_s11 + $0x78] sm:$0xff]  ;;  %6180 = vmatpush.msra.mxu2 %v6117_v46  ;;  %v6084_v61 = vld [vmem:[%s9201_s11 + $0x70] sm:$0xff]  ;;  %v6083_v0 = vld [vmem:[%s9201_s11 + $0x68] sm:$0xff] }
 0x775   : >> { %6140 = vmatpush.msra.mxu0 %v6085_v47  ;;  %v6101_v62 = vld [vmem:[%s9201_s11 + $0xf8] sm:$0xff]  ;;  %v6100_v3 = vld [vmem:[%s9201_s11 + $0xf0] sm:$0xff]  ;;  %v6099_v4 = vld [vmem:[%s9201_s11 + $0xe8] sm:$0xff] }
 0x776   : >> { %6160 = vmatpush.msra.mxu1 %v6101_v62  ;;  %6181 = vmatpush.msra.mxu2 %v6116_v60  ;;  %v6114_v5 = vld [vmem:[%s9201_s11 + $0x160] sm:$0xff]  ;;  %v6113_v15 = vld [vmem:[%s9201_s11 + $0x158] sm:$0xff]  ;;  %v6112_v20 = vld [vmem:[%s9201_s11 + $0x150] sm:$0xff] }
 0x777   : >> { %6141 = vmatpush.msra.mxu0 %v6084_v61  ;;  %v6082_v7 = vld [vmem:[%s9201_s11 + $0x60] sm:$0xff]  ;;  %v6081_v17 = vld [vmem:[%s9201_s11 + $0x58] sm:$0xff]  ;;  %v6080_v21 = vld [vmem:[%s9201_s11 + $0x50] sm:$0xff] }
 0x778   : >> { %6161 = vmatpush.msra.mxu1 %v6100_v3  ;;  %6182 = vmatpush.msra.mxu2 %v6115_v63  ;;  %v6098_v12 = vld [vmem:[%s9201_s11 + $0xe0] sm:$0xff]  ;;  %v6097_v18 = vld [vmem:[%s9201_s11 + $0xd8] sm:$0xff]  ;;  %v6096_v22 = vld [vmem:[%s9201_s11 + $0xd0] sm:$0xff] }
 0x779   : >> { %6142 = vmatpush.msra.mxu0 %v6083_v0  ;;  %v6111_v23 = vld [vmem:[%s9201_s11 + $0x148] sm:$0xff]  ;;  %v6110_v26 = vld [vmem:[%s9201_s11 + $0x140] sm:$0xff]  ;;  %v6109_v29 = vld [vmem:[%s9201_s11 + $0x138] sm:$0xff] }
 0x77a   : >> { %6162 = vmatpush.msra.mxu1 %v6099_v4  ;;  %6183 = vmatpush.msra.mxu2 %v6114_v5  ;;  %v6079_v24 = vld [vmem:[%s9201_s11 + $0x48] sm:$0xff]  ;;  %v6078_v27 = vld [vmem:[%s9201_s11 + $0x40] sm:$0xff]  ;;  %v6077_v30 = vld [vmem:[%s9201_s11 + $0x38] sm:$0xff] }
 0x77b   : >> { %6143 = vmatpush.msra.mxu0 %v6082_v7  ;;  %v6095_v25 = vld [vmem:[%s9201_s11 + $0xc8] sm:$0xff]  ;;  %v6094_v28 = vld [vmem:[%s9201_s11 + $0xc0] sm:$0xff]  ;;  %v6093_v2 = vld [vmem:[%s9201_s11 + $0xb8] sm:$0xff] }
 0x77c   : >> { %6163 = vmatpush.msra.mxu1 %v6098_v12  ;;  %6184 = vmatpush.msra.mxu2 %v6113_v15  ;;  %v6119_v48 = vld [vmem:[%s9201_s11 + $0x188] sm:$0xff]  ;;  %v6108_v10 = vld [vmem:[%s9201_s11 + $0x130] sm:$0xff]  ;;  %v6118_v11 = vld [vmem:[%s9201_s11 + $0x180] sm:$0xff] }
 0x77d   : >> { %6144 = vmatpush.msra.mxu0 %v6081_v17  ;;  %v6076_v49 = vld [vmem:[%s9201_s11 + $0x30] sm:$0xff]  ;;  %6214 = vmatpush.msra.mxu3 %v6119_v48  ;;  %v6133_v14 = vld.sshfl [vmem:[#allocation1 + $0x18] sm:$0xff pattern:$0x75316420]  ;;  %v6107_v50 = vld [vmem:[%s9201_s11 + $0x128] sm:$0xff] }
 0x77e   : >> { %6164 = vmatpush.msra.mxu1 %v6097_v18  ;;  %6185 = vmatpush.msra.mxu2 %v6112_v20  ;;  %v6092_v13 = vld [vmem:[%s9201_s11 + $0xb0] sm:$0xff]  ;;  %v6075_v9 = vld [vmem:[%s9201_s11 + $0x28] sm:$0xff]  ;;  %v6106_v52 = vld [vmem:[%s9201_s11 + $0x120] sm:$0xff] }
 0x77f   : >> { %6145 = vmatpush.msra.mxu0 %v6080_v21  ;;  %6215 = vmatpush.msra.mxu3 %v6118_v11  ;;  %v6091_v51 = vld [vmem:[%s9201_s11 + $0xa8] sm:$0xff]  ;;  %v6074_v53 = vld [vmem:[%s9201_s11 + $0x20] sm:$0xff]  ;;  %v6105_v16 = vld [vmem:[%s9201_s11 + $0x118] sm:$0xff] }
 0x780   : >> { %6165 = vmatpush.msra.mxu1 %v6096_v22  ;;  %6186 = vmatpush.msra.mxu2 %v6111_v23  ;;  %v6090_v6 = vld [vmem:[%s9201_s11 + $0xa0] sm:$0xff]  ;;  %v6073_v19 = vld [vmem:[%s9201_s11 + $0x18] sm:$0xff]  ;;  %v6104_v54 = vld [vmem:[%s9201_s11 + $0x110] sm:$0xff] }
 0x781   : >> { %6146 = vmatpush.msra.mxu0 %v6079_v24  ;;  %7161 = vmatmul.msk.f32.vlgmr.msra.gmra.mxu3 %vm6137_vm9, %v6133_v14  ;;  %v6089_v1 = vld [vmem:[%s9201_s11 + $0x98] sm:$0xff]  ;;  %v6072_v55 = vld [vmem:[%s9201_s11 + $0x10] sm:$0xff]  ;;  %v6103_v57 = vld [vmem:[%s9201_s11 + $0x108] sm:$0xff] }
 0x782   : >> { %6166 = vmatpush.msra.mxu1 %v6095_v25  ;;  %6187 = vmatpush.msra.mxu2 %v6110_v26  ;;  %v6088_v56 = vld [vmem:[%s9201_s11 + $0x90] sm:$0xff]  ;;  %v6071_v58 = vld [vmem:[%s9201_s11 + $0x8] sm:$0xff]  ;;  %v6102_v31 = vld [vmem:[%s9201_s11 + $0x100] sm:$0xff] }
 0x783   : >> { %6147 = vmatpush.msra.mxu0 %v6078_v27  ;;  %v6087_v59 = vld [vmem:[%s9201_s11 + $0x88] sm:$0xff]  ;;  %v6070_v32 = vld [vmem:[%s9201_s11] sm:$0xff]  ;;  %v6132_v33 = vld.sshfl [vmem:[#allocation1 + $0x10] sm:$0xff pattern:$0x75316420] }
 0x784   : >> { %6167 = vmatpush.msra.mxu1 %v6094_v28  ;;  %6188 = vmatpush.msra.mxu2 %v6109_v29  ;;  %v6130_v34 = vld.sshfl [vmem:[#allocation1] sm:$0xff pattern:$0x75316420]  ;;  %v6131_v36 = vld.sshfl [vmem:[#allocation1 + $0x8] sm:$0xff pattern:$0x75316420] }
 0x785   : >> { %6148 = vmatpush.msra.mxu0 %v6077_v30  ;;  %v6086_v35 = vld [vmem:[%s9201_s11 + $0x80] sm:$0xff] }
 0x786   : >> { %6168 = vmatpush.msra.mxu1 %v6093_v2  ;;  %6189 = vmatpush.msra.mxu2 %v6108_v10 }
 0x787   : >> { %6149 = vmatpush.msra.mxu0 %v6076_v49 }
 0x788   : >> { %6169 = vmatpush.msra.mxu1 %v6092_v13  ;;  %6190 = vmatpush.msra.mxu2 %v6107_v50 }
 0x789   : >> { %6150 = vmatpush.msra.mxu0 %v6075_v9 }
 0x78a   : >> { %6170 = vmatpush.msra.mxu1 %v6091_v51  ;;  %6191 = vmatpush.msra.mxu2 %v6106_v52 }
 0x78b   : >> { %6151 = vmatpush.msra.mxu0 %v6074_v53 }
 0x78c   : >> { %6171 = vmatpush.msra.mxu1 %v6090_v6  ;;  %6192 = vmatpush.msra.mxu2 %v6105_v16 }
 0x78d   : >> { %6152 = vmatpush.msra.mxu0 %v6073_v19 }
 0x78e   : >> { %6172 = vmatpush.msra.mxu1 %v6089_v1  ;;  %6193 = vmatpush.msra.mxu2 %v6104_v54 }
 0x78f   : >> { %6153 = vmatpush.msra.mxu0 %v6072_v55 }
 0x790   : >> { %6173 = vmatpush.msra.mxu1 %v6088_v56  ;;  %6194 = vmatpush.msra.mxu2 %v6103_v57 }
 0x791   : >> { %6154 = vmatpush.msra.mxu0 %v6071_v58 }
 0x792   : >> { %6174 = vmatpush.msra.mxu1 %v6087_v59  ;;  %6195 = vmatpush.msra.mxu2 %v6102_v31 }
 0x793   : >> { %6155 = vmatpush.msra.mxu0 %v6070_v32  ;;  %6196 = vmatmul.f32.vlgmr.msra.gmra.mxu2 %v6132_v33 }
 0x794   : >> { %6156 = vmatmul.f32.vlgmr.msra.gmra.mxu0 %v6130_v34  ;;  %6175 = vmatpush.msra.mxu1 %v6086_v35 }
 0x795   : >> { %6176 = vmatmul.f32.vlgmr.msra.gmra.mxu1 %v6131_v36 }
 0x7e1   : >> { %v6123_v37 = vpop.permute.xlu0 %6122 }
 0x804   : >> { %v6217_v46 = vpop.f32.mrf.mxu3 }
 0x811   : >> { %v6157_v38 = vpop.f32.mrf.mxu0 }
 0x812   : >> { %v6158_v39 = vadd.f32 %v6157_v38, %v6123_v37  ;;  %v6177_v40 = vpop.f32.mrf.mxu1 }
 0x814   : >> { %v6178_v41 = vadd.f32 %v6177_v40, %v6158_v39 }
 0x816   : >> { %v6197_v42 = vpop.f32.mrf.mxu2 }
 0x817   : >> { %v6198_v47 = vadd.f32 %v6197_v42, %v6178_v41 }
 0x819   : >> { %v6218_v60 = vadd.f32 %v6217_v46, %v6198_v47 }
 0x81b   : >> { %v7162_v61 = vmul.f32 -1.442695, %v6218_v60 }
 0x81d   : >> { %7234 = vpow2.f32 %v7162_v61 }
 0x823   : >> { %v7235_v62 = vpop.eup %7234 }
 0x824   : >> { %v6223_v63 = vadd.f32 1.0, %v7235_v62 }
 0x826   : >> { %7236 = vrcp.f32 %v6223_v63  ;;  %v6235_v5 = vand.u32 2147483648, %v6223_v63  ;;  %v6233_v8 = vand.u32 2147483647, %v6223_v63  ;;  %vm6229_vm4 = vweird.f32 %v6223_v63 }
 0x828   : >> { %v6236_v15 = vor.u32 1.1754944e-38, %v6235_v5  ;;  %vm6234_vm11 = vcmp.eq.f32.partialorder %v6233_v8, 8.507059e+37 }
 0x82c   : >> { %v7237_v0 = vpop.eup %7236 }
 0x82d   : >> { %v6225_v3 = vmul.f32 %v7237_v0, %v6223_v63  ;;  %vm6230_vm1 = vweird.f32 %v7237_v0 }
 0x82e   : >> { %vm6231_vm8 = vmor %vm6229_vm4, %vm6230_vm1 }
 0x82f   : >> { %v6226_v4 = vsub.f32 1.0, %v6225_v3 }
 0x831   : >> { %v6227_v7 = vmul.f32 %v7237_v0, %v6226_v4 }
 0x833   : >> { %v6228_v12 = vadd.f32 %v7237_v0, %v6227_v7  ;;  %6065 = sbr.rel (!%p6063_p7) target bundleno = 1901 (0x76d), region = 178 }
 0x835   : >> { %v6232_v17 = vsel %vm6231_vm8, %v7237_v0, %v6228_v12 }
 0x836   : >> { %v6237_v18 = vsel %vm6234_vm11, %v6236_v15, %v6232_v17 }
 0x837   : >> { %6242 = vst.msk [vmem:[%s6240_s13] sm:$0x7] %vm6241_vm10, %v6237_v18 }
 0x838 PF: > { %s17_s24 = sadd.s32 1, %s7260_s24  }
 0x839   : > { %p14_p8 = scmp.ge.s32.totalorder %s17_s24, 4  }
 0x83b   :  { %16 = sbr.rel (!%p14_p8) target bundleno = 1 (0x1), region = 189 }

</bundles_post_ra>
